<compile_context>
chip_gen: v5e
topology: v5e:2x2
jax: 0.10.0
libtpu: 0.0.40
codegen_flags: <defaults>
</compile_context>

<pallas_src>
import functools

import jax
import jax.numpy as jnp
from jax.experimental import pallas as pl
from jax.experimental.pallas import tpu as pltpu

# ----------------------------------------------------------------------------
# Problem constants (small shapes consistent with the module)
# ----------------------------------------------------------------------------
B, C, H, W = 8, 4, 16, 16            # NCHW inputs
IMG_DIM = C * H * W                  # flattened image dim (backbone input)
NUM_FRAG = 4                         # fragments produced by the stand-in model
FRAG_DIM = 512                       # == Network_frag "input_dim" (cluster head is Linear(512, .))
FEATURE_DIM = 64
CLASS_NUM = 16
PAD = 128                            # lane-dense output width for both heads
BLOCK_ROWS = 8                       # batch rows per grid step (sublane-aligned)
BB_OUT = NUM_FRAG * FRAG_DIM         # stand-in backbone output width


# ----------------------------------------------------------------------------
# Fused Pallas kernel: backbone + both projector heads for a block of rows
# ----------------------------------------------------------------------------
def _fused_kernel(x_ref, bbw_ref, bbb_ref,
                  w1_ref, b1_ref, w2_ref, b2_ref,
                  wc_ref, bc_ref,
                  z_ref, c_ref,
                  hfrag_ref,
                  *, num_frag, frag_dim, class_num):
    f32 = jnp.float32
    bf16 = jnp.bfloat16
    rows = x_ref.shape[0]                                   # static BLOCK_ROWS

    # --- stand-in backbone: h_all = relu(x @ Wbb + bbb), (R, F*D) in f32 ----
    h_all = jnp.dot(x_ref[...], bbw_ref[...], preferred_element_type=f32)
    h_all = jnp.maximum(h_all + bbb_ref[...], 0.0)

    # --- cluster-head LHS: fragment sum (commutes with the linear) ---------
    h_sum = h_all[:, 0:frag_dim]
    for f in range(1, num_frag):                            # static, unrolled
        h_sum = h_sum + h_all[:, f * frag_dim:(f + 1) * frag_dim]

    # --- instance head layer 1: restack fragments along sublanes so the F
    #     per-fragment matmuls become ONE (F*R, D) @ (D, D) MXU matmul -------
    for f in range(num_frag):                               # aligned (8,128) stores
        hfrag_ref[f * rows:(f + 1) * rows, :] = \
            h_all[:, f * frag_dim:(f + 1) * frag_dim]
    a_all = jnp.dot(hfrag_ref[...].astype(bf16), w1_ref[...],
                    preferred_element_type=f32)
    a_all = jnp.maximum(a_all + b1_ref[...], 0.0)           # (F*R, D) f32

    a_sum = a_all[0:rows, :]
    for f in range(1, num_frag):
        a_sum = a_sum + a_all[f * rows:(f + 1) * rows, :]

    nf = jnp.float32(num_frag)

    # --- instance head tail: z = a_sum @ W2 + F*b2 (padded to 128 lanes) ---
    z = jnp.dot(a_sum.astype(bf16), w2_ref[...], preferred_element_type=f32)
    z_ref[...] = z + nf * b2_ref[...]

    # --- cluster head: c = softmax(h_sum @ Wc + F*bc) over valid lanes -----
    logits = jnp.dot(h_sum.astype(bf16), wc_ref[...], preferred_element_type=f32)
    logits = logits + nf * bc_ref[...]
    lane = jax.lax.broadcasted_iota(jnp.int32, logits.shape, 1)
    logits = jnp.where(lane < class_num, logits, jnp.float32(-1e30))
    m = jnp.max(logits, axis=1, keepdims=True)
    e = jnp.exp(logits - m)
    c_ref[...] = e / jnp.sum(e, axis=1, keepdims=True)      # exact divide (sum-to-1)


# ----------------------------------------------------------------------------
# pallas_call wrapper (single launch; grid over batch-row blocks only)
# ----------------------------------------------------------------------------
def _fused_forward(params, x_rows):
    R, img_dim = x_rows.shape
    assert R % BLOCK_ROWS == 0
    grid = (R // BLOCK_ROWS,)

    kernel = functools.partial(_fused_kernel, num_frag=NUM_FRAG,
                               frag_dim=FRAG_DIM, class_num=CLASS_NUM)

    row_map = lambda i: (i, 0)     # batch-block inputs/outputs
    full_map = lambda i: (0, 0)    # weights: same block every step (no re-DMA)

    # advisory cost hint for XLA scheduling around the custom call
    flops = 2 * R * (img_dim * BB_OUT
                     + NUM_FRAG * FRAG_DIM * FRAG_DIM
                     + 2 * FRAG_DIM * PAD)
    weight_bytes = 2 * (img_dim * BB_OUT + FRAG_DIM * FRAG_DIM
                        + 2 * FRAG_DIM * PAD) + 4 * (BB_OUT + FRAG_DIM + 2 * PAD)
    bytes_accessed = 2 * R * img_dim + weight_bytes + 2 * R * PAD * 4
    cost = pl.CostEstimate(flops=flops, transcendentals=R * PAD,
                           bytes_accessed=bytes_accessed)

    z_pad, c_pad = pl.pallas_call(
        kernel,
        out_shape=(jax.ShapeDtypeStruct((R, PAD), jnp.float32),
                   jax.ShapeDtypeStruct((R, PAD), jnp.float32)),
        grid=grid,
        in_specs=[
            pl.BlockSpec((BLOCK_ROWS, img_dim), row_map),
            pl.BlockSpec(params["bb_w"].shape, full_map),
            pl.BlockSpec(params["bb_b"].shape, full_map),
            pl.BlockSpec(params["inst_w1"].shape, full_map),
            pl.BlockSpec(params["inst_b1"].shape, full_map),
            pl.BlockSpec(params["inst_w2"].shape, full_map),
            pl.BlockSpec(params["inst_b2"].shape, full_map),
            pl.BlockSpec(params["clu_w"].shape, full_map),
            pl.BlockSpec(params["clu_b"].shape, full_map),
        ],
        out_specs=(pl.BlockSpec((BLOCK_ROWS, PAD), row_map),
                   pl.BlockSpec((BLOCK_ROWS, PAD), row_map)),
        scratch_shapes=[pltpu.VMEM((NUM_FRAG * BLOCK_ROWS, FRAG_DIM),
                                   jnp.float32)],
        compiler_params=pltpu.CompilerParams(
            dimension_semantics=("parallel",),
            vmem_limit_bytes=32 * 1024 * 1024),
        cost_estimate=cost,
    )(x_rows.astype(jnp.bfloat16),
      params["bb_w"], params["bb_b"],
      params["inst_w1"], params["inst_b1"],
      params["inst_w2"], params["inst_b2"],
      params["clu_w"], params["clu_b"])

    return z_pad[:, :FEATURE_DIM], c_pad[:, :CLASS_NUM]


# ----------------------------------------------------------------------------
# Parameter init (PyTorch-Linear-style uniform(-k, k), k = 1/sqrt(fan_in);
# matmul weights stored in bf16, biases f32, head weights lane-padded to 128)
# ----------------------------------------------------------------------------
def _uniform(key, shape, fan_in):
    k = 1.0 / jnp.sqrt(jnp.float32(fan_in))
    return jax.random.uniform(key, shape, jnp.float32, minval=-k, maxval=k)


def init_params(key):
    ks = jax.random.split(key, 8)
    bb_w = _uniform(ks[0], (IMG_DIM, BB_OUT), IMG_DIM)
    bb_b = _uniform(ks[1], (1, BB_OUT), IMG_DIM)

    w1 = _uniform(ks[2], (FRAG_DIM, FRAG_DIM), FRAG_DIM)
    b1 = _uniform(ks[3], (1, FRAG_DIM), FRAG_DIM)

    w2 = jnp.zeros((FRAG_DIM, PAD), jnp.float32)
    w2 = w2.at[:, :FEATURE_DIM].set(_uniform(ks[4], (FRAG_DIM, FEATURE_DIM), FRAG_DIM))
    b2 = jnp.zeros((1, PAD), jnp.float32)
    b2 = b2.at[:, :FEATURE_DIM].set(_uniform(ks[5], (1, FEATURE_DIM), FRAG_DIM))

    wc = jnp.zeros((FRAG_DIM, PAD), jnp.float32)
    wc = wc.at[:, :CLASS_NUM].set(_uniform(ks[6], (FRAG_DIM, CLASS_NUM), FRAG_DIM))
    bc = jnp.zeros((1, PAD), jnp.float32)
    bc = bc.at[:, :CLASS_NUM].set(_uniform(ks[7], (1, CLASS_NUM), FRAG_DIM))

    return {
        "bb_w": bb_w.astype(jnp.bfloat16), "bb_b": bb_b,
        "inst_w1": w1.astype(jnp.bfloat16), "inst_b1": b1,
        "inst_w2": w2.astype(jnp.bfloat16), "inst_b2": b2,
        "clu_w": wc.astype(jnp.bfloat16), "clu_b": bc,
    }


# ----------------------------------------------------------------------------
# Network_frag.forward / forward_cluster equivalents
# ----------------------------------------------------------------------------
@jax.jit
def network_forward(params, x_i, x_j):
    b = x_i.shape[0]
    x = jnp.concatenate([x_i.reshape(b, -1), x_j.reshape(b, -1)],
                        axis=0).astype(jnp.float32)
    z, c = _fused_forward(params, x)
    return z[:b], z[b:], c[:b], c[b:]


@jax.jit
def forward_cluster(params, x):
    b = x.shape[0]
    z, c = _fused_forward(params, x.reshape(b, -1).astype(jnp.float32))
    return z, c


# ----------------------------------------------------------------------------
# Pure-JAX reference mirroring the PyTorch per-fragment loops (same bf16 math)
# ----------------------------------------------------------------------------
def reference_forward(params, x_i, x_j):
    def model(x):
        b = x.shape[0]
        xb = x.reshape(b, -1).astype(jnp.bfloat16)
        h = jnp.dot(xb, params["bb_w"], preferred_element_type=jnp.float32)
        h = jnp.maximum(h + params["bb_b"], 0.0)
        return [h[:, f * FRAG_DIM:(f + 1) * FRAG_DIM] for f in range(NUM_FRAG)]

    def instance_projector(h):
        a = jnp.dot(h.astype(jnp.bfloat16), params["inst_w1"],
                    preferred_element_type=jnp.float32) + params["inst_b1"]
        a = jnp.maximum(a, 0.0)
        out = jnp.dot(a.astype(jnp.bfloat16), params["inst_w2"],
                      preferred_element_type=jnp.float32) + params["inst_b2"]
        return out[:, :FEATURE_DIM]

    def cluster_projector(h):
        out = jnp.dot(h.astype(jnp.bfloat16), params["clu_w"],
                      preferred_element_type=jnp.float32) + params["clu_b"]
        return out[:, :CLASS_NUM]

    h_i, h_j = model(x_i), model(x_j)
    z_i = sum(instance_projector(h) for h in h_i)
    z_j = sum(instance_projector(h) for h in h_j)
    c_i = jax.nn.softmax(sum(cluster_projector(h) for h in h_i), axis=1)
    c_j = jax.nn.softmax(sum(cluster_projector(h) for h in h_j), axis=1)
    return z_i, z_j, c_i, c_j


# ----------------------------------------------------------------------------
# main
# ----------------------------------------------------------------------------
if __name__ == "__main__":
    key = jax.random.PRNGKey(0)
    k_params, k_xi, k_xj = jax.random.split(key, 3)

    params = init_params(k_params)
    x_i = jax.random.normal(k_xi, (B, C, H, W), jnp.float32)
    x_j = jax.random.normal(k_xj, (B, C, H, W), jnp.float32)

    z_i, z_j, c_i, c_j = network_forward(params, x_i, x_j)
    jax.block_until_ready((z_i, z_j, c_i, c_j))

    # shape / invariant checks
    assert z_i.shape == (B, FEATURE_DIM) and z_j.shape == (B, FEATURE_DIM)
    assert c_i.shape == (B, CLASS_NUM) and c_j.shape == (B, CLASS_NUM)
    assert bool(jnp.all(jnp.isfinite(z_i))) and bool(jnp.all(jnp.isfinite(z_j)))
    assert jnp.allclose(jnp.sum(c_i, axis=1), 1.0, atol=1e-5)
    assert jnp.allclose(jnp.sum(c_j, axis=1), 1.0, atol=1e-5)

    # numerical check vs the per-fragment reference (loose tolerance: bf16
    # rounding happens at slightly different points in the fused kernel)
    rz_i, rz_j, rc_i, rc_j = reference_forward(params, x_i, x_j)
    assert jnp.allclose(z_i, rz_i, atol=5e-2, rtol=5e-2)
    assert jnp.allclose(z_j, rz_j, atol=5e-2, rtol=5e-2)
    assert jnp.allclose(c_i, rc_i, atol=2e-2, rtol=2e-2)
    assert jnp.allclose(c_j, rc_j, atol=2e-2, rtol=2e-2)

    # forward_cluster
    zc, cc = forward_cluster(params, x_i)
    jax.block_until_ready((zc, cc))
    assert zc.shape == (B, FEATURE_DIM) and cc.shape == (B, CLASS_NUM)
    assert jnp.allclose(jnp.sum(cc, axis=1), 1.0, atol=1e-5)

    print("KERNEL_OK")
</pallas_src>

<mosaic_0001>
module attributes {stable_mosaic.version = 11 : i64} {
  func.func @_fused_kernel(%arg0: i32, %arg1: memref<8x1024xbf16, #tpu.memory_space<vmem>>, %arg2: memref<1024x2048xbf16, #tpu.memory_space<vmem>>, %arg3: memref<1x2048xf32, #tpu.memory_space<vmem>>, %arg4: memref<512x512xbf16, #tpu.memory_space<vmem>>, %arg5: memref<1x512xf32, #tpu.memory_space<vmem>>, %arg6: memref<512x128xbf16, #tpu.memory_space<vmem>>, %arg7: memref<1x128xf32, #tpu.memory_space<vmem>>, %arg8: memref<512x128xbf16, #tpu.memory_space<vmem>>, %arg9: memref<1x128xf32, #tpu.memory_space<vmem>>, %arg10: memref<8x128xf32, #tpu.memory_space<vmem>>, %arg11: memref<8x128xf32, #tpu.memory_space<vmem>>, %arg12: memref<32x512xf32, #tpu.memory_space<vmem>>) attributes {dimension_semantics = [#tpu.dimension_semantics<parallel>], iteration_bounds = array<i64: 2>, scalar_prefetch = 0 : i64, scratch_operands = 1 : i64, tpu.core_type = #tpu.core_type<tc>, window_params = [{transform_indices = @transform_0, window_bounds = array<i64: 8, 1024>}, {pipeline_mode = #tpu.pipeline_mode<synchronous>, transform_indices = @transform_1, window_bounds = array<i64: 1024, 2048>}, {pipeline_mode = #tpu.pipeline_mode<synchronous>, transform_indices = @transform_2, window_bounds = array<i64: 1, 2048>}, {pipeline_mode = #tpu.pipeline_mode<synchronous>, transform_indices = @transform_3, window_bounds = array<i64: 512, 512>}, {pipeline_mode = #tpu.pipeline_mode<synchronous>, transform_indices = @transform_4, window_bounds = array<i64: 1, 512>}, {pipeline_mode = #tpu.pipeline_mode<synchronous>, transform_indices = @transform_5, window_bounds = array<i64: 512, 128>}, {pipeline_mode = #tpu.pipeline_mode<synchronous>, transform_indices = @transform_6, window_bounds = array<i64: 1, 128>}, {pipeline_mode = #tpu.pipeline_mode<synchronous>, transform_indices = @transform_7, window_bounds = array<i64: 512, 128>}, {pipeline_mode = #tpu.pipeline_mode<synchronous>, transform_indices = @transform_8, window_bounds = array<i64: 1, 128>}, {transform_indices = @transform_9, window_bounds = array<i64: 8, 128>}, {transform_indices = @transform_10, window_bounds = array<i64: 8, 128>}]} {
    %c0 = arith.constant 0 : index
    %c0_0 = arith.constant 0 : index
    %0 = vector.load %arg1[%c0, %c0_0] : memref<8x1024xbf16, #tpu.memory_space<vmem>>, vector<8x1024xbf16>
    %c0_1 = arith.constant 0 : index
    %c0_2 = arith.constant 0 : index
    %1 = vector.load %arg2[%c0_1, %c0_2] : memref<1024x2048xbf16, #tpu.memory_space<vmem>>, vector<1024x2048xbf16>
    %cst = arith.constant dense<0.000000e+00> : vector<8x2048xf32>
    %2 = tpu.matmul %0, %1, %cst {dimension_numbers = #tpu.dot_dimension_numbers<[1], [0], [0], [1], [0, 0, 1, 1], [], []>} : vector<8x1024xbf16>, vector<1024x2048xbf16>, vector<8x2048xf32> -> vector<8x2048xf32>
    %c0_3 = arith.constant 0 : index
    %c0_4 = arith.constant 0 : index
    %3 = vector.load %arg3[%c0_3, %c0_4] : memref<1x2048xf32, #tpu.memory_space<vmem>>, vector<1x2048xf32>
    %4 = vector.broadcast %3 : vector<1x2048xf32> to vector<8x2048xf32>
    %5 = arith.addf %2, %4 : vector<8x2048xf32>
    %cst_5 = arith.constant 0.000000e+00 : f32
    %6 = vector.broadcast %cst_5 : f32 to vector<8x2048xf32>
    %7 = arith.maximumf %5, %6 : vector<8x2048xf32>
    %8 = vector.extract_strided_slice %7 {offsets = [0, 0], sizes = [8, 512], strides = [1, 1]} : vector<8x2048xf32> to vector<8x512xf32>
    %9 = vector.extract_strided_slice %7 {offsets = [0, 512], sizes = [8, 512], strides = [1, 1]} : vector<8x2048xf32> to vector<8x512xf32>
    %10 = arith.addf %8, %9 : vector<8x512xf32>
    %11 = vector.extract_strided_slice %7 {offsets = [0, 1024], sizes = [8, 512], strides = [1, 1]} : vector<8x2048xf32> to vector<8x512xf32>
    %12 = arith.addf %10, %11 : vector<8x512xf32>
    %13 = vector.extract_strided_slice %7 {offsets = [0, 1536], sizes = [8, 512], strides = [1, 1]} : vector<8x2048xf32> to vector<8x512xf32>
    %14 = arith.addf %12, %13 : vector<8x512xf32>
    %15 = vector.extract_strided_slice %7 {offsets = [0, 0], sizes = [8, 512], strides = [1, 1]} : vector<8x2048xf32> to vector<8x512xf32>
    %c0_6 = arith.constant 0 : index
    %c0_7 = arith.constant 0 : index
    %16 = vector.load %arg12[%c0_6, %c0_7] : memref<32x512xf32, #tpu.memory_space<vmem>>, vector<8x512xf32>
    tpu.vector_store %arg12[%c0_6, %c0_7], %15 {strides = array<i32>} : memref<32x512xf32, #tpu.memory_space<vmem>>, vector<8x512xf32>,
    %17 = vector.extract_strided_slice %7 {offsets = [0, 512], sizes = [8, 512], strides = [1, 1]} : vector<8x2048xf32> to vector<8x512xf32>
    %c8 = arith.constant 8 : index
    %c0_8 = arith.constant 0 : index
    %18 = vector.load %arg12[%c8, %c0_8] : memref<32x512xf32, #tpu.memory_space<vmem>>, vector<8x512xf32>
    tpu.vector_store %arg12[%c8, %c0_8], %17 {strides = array<i32>} : memref<32x512xf32, #tpu.memory_space<vmem>>, vector<8x512xf32>,
    %19 = vector.extract_strided_slice %7 {offsets = [0, 1024], sizes = [8, 512], strides = [1, 1]} : vector<8x2048xf32> to vector<8x512xf32>
    %c16 = arith.constant 16 : index
    %c0_9 = arith.constant 0 : index
    %20 = vector.load %arg12[%c16, %c0_9] : memref<32x512xf32, #tpu.memory_space<vmem>>, vector<8x512xf32>
    tpu.vector_store %arg12[%c16, %c0_9], %19 {strides = array<i32>} : memref<32x512xf32, #tpu.memory_space<vmem>>, vector<8x512xf32>,
    %21 = vector.extract_strided_slice %7 {offsets = [0, 1536], sizes = [8, 512], strides = [1, 1]} : vector<8x2048xf32> to vector<8x512xf32>
    %c24 = arith.constant 24 : index
    %c0_10 = arith.constant 0 : index
    %22 = vector.load %arg12[%c24, %c0_10] : memref<32x512xf32, #tpu.memory_space<vmem>>, vector<8x512xf32>
    tpu.vector_store %arg12[%c24, %c0_10], %21 {strides = array<i32>} : memref<32x512xf32, #tpu.memory_space<vmem>>, vector<8x512xf32>,
    %c0_11 = arith.constant 0 : index
    %c0_12 = arith.constant 0 : index
    %23 = vector.load %arg12[%c0_11, %c0_12] : memref<32x512xf32, #tpu.memory_space<vmem>>, vector<32x512xf32>
    %24 = arith.truncf %23 : vector<32x512xf32> to vector<32x512xbf16>
    %c0_13 = arith.constant 0 : index
    %c0_14 = arith.constant 0 : index
    %25 = vector.load %arg4[%c0_13, %c0_14] : memref<512x512xbf16, #tpu.memory_space<vmem>>, vector<512x512xbf16>
    %cst_15 = arith.constant dense<0.000000e+00> : vector<32x512xf32>
    %26 = tpu.matmul %24, %25, %cst_15 {dimension_numbers = #tpu.dot_dimension_numbers<[1], [0], [0], [1], [0, 0, 1, 1], [], []>} : vector<32x512xbf16>, vector<512x512xbf16>, vector<32x512xf32> -> vector<32x512xf32>
    %c0_16 = arith.constant 0 : index
    %c0_17 = arith.constant 0 : index
    %27 = vector.load %arg5[%c0_16, %c0_17] : memref<1x512xf32, #tpu.memory_space<vmem>>, vector<1x512xf32>
    %28 = vector.broadcast %27 : vector<1x512xf32> to vector<32x512xf32>
    %29 = arith.addf %26, %28 : vector<32x512xf32>
    %cst_18 = arith.constant 0.000000e+00 : f32
    %30 = vector.broadcast %cst_18 : f32 to vector<32x512xf32>
    %31 = arith.maximumf %29, %30 : vector<32x512xf32>
    %32 = vector.extract_strided_slice %31 {offsets = [0, 0], sizes = [8, 512], strides = [1, 1]} : vector<32x512xf32> to vector<8x512xf32>
    %33 = vector.extract_strided_slice %31 {offsets = [8, 0], sizes = [8, 512], strides = [1, 1]} : vector<32x512xf32> to vector<8x512xf32>
    %34 = arith.addf %32, %33 : vector<8x512xf32>
    %35 = vector.extract_strided_slice %31 {offsets = [16, 0], sizes = [8, 512], strides = [1, 1]} : vector<32x512xf32> to vector<8x512xf32>
    %36 = arith.addf %34, %35 : vector<8x512xf32>
    %37 = vector.extract_strided_slice %31 {offsets = [24, 0], sizes = [8, 512], strides = [1, 1]} : vector<32x512xf32> to vector<8x512xf32>
    %38 = arith.addf %36, %37 : vector<8x512xf32>
    %39 = arith.truncf %38 : vector<8x512xf32> to vector<8x512xbf16>
    %c0_19 = arith.constant 0 : index
    %c0_20 = arith.constant 0 : index
    %40 = vector.load %arg6[%c0_19, %c0_20] : memref<512x128xbf16, #tpu.memory_space<vmem>>, vector<512x128xbf16>
    %cst_21 = arith.constant dense<0.000000e+00> : vector<8x128xf32>
    %41 = tpu.matmul %39, %40, %cst_21 {dimension_numbers = #tpu.dot_dimension_numbers<[1], [0], [0], [1], [0, 0, 1, 1], [], []>} : vector<8x512xbf16>, vector<512x128xbf16>, vector<8x128xf32> -> vector<8x128xf32>
    %c0_22 = arith.constant 0 : index
    %c0_23 = arith.constant 0 : index
    %42 = vector.load %arg7[%c0_22, %c0_23] : memref<1x128xf32, #tpu.memory_space<vmem>>, vector<1x128xf32>
    %cst_24 = arith.constant 4.000000e+00 : f32
    %43 = vector.broadcast %cst_24 : f32 to vector<1x128xf32>
    %44 = arith.mulf %43, %42 : vector<1x128xf32>
    %45 = vector.broadcast %44 : vector<1x128xf32> to vector<8x128xf32>
    %46 = arith.addf %41, %45 : vector<8x128xf32>
    %c0_25 = arith.constant 0 : index
    %c0_26 = arith.constant 0 : index
    %47 = vector.load %arg10[%c0_25, %c0_26] : memref<8x128xf32, #tpu.memory_space<vmem>>, vector<8x128xf32>
    tpu.vector_store %arg10[%c0_25, %c0_26], %46 {strides = array<i32>} : memref<8x128xf32, #tpu.memory_space<vmem>>, vector<8x128xf32>,
    %48 = arith.truncf %14 : vector<8x512xf32> to vector<8x512xbf16>
    %c0_27 = arith.constant 0 : index
    %c0_28 = arith.constant 0 : index
    %49 = vector.load %arg8[%c0_27, %c0_28] : memref<512x128xbf16, #tpu.memory_space<vmem>>, vector<512x128xbf16>
    %cst_29 = arith.constant dense<0.000000e+00> : vector<8x128xf32>
    %50 = tpu.matmul %48, %49, %cst_29 {dimension_numbers = #tpu.dot_dimension_numbers<[1], [0], [0], [1], [0, 0, 1, 1], [], []>} : vector<8x512xbf16>, vector<512x128xbf16>, vector<8x128xf32> -> vector<8x128xf32>
    %c0_30 = arith.constant 0 : index
    %c0_31 = arith.constant 0 : index
    %51 = vector.load %arg9[%c0_30, %c0_31] : memref<1x128xf32, #tpu.memory_space<vmem>>, vector<1x128xf32>
    %cst_32 = arith.constant 4.000000e+00 : f32
    %52 = vector.broadcast %cst_32 : f32 to vector<1x128xf32>
    %53 = arith.mulf %52, %51 : vector<1x128xf32>
    %54 = vector.broadcast %53 : vector<1x128xf32> to vector<8x128xf32>
    %55 = arith.addf %50, %54 : vector<8x128xf32>
    %56 = tpu.iota {dimensions = array<i32: 1>} : vector<8x128xi32>
    %c16_i32 = arith.constant 16 : i32
    %57 = vector.broadcast %c16_i32 : i32 to vector<8x128xi32>
    %58 = arith.cmpi slt, %56, %57 : vector<8x128xi32>
    %cst_33 = arith.constant -1.000000e+30 : f32
    %59 = vector.broadcast %cst_33 : f32 to vector<8x128xf32>
    %60 = arith.select %58, %55, %59 : vector<8x128xi1>, vector<8x128xf32>
    %cst_34 = arith.constant dense<0xFF800000> : vector<8xf32>
    %61 = vector.multi_reduction <maximumf>, %60, %cst_34 [1] : vector<8x128xf32> to vector<8xf32>
    %62 = vector.shape_cast %61 : vector<8xf32> to vector<8x1xf32>
    %63 = vector.broadcast %62 : vector<8x1xf32> to vector<8x128xf32>
    %64 = arith.subf %60, %63 : vector<8x128xf32>
    %65 = math.exp %64 : vector<8x128xf32>
    %cst_35 = arith.constant dense<0.000000e+00> : vector<8xf32>
    %66 = vector.multi_reduction <add>, %65, %cst_35 [1] : vector<8x128xf32> to vector<8xf32>
    %67 = vector.shape_cast %66 : vector<8xf32> to vector<8x1xf32>
    %68 = vector.broadcast %67 : vector<8x1xf32> to vector<8x128xf32>
    %69 = arith.divf %65, %68 : vector<8x128xf32>
    %c0_36 = arith.constant 0 : index
    %c0_37 = arith.constant 0 : index
    %70 = vector.load %arg11[%c0_36, %c0_37] : memref<8x128xf32, #tpu.memory_space<vmem>>, vector<8x128xf32>
    tpu.vector_store %arg11[%c0_36, %c0_37], %69 {strides = array<i32>} : memref<8x128xf32, #tpu.memory_space<vmem>>, vector<8x128xf32>,
    return
  }
  func.func @transform_0(%arg0: i32) -> (i32, i32) {
    %c0_i32 = arith.constant 0 : i32
    %c0_i32_0 = arith.constant 0 : i32
    return %arg0, %c0_i32 : i32, i32
  }
  func.func @transform_1(%arg0: i32) -> (i32, i32) {
    %c0_i32 = arith.constant 0 : i32
    %c0_i32_0 = arith.constant 0 : i32
    %c0_i32_1 = arith.constant 0 : i32
    return %c0_i32, %c0_i32_0 : i32, i32
  }
  func.func @transform_2(%arg0: i32) -> (i32, i32) {
    %c0_i32 = arith.constant 0 : i32
    %c0_i32_0 = arith.constant 0 : i32
    %c0_i32_1 = arith.constant 0 : i32
    return %c0_i32, %c0_i32_0 : i32, i32
  }
  func.func @transform_3(%arg0: i32) -> (i32, i32) {
    %c0_i32 = arith.constant 0 : i32
    %c0_i32_0 = arith.constant 0 : i32
    %c0_i32_1 = arith.constant 0 : i32
    return %c0_i32, %c0_i32_0 : i32, i32
  }
  func.func @transform_4(%arg0: i32) -> (i32, i32) {
    %c0_i32 = arith.constant 0 : i32
    %c0_i32_0 = arith.constant 0 : i32
    %c0_i32_1 = arith.constant 0 : i32
    return %c0_i32, %c0_i32_0 : i32, i32
  }
  func.func @transform_5(%arg0: i32) -> (i32, i32) {
    %c0_i32 = arith.constant 0 : i32
    %c0_i32_0 = arith.constant 0 : i32
    %c0_i32_1 = arith.constant 0 : i32
    return %c0_i32, %c0_i32_0 : i32, i32
  }
  func.func @transform_6(%arg0: i32) -> (i32, i32) {
    %c0_i32 = arith.constant 0 : i32
    %c0_i32_0 = arith.constant 0 : i32
    %c0_i32_1 = arith.constant 0 : i32
    return %c0_i32, %c0_i32_0 : i32, i32
  }
  func.func @transform_7(%arg0: i32) -> (i32, i32) {
    %c0_i32 = arith.constant 0 : i32
    %c0_i32_0 = arith.constant 0 : i32
    %c0_i32_1 = arith.constant 0 : i32
    return %c0_i32, %c0_i32_0 : i32, i32
  }
  func.func @transform_8(%arg0: i32) -> (i32, i32) {
    %c0_i32 = arith.constant 0 : i32
    %c0_i32_0 = arith.constant 0 : i32
    %c0_i32_1 = arith.constant 0 : i32
    return %c0_i32, %c0_i32_0 : i32, i32
  }
  func.func @transform_9(%arg0: i32) -> (i32, i32) {
    %c0_i32 = arith.constant 0 : i32
    %c0_i32_0 = arith.constant 0 : i32
    return %arg0, %c0_i32 : i32, i32
  }
  func.func @transform_10(%arg0: i32) -> (i32, i32) {
    %c0_i32 = arith.constant 0 : i32
    %c0_i32_0 = arith.constant 0 : i32
    return %arg0, %c0_i32 : i32, i32
  }
}

</mosaic_0001>

<bundles_post_ra>
// kernel: network_forward.1
= control target key start
LH: loop header
LB: loop body
LE: loop exit
PB: predicated region body
PF: predicated region fallthrough
CT: control target
= control target key end

     0   :  { %16 = vsyncpa [#allocation4], 0  ;;  %s17445_s0 = inlined_call_operand.vmem [shape: bf16[16,1024], index: 0, kind: input, shape index: {}]   ;;  %s17446_s1 = inlined_call_operand.hbm [shape: bf16[1024,2048], index: 1, kind: input, shape index: {}]   ;;  %s17447_s2 = inlined_call_operand.hbm [shape: f32[1,2048], index: 2, kind: input, shape index: {}]   ;;  %s17448_s3 = inlined_call_operand.hbm [shape: bf16[512,512], index: 3, kind: input, shape index: {}]   ;;  %s17449_s4 = inlined_call_operand.hbm [shape: f32[1,512], index: 4, kind: input, shape index: {}]   ;;  %s17450_s5 = inlined_call_operand.hbm [shape: bf16[512,128], index: 5, kind: input, shape index: {}]   ;;  %s17451_s6 = inlined_call_operand.hbm [shape: f32[1,128], index: 6, kind: input, shape index: {}]   ;;  %s17452_s7 = inlined_call_operand.hbm [shape: bf16[512,128], index: 7, kind: input, shape index: {}]   ;;  %s17453_s8 = inlined_call_operand.hbm [shape: f32[1,128], index: 8, kind: input, shape index: {}]   ;;  %s17454_s9 = inlined_call_operand.vmem [shape: f32[16,128], index: 9, kind: output, shape index: {0}]   ;;  %s17455_s10 = inlined_call_operand.vmem [shape: f32[16,128], index: 10, kind: output, shape index: {1}]  }
   0x1   :  { %17 = vsyncpa [#allocation6], 0 }
   0x2   :  { %18 = vsyncpa [#allocation9], 0 }
   0x3   :  { %19 = vsyncpa [#allocation12], 0 }
   0x4   :  { %20 = vsyncpa [#allocation15], 0  ;;  %s16921_s13 = smov 0  }
   0x5 LB: > { %s303_s16 = sshll.u32 %s17447_s2, 4  ;;  %s16930_s17 = sadd.s32 4294967295, %s16851_s13   ;;  %s16851_s13 = sphi %s16921_s13, %s26_s13   ;;  %s304_s16 = int_to_ptr.hbm [resolvable:$true] %s303_s16 }
   0x6   : > { %p10375_p0 = scmp.ge.s32.totalorder %s16851_s13, 1  ;;  %p277_p1 = scmp.lt.s32.totalorder %s16851_s13, 3 }
   0x7   : > { %p16538_p2 = scmp.eq.s32.totalorder %s16930_s17, 0  ;;  %s16853_s19 = smov [#allocation5]  }
   0x8   : > { %p16935_p3 = pnand %p10375_p0, %p277_p1  ;;  %s305_s20 = sshll.u32 %s16853_s19, 4  ;;  %s306_s20 = int_to_ptr.vmem [resolvable:$true] %s305_s20 }
   0x9   : > { %s329_s23 = sshll.u32 %s17449_s4, 4  ;;  %s355_s26 = sshll.u32 %s17451_s6, 4  ;;  %s330_s23 = int_to_ptr.hbm [resolvable:$true] %s329_s23  ;;  %s356_s26 = int_to_ptr.hbm [resolvable:$true] %s355_s26 }
   0xa   : > { %p16513_p4 = pneg %p16935_p3  ;;  %s16854_s28 = smov [#allocation8]  }
   0xb   : > { %s331_s29 = sshll.u32 %s16854_s28, 4  ;;  %s16855_s30 = smov [#allocation11]   ;;  %s332_s29 = int_to_ptr.vmem [resolvable:$true] %s331_s29 }
   0xc   : > { %p16949_p5 = pnand %p16538_p2, %p16513_p4  ;;  %s357_s11 = sshll.u32 %s16855_s30, 4  ;;  %s358_s11 = int_to_ptr.vmem [resolvable:$true] %s357_s11 }
   0xd   : > { %s288_s15 = sshll.u32 %s17446_s1, 4  ;;  %s16856_s19 = smov [#allocation3]   ;;  %s289_s15 = int_to_ptr.hbm [resolvable:$true] %s288_s15 }
   0xe   : > { %16519 = dma.hbm_to_vmem [thread:$0]  (!%p16949_p5), %s304_s16, 256, %s306_s20, [#allocation6]  }
   0xf   : > { %16525 = dma.hbm_to_vmem [thread:$0]  (!%p16949_p5), %s330_s23, 64, %s332_s29, [#allocation9]  }
  0x10   : > { %16531 = dma.hbm_to_vmem [thread:$0]  (!%p16949_p5), %s356_s26, 16, %s358_s11, [#allocation12]  }
  0x11   : > { %s290_s21 = sshll.u32 %s16856_s19, 4  ;;  %s314_s16 = sshll.u32 %s17448_s3, 4  ;;  %s291_s21 = int_to_ptr.vmem [resolvable:$true] %s290_s21  ;;  %s315_s16 = int_to_ptr.hbm [resolvable:$true] %s314_s16 }
  0x12   : > { %s16857_s20 = smov 1024   ;;  %s16858_s23 = smov 64  }
  0x13   : > { %16516 = dma.hbm_to_vmem [thread:$0]  (!%p16949_p5), %s289_s15, 131072, %s291_s21, [#allocation4], %s16857_s20, %s16857_s20, %s16858_s23  }
  0x14   : > { %s16859_s25 = smov [#allocation7]   ;;  %s16860_s29 = smov 256  }
  0x15   : > { %s316_s28 = sshll.u32 %s16859_s25, 4  ;;  %s16861_s30 = smov 16   ;;  %s317_s28 = int_to_ptr.vmem [resolvable:$true] %s316_s28 }
  0x16   : > { %16522 = dma.hbm_to_vmem [thread:$0]  (!%p16949_p5), %s315_s16, 16384, %s317_s28, [#allocation6], %s16860_s29, %s16860_s29, %s16861_s30  }
  0x17   : > { %s340_s12 = sshll.u32 %s17450_s5, 4  ;;  %s16862_s14 = smov [#allocation10]   ;;  %s341_s12 = int_to_ptr.hbm [resolvable:$true] %s340_s12 }
  0x18   : > { %s342_s19 = sshll.u32 %s16862_s14, 4  ;;  %s16863_s22 = smov 4   ;;  %s343_s19 = int_to_ptr.vmem [resolvable:$true] %s342_s19 }
  0x19   : > { %16528 = dma.hbm_to_vmem [thread:$0]  (!%p16949_p5), %s341_s12, 4096, %s343_s19, [#allocation9], %s16858_s23, %s16858_s23, %s16863_s22  }
  0x1a   : > { %s366_s24 = sshll.u32 %s17452_s7, 4  ;;  %s16864_s20 = smov [#allocation13]   ;;  %s367_s24 = int_to_ptr.hbm [resolvable:$true] %s366_s24 }
  0x1b   : > { %s368_s25 = sshll.u32 %s16864_s20, 4  ;;  %s381_s29 = sshll.u32 %s17453_s8, 4  ;;  %s369_s25 = int_to_ptr.vmem [resolvable:$true] %s368_s25  ;;  %s382_s29 = int_to_ptr.hbm [resolvable:$true] %s381_s29 }
  0x1c   : > { %16534 = dma.hbm_to_vmem [thread:$0]  (!%p16949_p5), %s367_s24, 4096, %s369_s25, [#allocation12], %s16858_s23, %s16858_s23, %s16863_s22  }
  0x1d   : > { %s16865_s30 = smov [#allocation14]   ;;  %404 = sbr.rel (%p16935_p3) target bundleno = 2400 (0x960), region = 56 }
  0x1e   : > { %s383_s26 = sshll.u32 %s16865_s30, 4  ;;  %s384_s26 = int_to_ptr.vmem [resolvable:$true] %s383_s26 }
  0x1f   : > { %16537 = dma.hbm_to_vmem [thread:$0]  (!%p16949_p5), %s382_s29, 16, %s384_s26, [#allocation15]  }
  0x22   : > { %16830 = dma.done.wait (%p16538_p2), [#allocation4], 131072  }
  0x23   : > { %16832 = vsyncadd (%p16538_p2), [#allocation4], 4294836224 }
  0x24   : > { %16834 = dma.done.wait (%p16538_p2), [#allocation6], 16640  }
  0x25   : > { %16836 = vsyncadd (%p16538_p2), [#allocation6], 4294950656 }
  0x26   : > { %16838 = dma.done.wait (%p16538_p2), [#allocation9], 4160  }
  0x27   : > { %16840 = vsyncadd (%p16538_p2), [#allocation9], 4294963136 }
  0x28   : > { %16842 = dma.done.wait (%p16538_p2), [#allocation12], 4112  }
  0x29   : > { %16844 = vsyncadd (%p16538_p2), [#allocation12], 4294963184 }
  0x2a   : > { %16846 = dma.done.wait (%p16538_p2), [#allocation15], 16  }
  0x2b   : > { %16848 = vsyncadd (%p16538_p2), [#allocation15], 4294967280  ;;  %v10848_v0 = vld [vmem:[#allocation3 + $0x380] sm:$0xf]  ;;  %p481_p6 = scmp.lt.s32.totalorder %s16930_s17, 1 }
  0x2c   : > { %v15385_v1 = vld [vmem:[#allocation3 + $0x3bc] sm:$0xf0] }
  0x2d   : > { %v11360_v2 = vld [vmem:[#allocation3 + $0x780] sm:$0xf]  ;;  %v10849_v3 = vor.u32 %v15385_v1, %v10848_v0  ;;  %s17459_s17 = smov (!%p481_p6, %s16930_s17), 1 }
  0x2e   : > { %v15513_v4 = vld [vmem:[#allocation3 + $0x7bc] sm:$0xf0]  ;;  %s15264_s18 = sshll.u32 %s17459_s17, 5  ;;  %s10396_s12 = sshll.u32 %s17459_s17, 3 }
  0x2f   : > { %v11872_v5 = vld [vmem:[#allocation3 + $0xb80] sm:$0xf]  ;;  %v11361_v7 = vor.u32 %v15513_v4, %v11360_v2  ;;  %6706 = vmatpush.bf16.msra.mxu0 %v10849_v3  ;;  %s17016_s11 = scalar_lea.vmem %s17445_s0, %s15264_s18  ;;  %s489_s22 = scalar_lea.vmem %s17454_s9, %s10396_s12 }
  0x30   : > { %v15641_v6 = vld [vmem:[#allocation3 + $0xbbc] sm:$0xf0]  ;;  %s493_s24 = scalar_lea.vmem %s17455_s10, %s10396_s12 }
  0x31   : > { %v11873_v8 = vor.u32 %v15641_v6, %v11872_v5  ;;  %v12384_v9 = vld [vmem:[#allocation3 + $0xf80] sm:$0xf]  ;;  %6719 = vmatpush.bf16.msra.mxu1 %v11361_v7 }
  0x32   : > { %v15769_v10 = vld [vmem:[#allocation3 + $0xfbc] sm:$0xf0] }
  0x33   : > { %v10784_v11 = vld [vmem:[#allocation3 + $0x300] sm:$0xf]  ;;  %v12385_v12 = vor.u32 %v15769_v10, %v12384_v9  ;;  %6732 = vmatpush.bf16.msra.mxu2 %v11873_v8 }
  0x34   : > { %v15369_v13 = vld [vmem:[#allocation3 + $0x33c] sm:$0xf0] }
  0x35   : > { %v11296_v14 = vld [vmem:[#allocation3 + $0x700] sm:$0xf]  ;;  %v10785_v16 = vor.u32 %v15369_v13, %v10784_v11  ;;  %6745 = vmatpush.bf16.msra.mxu3 %v12385_v12 }
  0x36   : > { %v15497_v15 = vld [vmem:[#allocation3 + $0x73c] sm:$0xf0] }
  0x37   : > { %v11297_v17 = vor.u32 %v15497_v15, %v11296_v14  ;;  %v11808_v18 = vld [vmem:[#allocation3 + $0xb00] sm:$0xf]  ;;  %6707 = vmatpush.bf16.msra.mxu0 %v10785_v16 }
  0x38   : > { %v15625_v19 = vld [vmem:[#allocation3 + $0xb3c] sm:$0xf0] }
  0x39   : > { %v12320_v20 = vld [vmem:[#allocation3 + $0xf00] sm:$0xf]  ;;  %v11809_v21 = vor.u32 %v15625_v19, %v11808_v18  ;;  %6720 = vmatpush.bf16.msra.mxu1 %v11297_v17 }
  0x3a   : > { %v15753_v22 = vld [vmem:[#allocation3 + $0xf3c] sm:$0xf0] }
  0x3b   : > { %v10720_v23 = vld [vmem:[#allocation3 + $0x280] sm:$0xf]  ;;  %v12321_v25 = vor.u32 %v15753_v22, %v12320_v20  ;;  %6733 = vmatpush.bf16.msra.mxu2 %v11809_v21 }
  0x3c   : > { %v15353_v24 = vld [vmem:[#allocation3 + $0x2bc] sm:$0xf0] }
  0x3d   : > { %v11232_v26 = vld [vmem:[#allocation3 + $0x680] sm:$0xf]  ;;  %v10721_v29 = vor.u32 %v15353_v24, %v10720_v23  ;;  %6746 = vmatpush.bf16.msra.mxu3 %v12321_v25 }
  0x3e   : > { %v15481_v27 = vld [vmem:[#allocation3 + $0x6bc] sm:$0xf0] }
  0x3f   : > { %v11744_v28 = vld [vmem:[#allocation3 + $0xa80] sm:$0xf]  ;;  %v11233_v33 = vor.u32 %v15481_v27, %v11232_v26  ;;  %6708 = vmatpush.bf16.msra.mxu0 %v10721_v29 }
  0x40   : > { %v15609_v30 = vld [vmem:[#allocation3 + $0xabc] sm:$0xf0] }
  0x41   : > { %v12256_v31 = vld [vmem:[#allocation3 + $0xe80] sm:$0xf]  ;;  %v11745_v34 = vor.u32 %v15609_v30, %v11744_v28  ;;  %6721 = vmatpush.bf16.msra.mxu1 %v11233_v33 }
  0x42   : > { %v15737_v32 = vld [vmem:[#allocation3 + $0xebc] sm:$0xf0] }
  0x43   : > { %v10656_v35 = vld [vmem:[#allocation3 + $0x200] sm:$0xf]  ;;  %v12257_v38 = vor.u32 %v15737_v32, %v12256_v31  ;;  %6734 = vmatpush.bf16.msra.mxu2 %v11745_v34 }
  0x44   : > { %v15337_v36 = vld [vmem:[#allocation3 + $0x23c] sm:$0xf0] }
  0x45   : > { %v11168_v37 = vld [vmem:[#allocation3 + $0x600] sm:$0xf]  ;;  %v10657_v44 = vor.u32 %v15337_v36, %v10656_v35  ;;  %6747 = vmatpush.bf16.msra.mxu3 %v12257_v38 }
  0x46   : > { %v15465_v39 = vld [vmem:[#allocation3 + $0x63c] sm:$0xf0] }
  0x47   : > { %v11680_v40 = vld [vmem:[#allocation3 + $0xa00] sm:$0xf]  ;;  %v11169_v45 = vor.u32 %v15465_v39, %v11168_v37  ;;  %6709 = vmatpush.bf16.msra.mxu0 %v10657_v44 }
  0x48   : > { %v15593_v41 = vld [vmem:[#allocation3 + $0xa3c] sm:$0xf0] }
  0x49   : > { %v12192_v42 = vld [vmem:[#allocation3 + $0xe00] sm:$0xf]  ;;  %v11681_v46 = vor.u32 %v15593_v41, %v11680_v40  ;;  %6722 = vmatpush.bf16.msra.mxu1 %v11169_v45 }
  0x4a   : > { %v15721_v43 = vld [vmem:[#allocation3 + $0xe3c] sm:$0xf0] }
  0x4b   : > { %v10592_v47 = vld [vmem:[#allocation3 + $0x180] sm:$0xf]  ;;  %v12193_v50 = vor.u32 %v15721_v43, %v12192_v42  ;;  %6735 = vmatpush.bf16.msra.mxu2 %v11681_v46 }
  0x4c   : > { %v15321_v48 = vld [vmem:[#allocation3 + $0x1bc] sm:$0xf0] }
  0x4d   : > { %v11104_v49 = vld [vmem:[#allocation3 + $0x580] sm:$0xf]  ;;  %v10593_v56 = vor.u32 %v15321_v48, %v10592_v47  ;;  %6748 = vmatpush.bf16.msra.mxu3 %v12193_v50 }
  0x4e   : > { %v15449_v51 = vld [vmem:[#allocation3 + $0x5bc] sm:$0xf0] }
  0x4f   : > { %v11616_v52 = vld [vmem:[#allocation3 + $0x980] sm:$0xf]  ;;  %v11105_v57 = vor.u32 %v15449_v51, %v11104_v49  ;;  %6710 = vmatpush.bf16.msra.mxu0 %v10593_v56 }
  0x50   : > { %v15577_v53 = vld [vmem:[#allocation3 + $0x9bc] sm:$0xf0] }
  0x51   : > { %v12128_v54 = vld [vmem:[#allocation3 + $0xd80] sm:$0xf]  ;;  %v11617_v58 = vor.u32 %v15577_v53, %v11616_v52  ;;  %6723 = vmatpush.bf16.msra.mxu1 %v11105_v57 }
  0x52   : > { %v15705_v55 = vld [vmem:[#allocation3 + $0xdbc] sm:$0xf0] }
  0x53   : > { %v10528_v59 = vld [vmem:[#allocation3 + $0x100] sm:$0xf]  ;;  %v12129_v62 = vor.u32 %v15705_v55, %v12128_v54  ;;  %6736 = vmatpush.bf16.msra.mxu2 %v11617_v58 }
  0x54   : > { %v15305_v60 = vld [vmem:[#allocation3 + $0x13c] sm:$0xf0] }
  0x55   : > { %v11040_v61 = vld [vmem:[#allocation3 + $0x500] sm:$0xf]  ;;  %v10529_v4 = vor.u32 %v15305_v60, %v10528_v59  ;;  %6749 = vmatpush.bf16.msra.mxu3 %v12129_v62 }
  0x56   : > { %v15433_v63 = vld [vmem:[#allocation3 + $0x53c] sm:$0xf0] }
  0x57   : > { %v11552_v0 = vld [vmem:[#allocation3 + $0x900] sm:$0xf]  ;;  %v11041_v5 = vor.u32 %v15433_v63, %v11040_v61  ;;  %6711 = vmatpush.bf16.msra.mxu0 %v10529_v4 }
  0x58   : > { %v15561_v1 = vld [vmem:[#allocation3 + $0x93c] sm:$0xf0] }
  0x59   : > { %v12064_v2 = vld [vmem:[#allocation3 + $0xd00] sm:$0xf]  ;;  %v11553_v6 = vor.u32 %v15561_v1, %v11552_v0  ;;  %6724 = vmatpush.bf16.msra.mxu1 %v11041_v5 }
  0x5a   : > { %v15689_v3 = vld [vmem:[#allocation3 + $0xd3c] sm:$0xf0] }
  0x5b   : > { %v10464_v7 = vld [vmem:[#allocation3 + $0x80] sm:$0xf]  ;;  %v12065_v10 = vor.u32 %v15689_v3, %v12064_v2  ;;  %6737 = vmatpush.bf16.msra.mxu2 %v11553_v6  ;;  %v495_v2 = vld [vmem:[%s17016_s11 + $0x8] sm:$0xff] }
  0x5c   : > { %v15289_v8 = vld [vmem:[#allocation3 + $0xbc] sm:$0xf0] }
  0x5d   : > { %v10976_v9 = vld [vmem:[#allocation3 + $0x480] sm:$0xf]  ;;  %v10465_v16 = vor.u32 %v15289_v8, %v10464_v7  ;;  %6750 = vmatpush.bf16.msra.mxu3 %v12065_v10  ;;  %v1564_v8 = vunpack.c.l.b16 %v495_v2  ;;  %v1565_v10 = vunpack.c.h.b16 %v495_v2 }
  0x5e   : > { %v15417_v11 = vld [vmem:[#allocation3 + $0x4bc] sm:$0xf0] }
  0x5f   : > { %v11488_v12 = vld [vmem:[#allocation3 + $0x880] sm:$0xf]  ;;  %v10977_v19 = vor.u32 %v15417_v11, %v10976_v9  ;;  %6712 = vmatpush.bf16.msra.mxu0 %v10465_v16 }
  0x60   : > { %v15545_v13 = vld [vmem:[#allocation3 + $0x8bc] sm:$0xf0] }
  0x61   : > { %v12000_v14 = vld [vmem:[#allocation3 + $0xc80] sm:$0xf]  ;;  %v11489_v20 = vor.u32 %v15545_v13, %v11488_v12  ;;  %6725 = vmatpush.bf16.msra.mxu1 %v10977_v19 }
  0x62   : > { %v15673_v15 = vld [vmem:[#allocation3 + $0xcbc] sm:$0xf0] }
  0x63   : > { %v10400_v17 = vld [vmem:[#allocation3] sm:$0xf]  ;;  %v12001_v24 = vor.u32 %v15673_v15, %v12000_v14  ;;  %6738 = vmatpush.bf16.msra.mxu2 %v11489_v20  ;;  %v17024_v20 = vpack.c.b16 %v1565_v10, %v1565_v10  ;;  %v15505_v10 = vld [vmem:[#allocation3 + $0x784] sm:$0xf] }
  0x64   : > { %v15273_v18 = vld [vmem:[#allocation3 + $0x3c] sm:$0xf0] }
  0x65   : > { %v10912_v21 = vld [vmem:[#allocation3 + $0x400] sm:$0xf]  ;;  %v10401_v31 = vor.u32 %v15273_v18, %v10400_v17  ;;  %6751 = vmatpush.bf16.msra.mxu3 %v12001_v24  ;;  %v17020_v18 = vpack.c.b16 %v1564_v8, %v1564_v8  ;;  %v15377_v8 = vld [vmem:[#allocation3 + $0x384] sm:$0xf] }
  0x66   : > { %v15401_v22 = vld [vmem:[#allocation3 + $0x43c] sm:$0xf0] }
  0x67   : > { %v11424_v23 = vld [vmem:[#allocation3 + $0x800] sm:$0xf]  ;;  %v10913_v35 = vor.u32 %v15401_v22, %v10912_v21  ;;  %6713 = vmatpush.bf16.msra.mxu0 %v10401_v31 }
  0x68   : > { %v15529_v25 = vld [vmem:[#allocation3 + $0x83c] sm:$0xf0] }
  0x69   : > { %v11936_v26 = vld [vmem:[#allocation3 + $0xc00] sm:$0xf]  ;;  %v11425_v36 = vor.u32 %v15529_v25, %v11424_v23  ;;  %6726 = vmatpush.bf16.msra.mxu1 %v10913_v35 }
  0x6a   : > { %v15657_v27 = vld [vmem:[#allocation3 + $0xc3c] sm:$0xf0] }
  0x6b   : > { %v12896_v28 = vld [vmem:[#allocation3 + $0x1380] sm:$0xf]  ;;  %v11937_v39 = vor.u32 %v15657_v27, %v11936_v26  ;;  %6739 = vmatpush.bf16.msra.mxu2 %v11425_v36 }
  0x6c   : > { %v15897_v29 = vld [vmem:[#allocation3 + $0x13bc] sm:$0xf0] }
  0x6d   : > { %v13408_v30 = vld [vmem:[#allocation3 + $0x1780] sm:$0xf]  ;;  %v12897_v40 = vor.u32 %v15897_v29, %v12896_v28  ;;  %6752 = vmatpush.bf16.msra.mxu3 %v11937_v39 }
  0x6e   : > { %v16025_v32 = vld [vmem:[#allocation3 + $0x17bc] sm:$0xf0]  ;;  %6740 = vmatmul.bf16.vlgmr.msra.gmra.mxu2 %v17020_v18 }
  0x6f   : > { %v13920_v33 = vld [vmem:[#allocation3 + $0x1b80] sm:$0xf]  ;;  %v13409_v41 = vor.u32 %v16025_v32, %v13408_v30  ;;  %6758 = vmatpush.bf16.msrb.mxu0 %v12897_v40 }
  0x70   : > { %v16153_v34 = vld [vmem:[#allocation3 + $0x1bbc] sm:$0xf0]  ;;  %6753 = vmatmul.bf16.vlgmr.msra.gmra.mxu3 %v17024_v20 }
  0x71   : > { %v14432_v37 = vld [vmem:[#allocation3 + $0x1f80] sm:$0xf]  ;;  %v13921_v42 = vor.u32 %v16153_v34, %v13920_v33  ;;  %6771 = vmatpush.bf16.msrb.mxu1 %v13409_v41 }
  0x72   : > { %v16281_v38 = vld [vmem:[#allocation3 + $0x1fbc] sm:$0xf0] }
  0x73   : > { %v12832_v43 = vld [vmem:[#allocation3 + $0x1300] sm:$0xf]  ;;  %v14433_v46 = vor.u32 %v16281_v38, %v14432_v37  ;;  %6784 = vmatpush.bf16.msrb.mxu2 %v13921_v42 }
  0x74   : > { %v15881_v44 = vld [vmem:[#allocation3 + $0x133c] sm:$0xf0] }
  0x75   : > { %v13344_v45 = vld [vmem:[#allocation3 + $0x1700] sm:$0xf]  ;;  %v12833_v52 = vor.u32 %v15881_v44, %v12832_v43  ;;  %6797 = vmatpush.bf16.msrb.mxu3 %v14433_v46 }
  0x76   : > { %v16009_v47 = vld [vmem:[#allocation3 + $0x173c] sm:$0xf0] }
  0x77   : > { %v13856_v48 = vld [vmem:[#allocation3 + $0x1b00] sm:$0xf]  ;;  %v13345_v54 = vor.u32 %v16009_v47, %v13344_v45  ;;  %6759 = vmatpush.bf16.msrb.mxu0 %v12833_v52 }
  0x78   : > { %v16137_v49 = vld [vmem:[#allocation3 + $0x1b3c] sm:$0xf0] }
  0x79   : > { %v14368_v50 = vld [vmem:[#allocation3 + $0x1f00] sm:$0xf]  ;;  %v13857_v55 = vor.u32 %v16137_v49, %v13856_v48  ;;  %6772 = vmatpush.bf16.msrb.mxu1 %v13345_v54 }
  0x7a   : > { %v16265_v51 = vld [vmem:[#allocation3 + $0x1f3c] sm:$0xf0] }
  0x7b   : > { %v12768_v53 = vld [vmem:[#allocation3 + $0x1280] sm:$0xf]  ;;  %v14369_v59 = vor.u32 %v16265_v51, %v14368_v50  ;;  %6785 = vmatpush.bf16.msrb.mxu2 %v13857_v55 }
  0x7c   : > { %v15865_v56 = vld [vmem:[#allocation3 + $0x12bc] sm:$0xf0] }
  0x7d   : > { %v13280_v57 = vld [vmem:[#allocation3 + $0x1680] sm:$0xf]  ;;  %v12769_v0 = vor.u32 %v15865_v56, %v12768_v53  ;;  %6798 = vmatpush.bf16.msrb.mxu3 %v14369_v59 }
  0x7e   : > { %v15993_v58 = vld [vmem:[#allocation3 + $0x16bc] sm:$0xf0] }
  0x7f   : > { %v13792_v60 = vld [vmem:[#allocation3 + $0x1a80] sm:$0xf]  ;;  %v13281_v1 = vor.u32 %v15993_v58, %v13280_v57  ;;  %6760 = vmatpush.bf16.msrb.mxu0 %v12769_v0 }
  0x80   : > { %v16121_v61 = vld [vmem:[#allocation3 + $0x1abc] sm:$0xf0] }
  0x81   : > { %v14304_v62 = vld [vmem:[#allocation3 + $0x1e80] sm:$0xf]  ;;  %v13793_v4 = vor.u32 %v16121_v61, %v13792_v60  ;;  %6773 = vmatpush.bf16.msrb.mxu1 %v13281_v1 }
  0x82   : > { %v16249_v63 = vld [vmem:[#allocation3 + $0x1ebc] sm:$0xf0] }
  0x83   : > { %v494_v3 = vld [vmem:[%s17016_s11] sm:$0xff]  ;;  %v14305_v11 = vor.u32 %v16249_v63, %v14304_v62  ;;  %6786 = vmatpush.bf16.msrb.mxu2 %v13793_v4 }
  0x84   : > { %v12704_v5 = vld [vmem:[#allocation3 + $0x1200] sm:$0xf]  ;;  %v1562_v9 = vunpack.c.l.b16 %v494_v3  ;;  %v1563_v15 = vunpack.c.h.b16 %v494_v3  ;;  %v497_v3 = vld [vmem:[%s17016_s11 + $0x18] sm:$0xff] }
  0x85   : > { %v15849_v6 = vld [vmem:[#allocation3 + $0x123c] sm:$0xf0]  ;;  %6799 = vmatpush.bf16.msrb.mxu3 %v14305_v11 }
  0x86   : > { %v13216_v7 = vld [vmem:[#allocation3 + $0x1600] sm:$0xf]  ;;  %v17022_v19 = vpack.c.b16 %v1562_v9, %v1562_v9  ;;  %v12705_v21 = vor.u32 %v15849_v6, %v12704_v5  ;;  %v17026_v22 = vpack.c.b16 %v1563_v15, %v1563_v15  ;;  %v10850_v9 = vld [vmem:[#allocation3 + $0x3c0] sm:$0xf0]  ;;  %v1568_v15 = vunpack.c.l.b16 %v497_v3 }
  0x87   : > { %v15977_v12 = vld [vmem:[#allocation3 + $0x163c] sm:$0xf0] }
  0x88   : > { %v13728_v13 = vld [vmem:[#allocation3 + $0x1a00] sm:$0xf]  ;;  %v13217_v23 = vor.u32 %v15977_v12, %v13216_v7  ;;  %6714 = vmatmul.bf16.vlgmr.msra.gmra.mxu0 %v17022_v19  ;;  %6727 = vmatmul.bf16.vlgmr.msra.gmra.mxu1 %v17026_v22  ;;  %v496_v7 = vld [vmem:[%s17016_s11 + $0x10] sm:$0xff]  ;;  %v11362_v12 = vld [vmem:[#allocation3 + $0x7c0] sm:$0xf0] }
  0x89   : > { %v16105_v14 = vld [vmem:[#allocation3 + $0x1a3c] sm:$0xf0]  ;;  %6761 = vmatpush.bf16.msrb.mxu0 %v12705_v21  ;;  %v15761_v21 = vld [vmem:[#allocation3 + $0xf84] sm:$0xf] }
  0x8a   : > { %v14240_v16 = vld [vmem:[#allocation3 + $0x1e00] sm:$0xf]  ;;  %v13729_v24 = vor.u32 %v16105_v14, %v13728_v13  ;;  %6774 = vmatpush.bf16.msrb.mxu1 %v13217_v23  ;;  %v15633_v13 = vld [vmem:[#allocation3 + $0xb84] sm:$0xf] }
  0x8b   : > { %v16233_v17 = vld [vmem:[#allocation3 + $0x1e3c] sm:$0xf0]  ;;  %v11874_v14 = vld [vmem:[#allocation3 + $0xbc0] sm:$0xf0] }
  0x8c   : > { %v12640_v25 = vld [vmem:[#allocation3 + $0x1180] sm:$0xf]  ;;  %v14241_v28 = vor.u32 %v16233_v17, %v14240_v16  ;;  %6787 = vmatpush.bf16.msrb.mxu2 %v13729_v24  ;;  %v12386_v23 = vld [vmem:[#allocation3 + $0xfc0] sm:$0xf0]  ;;  %v1566_v24 = vunpack.c.l.b16 %v496_v7 }
  0x8d   : > { %v15833_v26 = vld [vmem:[#allocation3 + $0x11bc] sm:$0xf0] }
  0x8e   : > { %v13152_v27 = vld [vmem:[#allocation3 + $0x1580] sm:$0xf]  ;;  %v12641_v34 = vor.u32 %v15833_v26, %v12640_v25  ;;  %6800 = vmatpush.bf16.msrb.mxu3 %v14241_v28  ;;  %v1569_v25 = vunpack.c.h.b16 %v497_v3  ;;  %v1567_v28 = vunpack.c.h.b16 %v496_v7  ;;  %v12194_v3 = vld [vmem:[#allocation3 + $0xe40] sm:$0xf0] }
  0x8f   : > { %v15961_v29 = vld [vmem:[#allocation3 + $0x15bc] sm:$0xf0]  ;;  %v15313_v7 = vld [vmem:[#allocation3 + $0x184] sm:$0xf] }
  0x90   : > { %v13664_v30 = vld [vmem:[#allocation3 + $0x1980] sm:$0xf]  ;;  %v13153_v35 = vor.u32 %v15961_v29, %v13152_v27  ;;  %6762 = vmatpush.bf16.msrb.mxu0 %v12641_v34  ;;  %v10853_v27 = vor.u32 %v15377_v8, %v10850_v9  ;;  %v11365_v29 = vor.u32 %v15505_v10, %v11362_v12  ;;  %v12389_v34 = vor.u32 %v15761_v21, %v12386_v23  ;;  %v10594_v8 = vld [vmem:[#allocation3 + $0x1c0] sm:$0xf0] }
  0x91   : > { %v16089_v31 = vld [vmem:[#allocation3 + $0x19bc] sm:$0xf0]  ;;  %v15441_v9 = vld [vmem:[#allocation3 + $0x584] sm:$0xf] }
  0x92   : > { %v14176_v32 = vld [vmem:[#allocation3 + $0x1d80] sm:$0xf]  ;;  %v13665_v36 = vor.u32 %v16089_v31, %v13664_v30  ;;  %6775 = vmatpush.bf16.msrb.mxu1 %v13153_v35  ;;  %v11877_v30 = vor.u32 %v15633_v13, %v11874_v14  ;;  %v15361_v31 = vld [vmem:[#allocation3 + $0x304] sm:$0xf] }
  0x93   : > { %v16217_v33 = vld [vmem:[#allocation3 + $0x1dbc] sm:$0xf0]  ;;  %v11298_v35 = vld [vmem:[#allocation3 + $0x740] sm:$0xf0] }
  0x94   : > { %v12576_v37 = vld [vmem:[#allocation3 + $0x1100] sm:$0xf]  ;;  %v14177_v40 = vor.u32 %v16217_v33, %v14176_v32  ;;  %6788 = vmatpush.bf16.msrb.mxu2 %v13665_v36  ;;  %v10786_v32 = vld [vmem:[#allocation3 + $0x340] sm:$0xf0] }
  0x95   : > { %v15817_v38 = vld [vmem:[#allocation3 + $0x113c] sm:$0xf0]  ;;  %v15489_v33 = vld [vmem:[#allocation3 + $0x704] sm:$0xf] }
  0x96   : > { %v13088_v39 = vld [vmem:[#allocation3 + $0x1500] sm:$0xf]  ;;  %v12577_v46 = vor.u32 %v15817_v38, %v12576_v37  ;;  %6801 = vmatpush.bf16.msrb.mxu3 %v14177_v40  ;;  %v15617_v36 = vld [vmem:[#allocation3 + $0xb04] sm:$0xf]  ;;  %v17034_v38 = vpack.c.b16 %v1568_v15, %v1568_v15 }
  0x97   : > { %v15945_v41 = vld [vmem:[#allocation3 + $0x153c] sm:$0xf0]  ;;  %v11810_v37 = vld [vmem:[#allocation3 + $0xb40] sm:$0xf0] }
  0x98   : > { %v13600_v42 = vld [vmem:[#allocation3 + $0x1900] sm:$0xf]  ;;  %v13089_v47 = vor.u32 %v15945_v41, %v13088_v39  ;;  %6763 = vmatpush.bf16.msrb.mxu0 %v12577_v46  ;;  %v15745_v39 = vld [vmem:[#allocation3 + $0xf04] sm:$0xf]  ;;  %v17036_v41 = vpack.c.b16 %v1566_v24, %v1566_v24  ;;  %v11813_v46 = vor.u32 %v15617_v36, %v11810_v37 }
  0x99   : > { %v16073_v43 = vld [vmem:[#allocation3 + $0x193c] sm:$0xf0]  ;;  %v12322_v40 = vld [vmem:[#allocation3 + $0xf40] sm:$0xf0] }
  0x9a   : > { %v14112_v44 = vld [vmem:[#allocation3 + $0x1d00] sm:$0xf]  ;;  %v13601_v48 = vor.u32 %v16073_v43, %v13600_v42  ;;  %6776 = vmatpush.bf16.msrb.mxu1 %v13089_v47  ;;  %v17038_v42 = vpack.c.b16 %v1569_v25, %v1569_v25  ;;  %v10789_v43 = vor.u32 %v15361_v31, %v10786_v32  ;;  %v15345_v47 = vld [vmem:[#allocation3 + $0x284] sm:$0xf] }
  0x9b   : > { %v16201_v45 = vld [vmem:[#allocation3 + $0x1d3c] sm:$0xf0]  ;;  %v15569_v12 = vld [vmem:[#allocation3 + $0x984] sm:$0xf] }
  0x9c   : > { %v12512_v49 = vld [vmem:[#allocation3 + $0x1080] sm:$0xf]  ;;  %v14113_v52 = vor.u32 %v16201_v45, %v14112_v44  ;;  %6789 = vmatpush.bf16.msrb.mxu2 %v13601_v48  ;;  %v17040_v44 = vpack.c.b16 %v1567_v28, %v1567_v28  ;;  %v11301_v45 = vor.u32 %v15489_v33, %v11298_v35  ;;  %v10722_v48 = vld [vmem:[#allocation3 + $0x2c0] sm:$0xf0] }
  0x9d   : > { %v15801_v50 = vld [vmem:[#allocation3 + $0x10bc] sm:$0xf0]  ;;  %v11618_v13 = vld [vmem:[#allocation3 + $0x9c0] sm:$0xf0] }
  0x9e   : > { %v13024_v51 = vld [vmem:[#allocation3 + $0x1480] sm:$0xf]  ;;  %v12513_v59 = vor.u32 %v15801_v50, %v12512_v49  ;;  %6802 = vmatpush.bf16.msrb.mxu3 %v14113_v52  ;;  %v15473_v49 = vld [vmem:[#allocation3 + $0x684] sm:$0xf]  ;;  %v12325_v50 = vor.u32 %v15745_v39, %v12322_v40  ;;  %v11621_v21 = vor.u32 %v15569_v12, %v11618_v13 }
  0x9f   : > { %v15929_v53 = vld [vmem:[#allocation3 + $0x14bc] sm:$0xf0]  ;;  %v15601_v52 = vld [vmem:[#allocation3 + $0xa84] sm:$0xf] }
  0xa0   : > { %v13536_v54 = vld [vmem:[#allocation3 + $0x1880] sm:$0xf]  ;;  %v13025_v63 = vor.u32 %v15929_v53, %v13024_v51  ;;  %6764 = vmatpush.bf16.msrb.mxu0 %v12513_v59  ;;  %v11234_v51 = vld [vmem:[#allocation3 + $0x6c0] sm:$0xf0] }
  0xa1   : > { %v16057_v55 = vld [vmem:[#allocation3 + $0x18bc] sm:$0xf0]  ;;  %v11746_v53 = vld [vmem:[#allocation3 + $0xac0] sm:$0xf0] }
  0xa2   : > { %v14048_v56 = vld [vmem:[#allocation3 + $0x1c80] sm:$0xf]  ;;  %v13537_v0 = vor.u32 %v16057_v55, %v13536_v54  ;;  %6777 = vmatpush.bf16.msrb.mxu1 %v13025_v63  ;;  %v15729_v54 = vld [vmem:[#allocation3 + $0xe84] sm:$0xf] }
  0xa3   : > { %v16185_v57 = vld [vmem:[#allocation3 + $0x1cbc] sm:$0xf0]  ;;  %v12258_v55 = vld [vmem:[#allocation3 + $0xec0] sm:$0xf0] }
  0xa4   : > { %v12448_v58 = vld [vmem:[#allocation3 + $0x1000] sm:$0xf]  ;;  %v14049_v4 = vor.u32 %v16185_v57, %v14048_v56  ;;  %6790 = vmatpush.bf16.msrb.mxu2 %v13537_v0  ;;  %v10725_v56 = vor.u32 %v15345_v47, %v10722_v48  ;;  %v11237_v57 = vor.u32 %v15473_v49, %v11234_v51  ;;  %v15329_v59 = vld [vmem:[#allocation3 + $0x204] sm:$0xf] }
  0xa5   : > { %v15785_v60 = vld [vmem:[#allocation3 + $0x103c] sm:$0xf0]  ;;  %v11170_v63 = vld [vmem:[#allocation3 + $0x640] sm:$0xf0] }
  0xa6   : > { %v12960_v61 = vld [vmem:[#allocation3 + $0x1400] sm:$0xf]  ;;  %v12449_v11 = vor.u32 %v15785_v60, %v12448_v58  ;;  %6803 = vmatpush.bf16.msrb.mxu3 %v14049_v4  ;;  %v11749_v58 = vor.u32 %v15601_v52, %v11746_v53  ;;  %v10658_v60 = vld [vmem:[#allocation3 + $0x240] sm:$0xf0] }
  0xa7   : > { %v15913_v62 = vld [vmem:[#allocation3 + $0x143c] sm:$0xf0]  ;;  %v15585_v0 = vld [vmem:[#allocation3 + $0xa04] sm:$0xf]  ;;  %v10661_v4 = vor.u32 %v15329_v59, %v10658_v60 }
  0xa8   : > { %v13472_v1 = vld [vmem:[#allocation3 + $0x1800] sm:$0xf]  ;;  %v12961_v16 = vor.u32 %v15913_v62, %v12960_v61  ;;  %6765 = vmatpush.bf16.msrb.mxu0 %v12449_v11  ;;  %v15457_v61 = vld [vmem:[#allocation3 + $0x604] sm:$0xf]  ;;  %v12261_v62 = vor.u32 %v15729_v54, %v12258_v55 }
  0xa9   : > { %v16041_v2 = vld [vmem:[#allocation3 + $0x183c] sm:$0xf0]  ;;  %v11106_v11 = vld [vmem:[#allocation3 + $0x5c0] sm:$0xf0] }
  0xaa   : > { %v13984_v5 = vld [vmem:[#allocation3 + $0x1c00] sm:$0xf]  ;;  %v13473_v17 = vor.u32 %v16041_v2, %v13472_v1  ;;  %6778 = vmatpush.bf16.msrb.mxu1 %v12961_v16  ;;  %v11682_v1 = vld [vmem:[#allocation3 + $0xa40] sm:$0xf0]  ;;  %v10597_v16 = vor.u32 %v15313_v7, %v10594_v8 }
  0xab   : > { %v16169_v6 = vld [vmem:[#allocation3 + $0x1c3c] sm:$0xf0]  ;;  %6766 = vmatmul.bf16.vlgmr.msrb.gmra.mxu0 %v17036_v41  ;;  %v15713_v2 = vld [vmem:[#allocation3 + $0xe04] sm:$0xf] }
  0xac   : > { %v13985_v26 = vor.u32 %v16169_v6, %v13984_v5  ;;  %6791 = vmatpush.bf16.msrb.mxu2 %v13473_v17  ;;  %6810 = vmatpush.bf16.msra.mxu0 %v10853_v27  ;;  %v11173_v5 = vor.u32 %v15457_v61, %v11170_v63  ;;  %v11685_v6 = vor.u32 %v15585_v0, %v11682_v1  ;;  %v15697_v14 = vld [vmem:[#allocation3 + $0xd84] sm:$0xf] }
  0xad   : > { %6779 = vmatmul.bf16.vlgmr.msrb.gmra.mxu1 %v17040_v44  ;;  %v12197_v10 = vor.u32 %v15713_v2, %v12194_v3  ;;  %v12130_v15 = vld [vmem:[#allocation3 + $0xdc0] sm:$0xf0]  ;;  %v11109_v17 = vor.u32 %v15441_v9, %v11106_v11 }
  0xae   : > { %6804 = vmatpush.bf16.msrb.mxu3 %v13985_v26  ;;  %6823 = vmatpush.bf16.msra.mxu1 %v11365_v29  ;;  %v15297_v23 = vld [vmem:[#allocation3 + $0x104] sm:$0xf]  ;;  %v12133_v26 = vor.u32 %v15697_v14, %v12130_v15 }
  0xaf   : > { %6792 = vmatmul.bf16.vlgmr.msrb.gmra.mxu2 %v17034_v38  ;;  %v10530_v24 = vld [vmem:[#allocation3 + $0x140] sm:$0xf0] }
  0xb0   : > { %6836 = vmatpush.bf16.msra.mxu2 %v11877_v30  ;;  %6811 = vmatpush.bf16.msra.mxu0 %v10789_v43  ;;  %v15425_v25 = vld [vmem:[#allocation3 + $0x504] sm:$0xf]  ;;  %v10533_v32 = vor.u32 %v15297_v23, %v10530_v24 }
  0xb1   : > { %6805 = vmatmul.bf16.vlgmr.msrb.gmra.mxu3 %v17038_v42  ;;  %v11042_v27 = vld [vmem:[#allocation3 + $0x540] sm:$0xf0] }
  0xb2   : > { %6849 = vmatpush.bf16.msra.mxu3 %v12389_v34  ;;  %6824 = vmatpush.bf16.msra.mxu1 %v11301_v45  ;;  %v15553_v28 = vld [vmem:[#allocation3 + $0x904] sm:$0xf]  ;;  %v11045_v33 = vor.u32 %v15425_v25, %v11042_v27 }
  0xb3   : > { %v11554_v29 = vld [vmem:[#allocation3 + $0x940] sm:$0xf0] }
  0xb4   : > { %6837 = vmatpush.bf16.msra.mxu2 %v11813_v46  ;;  %6812 = vmatpush.bf16.msra.mxu0 %v10725_v56  ;;  %v15681_v30 = vld [vmem:[#allocation3 + $0xd04] sm:$0xf]  ;;  %v11557_v34 = vor.u32 %v15553_v28, %v11554_v29 }
  0xb5   : > { %v12066_v31 = vld [vmem:[#allocation3 + $0xd40] sm:$0xf0] }
  0xb6   : > { %6850 = vmatpush.bf16.msra.mxu3 %v12325_v50  ;;  %6825 = vmatpush.bf16.msra.mxu1 %v11237_v57  ;;  %v15281_v35 = vld [vmem:[#allocation3 + $0x84] sm:$0xf]  ;;  %v12069_v39 = vor.u32 %v15681_v30, %v12066_v31 }
  0xb7   : > { %v10466_v36 = vld [vmem:[#allocation3 + $0xc0] sm:$0xf0] }
  0xb8   : > { %6838 = vmatpush.bf16.msra.mxu2 %v11749_v58  ;;  %6813 = vmatpush.bf16.msra.mxu0 %v10661_v4  ;;  %v15409_v37 = vld [vmem:[#allocation3 + $0x484] sm:$0xf]  ;;  %v10469_v48 = vor.u32 %v15281_v35, %v10466_v36 }
  0xb9   : > { %v10978_v40 = vld [vmem:[#allocation3 + $0x4c0] sm:$0xf0] }
  0xba   : > { %6851 = vmatpush.bf16.msra.mxu3 %v12261_v62  ;;  %6826 = vmatpush.bf16.msra.mxu1 %v11173_v5  ;;  %v15537_v43 = vld [vmem:[#allocation3 + $0x884] sm:$0xf]  ;;  %v10981_v51 = vor.u32 %v15409_v37, %v10978_v40 }
  0xbb   : > { %v11490_v45 = vld [vmem:[#allocation3 + $0x8c0] sm:$0xf0] }
  0xbc   : > { %6839 = vmatpush.bf16.msra.mxu2 %v11685_v6  ;;  %6814 = vmatpush.bf16.msra.mxu0 %v10597_v16  ;;  %v15665_v46 = vld [vmem:[#allocation3 + $0xc84] sm:$0xf]  ;;  %v11493_v52 = vor.u32 %v15537_v43, %v11490_v45 }
  0xbd   : > { %v12002_v47 = vld [vmem:[#allocation3 + $0xcc0] sm:$0xf0] }
  0xbe   : > { %6852 = vmatpush.bf16.msra.mxu3 %v12197_v10  ;;  %6827 = vmatpush.bf16.msra.mxu1 %v11109_v17  ;;  %v15265_v49 = vld [vmem:[#allocation3 + $0x4] sm:$0xf]  ;;  %v12005_v56 = vor.u32 %v15665_v46, %v12002_v47 }
  0xbf   : > { %v10402_v50 = vld [vmem:[#allocation3 + $0x40] sm:$0xf0] }
  0xc0   : > { %6840 = vmatpush.bf16.msra.mxu2 %v11621_v21  ;;  %6815 = vmatpush.bf16.msra.mxu0 %v10533_v32  ;;  %v15393_v53 = vld [vmem:[#allocation3 + $0x404] sm:$0xf]  ;;  %v10405_v63 = vor.u32 %v15265_v49, %v10402_v50 }
  0xc1   : > { %v10914_v54 = vld [vmem:[#allocation3 + $0x440] sm:$0xf0] }
  0xc2   : > { %6853 = vmatpush.bf16.msra.mxu3 %v12133_v26  ;;  %6828 = vmatpush.bf16.msra.mxu1 %v11045_v33  ;;  %v15521_v55 = vld [vmem:[#allocation3 + $0x804] sm:$0xf]  ;;  %v10917_v3 = vor.u32 %v15393_v53, %v10914_v54 }
  0xc3   : > { %v11426_v57 = vld [vmem:[#allocation3 + $0x840] sm:$0xf0] }
  0xc4   : > { %6841 = vmatpush.bf16.msra.mxu2 %v11557_v34  ;;  %v15649_v58 = vld [vmem:[#allocation3 + $0xc04] sm:$0xf]  ;;  %6816 = vmatpush.bf16.msra.mxu0 %v10469_v48  ;;  %v11429_v4 = vor.u32 %v15521_v55, %v11426_v57 }
  0xc5   : > { %v11938_v59 = vld [vmem:[#allocation3 + $0xc40] sm:$0xf0] }
  0xc6   : > { %6854 = vmatpush.bf16.msra.mxu3 %v12069_v39  ;;  %v15889_v60 = vld [vmem:[#allocation3 + $0x1384] sm:$0xf]  ;;  %6829 = vmatpush.bf16.msra.mxu1 %v10981_v51  ;;  %v11941_v7 = vor.u32 %v15649_v58, %v11938_v59 }
  0xc7   : > { %v12898_v61 = vld [vmem:[#allocation3 + $0x13c0] sm:$0xf0] }
  0xc8   : > { %v16017_v62 = vld [vmem:[#allocation3 + $0x1784] sm:$0xf]  ;;  %6842 = vmatpush.bf16.msra.mxu2 %v11493_v52  ;;  %v12901_v8 = vor.u32 %v15889_v60, %v12898_v61  ;;  %6817 = vmatpush.bf16.msra.mxu0 %v10405_v63 }
  0xc9   : > { %v13410_v0 = vld [vmem:[#allocation3 + $0x17c0] sm:$0xf0] }
  0xca   : > { %v16145_v1 = vld [vmem:[#allocation3 + $0x1b84] sm:$0xf]  ;;  %6855 = vmatpush.bf16.msra.mxu3 %v12005_v56  ;;  %v13413_v9 = vor.u32 %v16017_v62, %v13410_v0  ;;  %6830 = vmatpush.bf16.msra.mxu1 %v10917_v3 }
  0xcb   : > { %v13922_v2 = vld [vmem:[#allocation3 + $0x1bc0] sm:$0xf0]  ;;  %6818 = vmatmul.bf16.vlgmr.msra.gmra.mxu0 %v17022_v19 }
  0xcc   : > { %v16273_v5 = vld [vmem:[#allocation3 + $0x1f84] sm:$0xf]  ;;  %v13925_v10 = vor.u32 %v16145_v1, %v13922_v2  ;;  %6843 = vmatpush.bf16.msra.mxu2 %v11429_v4  ;;  %6862 = vmatpush.bf16.msrb.mxu0 %v12901_v8 }
  0xcd   : > { %v14434_v6 = vld [vmem:[#allocation3 + $0x1fc0] sm:$0xf0]  ;;  %6831 = vmatmul.bf16.vlgmr.msra.gmra.mxu1 %v17026_v22 }
  0xce   : > { %v15873_v11 = vld [vmem:[#allocation3 + $0x1304] sm:$0xf]  ;;  %v14437_v14 = vor.u32 %v16273_v5, %v14434_v6  ;;  %6856 = vmatpush.bf16.msra.mxu3 %v11941_v7  ;;  %6875 = vmatpush.bf16.msrb.mxu1 %v13413_v9 }
  0xcf   : > { %v12834_v12 = vld [vmem:[#allocation3 + $0x1340] sm:$0xf0]  ;;  %6844 = vmatmul.bf16.vlgmr.msra.gmra.mxu2 %v17020_v18 }
  0xd0   : > { %v16001_v13 = vld [vmem:[#allocation3 + $0x1704] sm:$0xf]  ;;  %v12837_v24 = vor.u32 %v15873_v11, %v12834_v12  ;;  %6888 = vmatpush.bf16.msrb.mxu2 %v13925_v10 }
  0xd1   : > { %v13346_v15 = vld [vmem:[#allocation3 + $0x1740] sm:$0xf0]  ;;  %6857 = vmatmul.bf16.vlgmr.msra.gmra.mxu3 %v17024_v20 }
  0xd2   : > { %v16129_v16 = vld [vmem:[#allocation3 + $0x1b04] sm:$0xf]  ;;  %v13349_v25 = vor.u32 %v16001_v13, %v13346_v15  ;;  %6901 = vmatpush.bf16.msrb.mxu3 %v14437_v14  ;;  %6863 = vmatpush.bf16.msrb.mxu0 %v12837_v24 }
  0xd3   : > { %v13858_v17 = vld [vmem:[#allocation3 + $0x1b40] sm:$0xf0] }
  0xd4   : > { %v16257_v21 = vld [vmem:[#allocation3 + $0x1f04] sm:$0xf]  ;;  %v13861_v26 = vor.u32 %v16129_v16, %v13858_v17  ;;  %6876 = vmatpush.bf16.msrb.mxu1 %v13349_v25 }
  0xd5   : > { %v14370_v23 = vld [vmem:[#allocation3 + $0x1f40] sm:$0xf0] }
  0xd6   : > { %v15857_v27 = vld [vmem:[#allocation3 + $0x1284] sm:$0xf]  ;;  %v14373_v30 = vor.u32 %v16257_v21, %v14370_v23  ;;  %6889 = vmatpush.bf16.msrb.mxu2 %v13861_v26 }
  0xd7   : > { %v12770_v28 = vld [vmem:[#allocation3 + $0x12c0] sm:$0xf0] }
  0xd8   : > { %v15985_v29 = vld [vmem:[#allocation3 + $0x1684] sm:$0xf]  ;;  %v12773_v36 = vor.u32 %v15857_v27, %v12770_v28  ;;  %6902 = vmatpush.bf16.msrb.mxu3 %v14373_v30 }
  0xd9   : > { %v13282_v31 = vld [vmem:[#allocation3 + $0x16c0] sm:$0xf0] }
  0xda   : > { %v16113_v32 = vld [vmem:[#allocation3 + $0x1a84] sm:$0xf]  ;;  %v13285_v37 = vor.u32 %v15985_v29, %v13282_v31  ;;  %6864 = vmatpush.bf16.msrb.mxu0 %v12773_v36 }
  0xdb   : > { %v13794_v33 = vld [vmem:[#allocation3 + $0x1ac0] sm:$0xf0] }
  0xdc   : > { %v16241_v34 = vld [vmem:[#allocation3 + $0x1e84] sm:$0xf]  ;;  %v13797_v39 = vor.u32 %v16113_v32, %v13794_v33  ;;  %6877 = vmatpush.bf16.msrb.mxu1 %v13285_v37 }
  0xdd   : > { %v14306_v35 = vld [vmem:[#allocation3 + $0x1ec0] sm:$0xf0] }
  0xde   : > { %v15841_v40 = vld [vmem:[#allocation3 + $0x1204] sm:$0xf]  ;;  %v14309_v46 = vor.u32 %v16241_v34, %v14306_v35  ;;  %6890 = vmatpush.bf16.msrb.mxu2 %v13797_v39 }
  0xdf   : > { %v12706_v43 = vld [vmem:[#allocation3 + $0x1240] sm:$0xf0] }
  0xe0   : > { %v15969_v45 = vld [vmem:[#allocation3 + $0x1604] sm:$0xf]  ;;  %v12709_v52 = vor.u32 %v15841_v40, %v12706_v43  ;;  %6903 = vmatpush.bf16.msrb.mxu3 %v14309_v46  ;;  %v10856_v43 = vld [vmem:[#allocation3 + $0x388] sm:$0xf] }
  0xe1   : > { %v13218_v47 = vld [vmem:[#allocation3 + $0x1640] sm:$0xf0]  ;;  %v11368_v46 = vld [vmem:[#allocation3 + $0x788] sm:$0xf] }
  0xe2   : > { %v16097_v48 = vld [vmem:[#allocation3 + $0x1a04] sm:$0xf]  ;;  %v13221_v53 = vor.u32 %v15969_v45, %v13218_v47  ;;  %6865 = vmatpush.bf16.msrb.mxu0 %v12709_v52  ;;  %v15386_v45 = vld [vmem:[#allocation3 + $0x3c4] sm:$0xf0] }
  0xe3   : > { %v13730_v49 = vld [vmem:[#allocation3 + $0x1a40] sm:$0xf0] }
  0xe4   : > { %v16225_v50 = vld [vmem:[#allocation3 + $0x1e04] sm:$0xf]  ;;  %v13733_v54 = vor.u32 %v16097_v48, %v13730_v49  ;;  %6878 = vmatpush.bf16.msrb.mxu1 %v13221_v53  ;;  %v15514_v48 = vld [vmem:[#allocation3 + $0x7c4] sm:$0xf0] }
  0xe5   : > { %v14242_v51 = vld [vmem:[#allocation3 + $0x1e40] sm:$0xf0]  ;;  %v11880_v49 = vld [vmem:[#allocation3 + $0xb88] sm:$0xf] }
  0xe6   : > { %v15825_v55 = vld [vmem:[#allocation3 + $0x1184] sm:$0xf]  ;;  %v14245_v58 = vor.u32 %v16225_v50, %v14242_v51  ;;  %6891 = vmatpush.bf16.msrb.mxu2 %v13733_v54  ;;  %v15642_v50 = vld [vmem:[#allocation3 + $0xbc4] sm:$0xf0] }
  0xe7   : > { %v12642_v56 = vld [vmem:[#allocation3 + $0x11c0] sm:$0xf0]  ;;  %v12392_v53 = vld [vmem:[#allocation3 + $0xf88] sm:$0xf] }
  0xe8   : > { %v15953_v57 = vld [vmem:[#allocation3 + $0x1584] sm:$0xf]  ;;  %v12645_v0 = vor.u32 %v15825_v55, %v12642_v56  ;;  %6904 = vmatpush.bf16.msrb.mxu3 %v14245_v58  ;;  %v15770_v54 = vld [vmem:[#allocation3 + $0xfc4] sm:$0xf0]  ;;  %v10857_v56 = vor.u32 %v15386_v45, %v10856_v43  ;;  %v11881_v58 = vor.u32 %v15642_v50, %v11880_v49 }
  0xe9   : > { %v13154_v59 = vld [vmem:[#allocation3 + $0x15c0] sm:$0xf0]  ;;  %v11624_v43 = vld [vmem:[#allocation3 + $0x988] sm:$0xf] }
  0xea   : > { %v16081_v60 = vld [vmem:[#allocation3 + $0x1984] sm:$0xf]  ;;  %v13157_v1 = vor.u32 %v15953_v57, %v13154_v59  ;;  %6866 = vmatpush.bf16.msrb.mxu0 %v12645_v0  ;;  %v11369_v57 = vor.u32 %v15514_v48, %v11368_v46  ;;  %v10792_v59 = vld [vmem:[#allocation3 + $0x308] sm:$0xf] }
  0xeb   : > { %v13666_v61 = vld [vmem:[#allocation3 + $0x19c0] sm:$0xf0]  ;;  %v11816_v0 = vld [vmem:[#allocation3 + $0xb08] sm:$0xf] }
  0xec   : > { %v16209_v62 = vld [vmem:[#allocation3 + $0x1d84] sm:$0xf]  ;;  %v13669_v2 = vor.u32 %v16081_v60, %v13666_v61  ;;  %6879 = vmatpush.bf16.msrb.mxu1 %v13157_v1  ;;  %v15370_v60 = vld [vmem:[#allocation3 + $0x344] sm:$0xf0] }
  0xed   : > { %v14178_v63 = vld [vmem:[#allocation3 + $0x1dc0] sm:$0xf0]  ;;  %v11304_v61 = vld [vmem:[#allocation3 + $0x708] sm:$0xf] }
  0xee   : > { %v15809_v3 = vld [vmem:[#allocation3 + $0x1104] sm:$0xf]  ;;  %v14181_v6 = vor.u32 %v16209_v62, %v14178_v63  ;;  %6892 = vmatpush.bf16.msrb.mxu2 %v13669_v2  ;;  %v12393_v62 = vor.u32 %v15770_v54, %v12392_v53  ;;  %v15498_v63 = vld [vmem:[#allocation3 + $0x744] sm:$0xf0] }
  0xef   : > { %v12578_v4 = vld [vmem:[#allocation3 + $0x1140] sm:$0xf0]  ;;  %v15626_v1 = vld [vmem:[#allocation3 + $0xb44] sm:$0xf0] }
  0xf0   : > { %v15937_v5 = vld [vmem:[#allocation3 + $0x1504] sm:$0xf]  ;;  %v12581_v12 = vor.u32 %v15809_v3, %v12578_v4  ;;  %6905 = vmatpush.bf16.msrb.mxu3 %v14181_v6  ;;  %v12328_v2 = vld [vmem:[#allocation3 + $0xf08] sm:$0xf]  ;;  %v10793_v4 = vor.u32 %v15370_v60, %v10792_v59  ;;  %v11817_v6 = vor.u32 %v15626_v1, %v11816_v0 }
  0xf1   : > { %v13090_v7 = vld [vmem:[#allocation3 + $0x1540] sm:$0xf0]  ;;  %v15754_v3 = vld [vmem:[#allocation3 + $0xf44] sm:$0xf0] }
  0xf2   : > { %v16065_v8 = vld [vmem:[#allocation3 + $0x1904] sm:$0xf]  ;;  %v13093_v13 = vor.u32 %v15937_v5, %v13090_v7  ;;  %6867 = vmatpush.bf16.msrb.mxu0 %v12581_v12  ;;  %v11305_v5 = vor.u32 %v15498_v63, %v11304_v61  ;;  %v10728_v7 = vld [vmem:[#allocation3 + $0x288] sm:$0xf] }
  0xf3   : > { %v13602_v9 = vld [vmem:[#allocation3 + $0x1940] sm:$0xf0]  ;;  %v11752_v12 = vld [vmem:[#allocation3 + $0xa88] sm:$0xf] }
  0xf4   : > { %v16193_v10 = vld [vmem:[#allocation3 + $0x1d04] sm:$0xf]  ;;  %v13605_v14 = vor.u32 %v16065_v8, %v13602_v9  ;;  %6880 = vmatpush.bf16.msrb.mxu1 %v13093_v13  ;;  %v15354_v8 = vld [vmem:[#allocation3 + $0x2c4] sm:$0xf0] }
  0xf5   : > { %v14114_v11 = vld [vmem:[#allocation3 + $0x1d40] sm:$0xf0]  ;;  %v11240_v9 = vld [vmem:[#allocation3 + $0x688] sm:$0xf] }
  0xf6   : > { %v15793_v15 = vld [vmem:[#allocation3 + $0x1084] sm:$0xf]  ;;  %v14117_v21 = vor.u32 %v16193_v10, %v14114_v11  ;;  %6893 = vmatpush.bf16.msrb.mxu2 %v13605_v14  ;;  %v12329_v10 = vor.u32 %v15754_v3, %v12328_v2  ;;  %v15482_v11 = vld [vmem:[#allocation3 + $0x6c4] sm:$0xf0] }
  0xf7   : > { %v12514_v16 = vld [vmem:[#allocation3 + $0x10c0] sm:$0xf0]  ;;  %v15610_v13 = vld [vmem:[#allocation3 + $0xac4] sm:$0xf0] }
  0xf8   : > { %v15921_v17 = vld [vmem:[#allocation3 + $0x1484] sm:$0xf]  ;;  %v12517_v28 = vor.u32 %v15793_v15, %v12514_v16  ;;  %6906 = vmatpush.bf16.msrb.mxu3 %v14117_v21  ;;  %v12264_v14 = vld [vmem:[#allocation3 + $0xe88] sm:$0xf]  ;;  %v10729_v16 = vor.u32 %v15354_v8, %v10728_v7  ;;  %v11753_v21 = vor.u32 %v15610_v13, %v11752_v12 }
  0xf9   : > { %v13026_v23 = vld [vmem:[#allocation3 + $0x14c0] sm:$0xf0]  ;;  %v15738_v15 = vld [vmem:[#allocation3 + $0xec4] sm:$0xf0] }
  0xfa   : > { %v16049_v24 = vld [vmem:[#allocation3 + $0x1884] sm:$0xf]  ;;  %v13029_v31 = vor.u32 %v15921_v17, %v13026_v23  ;;  %6868 = vmatpush.bf16.msrb.mxu0 %v12517_v28  ;;  %v11241_v17 = vor.u32 %v15482_v11, %v11240_v9  ;;  %v10664_v23 = vld [vmem:[#allocation3 + $0x208] sm:$0xf] }
  0xfb   : > { %v13538_v25 = vld [vmem:[#allocation3 + $0x18c0] sm:$0xf0]  ;;  %v11688_v28 = vld [vmem:[#allocation3 + $0xa08] sm:$0xf] }
  0xfc   : > { %v16177_v26 = vld [vmem:[#allocation3 + $0x1c84] sm:$0xf]  ;;  %v13541_v32 = vor.u32 %v16049_v24, %v13538_v25  ;;  %6881 = vmatpush.bf16.msrb.mxu1 %v13029_v31  ;;  %v15338_v24 = vld [vmem:[#allocation3 + $0x244] sm:$0xf0] }
  0xfd   : > { %v14050_v27 = vld [vmem:[#allocation3 + $0x1cc0] sm:$0xf0]  ;;  %v11176_v25 = vld [vmem:[#allocation3 + $0x608] sm:$0xf] }
  0xfe   : > { %v15777_v29 = vld [vmem:[#allocation3 + $0x1004] sm:$0xf]  ;;  %v14053_v36 = vor.u32 %v16177_v26, %v14050_v27  ;;  %6894 = vmatpush.bf16.msrb.mxu2 %v13541_v32  ;;  %v12265_v26 = vor.u32 %v15738_v15, %v12264_v14  ;;  %v15466_v27 = vld [vmem:[#allocation3 + $0x644] sm:$0xf0]  ;;  %v10665_v32 = vor.u32 %v15338_v24, %v10664_v23 }
  0xff   : > { %v12450_v30 = vld [vmem:[#allocation3 + $0x1040] sm:$0xf0]  ;;  %v15722_v31 = vld [vmem:[#allocation3 + $0xe44] sm:$0xf0] }
 0x100   : > { %v15905_v33 = vld [vmem:[#allocation3 + $0x1404] sm:$0xf]  ;;  %v12453_v47 = vor.u32 %v15777_v29, %v12450_v30  ;;  %6907 = vmatpush.bf16.msrb.mxu3 %v14053_v36  ;;  %v15594_v29 = vld [vmem:[#allocation3 + $0xa44] sm:$0xf0] }
 0x101   : > { %v12962_v34 = vld [vmem:[#allocation3 + $0x1440] sm:$0xf0]  ;;  %v12200_v30 = vld [vmem:[#allocation3 + $0xe08] sm:$0xf] }
 0x102   : > { %v16033_v35 = vld [vmem:[#allocation3 + $0x1804] sm:$0xf]  ;;  %v12965_v51 = vor.u32 %v15905_v33, %v12962_v34  ;;  %6869 = vmatpush.bf16.msrb.mxu0 %v12453_v47  ;;  %v11177_v33 = vor.u32 %v15466_v27, %v11176_v25  ;;  %v11689_v34 = vor.u32 %v15594_v29, %v11688_v28  ;;  %v15322_v36 = vld [vmem:[#allocation3 + $0x1c4] sm:$0xf0] }
 0x103   : > { %v13474_v37 = vld [vmem:[#allocation3 + $0x1840] sm:$0xf0]  ;;  %v15578_v45 = vld [vmem:[#allocation3 + $0x9c4] sm:$0xf0] }
 0x104   : > { %v16161_v39 = vld [vmem:[#allocation3 + $0x1c04] sm:$0xf]  ;;  %v13477_v52 = vor.u32 %v16033_v35, %v13474_v37  ;;  %6882 = vmatpush.bf16.msrb.mxu1 %v12965_v51  ;;  %v10600_v35 = vld [vmem:[#allocation3 + $0x188] sm:$0xf]  ;;  %v11625_v50 = vor.u32 %v15578_v45, %v11624_v43 }
 0x105   : > { %v13986_v40 = vld [vmem:[#allocation3 + $0x1c40] sm:$0xf0]  ;;  %6870 = vmatmul.bf16.vlgmr.msrb.gmra.mxu0 %v17036_v41  ;;  %v11112_v37 = vld [vmem:[#allocation3 + $0x588] sm:$0xf]  ;;  %v10601_v48 = vor.u32 %v15322_v36, %v10600_v35 }
 0x106   : > { %v13989_v55 = vor.u32 %v16161_v39, %v13986_v40  ;;  %6895 = vmatpush.bf16.msrb.mxu2 %v13477_v52  ;;  %6914 = vmatpush.bf16.msra.mxu0 %v10857_v56  ;;  %v12201_v39 = vor.u32 %v15722_v31, %v12200_v30  ;;  %v15450_v40 = vld [vmem:[#allocation3 + $0x5c4] sm:$0xf0] }
 0x107   : > { %6883 = vmatmul.bf16.vlgmr.msrb.gmra.mxu1 %v17040_v44  ;;  %v12136_v46 = vld [vmem:[#allocation3 + $0xd88] sm:$0xf]  ;;  %v11113_v49 = vor.u32 %v15450_v40, %v11112_v37 }
 0x108   : > { %6908 = vmatpush.bf16.msrb.mxu3 %v13989_v55  ;;  %6927 = vmatpush.bf16.msra.mxu1 %v11369_v57  ;;  %v15706_v47 = vld [vmem:[#allocation3 + $0xdc4] sm:$0xf0] }
 0x109   : > { %6896 = vmatmul.bf16.vlgmr.msrb.gmra.mxu2 %v17034_v38  ;;  %v10536_v51 = vld [vmem:[#allocation3 + $0x108] sm:$0xf]  ;;  %v12137_v54 = vor.u32 %v15706_v47, %v12136_v46 }
 0x10a   : > { %6940 = vmatpush.bf16.msra.mxu2 %v11881_v58  ;;  %6915 = vmatpush.bf16.msra.mxu0 %v10793_v4  ;;  %v15306_v52 = vld [vmem:[#allocation3 + $0x144] sm:$0xf0] }
 0x10b   : > { %6909 = vmatmul.bf16.vlgmr.msrb.gmra.mxu3 %v17038_v42  ;;  %v11048_v53 = vld [vmem:[#allocation3 + $0x508] sm:$0xf]  ;;  %v10537_v60 = vor.u32 %v15306_v52, %v10536_v51 }
 0x10c   : > { %6953 = vmatpush.bf16.msra.mxu3 %v12393_v62  ;;  %6928 = vmatpush.bf16.msra.mxu1 %v11305_v5  ;;  %v15434_v55 = vld [vmem:[#allocation3 + $0x544] sm:$0xf0] }
 0x10d   : > { %v11560_v56 = vld [vmem:[#allocation3 + $0x908] sm:$0xf]  ;;  %v11049_v61 = vor.u32 %v15434_v55, %v11048_v53 }
 0x10e   : > { %6941 = vmatpush.bf16.msra.mxu2 %v11817_v6  ;;  %6916 = vmatpush.bf16.msra.mxu0 %v10729_v16  ;;  %v15562_v57 = vld [vmem:[#allocation3 + $0x944] sm:$0xf0] }
 0x10f   : > { %v12072_v58 = vld [vmem:[#allocation3 + $0xd08] sm:$0xf]  ;;  %v11561_v62 = vor.u32 %v15562_v57, %v11560_v56 }
 0x110   : > { %6954 = vmatpush.bf16.msra.mxu3 %v12329_v10  ;;  %6929 = vmatpush.bf16.msra.mxu1 %v11241_v17  ;;  %v15690_v59 = vld [vmem:[#allocation3 + $0xd44] sm:$0xf0] }
 0x111   : > { %v10472_v63 = vld [vmem:[#allocation3 + $0x88] sm:$0xf]  ;;  %v12073_v2 = vor.u32 %v15690_v59, %v12072_v58 }
 0x112   : > { %6942 = vmatpush.bf16.msra.mxu2 %v11753_v21  ;;  %6917 = vmatpush.bf16.msra.mxu0 %v10665_v32  ;;  %v15290_v0 = vld [vmem:[#allocation3 + $0xc4] sm:$0xf0] }
 0x113   : > { %v10984_v1 = vld [vmem:[#allocation3 + $0x488] sm:$0xf]  ;;  %v10473_v8 = vor.u32 %v15290_v0, %v10472_v63 }
 0x114   : > { %6955 = vmatpush.bf16.msra.mxu3 %v12265_v26  ;;  %6930 = vmatpush.bf16.msra.mxu1 %v11177_v33  ;;  %v15418_v3 = vld [vmem:[#allocation3 + $0x4c4] sm:$0xf0] }
 0x115   : > { %v11496_v4 = vld [vmem:[#allocation3 + $0x888] sm:$0xf]  ;;  %v10985_v11 = vor.u32 %v15418_v3, %v10984_v1 }
 0x116   : > { %6943 = vmatpush.bf16.msra.mxu2 %v11689_v34  ;;  %6918 = vmatpush.bf16.msra.mxu0 %v10601_v48  ;;  %v15546_v5 = vld [vmem:[#allocation3 + $0x8c4] sm:$0xf0] }
 0x117   : > { %v12008_v6 = vld [vmem:[#allocation3 + $0xc88] sm:$0xf]  ;;  %v11497_v12 = vor.u32 %v15546_v5, %v11496_v4 }
 0x118   : > { %6956 = vmatpush.bf16.msra.mxu3 %v12201_v39  ;;  %6931 = vmatpush.bf16.msra.mxu1 %v11113_v49  ;;  %v15674_v7 = vld [vmem:[#allocation3 + $0xcc4] sm:$0xf0] }
 0x119   : > { %v10408_v9 = vld [vmem:[#allocation3 + $0x8] sm:$0xf]  ;;  %v12009_v16 = vor.u32 %v15674_v7, %v12008_v6 }
 0x11a   : > { %6944 = vmatpush.bf16.msra.mxu2 %v11625_v50  ;;  %6919 = vmatpush.bf16.msra.mxu0 %v10537_v60  ;;  %v15274_v10 = vld [vmem:[#allocation3 + $0x44] sm:$0xf0] }
 0x11b   : > { %v10920_v13 = vld [vmem:[#allocation3 + $0x408] sm:$0xf]  ;;  %v10409_v27 = vor.u32 %v15274_v10, %v10408_v9 }
 0x11c   : > { %6957 = vmatpush.bf16.msra.mxu3 %v12137_v54  ;;  %6932 = vmatpush.bf16.msra.mxu1 %v11049_v61  ;;  %v15402_v14 = vld [vmem:[#allocation3 + $0x444] sm:$0xf0] }
 0x11d   : > { %v11432_v15 = vld [vmem:[#allocation3 + $0x808] sm:$0xf]  ;;  %v10921_v31 = vor.u32 %v15402_v14, %v10920_v13 }
 0x11e   : > { %6945 = vmatpush.bf16.msra.mxu2 %v11561_v62  ;;  %v15530_v17 = vld [vmem:[#allocation3 + $0x844] sm:$0xf0]  ;;  %6920 = vmatpush.bf16.msra.mxu0 %v10473_v8 }
 0x11f   : > { %v11944_v21 = vld [vmem:[#allocation3 + $0xc08] sm:$0xf]  ;;  %v11433_v32 = vor.u32 %v15530_v17, %v11432_v15 }
 0x120   : > { %6958 = vmatpush.bf16.msra.mxu3 %v12073_v2  ;;  %v15658_v23 = vld [vmem:[#allocation3 + $0xc44] sm:$0xf0]  ;;  %6933 = vmatpush.bf16.msra.mxu1 %v10985_v11 }
 0x121   : > { %v12904_v24 = vld [vmem:[#allocation3 + $0x1388] sm:$0xf]  ;;  %v11945_v35 = vor.u32 %v15658_v23, %v11944_v21 }
 0x122   : > { %v15898_v25 = vld [vmem:[#allocation3 + $0x13c4] sm:$0xf0]  ;;  %6946 = vmatpush.bf16.msra.mxu2 %v11497_v12  ;;  %6921 = vmatpush.bf16.msra.mxu0 %v10409_v27 }
 0x123   : > { %v13416_v26 = vld [vmem:[#allocation3 + $0x1788] sm:$0xf]  ;;  %v12905_v36 = vor.u32 %v15898_v25, %v12904_v24 }
 0x124   : > { %v16026_v28 = vld [vmem:[#allocation3 + $0x17c4] sm:$0xf0]  ;;  %6959 = vmatpush.bf16.msra.mxu3 %v12009_v16  ;;  %6934 = vmatpush.bf16.msra.mxu1 %v10921_v31 }
 0x125   : > { %v13928_v29 = vld [vmem:[#allocation3 + $0x1b88] sm:$0xf]  ;;  %v13417_v37 = vor.u32 %v16026_v28, %v13416_v26  ;;  %6922 = vmatmul.bf16.vlgmr.msra.gmra.mxu0 %v17022_v19  ;;  %v17058_v26 = vld [vmem:[#allocation5] sm:$0xff] }
 0x126   : > { %v16154_v30 = vld [vmem:[#allocation3 + $0x1bc4] sm:$0xf0]  ;;  %6947 = vmatpush.bf16.msra.mxu2 %v11433_v32  ;;  %6966 = vmatpush.bf16.msrb.mxu0 %v12905_v36 }
 0x127   : > { %v14440_v33 = vld [vmem:[#allocation3 + $0x1f88] sm:$0xf]  ;;  %v13929_v39 = vor.u32 %v16154_v30, %v13928_v29  ;;  %6935 = vmatmul.bf16.vlgmr.msra.gmra.mxu1 %v17026_v22 }
 0x128   : > { %v16282_v34 = vld [vmem:[#allocation3 + $0x1fc4] sm:$0xf0]  ;;  %6960 = vmatpush.bf16.msra.mxu3 %v11945_v35  ;;  %6979 = vmatpush.bf16.msrb.mxu1 %v13417_v37  ;;  %v1526_v35 = vperm.slane %v17058_v26, 0 }
 0x129   : > { %v12840_v40 = vld [vmem:[#allocation3 + $0x1308] sm:$0xf]  ;;  %v14441_v46 = vor.u32 %v16282_v34, %v14440_v33  ;;  %6948 = vmatmul.bf16.vlgmr.msra.gmra.mxu2 %v17020_v18 }
 0x12a   : > { %v15882_v43 = vld [vmem:[#allocation3 + $0x1344] sm:$0xf0]  ;;  %6992 = vmatpush.bf16.msrb.mxu2 %v13929_v39 }
 0x12b   : > { %v13352_v45 = vld [vmem:[#allocation3 + $0x1708] sm:$0xf]  ;;  %v12841_v52 = vor.u32 %v15882_v43, %v12840_v40  ;;  %6961 = vmatmul.bf16.vlgmr.msra.gmra.mxu3 %v17024_v20 }
 0x12c   : > { %v16010_v47 = vld [vmem:[#allocation3 + $0x1744] sm:$0xf0]  ;;  %7005 = vmatpush.bf16.msrb.mxu3 %v14441_v46 }
 0x12d   : > { %v13864_v48 = vld [vmem:[#allocation3 + $0x1b08] sm:$0xf]  ;;  %v13353_v53 = vor.u32 %v16010_v47, %v13352_v45  ;;  %6967 = vmatpush.bf16.msrb.mxu0 %v12841_v52  ;;  %v6715_v47 = vpop.f32.mrf.mxu0 }
 0x12e   : > { %v16138_v49 = vld [vmem:[#allocation3 + $0x1b44] sm:$0xf0] }
 0x12f   : > { %v14376_v50 = vld [vmem:[#allocation3 + $0x1f08] sm:$0xf]  ;;  %v13865_v54 = vor.u32 %v16138_v49, %v13864_v48  ;;  %6980 = vmatpush.bf16.msrb.mxu1 %v13353_v53  ;;  %v6716_v53 = vadd.f32 %v6715_v47, %v1526_v35  ;;  %v15746_v47 = vld [vmem:[#allocation3 + $0xf0c] sm:$0xf] }
 0x130   : > { %v16266_v51 = vld [vmem:[#allocation3 + $0x1f44] sm:$0xf0] }
 0x131   : > { %v12776_v55 = vld [vmem:[#allocation3 + $0x1288] sm:$0xf]  ;;  %v14377_v58 = vor.u32 %v16266_v51, %v14376_v50  ;;  %6993 = vmatpush.bf16.msrb.mxu2 %v13865_v54  ;;  %v6728_v54 = vpop.f32.mrf.mxu1 }
 0x132   : > { %v15866_v56 = vld [vmem:[#allocation3 + $0x12c4] sm:$0xf0] }
 0x133   : > { %v13288_v57 = vld [vmem:[#allocation3 + $0x1688] sm:$0xf]  ;;  %v12777_v0 = vor.u32 %v15866_v56, %v12776_v55  ;;  %7006 = vmatpush.bf16.msrb.mxu3 %v14377_v58 }
 0x134   : > { %v15994_v59 = vld [vmem:[#allocation3 + $0x16c4] sm:$0xf0] }
 0x135   : > { %v13800_v60 = vld [vmem:[#allocation3 + $0x1a88] sm:$0xf]  ;;  %v13289_v1 = vor.u32 %v15994_v59, %v13288_v57  ;;  %6968 = vmatpush.bf16.msrb.mxu0 %v12777_v0 }
 0x136   : > { %v16122_v61 = vld [vmem:[#allocation3 + $0x1ac4] sm:$0xf0] }
 0x137   : > { %v14312_v62 = vld [vmem:[#allocation3 + $0x1e88] sm:$0xf]  ;;  %v13801_v2 = vor.u32 %v16122_v61, %v13800_v60  ;;  %6981 = vmatpush.bf16.msrb.mxu1 %v13289_v1  ;;  %v6729_v61 = vadd.f32 %v6728_v54, %v6716_v53  ;;  %v15346_v54 = vld [vmem:[#allocation3 + $0x28c] sm:$0xf] }
 0x138   : > { %v16250_v63 = vld [vmem:[#allocation3 + $0x1ec4] sm:$0xf0] }
 0x139   : > { %v12712_v3 = vld [vmem:[#allocation3 + $0x1208] sm:$0xf]  ;;  %v14313_v6 = vor.u32 %v16250_v63, %v14312_v62  ;;  %6994 = vmatpush.bf16.msrb.mxu2 %v13801_v2 }
 0x13a   : > { %v15850_v4 = vld [vmem:[#allocation3 + $0x1244] sm:$0xf0] }
 0x13b   : > { %v13224_v5 = vld [vmem:[#allocation3 + $0x1608] sm:$0xf]  ;;  %v12713_v12 = vor.u32 %v15850_v4, %v12712_v3  ;;  %7007 = vmatpush.bf16.msrb.mxu3 %v14313_v6  ;;  %v6741_v6 = vpop.f32.mrf.mxu2 }
 0x13c   : > { %v15978_v7 = vld [vmem:[#allocation3 + $0x1644] sm:$0xf0] }
 0x13d   : > { %v13736_v8 = vld [vmem:[#allocation3 + $0x1a08] sm:$0xf]  ;;  %v13225_v14 = vor.u32 %v15978_v7, %v13224_v5  ;;  %6969 = vmatpush.bf16.msrb.mxu0 %v12713_v12  ;;  %v6754_v12 = vpop.f32.mrf.mxu3 }
 0x13e   : > { %v16106_v9 = vld [vmem:[#allocation3 + $0x1a44] sm:$0xf0] }
 0x13f   : > { %v14248_v10 = vld [vmem:[#allocation3 + $0x1e08] sm:$0xf]  ;;  %v13737_v15 = vor.u32 %v16106_v9, %v13736_v8  ;;  %6982 = vmatpush.bf16.msrb.mxu1 %v13225_v14  ;;  %v10858_v14 = vld [vmem:[#allocation3 + $0x3c8] sm:$0xf0] }
 0x140   : > { %v16234_v11 = vld [vmem:[#allocation3 + $0x1e44] sm:$0xf0] }
 0x141   : > { %v12648_v13 = vld [vmem:[#allocation3 + $0x1188] sm:$0xf]  ;;  %v14249_v23 = vor.u32 %v16234_v11, %v14248_v10  ;;  %6995 = vmatpush.bf16.msrb.mxu2 %v13737_v15  ;;  %v6742_v11 = vadd.f32 %v6741_v6, %v6729_v61  ;;  %v15506_v15 = vld [vmem:[#allocation3 + $0x78c] sm:$0xf] }
 0x142   : > { %v15834_v16 = vld [vmem:[#allocation3 + $0x11c4] sm:$0xf0]  ;;  %v15730_v61 = vld [vmem:[#allocation3 + $0xe8c] sm:$0xf] }
 0x143   : > { %v13160_v17 = vld [vmem:[#allocation3 + $0x1588] sm:$0xf]  ;;  %v12649_v29 = vor.u32 %v15834_v16, %v12648_v13  ;;  %7008 = vmatpush.bf16.msrb.mxu3 %v14249_v23  ;;  %v15378_v13 = vld [vmem:[#allocation3 + $0x38c] sm:$0xf] }
 0x144   : > { %v15962_v21 = vld [vmem:[#allocation3 + $0x15c4] sm:$0xf0]  ;;  %v11882_v23 = vld [vmem:[#allocation3 + $0xbc8] sm:$0xf0] }
 0x145   : > { %v13672_v24 = vld [vmem:[#allocation3 + $0x1988] sm:$0xf]  ;;  %v13161_v31 = vor.u32 %v15962_v21, %v13160_v17  ;;  %6970 = vmatpush.bf16.msrb.mxu0 %v12649_v29  ;;  %v11370_v17 = vld [vmem:[#allocation3 + $0x7c8] sm:$0xf0] }
 0x146   : > { %v16090_v25 = vld [vmem:[#allocation3 + $0x19c4] sm:$0xf0]  ;;  %v15634_v21 = vld [vmem:[#allocation3 + $0xb8c] sm:$0xf] }
 0x147   : > { %v14184_v27 = vld [vmem:[#allocation3 + $0x1d88] sm:$0xf]  ;;  %v13673_v32 = vor.u32 %v16090_v25, %v13672_v24  ;;  %6983 = vmatpush.bf16.msrb.mxu1 %v13161_v31  ;;  %v17061_v24 = vadd.f32 %v6754_v12, %v6742_v11  ;;  %v6717_v25 = vpop.f32.mrf.mxu0  ;;  %v15762_v29 = vld [vmem:[#allocation3 + $0xf8c] sm:$0xf]  ;;  %v6730_v31 = vpop.f32.mrf.mxu1  ;;  %v11885_v35 = vor.u32 %v15634_v21, %v11882_v23 }
 0x148   : > { %v16218_v28 = vld [vmem:[#allocation3 + $0x1dc4] sm:$0xf0]  ;;  %v11178_v6 = vld [vmem:[#allocation3 + $0x648] sm:$0xf0] }
 0x149   : > { %v12584_v30 = vld [vmem:[#allocation3 + $0x1108] sm:$0xf]  ;;  %v14185_v36 = vor.u32 %v16218_v28, %v14184_v27  ;;  %6996 = vmatpush.bf16.msrb.mxu2 %v13673_v32  ;;  %v12138_v31 = vld [vmem:[#allocation3 + $0xdc8] sm:$0xf0] }
 0x14a   : > { %v15818_v33 = vld [vmem:[#allocation3 + $0x1144] sm:$0xf0] }
 0x14b   : > { %v13096_v34 = vld [vmem:[#allocation3 + $0x1508] sm:$0xf]  ;;  %v12585_v46 = vor.u32 %v15818_v33, %v12584_v30  ;;  %7009 = vmatpush.bf16.msrb.mxu3 %v14185_v36  ;;  %v12394_v30 = vld [vmem:[#allocation3 + $0xfc8] sm:$0xf0]  ;;  %v10861_v33 = vor.u32 %v15378_v13, %v10858_v14 }
 0x14c   : > { %v15946_v37 = vld [vmem:[#allocation3 + $0x1544] sm:$0xf0]  ;;  %v15362_v36 = vld [vmem:[#allocation3 + $0x30c] sm:$0xf] }
 0x14d   : > { %v13608_v39 = vld [vmem:[#allocation3 + $0x1908] sm:$0xf]  ;;  %v13097_v48 = vor.u32 %v15946_v37, %v13096_v34  ;;  %6971 = vmatpush.bf16.msrb.mxu0 %v12585_v46  ;;  %v11373_v34 = vor.u32 %v15506_v15, %v11370_v17  ;;  %v10794_v37 = vld [vmem:[#allocation3 + $0x348] sm:$0xf0] }
 0x14e   : > { %v16074_v40 = vld [vmem:[#allocation3 + $0x1944] sm:$0xf0]  ;;  %v11818_v46 = vld [vmem:[#allocation3 + $0xb48] sm:$0xf0] }
 0x14f   : > { %v14120_v43 = vld [vmem:[#allocation3 + $0x1d08] sm:$0xf]  ;;  %v13609_v49 = vor.u32 %v16074_v40, %v13608_v39  ;;  %6984 = vmatpush.bf16.msrb.mxu1 %v13097_v48  ;;  %v15490_v39 = vld [vmem:[#allocation3 + $0x70c] sm:$0xf]  ;;  %v12397_v40 = vor.u32 %v15762_v29, %v12394_v30  ;;  %v6767_v12 = vpop.f32.mrf.mxu0  ;;  %v6780_v23 = vpop.f32.mrf.mxu1 }
 0x150   : > { %v16202_v45 = vld [vmem:[#allocation3 + $0x1d44] sm:$0xf0]  ;;  %v12330_v48 = vld [vmem:[#allocation3 + $0xf48] sm:$0xf0]  ;;  %v6768_v21 = vadd.f32 %v6767_v12, %v17061_v24 }
 0x151   : > { %v12520_v50 = vld [vmem:[#allocation3 + $0x1088] sm:$0xf]  ;;  %v14121_v55 = vor.u32 %v16202_v45, %v14120_v43  ;;  %6997 = vmatpush.bf16.msrb.mxu2 %v13609_v49  ;;  %v11306_v43 = vld [vmem:[#allocation3 + $0x748] sm:$0xf0]  ;;  %v6743_v49 = vpop.f32.mrf.mxu2 }
 0x152   : > { %v15802_v51 = vld [vmem:[#allocation3 + $0x10c4] sm:$0xf0]  ;;  %v15618_v45 = vld [vmem:[#allocation3 + $0xb0c] sm:$0xf] }
 0x153   : > { %v13032_v52 = vld [vmem:[#allocation3 + $0x1488] sm:$0xf]  ;;  %v12521_v62 = vor.u32 %v15802_v51, %v12520_v50  ;;  %7010 = vmatpush.bf16.msrb.mxu3 %v14121_v55  ;;  %v10797_v50 = vor.u32 %v15362_v36, %v10794_v37  ;;  %v6756_v51 = vpop.f32.mrf.mxu3  ;;  %v11821_v53 = vor.u32 %v15618_v45, %v11818_v46  ;;  %v10730_v55 = vld [vmem:[#allocation3 + $0x2c8] sm:$0xf0] }
 0x154   : > { %v15930_v56 = vld [vmem:[#allocation3 + $0x14c4] sm:$0xf0]  ;;  %v15314_v15 = vld [vmem:[#allocation3 + $0x18c] sm:$0xf] }
 0x155   : > { %v13544_v57 = vld [vmem:[#allocation3 + $0x1888] sm:$0xf]  ;;  %v13033_v1 = vor.u32 %v15930_v56, %v13032_v52  ;;  %6972 = vmatpush.bf16.msrb.mxu0 %v12521_v62  ;;  %v11309_v52 = vor.u32 %v15490_v39, %v11306_v43  ;;  %v15474_v56 = vld [vmem:[#allocation3 + $0x68c] sm:$0xf] }
 0x156   : > { %v16058_v58 = vld [vmem:[#allocation3 + $0x18c4] sm:$0xf0]  ;;  %v12266_v62 = vld [vmem:[#allocation3 + $0xec8] sm:$0xf0] }
 0x157   : > { %v14056_v59 = vld [vmem:[#allocation3 + $0x1c88] sm:$0xf]  ;;  %v13545_v2 = vor.u32 %v16058_v58, %v13544_v57  ;;  %6985 = vmatpush.bf16.msrb.mxu1 %v13033_v1  ;;  %v12333_v57 = vor.u32 %v15746_v47, %v12330_v48  ;;  %v11242_v58 = vld [vmem:[#allocation3 + $0x6c8] sm:$0xf0] }
 0x158   : > { %v16186_v60 = vld [vmem:[#allocation3 + $0x1cc4] sm:$0xf0]  ;;  %v15442_v17 = vld [vmem:[#allocation3 + $0x58c] sm:$0xf] }
 0x159   : > { %v12456_v63 = vld [vmem:[#allocation3 + $0x1008] sm:$0xf]  ;;  %v14057_v7 = vor.u32 %v16186_v60, %v14056_v59  ;;  %6998 = vmatpush.bf16.msrb.mxu2 %v13545_v2  ;;  %v15602_v59 = vld [vmem:[#allocation3 + $0xa8c] sm:$0xf] }
 0x15a   : > { %v15786_v0 = vld [vmem:[#allocation3 + $0x1044] sm:$0xf0]  ;;  %v11754_v60 = vld [vmem:[#allocation3 + $0xac8] sm:$0xf0] }
 0x15b   : > { %v12968_v3 = vld [vmem:[#allocation3 + $0x1408] sm:$0xf]  ;;  %v12457_v16 = vor.u32 %v15786_v0, %v12456_v63  ;;  %7011 = vmatpush.bf16.msrb.mxu3 %v14057_v7  ;;  %v10733_v63 = vor.u32 %v15346_v54, %v10730_v55  ;;  %v11245_v0 = vor.u32 %v15474_v56, %v11242_v58  ;;  %v11757_v1 = vor.u32 %v15602_v59, %v11754_v60  ;;  %v15330_v2 = vld [vmem:[#allocation3 + $0x20c] sm:$0xf]  ;;  %v6806_v48 = vpop.f32.mrf.mxu3  ;;  %v6782_v59 = vpop.f32.mrf.mxu1 }
 0x15c   : > { %v15914_v4 = vld [vmem:[#allocation3 + $0x1444] sm:$0xf0]  ;;  %v15586_v7 = vld [vmem:[#allocation3 + $0xa0c] sm:$0xf] }
 0x15d   : > { %v13480_v5 = vld [vmem:[#allocation3 + $0x1808] sm:$0xf]  ;;  %v12969_v27 = vor.u32 %v15914_v4, %v12968_v3  ;;  %6973 = vmatpush.bf16.msrb.mxu0 %v12457_v16  ;;  %v10666_v3 = vld [vmem:[#allocation3 + $0x248] sm:$0xf0] }
 0x15e   : > { %v16042_v8 = vld [vmem:[#allocation3 + $0x1844] sm:$0xf0]  ;;  %v15458_v4 = vld [vmem:[#allocation3 + $0x60c] sm:$0xf]  ;;  %v10669_v11 = vor.u32 %v15330_v2, %v10666_v3 }
 0x15f   : > { %v13992_v9 = vld [vmem:[#allocation3 + $0x1c08] sm:$0xf]  ;;  %v13481_v28 = vor.u32 %v16042_v8, %v13480_v5  ;;  %6986 = vmatpush.bf16.msrb.mxu1 %v12969_v27  ;;  %v12269_v5 = vor.u32 %v15730_v61, %v12266_v62  ;;  %v11690_v8 = vld [vmem:[#allocation3 + $0xa48] sm:$0xf0]  ;;  %v11181_v13 = vor.u32 %v15458_v4, %v11178_v6 }
 0x160   : > { %v16170_v10 = vld [vmem:[#allocation3 + $0x1c44] sm:$0xf0]  ;;  %6974 = vmatmul.bf16.vlgmr.msrb.gmra.mxu0 %v17036_v41  ;;  %v11693_v14 = vor.u32 %v15586_v7, %v11690_v8  ;;  %v10602_v16 = vld [vmem:[#allocation3 + $0x1c8] sm:$0xf0] }
 0x161   : > { %v13993_v32 = vor.u32 %v16170_v10, %v13992_v9  ;;  %6999 = vmatpush.bf16.msrb.mxu2 %v13481_v28  ;;  %7018 = vmatpush.bf16.msra.mxu0 %v10861_v33  ;;  %v15714_v9 = vld [vmem:[#allocation3 + $0xe0c] sm:$0xf]  ;;  %v10605_v33 = vor.u32 %v15314_v15, %v10602_v16 }
 0x162   : > { %6987 = vmatmul.bf16.vlgmr.msrb.gmra.mxu1 %v17040_v44  ;;  %v12202_v10 = vld [vmem:[#allocation3 + $0xe48] sm:$0xf0] }
 0x163   : > { %7012 = vmatpush.bf16.msrb.mxu3 %v13993_v32  ;;  %7031 = vmatpush.bf16.msra.mxu1 %v11373_v34  ;;  %v12205_v25 = vor.u32 %v15714_v9, %v12202_v10  ;;  %v11114_v27 = vld [vmem:[#allocation3 + $0x5c8] sm:$0xf0]  ;;  %v6781_v32 = vadd.f32 %v6780_v23, %v6768_v21  ;;  %v6808_v15 = vpop.f32.mrf.mxu3 }
 0x164   : > { %7000 = vmatmul.bf16.vlgmr.msrb.gmra.mxu2 %v17034_v38  ;;  %v15570_v28 = vld [vmem:[#allocation3 + $0x98c] sm:$0xf]  ;;  %v11117_v34 = vor.u32 %v15442_v17, %v11114_v27 }
 0x165   : > { %7044 = vmatpush.bf16.msra.mxu2 %v11885_v35  ;;  %7019 = vmatpush.bf16.msra.mxu0 %v10797_v50  ;;  %v11626_v29 = vld [vmem:[#allocation3 + $0x9c8] sm:$0xf0] }
 0x166   : > { %7013 = vmatmul.bf16.vlgmr.msrb.gmra.mxu3 %v17038_v42  ;;  %v15698_v30 = vld [vmem:[#allocation3 + $0xd8c] sm:$0xf]  ;;  %v11629_v35 = vor.u32 %v15570_v28, %v11626_v29 }
 0x167   : > { %7057 = vmatpush.bf16.msra.mxu3 %v12397_v40  ;;  %7032 = vmatpush.bf16.msra.mxu1 %v11309_v52  ;;  %v15298_v36 = vld [vmem:[#allocation3 + $0x10c] sm:$0xf]  ;;  %v6793_v40 = vpop.f32.mrf.mxu2  ;;  %v12141_v24 = vor.u32 %v15698_v30, %v12138_v31 }
 0x168   : > { %v10538_v37 = vld [vmem:[#allocation3 + $0x148] sm:$0xf0]  ;;  %v6794_v47 = vadd.f32 %v6793_v40, %v6781_v32 }
 0x169   : > { %7045 = vmatpush.bf16.msra.mxu2 %v11821_v53  ;;  %7020 = vmatpush.bf16.msra.mxu0 %v10733_v63  ;;  %v15426_v39 = vld [vmem:[#allocation3 + $0x50c] sm:$0xf]  ;;  %v10541_v51 = vor.u32 %v15298_v36, %v10538_v37  ;;  %v6769_v53 = vpop.f32.mrf.mxu0 }
 0x16a   : > { %v11050_v43 = vld [vmem:[#allocation3 + $0x548] sm:$0xf0]  ;;  %v17068_v52 = vadd.f32 %v6806_v48, %v6794_v47 }
 0x16b   : > { %7058 = vmatpush.bf16.msra.mxu3 %v12333_v57  ;;  %7033 = vmatpush.bf16.msra.mxu1 %v11245_v0  ;;  %v15554_v45 = vld [vmem:[#allocation3 + $0x90c] sm:$0xf]  ;;  %v11053_v54 = vor.u32 %v15426_v39, %v11050_v43 }
 0x16c   : > { %v11562_v46 = vld [vmem:[#allocation3 + $0x948] sm:$0xf0] }
 0x16d   : > { %7046 = vmatpush.bf16.msra.mxu2 %v11757_v1  ;;  %7021 = vmatpush.bf16.msra.mxu0 %v10669_v11  ;;  %v15682_v49 = vld [vmem:[#allocation3 + $0xd0c] sm:$0xf]  ;;  %v11565_v55 = vor.u32 %v15554_v45, %v11562_v46 }
 0x16e   : > { %v12074_v50 = vld [vmem:[#allocation3 + $0xd48] sm:$0xf0] }
 0x16f   : > { %7059 = vmatpush.bf16.msra.mxu3 %v12269_v5  ;;  %7034 = vmatpush.bf16.msra.mxu1 %v11181_v13  ;;  %v15282_v56 = vld [vmem:[#allocation3 + $0x8c] sm:$0xf]  ;;  %v12077_v60 = vor.u32 %v15682_v49, %v12074_v50  ;;  %v6795_v10 = vpop.f32.mrf.mxu2 }
 0x170   : > { %v10474_v57 = vld [vmem:[#allocation3 + $0xc8] sm:$0xf0] }
 0x171   : > { %7047 = vmatpush.bf16.msra.mxu2 %v11693_v14  ;;  %7022 = vmatpush.bf16.msra.mxu0 %v10605_v33  ;;  %v15410_v58 = vld [vmem:[#allocation3 + $0x48c] sm:$0xf]  ;;  %v10477_v2 = vor.u32 %v15282_v56, %v10474_v57 }
 0x172   : > { %v10986_v61 = vld [vmem:[#allocation3 + $0x4c8] sm:$0xf0] }
 0x173   : > { %7060 = vmatpush.bf16.msra.mxu3 %v12205_v25  ;;  %7035 = vmatpush.bf16.msra.mxu1 %v11117_v34  ;;  %v15538_v62 = vld [vmem:[#allocation3 + $0x88c] sm:$0xf]  ;;  %v10989_v5 = vor.u32 %v15410_v58, %v10986_v61 }
 0x174   : > { %v11498_v63 = vld [vmem:[#allocation3 + $0x8c8] sm:$0xf0] }
 0x175   : > { %7048 = vmatpush.bf16.msra.mxu2 %v11629_v35  ;;  %v15666_v0 = vld [vmem:[#allocation3 + $0xc8c] sm:$0xf]  ;;  %7023 = vmatpush.bf16.msra.mxu0 %v10541_v51  ;;  %v11501_v6 = vor.u32 %v15538_v62, %v11498_v63 }
 0x176   : > { %v12010_v1 = vld [vmem:[#allocation3 + $0xcc8] sm:$0xf0] }
 0x177   : > { %7061 = vmatpush.bf16.msra.mxu3 %v12141_v24  ;;  %v15266_v3 = vld [vmem:[#allocation3 + $0xc] sm:$0xf]  ;;  %7036 = vmatpush.bf16.msra.mxu1 %v11053_v54  ;;  %v12013_v11 = vor.u32 %v15666_v0, %v12010_v1 }
 0x178   : > { %v10410_v4 = vld [vmem:[#allocation3 + $0x48] sm:$0xf0] }
 0x179   : > { %7049 = vmatpush.bf16.msra.mxu2 %v11565_v55  ;;  %v15394_v7 = vld [vmem:[#allocation3 + $0x40c] sm:$0xf]  ;;  %7024 = vmatpush.bf16.msra.mxu0 %v10477_v2  ;;  %v10413_v23 = vor.u32 %v15266_v3, %v10410_v4  ;;  %v1527_v4 = vperm.slane %v17058_v26, 1 }
 0x17a   : > { %v10922_v8 = vld [vmem:[#allocation3 + $0x448] sm:$0xf0] }
 0x17b   : > { %v15522_v9 = vld [vmem:[#allocation3 + $0x80c] sm:$0xf]  ;;  %7062 = vmatpush.bf16.msra.mxu3 %v12077_v60  ;;  %7037 = vmatpush.bf16.msra.mxu1 %v10989_v5  ;;  %v10925_v29 = vor.u32 %v15394_v7, %v10922_v8 }
 0x17c   : > { %v11434_v12 = vld [vmem:[#allocation3 + $0x848] sm:$0xf0] }
 0x17d   : > { %v15650_v13 = vld [vmem:[#allocation3 + $0xc0c] sm:$0xf]  ;;  %7050 = vmatpush.bf16.msra.mxu2 %v11501_v6  ;;  %v11437_v30 = vor.u32 %v15522_v9, %v11434_v12  ;;  %7025 = vmatpush.bf16.msra.mxu0 %v10413_v23  ;;  %v6819_v12 = vpop.f32.mrf.mxu0  ;;  %v6832_v23 = vpop.f32.mrf.mxu1 }
 0x17e   : > { %v11946_v14 = vld [vmem:[#allocation3 + $0xc48] sm:$0xf0] }
 0x17f   : > { %v15890_v16 = vld [vmem:[#allocation3 + $0x138c] sm:$0xf]  ;;  %7063 = vmatpush.bf16.msra.mxu3 %v12013_v11  ;;  %v11949_v33 = vor.u32 %v15650_v13, %v11946_v14  ;;  %7038 = vmatpush.bf16.msra.mxu1 %v10925_v29 }
 0x180   : > { %v12906_v17 = vld [vmem:[#allocation3 + $0x13c8] sm:$0xf0]  ;;  %7026 = vmatmul.bf16.vlgmr.msra.gmra.mxu0 %v17022_v19 }
 0x181   : > { %v16018_v21 = vld [vmem:[#allocation3 + $0x178c] sm:$0xf]  ;;  %v12909_v34 = vor.u32 %v15890_v16, %v12906_v17  ;;  %7051 = vmatpush.bf16.msra.mxu2 %v11437_v30 }
 0x182   : > { %v13418_v25 = vld [vmem:[#allocation3 + $0x17c8] sm:$0xf0]  ;;  %7039 = vmatmul.bf16.vlgmr.msra.gmra.mxu1 %v17026_v22 }
 0x183   : > { %v16146_v27 = vld [vmem:[#allocation3 + $0x1b8c] sm:$0xf]  ;;  %v13421_v35 = vor.u32 %v16018_v21, %v13418_v25  ;;  %7064 = vmatpush.bf16.msra.mxu3 %v11949_v33  ;;  %7070 = vmatpush.bf16.msrb.mxu0 %v12909_v34  ;;  %v6820_v21 = vadd.f32 %v6819_v12, %v1527_v4 }
 0x184   : > { %v13930_v28 = vld [vmem:[#allocation3 + $0x1bc8] sm:$0xf0]  ;;  %7052 = vmatmul.bf16.vlgmr.msra.gmra.mxu2 %v17020_v18 }
 0x185   : > { %v16274_v31 = vld [vmem:[#allocation3 + $0x1f8c] sm:$0xf]  ;;  %v13933_v36 = vor.u32 %v16146_v27, %v13930_v28  ;;  %7083 = vmatpush.bf16.msrb.mxu1 %v13421_v35 }
 0x186   : > { %v14442_v32 = vld [vmem:[#allocation3 + $0x1fc8] sm:$0xf0]  ;;  %7065 = vmatmul.bf16.vlgmr.msra.gmra.mxu3 %v17024_v20 }
 0x187   : > { %v15874_v37 = vld [vmem:[#allocation3 + $0x130c] sm:$0xf]  ;;  %v14445_v24 = vor.u32 %v16274_v31, %v14442_v32  ;;  %7096 = vmatpush.bf16.msrb.mxu2 %v13933_v36  ;;  %v6833_v31 = vadd.f32 %v6832_v23, %v6820_v21  ;;  %v11376_v21 = vld [vmem:[#allocation3 + $0x790] sm:$0xf] }
 0x188   : > { %v12842_v39 = vld [vmem:[#allocation3 + $0x1348] sm:$0xf0] }
 0x189   : > { %v16002_v40 = vld [vmem:[#allocation3 + $0x170c] sm:$0xf]  ;;  %v12845_v49 = vor.u32 %v15874_v37, %v12842_v39  ;;  %7109 = vmatpush.bf16.msrb.mxu3 %v14445_v24  ;;  %v6845_v39 = vpop.f32.mrf.mxu2 }
 0x18a   : > { %v13354_v43 = vld [vmem:[#allocation3 + $0x1748] sm:$0xf0] }
 0x18b   : > { %v16130_v45 = vld [vmem:[#allocation3 + $0x1b0c] sm:$0xf]  ;;  %v13357_v50 = vor.u32 %v16002_v40, %v13354_v43  ;;  %7071 = vmatpush.bf16.msrb.mxu0 %v12845_v49 }
 0x18c   : > { %v13866_v46 = vld [vmem:[#allocation3 + $0x1b48] sm:$0xf0] }
 0x18d   : > { %v16258_v47 = vld [vmem:[#allocation3 + $0x1f0c] sm:$0xf]  ;;  %v13869_v51 = vor.u32 %v16130_v45, %v13866_v46  ;;  %7084 = vmatpush.bf16.msrb.mxu1 %v13357_v50  ;;  %v6846_v46 = vadd.f32 %v6845_v39, %v6833_v31  ;;  %v15771_v31 = vld [vmem:[#allocation3 + $0xfcc] sm:$0xf0] }
 0x18e   : > { %v14378_v48 = vld [vmem:[#allocation3 + $0x1f48] sm:$0xf0]  ;;  %v11312_v39 = vld [vmem:[#allocation3 + $0x710] sm:$0xf] }
 0x18f   : > { %v15858_v53 = vld [vmem:[#allocation3 + $0x128c] sm:$0xf]  ;;  %v14381_v56 = vor.u32 %v16258_v47, %v14378_v48  ;;  %7097 = vmatpush.bf16.msrb.mxu2 %v13869_v51  ;;  %v6858_v47 = vpop.f32.mrf.mxu3 }
 0x190   : > { %v12778_v54 = vld [vmem:[#allocation3 + $0x12c8] sm:$0xf0]  ;;  %v17075_v51 = vadd.f32 %v6858_v47, %v6846_v46  ;;  %v12336_v46 = vld [vmem:[#allocation3 + $0xf10] sm:$0xf] }
 0x191   : > { %v15986_v55 = vld [vmem:[#allocation3 + $0x168c] sm:$0xf]  ;;  %v12781_v62 = vor.u32 %v15858_v53, %v12778_v54  ;;  %7110 = vmatpush.bf16.msrb.mxu3 %v14381_v56  ;;  %v6821_v53 = vpop.f32.mrf.mxu0  ;;  %v15755_v47 = vld [vmem:[#allocation3 + $0xf4c] sm:$0xf0] }
 0x192   : > { %v13290_v57 = vld [vmem:[#allocation3 + $0x16c8] sm:$0xf0]  ;;  %v10736_v53 = vld [vmem:[#allocation3 + $0x290] sm:$0xf] }
 0x193   : > { %v16114_v58 = vld [vmem:[#allocation3 + $0x1a8c] sm:$0xf]  ;;  %v13293_v0 = vor.u32 %v15986_v55, %v13290_v57  ;;  %7072 = vmatpush.bf16.msrb.mxu0 %v12781_v62 }
 0x194   : > { %v13802_v59 = vld [vmem:[#allocation3 + $0x1ac8] sm:$0xf0] }
 0x195   : > { %v16242_v60 = vld [vmem:[#allocation3 + $0x1e8c] sm:$0xf]  ;;  %v13805_v1 = vor.u32 %v16114_v58, %v13802_v59  ;;  %7085 = vmatpush.bf16.msrb.mxu1 %v13293_v0  ;;  %v6834_v59 = vpop.f32.mrf.mxu1 }
 0x196   : > { %v14314_v61 = vld [vmem:[#allocation3 + $0x1ec8] sm:$0xf0]  ;;  %v15611_v59 = vld [vmem:[#allocation3 + $0xacc] sm:$0xf0] }
 0x197   : > { %v15842_v63 = vld [vmem:[#allocation3 + $0x120c] sm:$0xf]  ;;  %v14317_v5 = vor.u32 %v16242_v60, %v14314_v61  ;;  %7098 = vmatpush.bf16.msrb.mxu2 %v13805_v1 }
 0x198   : > { %v12714_v2 = vld [vmem:[#allocation3 + $0x1248] sm:$0xf0] }
 0x199   : > { %v15970_v3 = vld [vmem:[#allocation3 + $0x160c] sm:$0xf]  ;;  %v12717_v11 = vor.u32 %v15842_v63, %v12714_v2  ;;  %7111 = vmatpush.bf16.msrb.mxu3 %v14317_v5 }
 0x19a   : > { %v13226_v6 = vld [vmem:[#allocation3 + $0x1648] sm:$0xf0] }
 0x19b   : > { %v16098_v7 = vld [vmem:[#allocation3 + $0x1a0c] sm:$0xf]  ;;  %v13229_v13 = vor.u32 %v15970_v3, %v13226_v6  ;;  %7073 = vmatpush.bf16.msrb.mxu0 %v12717_v11 }
 0x19c   : > { %v13738_v8 = vld [vmem:[#allocation3 + $0x1a48] sm:$0xf0] }
 0x19d   : > { %v16226_v9 = vld [vmem:[#allocation3 + $0x1e0c] sm:$0xf]  ;;  %v13741_v14 = vor.u32 %v16098_v7, %v13738_v8  ;;  %7086 = vmatpush.bf16.msrb.mxu1 %v13229_v13 }
 0x19e   : > { %v14250_v10 = vld [vmem:[#allocation3 + $0x1e48] sm:$0xf0] }
 0x19f   : > { %v15826_v15 = vld [vmem:[#allocation3 + $0x118c] sm:$0xf]  ;;  %v14253_v26 = vor.u32 %v16226_v9, %v14250_v10  ;;  %7099 = vmatpush.bf16.msrb.mxu2 %v13741_v14  ;;  %v6847_v10 = vpop.f32.mrf.mxu2 }
 0x1a0   : > { %v12650_v16 = vld [vmem:[#allocation3 + $0x11c8] sm:$0xf0] }
 0x1a1   : > { %v15954_v17 = vld [vmem:[#allocation3 + $0x158c] sm:$0xf]  ;;  %v12653_v32 = vor.u32 %v15826_v15, %v12650_v16  ;;  %7112 = vmatpush.bf16.msrb.mxu3 %v14253_v26  ;;  %v6860_v15 = vpop.f32.mrf.mxu3  ;;  %v10864_v16 = vld [vmem:[#allocation3 + $0x390] sm:$0xf] }
 0x1a2   : > { %v13162_v25 = vld [vmem:[#allocation3 + $0x15c8] sm:$0xf0]  ;;  %v15515_v26 = vld [vmem:[#allocation3 + $0x7cc] sm:$0xf0] }
 0x1a3   : > { %v16082_v27 = vld [vmem:[#allocation3 + $0x198c] sm:$0xf]  ;;  %v13165_v33 = vor.u32 %v15954_v17, %v13162_v25  ;;  %7074 = vmatpush.bf16.msrb.mxu0 %v12653_v32  ;;  %v15387_v17 = vld [vmem:[#allocation3 + $0x3cc] sm:$0xf0] }
 0x1a4   : > { %v13674_v28 = vld [vmem:[#allocation3 + $0x19c8] sm:$0xf0]  ;;  %v11888_v25 = vld [vmem:[#allocation3 + $0xb90] sm:$0xf] }
 0x1a5   : > { %v16210_v29 = vld [vmem:[#allocation3 + $0x1d8c] sm:$0xf]  ;;  %v13677_v34 = vor.u32 %v16082_v27, %v13674_v28  ;;  %7087 = vmatpush.bf16.msrb.mxu1 %v13165_v33  ;;  %v15643_v27 = vld [vmem:[#allocation3 + $0xbcc] sm:$0xf0]  ;;  %v10865_v33 = vor.u32 %v15387_v17, %v10864_v16 }
 0x1a6   : > { %v14186_v30 = vld [vmem:[#allocation3 + $0x1dc8] sm:$0xf0]  ;;  %v15323_v15 = vld [vmem:[#allocation3 + $0x1cc] sm:$0xf0] }
 0x1a7   : > { %v15810_v35 = vld [vmem:[#allocation3 + $0x110c] sm:$0xf]  ;;  %v14189_v40 = vor.u32 %v16210_v29, %v14186_v30  ;;  %7100 = vmatpush.bf16.msrb.mxu2 %v13677_v34  ;;  %v12400_v30 = vld [vmem:[#allocation3 + $0xf90] sm:$0xf]  ;;  %v11377_v34 = vor.u32 %v15515_v26, %v11376_v21  ;;  %v6884_v21 = vpop.f32.mrf.mxu1 }
 0x1a8   : > { %v12586_v36 = vld [vmem:[#allocation3 + $0x1148] sm:$0xf0]  ;;  %v11120_v16 = vld [vmem:[#allocation3 + $0x590] sm:$0xf] }
 0x1a9   : > { %v15938_v37 = vld [vmem:[#allocation3 + $0x150c] sm:$0xf]  ;;  %v12589_v50 = vor.u32 %v15810_v35, %v12586_v36  ;;  %7113 = vmatpush.bf16.msrb.mxu3 %v14189_v40  ;;  %v11889_v35 = vor.u32 %v15643_v27, %v11888_v25  ;;  %v10800_v36 = vld [vmem:[#allocation3 + $0x310] sm:$0xf]  ;;  %v12401_v40 = vor.u32 %v15771_v31, %v12400_v30 }
 0x1aa   : > { %v13098_v24 = vld [vmem:[#allocation3 + $0x1548] sm:$0xf0]  ;;  %v15451_v26 = vld [vmem:[#allocation3 + $0x5cc] sm:$0xf0] }
 0x1ab   : > { %v16066_v43 = vld [vmem:[#allocation3 + $0x190c] sm:$0xf]  ;;  %v13101_v54 = vor.u32 %v15938_v37, %v13098_v24  ;;  %7075 = vmatpush.bf16.msrb.mxu0 %v12589_v50  ;;  %v15371_v37 = vld [vmem:[#allocation3 + $0x34c] sm:$0xf0] }
 0x1ac   : > { %v13610_v45 = vld [vmem:[#allocation3 + $0x1948] sm:$0xf0]  ;;  %v15499_v24 = vld [vmem:[#allocation3 + $0x74c] sm:$0xf0] }
 0x1ad   : > { %v16194_v48 = vld [vmem:[#allocation3 + $0x1d0c] sm:$0xf]  ;;  %v13613_v55 = vor.u32 %v16066_v43, %v13610_v45  ;;  %7088 = vmatpush.bf16.msrb.mxu1 %v13101_v54  ;;  %v11824_v43 = vld [vmem:[#allocation3 + $0xb10] sm:$0xf] }
 0x1ae   : > { %v14122_v49 = vld [vmem:[#allocation3 + $0x1d48] sm:$0xf0]  ;;  %v15627_v45 = vld [vmem:[#allocation3 + $0xb4c] sm:$0xf0] }
 0x1af   : > { %v15794_v56 = vld [vmem:[#allocation3 + $0x108c] sm:$0xf]  ;;  %v14125_v60 = vor.u32 %v16194_v48, %v14122_v49  ;;  %7101 = vmatpush.bf16.msrb.mxu2 %v13613_v55  ;;  %v10801_v48 = vor.u32 %v15371_v37, %v10800_v36  ;;  %v11313_v49 = vor.u32 %v15499_v24, %v11312_v39  ;;  %v11825_v50 = vor.u32 %v15627_v45, %v11824_v43  ;;  %v15355_v54 = vld [vmem:[#allocation3 + $0x2cc] sm:$0xf0]  ;;  %v6897_v37 = vpop.f32.mrf.mxu2  ;;  %v6910_v45 = vpop.f32.mrf.mxu3 }
 0x1b0   : > { %v12522_v57 = vld [vmem:[#allocation3 + $0x10c8] sm:$0xf0]  ;;  %v11248_v55 = vld [vmem:[#allocation3 + $0x690] sm:$0xf] }
 0x1b1   : > { %v15922_v58 = vld [vmem:[#allocation3 + $0x148c] sm:$0xf]  ;;  %v12525_v2 = vor.u32 %v15794_v56, %v12522_v57  ;;  %7114 = vmatpush.bf16.msrb.mxu3 %v14125_v60  ;;  %v12337_v56 = vor.u32 %v15755_v47, %v12336_v46  ;;  %v15483_v57 = vld [vmem:[#allocation3 + $0x6cc] sm:$0xf0] }
 0x1b2   : > { %v13034_v61 = vld [vmem:[#allocation3 + $0x14c8] sm:$0xf0]  ;;  %v12272_v60 = vld [vmem:[#allocation3 + $0xe90] sm:$0xf] }
 0x1b3   : > { %v16050_v62 = vld [vmem:[#allocation3 + $0x188c] sm:$0xf]  ;;  %v13037_v5 = vor.u32 %v15922_v58, %v13034_v61  ;;  %7076 = vmatpush.bf16.msrb.mxu0 %v12525_v2  ;;  %v11760_v58 = vld [vmem:[#allocation3 + $0xa90] sm:$0xf] }
 0x1b4   : > { %v13546_v63 = vld [vmem:[#allocation3 + $0x18c8] sm:$0xf0]  ;;  %v15739_v61 = vld [vmem:[#allocation3 + $0xecc] sm:$0xf0] }
 0x1b5   : > { %v16178_v0 = vld [vmem:[#allocation3 + $0x1c8c] sm:$0xf]  ;;  %v13549_v6 = vor.u32 %v16050_v62, %v13546_v63  ;;  %7089 = vmatpush.bf16.msrb.mxu1 %v13037_v5  ;;  %v10737_v62 = vor.u32 %v15355_v54, %v10736_v53  ;;  %v11249_v63 = vor.u32 %v15483_v57, %v11248_v55  ;;  %v15339_v2 = vld [vmem:[#allocation3 + $0x24c] sm:$0xf0] }
 0x1b6   : > { %v14058_v1 = vld [vmem:[#allocation3 + $0x1cc8] sm:$0xf0]  ;;  %v15467_v5 = vld [vmem:[#allocation3 + $0x64c] sm:$0xf0] }
 0x1b7   : > { %v15778_v3 = vld [vmem:[#allocation3 + $0x100c] sm:$0xf]  ;;  %v14061_v11 = vor.u32 %v16178_v0, %v14058_v1  ;;  %7102 = vmatpush.bf16.msrb.mxu2 %v13549_v6  ;;  %v11761_v0 = vor.u32 %v15611_v59, %v11760_v58  ;;  %v10672_v1 = vld [vmem:[#allocation3 + $0x210] sm:$0xf]  ;;  %v6886_v58 = vpop.f32.mrf.mxu1 }
 0x1b8   : > { %v12458_v4 = vld [vmem:[#allocation3 + $0x1048] sm:$0xf0]  ;;  %v11696_v6 = vld [vmem:[#allocation3 + $0xa10] sm:$0xf]  ;;  %v10673_v10 = vor.u32 %v15339_v2, %v10672_v1 }
 0x1b9   : > { %v15906_v7 = vld [vmem:[#allocation3 + $0x140c] sm:$0xf]  ;;  %v12461_v23 = vor.u32 %v15778_v3, %v12458_v4  ;;  %7115 = vmatpush.bf16.msrb.mxu3 %v14061_v11  ;;  %v11184_v3 = vld [vmem:[#allocation3 + $0x610] sm:$0xf]  ;;  %v12273_v4 = vor.u32 %v15739_v61, %v12272_v60  ;;  %v6871_v11 = vpop.f32.mrf.mxu0 }
 0x1ba   : > { %v12970_v8 = vld [vmem:[#allocation3 + $0x1448] sm:$0xf0]  ;;  %v6872_v17 = vadd.f32 %v6871_v11, %v17075_v51  ;;  %v11632_v25 = vld [vmem:[#allocation3 + $0x990] sm:$0xf] }
 0x1bb   : > { %v16034_v9 = vld [vmem:[#allocation3 + $0x180c] sm:$0xf]  ;;  %v12973_v28 = vor.u32 %v15906_v7, %v12970_v8  ;;  %7077 = vmatpush.bf16.msrb.mxu0 %v12461_v23  ;;  %v15595_v7 = vld [vmem:[#allocation3 + $0xa4c] sm:$0xf0] }
 0x1bc   : > { %v13482_v12 = vld [vmem:[#allocation3 + $0x1848] sm:$0xf0]  ;;  %v12208_v8 = vld [vmem:[#allocation3 + $0xe10] sm:$0xf]  ;;  %v6885_v30 = vadd.f32 %v6884_v21, %v6872_v17 }
 0x1bd   : > { %v16162_v13 = vld [vmem:[#allocation3 + $0x1c0c] sm:$0xf]  ;;  %v13485_v29 = vor.u32 %v16034_v9, %v13482_v12  ;;  %7090 = vmatpush.bf16.msrb.mxu1 %v12973_v28  ;;  %v15723_v9 = vld [vmem:[#allocation3 + $0xe4c] sm:$0xf0]  ;;  %v11185_v12 = vor.u32 %v15467_v5, %v11184_v3 }
 0x1be   : > { %v13994_v14 = vld [vmem:[#allocation3 + $0x1c48] sm:$0xf0]  ;;  %7078 = vmatmul.bf16.vlgmr.msrb.gmra.mxu0 %v17036_v41  ;;  %v12209_v23 = vor.u32 %v15723_v9, %v12208_v8  ;;  %v15579_v27 = vld [vmem:[#allocation3 + $0x9cc] sm:$0xf0]  ;;  %v6898_v43 = vadd.f32 %v6897_v37, %v6885_v30  ;;  %v6899_v9 = vpop.f32.mrf.mxu2 }
 0x1bf   : > { %v13997_v32 = vor.u32 %v16162_v13, %v13994_v14  ;;  %7103 = vmatpush.bf16.msrb.mxu2 %v13485_v29  ;;  %7122 = vmatpush.bf16.msra.mxu0 %v10865_v33  ;;  %v11697_v13 = vor.u32 %v15595_v7, %v11696_v6  ;;  %v10608_v14 = vld [vmem:[#allocation3 + $0x190] sm:$0xf]  ;;  %v11633_v33 = vor.u32 %v15579_v27, %v11632_v25 }
 0x1c0   : > { %7091 = vmatmul.bf16.vlgmr.msrb.gmra.mxu1 %v17040_v44  ;;  %v12144_v28 = vld [vmem:[#allocation3 + $0xd90] sm:$0xf]  ;;  %v10609_v31 = vor.u32 %v15323_v15, %v10608_v14  ;;  %v6912_v14 = vpop.f32.mrf.mxu3 }
 0x1c1   : > { %7116 = vmatpush.bf16.msrb.mxu3 %v13997_v32  ;;  %7135 = vmatpush.bf16.msra.mxu1 %v11377_v34  ;;  %v15707_v29 = vld [vmem:[#allocation3 + $0xdcc] sm:$0xf0]  ;;  %v11121_v32 = vor.u32 %v15451_v26, %v11120_v16 }
 0x1c2   : > { %7104 = vmatmul.bf16.vlgmr.msrb.gmra.mxu2 %v17034_v38  ;;  %v10544_v34 = vld [vmem:[#allocation3 + $0x110] sm:$0xf]  ;;  %v12145_v51 = vor.u32 %v15707_v29, %v12144_v28 }
 0x1c3   : > { %7148 = vmatpush.bf16.msra.mxu2 %v11889_v35  ;;  %7123 = vmatpush.bf16.msra.mxu0 %v10801_v48  ;;  %v15307_v35 = vld [vmem:[#allocation3 + $0x14c] sm:$0xf0] }
 0x1c4   : > { %7117 = vmatmul.bf16.vlgmr.msrb.gmra.mxu3 %v17038_v42  ;;  %v11056_v36 = vld [vmem:[#allocation3 + $0x510] sm:$0xf]  ;;  %v10545_v48 = vor.u32 %v15307_v35, %v10544_v34 }
 0x1c5   : > { %7161 = vmatpush.bf16.msra.mxu3 %v12401_v40  ;;  %7136 = vmatpush.bf16.msra.mxu1 %v11313_v49  ;;  %v15435_v39 = vld [vmem:[#allocation3 + $0x54c] sm:$0xf0]  ;;  %v17082_v49 = vadd.f32 %v6910_v45, %v6898_v43 }
 0x1c6   : > { %v11568_v40 = vld [vmem:[#allocation3 + $0x910] sm:$0xf]  ;;  %v11057_v53 = vor.u32 %v15435_v39, %v11056_v36 }
 0x1c7   : > { %7149 = vmatpush.bf16.msra.mxu2 %v11825_v50  ;;  %7124 = vmatpush.bf16.msra.mxu0 %v10737_v62  ;;  %v15563_v24 = vld [vmem:[#allocation3 + $0x94c] sm:$0xf0]  ;;  %v6873_v50 = vpop.f32.mrf.mxu0 }
 0x1c8   : > { %v12080_v46 = vld [vmem:[#allocation3 + $0xd10] sm:$0xf]  ;;  %v11569_v54 = vor.u32 %v15563_v24, %v11568_v40 }
 0x1c9   : > { %7162 = vmatpush.bf16.msra.mxu3 %v12337_v56  ;;  %7137 = vmatpush.bf16.msra.mxu1 %v11249_v63  ;;  %v15691_v47 = vld [vmem:[#allocation3 + $0xd4c] sm:$0xf0] }
 0x1ca   : > { %v10480_v55 = vld [vmem:[#allocation3 + $0x90] sm:$0xf]  ;;  %v12081_v59 = vor.u32 %v15691_v47, %v12080_v46 }
 0x1cb   : > { %7150 = vmatpush.bf16.msra.mxu2 %v11761_v0  ;;  %7125 = vmatpush.bf16.msra.mxu0 %v10673_v10  ;;  %v15291_v56 = vld [vmem:[#allocation3 + $0xcc] sm:$0xf0] }
 0x1cc   : > { %v10992_v57 = vld [vmem:[#allocation3 + $0x490] sm:$0xf]  ;;  %v10481_v1 = vor.u32 %v15291_v56, %v10480_v55 }
 0x1cd   : > { %7163 = vmatpush.bf16.msra.mxu3 %v12273_v4  ;;  %7138 = vmatpush.bf16.msra.mxu1 %v11185_v12  ;;  %v15419_v60 = vld [vmem:[#allocation3 + $0x4cc] sm:$0xf0] }
 0x1ce   : > { %v11504_v61 = vld [vmem:[#allocation3 + $0x890] sm:$0xf]  ;;  %v10993_v4 = vor.u32 %v15419_v60, %v10992_v57 }
 0x1cf   : > { %7151 = vmatpush.bf16.msra.mxu2 %v11697_v13  ;;  %7126 = vmatpush.bf16.msra.mxu0 %v10609_v31  ;;  %v15547_v62 = vld [vmem:[#allocation3 + $0x8cc] sm:$0xf0] }
 0x1d0   : > { %v12016_v63 = vld [vmem:[#allocation3 + $0xc90] sm:$0xf]  ;;  %v11505_v5 = vor.u32 %v15547_v62, %v11504_v61 }
 0x1d1   : > { %7164 = vmatpush.bf16.msra.mxu3 %v12209_v23  ;;  %7139 = vmatpush.bf16.msra.mxu1 %v11121_v32  ;;  %v15675_v0 = vld [vmem:[#allocation3 + $0xccc] sm:$0xf0] }
 0x1d2   : > { %v10416_v2 = vld [vmem:[#allocation3 + $0x10] sm:$0xf]  ;;  %v12017_v10 = vor.u32 %v15675_v0, %v12016_v63 }
 0x1d3   : > { %7152 = vmatpush.bf16.msra.mxu2 %v11633_v33  ;;  %7127 = vmatpush.bf16.msra.mxu0 %v10545_v48  ;;  %v15275_v3 = vld [vmem:[#allocation3 + $0x4c] sm:$0xf0] }
 0x1d4   : > { %v10928_v6 = vld [vmem:[#allocation3 + $0x410] sm:$0xf]  ;;  %v10417_v21 = vor.u32 %v15275_v3, %v10416_v2  ;;  %v17088_v3 = vld [vmem:[#allocation5] sm:$0xff] }
 0x1d5   : > { %7165 = vmatpush.bf16.msra.mxu3 %v12145_v51  ;;  %7140 = vmatpush.bf16.msra.mxu1 %v11057_v53  ;;  %v15403_v7 = vld [vmem:[#allocation3 + $0x44c] sm:$0xf0] }
 0x1d6   : > { %v11440_v8 = vld [vmem:[#allocation3 + $0x810] sm:$0xf]  ;;  %v10929_v27 = vor.u32 %v15403_v7, %v10928_v6 }
 0x1d7   : > { %7153 = vmatpush.bf16.msra.mxu2 %v11569_v54  ;;  %v15531_v11 = vld [vmem:[#allocation3 + $0x84c] sm:$0xf0]  ;;  %7128 = vmatpush.bf16.msra.mxu0 %v10481_v1 }
 0x1d8   : > { %v11952_v12 = vld [vmem:[#allocation3 + $0xc10] sm:$0xf]  ;;  %v11441_v28 = vor.u32 %v15531_v11, %v11440_v8 }
 0x1d9   : > { %7166 = vmatpush.bf16.msra.mxu3 %v12081_v59  ;;  %v15659_v13 = vld [vmem:[#allocation3 + $0xc4c] sm:$0xf0]  ;;  %7141 = vmatpush.bf16.msra.mxu1 %v10993_v4  ;;  %v1528_v4 = vperm.slane %v17088_v3, 2 }
 0x1da   : > { %v12912_v15 = vld [vmem:[#allocation3 + $0x1390] sm:$0xf]  ;;  %v11953_v31 = vor.u32 %v15659_v13, %v11952_v12  ;;  %v6923_v12 = vpop.f32.mrf.mxu0 }
 0x1db   : > { %v15899_v16 = vld [vmem:[#allocation3 + $0x13cc] sm:$0xf0]  ;;  %7154 = vmatpush.bf16.msra.mxu2 %v11505_v5  ;;  %7129 = vmatpush.bf16.msra.mxu0 %v10417_v21  ;;  %v6924_v21 = vadd.f32 %v6923_v12, %v1528_v4 }
 0x1dc   : > { %v13424_v17 = vld [vmem:[#allocation3 + $0x1790] sm:$0xf]  ;;  %v12913_v32 = vor.u32 %v15899_v16, %v12912_v15 }
 0x1dd   : > { %v16027_v23 = vld [vmem:[#allocation3 + $0x17cc] sm:$0xf0]  ;;  %7167 = vmatpush.bf16.msra.mxu3 %v12017_v10  ;;  %7142 = vmatpush.bf16.msra.mxu1 %v10929_v27 }
 0x1de   : > { %v13936_v26 = vld [vmem:[#allocation3 + $0x1b90] sm:$0xf]  ;;  %v13425_v33 = vor.u32 %v16027_v23, %v13424_v17  ;;  %7130 = vmatmul.bf16.vlgmr.msra.gmra.mxu0 %v17022_v19  ;;  %v6936_v23 = vpop.f32.mrf.mxu1 }
 0x1df   : > { %v16155_v25 = vld [vmem:[#allocation3 + $0x1bcc] sm:$0xf0]  ;;  %7155 = vmatpush.bf16.msra.mxu2 %v11441_v28  ;;  %7174 = vmatpush.bf16.msrb.mxu0 %v12913_v32 }
 0x1e0   : > { %v14448_v29 = vld [vmem:[#allocation3 + $0x1f90] sm:$0xf]  ;;  %v13937_v34 = vor.u32 %v16155_v25, %v13936_v26  ;;  %7143 = vmatmul.bf16.vlgmr.msra.gmra.mxu1 %v17026_v22 }
 0x1e1   : > { %v16283_v30 = vld [vmem:[#allocation3 + $0x1fcc] sm:$0xf0]  ;;  %7168 = vmatpush.bf16.msra.mxu3 %v11953_v31  ;;  %7187 = vmatpush.bf16.msrb.mxu1 %v13425_v33  ;;  %v6937_v31 = vadd.f32 %v6936_v23, %v6924_v21  ;;  %v15379_v21 = vld [vmem:[#allocation3 + $0x394] sm:$0xf] }
 0x1e2   : > { %v12848_v35 = vld [vmem:[#allocation3 + $0x1310] sm:$0xf]  ;;  %v14449_v51 = vor.u32 %v16283_v30, %v14448_v29  ;;  %7156 = vmatmul.bf16.vlgmr.msra.gmra.mxu2 %v17020_v18  ;;  %v10866_v23 = vld [vmem:[#allocation3 + $0x3d0] sm:$0xf0] }
 0x1e3   : > { %v15883_v36 = vld [vmem:[#allocation3 + $0x134c] sm:$0xf0]  ;;  %7200 = vmatpush.bf16.msrb.mxu2 %v13937_v34 }
 0x1e4   : > { %v13360_v37 = vld [vmem:[#allocation3 + $0x1710] sm:$0xf]  ;;  %v12849_v46 = vor.u32 %v15883_v36, %v12848_v35  ;;  %7169 = vmatmul.bf16.vlgmr.msra.gmra.mxu3 %v17024_v20 }
 0x1e5   : > { %v16011_v39 = vld [vmem:[#allocation3 + $0x174c] sm:$0xf0]  ;;  %7213 = vmatpush.bf16.msrb.mxu3 %v14449_v51  ;;  %v6949_v51 = vpop.f32.mrf.mxu2 }
 0x1e6   : > { %v13872_v40 = vld [vmem:[#allocation3 + $0x1b10] sm:$0xf]  ;;  %v13361_v47 = vor.u32 %v16011_v39, %v13360_v37  ;;  %7175 = vmatpush.bf16.msrb.mxu0 %v12849_v46  ;;  %v6962_v46 = vpop.f32.mrf.mxu3 }
 0x1e7   : > { %v16139_v24 = vld [vmem:[#allocation3 + $0x1b4c] sm:$0xf0] }
 0x1e8   : > { %v14384_v43 = vld [vmem:[#allocation3 + $0x1f10] sm:$0xf]  ;;  %v13873_v48 = vor.u32 %v16139_v24, %v13872_v40  ;;  %7188 = vmatpush.bf16.msrb.mxu1 %v13361_v47 }
 0x1e9   : > { %v16267_v45 = vld [vmem:[#allocation3 + $0x1f4c] sm:$0xf0] }
 0x1ea   : > { %v12784_v50 = vld [vmem:[#allocation3 + $0x1290] sm:$0xf]  ;;  %v14385_v55 = vor.u32 %v16267_v45, %v14384_v43  ;;  %7201 = vmatpush.bf16.msrb.mxu2 %v13873_v48  ;;  %v6950_v45 = vadd.f32 %v6949_v51, %v6937_v31  ;;  %v15363_v51 = vld [vmem:[#allocation3 + $0x314] sm:$0xf] }
 0x1eb   : > { %v15867_v53 = vld [vmem:[#allocation3 + $0x12cc] sm:$0xf0] }
 0x1ec   : > { %v13296_v54 = vld [vmem:[#allocation3 + $0x1690] sm:$0xf]  ;;  %v12785_v61 = vor.u32 %v15867_v53, %v12784_v50  ;;  %7214 = vmatpush.bf16.msrb.mxu3 %v14385_v55  ;;  %v17091_v53 = vadd.f32 %v6962_v46, %v6950_v45  ;;  %v15619_v45 = vld [vmem:[#allocation3 + $0xb14] sm:$0xf] }
 0x1ed   : > { %v15995_v56 = vld [vmem:[#allocation3 + $0x16cc] sm:$0xf0]  ;;  %v6951_v12 = vpop.f32.mrf.mxu2  ;;  %v11826_v46 = vld [vmem:[#allocation3 + $0xb50] sm:$0xf0] }
 0x1ee   : > { %v13808_v57 = vld [vmem:[#allocation3 + $0x1a90] sm:$0xf]  ;;  %v13297_v63 = vor.u32 %v15995_v56, %v13296_v54  ;;  %7176 = vmatpush.bf16.msrb.mxu0 %v12785_v61  ;;  %v6925_v54 = vpop.f32.mrf.mxu0  ;;  %v15715_v12 = vld [vmem:[#allocation3 + $0xe14] sm:$0xf] }
 0x1ef   : > { %v16123_v58 = vld [vmem:[#allocation3 + $0x1acc] sm:$0xf0] }
 0x1f0   : > { %v14320_v59 = vld [vmem:[#allocation3 + $0x1e90] sm:$0xf]  ;;  %v13809_v0 = vor.u32 %v16123_v58, %v13808_v57  ;;  %7189 = vmatpush.bf16.msrb.mxu1 %v13297_v63 }
 0x1f1   : > { %v16251_v60 = vld [vmem:[#allocation3 + $0x1ecc] sm:$0xf0] }
 0x1f2   : > { %v12720_v62 = vld [vmem:[#allocation3 + $0x1210] sm:$0xf]  ;;  %v14321_v5 = vor.u32 %v16251_v60, %v14320_v59  ;;  %7202 = vmatpush.bf16.msrb.mxu2 %v13809_v0  ;;  %v6938_v60 = vpop.f32.mrf.mxu1 }
 0x1f3   : > { %v15851_v1 = vld [vmem:[#allocation3 + $0x124c] sm:$0xf0]  ;;  %v11250_v60 = vld [vmem:[#allocation3 + $0x6d0] sm:$0xf0] }
 0x1f4   : > { %v13232_v2 = vld [vmem:[#allocation3 + $0x1610] sm:$0xf]  ;;  %v12721_v11 = vor.u32 %v15851_v1, %v12720_v62  ;;  %7215 = vmatpush.bf16.msrb.mxu3 %v14321_v5 }
 0x1f5   : > { %v15979_v6 = vld [vmem:[#allocation3 + $0x164c] sm:$0xf0] }
 0x1f6   : > { %v13744_v7 = vld [vmem:[#allocation3 + $0x1a10] sm:$0xf]  ;;  %v13233_v13 = vor.u32 %v15979_v6, %v13232_v2  ;;  %7177 = vmatpush.bf16.msrb.mxu0 %v12721_v11 }
 0x1f7   : > { %v16107_v8 = vld [vmem:[#allocation3 + $0x1a4c] sm:$0xf0] }
 0x1f8   : > { %v14256_v9 = vld [vmem:[#allocation3 + $0x1e10] sm:$0xf]  ;;  %v13745_v14 = vor.u32 %v16107_v8, %v13744_v7  ;;  %7190 = vmatpush.bf16.msrb.mxu1 %v13233_v13 }
 0x1f9   : > { %v16235_v10 = vld [vmem:[#allocation3 + $0x1e4c] sm:$0xf0] }
 0x1fa   : > { %v12656_v15 = vld [vmem:[#allocation3 + $0x1190] sm:$0xf]  ;;  %v14257_v26 = vor.u32 %v16235_v10, %v14256_v9  ;;  %7203 = vmatpush.bf16.msrb.mxu2 %v13745_v14 }
 0x1fb   : > { %v15835_v16 = vld [vmem:[#allocation3 + $0x11cc] sm:$0xf0] }
 0x1fc   : > { %v13168_v17 = vld [vmem:[#allocation3 + $0x1590] sm:$0xf]  ;;  %v12657_v32 = vor.u32 %v15835_v16, %v12656_v15  ;;  %7216 = vmatpush.bf16.msrb.mxu3 %v14257_v26  ;;  %v15507_v26 = vld [vmem:[#allocation3 + $0x794] sm:$0xf] }
 0x1fd   : > { %v15963_v25 = vld [vmem:[#allocation3 + $0x15cc] sm:$0xf0] }
 0x1fe   : > { %v13680_v27 = vld [vmem:[#allocation3 + $0x1990] sm:$0xf]  ;;  %v13169_v33 = vor.u32 %v15963_v25, %v13168_v17  ;;  %7178 = vmatpush.bf16.msrb.mxu0 %v12657_v32  ;;  %v6964_v17 = vpop.f32.mrf.mxu3  ;;  %v15763_v32 = vld [vmem:[#allocation3 + $0xf94] sm:$0xf] }
 0x1ff   : > { %v16091_v28 = vld [vmem:[#allocation3 + $0x19cc] sm:$0xf0] }
 0x200   : > { %v14192_v29 = vld [vmem:[#allocation3 + $0x1d90] sm:$0xf]  ;;  %v13681_v34 = vor.u32 %v16091_v28, %v13680_v27  ;;  %7191 = vmatpush.bf16.msrb.mxu1 %v13169_v33  ;;  %v11378_v27 = vld [vmem:[#allocation3 + $0x7d0] sm:$0xf0] }
 0x201   : > { %v16219_v30 = vld [vmem:[#allocation3 + $0x1dcc] sm:$0xf0]  ;;  %v15635_v28 = vld [vmem:[#allocation3 + $0xb94] sm:$0xf] }
 0x202   : > { %v12592_v35 = vld [vmem:[#allocation3 + $0x1110] sm:$0xf]  ;;  %v14193_v39 = vor.u32 %v16219_v30, %v14192_v29  ;;  %7204 = vmatpush.bf16.msrb.mxu2 %v13681_v34  ;;  %v11890_v29 = vld [vmem:[#allocation3 + $0xbd0] sm:$0xf0] }
 0x203   : > { %v15819_v36 = vld [vmem:[#allocation3 + $0x114c] sm:$0xf0]  ;;  %v12402_v33 = vld [vmem:[#allocation3 + $0xfd0] sm:$0xf0] }
 0x204   : > { %v13104_v37 = vld [vmem:[#allocation3 + $0x1510] sm:$0xf]  ;;  %v12593_v50 = vor.u32 %v15819_v36, %v12592_v35  ;;  %7217 = vmatpush.bf16.msrb.mxu3 %v14193_v39  ;;  %v10869_v35 = vor.u32 %v15379_v21, %v10866_v23  ;;  %v11381_v36 = vor.u32 %v15507_v26, %v11378_v27  ;;  %v10802_v39 = vld [vmem:[#allocation3 + $0x350] sm:$0xf0]  ;;  %v6988_v27 = vpop.f32.mrf.mxu1 }
 0x205   : > { %v15947_v40 = vld [vmem:[#allocation3 + $0x154c] sm:$0xf0]  ;;  %v15315_v21 = vld [vmem:[#allocation3 + $0x194] sm:$0xf] }
 0x206   : > { %v13616_v24 = vld [vmem:[#allocation3 + $0x1910] sm:$0xf]  ;;  %v13105_v55 = vor.u32 %v15947_v40, %v13104_v37  ;;  %7179 = vmatpush.bf16.msrb.mxu0 %v12593_v50  ;;  %v11893_v37 = vor.u32 %v15635_v28, %v11890_v29  ;;  %v15491_v40 = vld [vmem:[#allocation3 + $0x714] sm:$0xf]  ;;  %v10805_v50 = vor.u32 %v15363_v51, %v10802_v39 }
 0x207   : > { %v16075_v43 = vld [vmem:[#allocation3 + $0x194c] sm:$0xf0]  ;;  %v10610_v23 = vld [vmem:[#allocation3 + $0x1d0] sm:$0xf0] }
 0x208   : > { %v14128_v47 = vld [vmem:[#allocation3 + $0x1d10] sm:$0xf]  ;;  %v13617_v56 = vor.u32 %v16075_v43, %v13616_v24  ;;  %7192 = vmatpush.bf16.msrb.mxu1 %v13105_v55  ;;  %v12405_v24 = vor.u32 %v15763_v32, %v12402_v33  ;;  %v11314_v43 = vld [vmem:[#allocation3 + $0x750] sm:$0xf0]  ;;  %v11829_v55 = vor.u32 %v15619_v45, %v11826_v46 }
 0x209   : > { %v16203_v48 = vld [vmem:[#allocation3 + $0x1d4c] sm:$0xf0]  ;;  %v11317_v54 = vor.u32 %v15491_v40, %v11314_v43  ;;  %v15443_v26 = vld [vmem:[#allocation3 + $0x594] sm:$0xf] }
 0x20a   : > { %v12528_v57 = vld [vmem:[#allocation3 + $0x1090] sm:$0xf]  ;;  %v14129_v61 = vor.u32 %v16203_v48, %v14128_v47  ;;  %7205 = vmatpush.bf16.msrb.mxu2 %v13617_v56  ;;  %v15747_v47 = vld [vmem:[#allocation3 + $0xf14] sm:$0xf] }
 0x20b   : > { %v15803_v58 = vld [vmem:[#allocation3 + $0x10cc] sm:$0xf0]  ;;  %v12338_v48 = vld [vmem:[#allocation3 + $0xf50] sm:$0xf0] }
 0x20c   : > { %v13040_v59 = vld [vmem:[#allocation3 + $0x1490] sm:$0xf]  ;;  %v12529_v4 = vor.u32 %v15803_v58, %v12528_v57  ;;  %7218 = vmatpush.bf16.msrb.mxu3 %v14129_v61  ;;  %v15347_v56 = vld [vmem:[#allocation3 + $0x294] sm:$0xf] }
 0x20d   : > { %v15931_v62 = vld [vmem:[#allocation3 + $0x14cc] sm:$0xf0]  ;;  %v10738_v57 = vld [vmem:[#allocation3 + $0x2d0] sm:$0xf0] }
 0x20e   : > { %v13552_v63 = vld [vmem:[#allocation3 + $0x1890] sm:$0xf]  ;;  %v13041_v7 = vor.u32 %v15931_v62, %v13040_v59  ;;  %7180 = vmatpush.bf16.msrb.mxu0 %v12529_v4  ;;  %v15475_v58 = vld [vmem:[#allocation3 + $0x694] sm:$0xf]  ;;  %v12341_v59 = vor.u32 %v15747_v47, %v12338_v48  ;;  %v7014_v48 = vpop.f32.mrf.mxu3 }
 0x20f   : > { %v16059_v0 = vld [vmem:[#allocation3 + $0x18cc] sm:$0xf0]  ;;  %v15603_v61 = vld [vmem:[#allocation3 + $0xa94] sm:$0xf] }
 0x210   : > { %v14064_v1 = vld [vmem:[#allocation3 + $0x1c90] sm:$0xf]  ;;  %v13553_v8 = vor.u32 %v16059_v0, %v13552_v63  ;;  %7193 = vmatpush.bf16.msrb.mxu1 %v13041_v7  ;;  %v11762_v62 = vld [vmem:[#allocation3 + $0xad0] sm:$0xf0] }
 0x211   : > { %v16187_v2 = vld [vmem:[#allocation3 + $0x1ccc] sm:$0xf0]  ;;  %v15731_v63 = vld [vmem:[#allocation3 + $0xe94] sm:$0xf]  ;;  %v11765_v4 = vor.u32 %v15603_v61, %v11762_v62 }
 0x212   : > { %v12464_v5 = vld [vmem:[#allocation3 + $0x1010] sm:$0xf]  ;;  %v14065_v13 = vor.u32 %v16187_v2, %v14064_v1  ;;  %7206 = vmatpush.bf16.msrb.mxu2 %v13553_v8  ;;  %v12274_v0 = vld [vmem:[#allocation3 + $0xed0] sm:$0xf0]  ;;  %v10741_v1 = vor.u32 %v15347_v56, %v10738_v57  ;;  %v11253_v2 = vor.u32 %v15475_v58, %v11250_v60 }
 0x213   : > { %v15787_v6 = vld [vmem:[#allocation3 + $0x104c] sm:$0xf0]  ;;  %v15459_v7 = vld [vmem:[#allocation3 + $0x614] sm:$0xf]  ;;  %v12277_v8 = vor.u32 %v15731_v63, %v12274_v0  ;;  %v6990_v63 = vpop.f32.mrf.mxu1 }
 0x214   : > { %v12976_v9 = vld [vmem:[#allocation3 + $0x1410] sm:$0xf]  ;;  %v12465_v25 = vor.u32 %v15787_v6, %v12464_v5  ;;  %7219 = vmatpush.bf16.msrb.mxu3 %v14065_v13  ;;  %v15331_v5 = vld [vmem:[#allocation3 + $0x214] sm:$0xf] }
 0x215   : > { %v15915_v10 = vld [vmem:[#allocation3 + $0x144c] sm:$0xf0]  ;;  %v10674_v6 = vld [vmem:[#allocation3 + $0x250] sm:$0xf0] }
 0x216   : > { %v13488_v11 = vld [vmem:[#allocation3 + $0x1810] sm:$0xf]  ;;  %v12977_v30 = vor.u32 %v15915_v10, %v12976_v9  ;;  %7181 = vmatpush.bf16.msrb.mxu0 %v12465_v25  ;;  %v11186_v9 = vld [vmem:[#allocation3 + $0x650] sm:$0xf0] }
 0x217   : > { %v16043_v14 = vld [vmem:[#allocation3 + $0x184c] sm:$0xf0]  ;;  %v15587_v10 = vld [vmem:[#allocation3 + $0xa14] sm:$0xf] }
 0x218   : > { %v14000_v15 = vld [vmem:[#allocation3 + $0x1c10] sm:$0xf]  ;;  %v13489_v31 = vor.u32 %v16043_v14, %v13488_v11  ;;  %7194 = vmatpush.bf16.msrb.mxu1 %v12977_v30  ;;  %v11698_v11 = vld [vmem:[#allocation3 + $0xa50] sm:$0xf0]  ;;  %v10677_v14 = vor.u32 %v15331_v5, %v10674_v6 }
 0x219   : > { %v16171_v16 = vld [vmem:[#allocation3 + $0x1c4c] sm:$0xf0]  ;;  %7182 = vmatmul.bf16.vlgmr.msrb.gmra.mxu0 %v17036_v41  ;;  %v12210_v13 = vld [vmem:[#allocation3 + $0xe50] sm:$0xf0]  ;;  %v11701_v17 = vor.u32 %v15587_v10, %v11698_v11 }
 0x21a   : > { %v14001_v34 = vor.u32 %v16171_v16, %v14000_v15  ;;  %7207 = vmatpush.bf16.msrb.mxu2 %v13489_v31  ;;  %7226 = vmatpush.bf16.msra.mxu0 %v10869_v35  ;;  %v6975_v15 = vpop.f32.mrf.mxu0  ;;  %v11189_v16 = vor.u32 %v15459_v7, %v11186_v9  ;;  %v12213_v28 = vor.u32 %v15715_v12, %v12210_v13  ;;  %v11122_v29 = vld [vmem:[#allocation3 + $0x5d0] sm:$0xf0] }
 0x21b   : > { %7195 = vmatmul.bf16.vlgmr.msrb.gmra.mxu1 %v17040_v44  ;;  %v6976_v25 = vadd.f32 %v6975_v15, %v17091_v53  ;;  %v15571_v30 = vld [vmem:[#allocation3 + $0x994] sm:$0xf]  ;;  %v10613_v35 = vor.u32 %v15315_v21, %v10610_v23 }
 0x21c   : > { %7220 = vmatpush.bf16.msrb.mxu3 %v14001_v34  ;;  %7239 = vmatpush.bf16.msra.mxu1 %v11381_v36  ;;  %v11634_v31 = vld [vmem:[#allocation3 + $0x9d0] sm:$0xf0]  ;;  %v11125_v36 = vor.u32 %v15443_v26, %v11122_v29  ;;  %v7016_v26 = vpop.f32.mrf.mxu3 }
 0x21d   : > { %7208 = vmatmul.bf16.vlgmr.msrb.gmra.mxu2 %v17034_v38  ;;  %v15699_v32 = vld [vmem:[#allocation3 + $0xd94] sm:$0xf]  ;;  %v6989_v34 = vadd.f32 %v6988_v27, %v6976_v25 }
 0x21e   : > { %7252 = vmatpush.bf16.msra.mxu2 %v11893_v37  ;;  %7227 = vmatpush.bf16.msra.mxu0 %v10805_v50  ;;  %v12146_v33 = vld [vmem:[#allocation3 + $0xdd0] sm:$0xf0]  ;;  %v11637_v37 = vor.u32 %v15571_v30, %v11634_v31 }
 0x21f   : > { %7221 = vmatmul.bf16.vlgmr.msrb.gmra.mxu3 %v17038_v42  ;;  %v15299_v51 = vld [vmem:[#allocation3 + $0x114] sm:$0xf]  ;;  %v12149_v53 = vor.u32 %v15699_v32, %v12146_v33 }
 0x220   : > { %7265 = vmatpush.bf16.msra.mxu3 %v12405_v24  ;;  %7240 = vmatpush.bf16.msra.mxu1 %v11317_v54  ;;  %v10546_v39 = vld [vmem:[#allocation3 + $0x150] sm:$0xf0]  ;;  %v7001_v24 = vpop.f32.mrf.mxu2 }
 0x221   : > { %v15427_v40 = vld [vmem:[#allocation3 + $0x514] sm:$0xf]  ;;  %v7002_v47 = vadd.f32 %v7001_v24, %v6989_v34 }
 0x222   : > { %7253 = vmatpush.bf16.msra.mxu2 %v11829_v55  ;;  %7228 = vmatpush.bf16.msra.mxu0 %v10741_v1  ;;  %v11058_v43 = vld [vmem:[#allocation3 + $0x550] sm:$0xf0]  ;;  %v10549_v55 = vor.u32 %v15299_v51, %v10546_v39  ;;  %v6977_v57 = vpop.f32.mrf.mxu0 }
 0x223   : > { %v15555_v45 = vld [vmem:[#allocation3 + $0x914] sm:$0xf]  ;;  %v17098_v56 = vadd.f32 %v7014_v48, %v7002_v47  ;;  %v11061_v58 = vor.u32 %v15427_v40, %v11058_v43 }
 0x224   : > { %7266 = vmatpush.bf16.msra.mxu3 %v12341_v59  ;;  %7241 = vmatpush.bf16.msra.mxu1 %v11253_v2  ;;  %v11570_v46 = vld [vmem:[#allocation3 + $0x950] sm:$0xf0] }
 0x225   : > { %v15683_v50 = vld [vmem:[#allocation3 + $0xd14] sm:$0xf]  ;;  %v11573_v59 = vor.u32 %v15555_v45, %v11570_v46 }
 0x226   : > { %7254 = vmatpush.bf16.msra.mxu2 %v11765_v4  ;;  %7229 = vmatpush.bf16.msra.mxu0 %v10677_v14  ;;  %v12082_v54 = vld [vmem:[#allocation3 + $0xd50] sm:$0xf0] }
 0x227   : > { %v15283_v60 = vld [vmem:[#allocation3 + $0x94] sm:$0xf]  ;;  %v12085_v0 = vor.u32 %v15683_v50, %v12082_v54 }
 0x228   : > { %7267 = vmatpush.bf16.msra.mxu3 %v12277_v8  ;;  %7242 = vmatpush.bf16.msra.mxu1 %v11189_v16  ;;  %v10482_v61 = vld [vmem:[#allocation3 + $0xd0] sm:$0xf0]  ;;  %v7003_v15 = vpop.f32.mrf.mxu2 }
 0x229   : > { %v15411_v62 = vld [vmem:[#allocation3 + $0x494] sm:$0xf]  ;;  %v10485_v7 = vor.u32 %v15283_v60, %v10482_v61 }
 0x22a   : > { %7255 = vmatpush.bf16.msra.mxu2 %v11701_v17  ;;  %7230 = vmatpush.bf16.msra.mxu0 %v10613_v35  ;;  %v10994_v1 = vld [vmem:[#allocation3 + $0x4d0] sm:$0xf0] }
 0x22b   : > { %v15539_v2 = vld [vmem:[#allocation3 + $0x894] sm:$0xf]  ;;  %v10997_v10 = vor.u32 %v15411_v62, %v10994_v1 }
 0x22c   : > { %7268 = vmatpush.bf16.msra.mxu3 %v12213_v28  ;;  %7243 = vmatpush.bf16.msra.mxu1 %v11125_v36  ;;  %v11506_v4 = vld [vmem:[#allocation3 + $0x8d0] sm:$0xf0] }
 0x22d   : > { %v15667_v5 = vld [vmem:[#allocation3 + $0xc94] sm:$0xf]  ;;  %v11509_v11 = vor.u32 %v15539_v2, %v11506_v4 }
 0x22e   : > { %7256 = vmatpush.bf16.msra.mxu2 %v11637_v37  ;;  %v12018_v6 = vld [vmem:[#allocation3 + $0xcd0] sm:$0xf0]  ;;  %7231 = vmatpush.bf16.msra.mxu0 %v10549_v55 }
 0x22f   : > { %v15267_v8 = vld [vmem:[#allocation3 + $0x14] sm:$0xf]  ;;  %v12021_v16 = vor.u32 %v15667_v5, %v12018_v6 }
 0x230   : > { %7269 = vmatpush.bf16.msra.mxu3 %v12149_v53  ;;  %v10418_v9 = vld [vmem:[#allocation3 + $0x50] sm:$0xf0]  ;;  %7244 = vmatpush.bf16.msra.mxu1 %v11061_v58 }
 0x231   : > { %v15395_v12 = vld [vmem:[#allocation3 + $0x414] sm:$0xf]  ;;  %v10421_v29 = vor.u32 %v15267_v8, %v10418_v9 }
 0x232   : > { %7257 = vmatpush.bf16.msra.mxu2 %v11573_v59  ;;  %v10930_v13 = vld [vmem:[#allocation3 + $0x450] sm:$0xf0]  ;;  %7232 = vmatpush.bf16.msra.mxu0 %v10485_v7 }
 0x233   : > { %v15523_v14 = vld [vmem:[#allocation3 + $0x814] sm:$0xf]  ;;  %v10933_v33 = vor.u32 %v15395_v12, %v10930_v13 }
 0x234   : > { %7270 = vmatpush.bf16.msra.mxu3 %v12085_v0  ;;  %v11442_v17 = vld [vmem:[#allocation3 + $0x850] sm:$0xf0]  ;;  %7245 = vmatpush.bf16.msra.mxu1 %v10997_v10 }
 0x235   : > { %v15651_v21 = vld [vmem:[#allocation3 + $0xc14] sm:$0xf]  ;;  %v11445_v34 = vor.u32 %v15523_v14, %v11442_v17 }
 0x236   : > { %v11954_v23 = vld [vmem:[#allocation3 + $0xc50] sm:$0xf0]  ;;  %7258 = vmatpush.bf16.msra.mxu2 %v11509_v11  ;;  %7233 = vmatpush.bf16.msra.mxu0 %v10421_v29  ;;  %v1529_v11 = vperm.slane %v17088_v3, 3 }
 0x237   : > { %v15891_v25 = vld [vmem:[#allocation3 + $0x1394] sm:$0xf]  ;;  %v11957_v37 = vor.u32 %v15651_v21, %v11954_v23  ;;  %v7027_v23 = vpop.f32.mrf.mxu0 }
 0x238   : > { %v12914_v27 = vld [vmem:[#allocation3 + $0x13d0] sm:$0xf0]  ;;  %7271 = vmatpush.bf16.msra.mxu3 %v12021_v16  ;;  %7246 = vmatpush.bf16.msra.mxu1 %v10933_v33 }
 0x239   : > { %v16019_v28 = vld [vmem:[#allocation3 + $0x1794] sm:$0xf]  ;;  %v12917_v51 = vor.u32 %v15891_v25, %v12914_v27  ;;  %7234 = vmatmul.bf16.vlgmr.msra.gmra.mxu0 %v17022_v19 }
 0x23a   : > { %v13426_v30 = vld [vmem:[#allocation3 + $0x17d0] sm:$0xf0]  ;;  %7259 = vmatpush.bf16.msra.mxu2 %v11445_v34 }
 0x23b   : > { %v16147_v31 = vld [vmem:[#allocation3 + $0x1b94] sm:$0xf]  ;;  %v13429_v39 = vor.u32 %v16019_v28, %v13426_v30  ;;  %7278 = vmatpush.bf16.msrb.mxu0 %v12917_v51  ;;  %7247 = vmatmul.bf16.vlgmr.msra.gmra.mxu1 %v17026_v22  ;;  %v7028_v30 = vadd.f32 %v7027_v23, %v1529_v11 }
 0x23c   : > { %v13938_v32 = vld [vmem:[#allocation3 + $0x1bd0] sm:$0xf0]  ;;  %7272 = vmatpush.bf16.msra.mxu3 %v11957_v37 }
 0x23d   : > { %v16275_v35 = vld [vmem:[#allocation3 + $0x1f94] sm:$0xf]  ;;  %v13941_v40 = vor.u32 %v16147_v31, %v13938_v32  ;;  %7291 = vmatpush.bf16.msrb.mxu1 %v13429_v39  ;;  %7260 = vmatmul.bf16.vlgmr.msra.gmra.mxu2 %v17020_v18  ;;  %v7040_v31 = vpop.f32.mrf.mxu1 }
 0x23e   : > { %v14450_v36 = vld [vmem:[#allocation3 + $0x1fd0] sm:$0xf0]  ;;  %v7041_v37 = vadd.f32 %v7040_v31, %v7028_v30  ;;  %v10872_v30 = vld [vmem:[#allocation3 + $0x398] sm:$0xf] }
 0x23f   : > { %v15875_v24 = vld [vmem:[#allocation3 + $0x1314] sm:$0xf]  ;;  %v14453_v45 = vor.u32 %v16275_v35, %v14450_v36  ;;  %7304 = vmatpush.bf16.msrb.mxu2 %v13941_v40  ;;  %7273 = vmatmul.bf16.vlgmr.msra.gmra.mxu3 %v17024_v20  ;;  %v15388_v31 = vld [vmem:[#allocation3 + $0x3d4] sm:$0xf0] }
 0x240   : > { %v12850_v53 = vld [vmem:[#allocation3 + $0x1350] sm:$0xf0] }
 0x241   : > { %v16003_v43 = vld [vmem:[#allocation3 + $0x1714] sm:$0xf]  ;;  %v12853_v55 = vor.u32 %v15875_v24, %v12850_v53  ;;  %7317 = vmatpush.bf16.msrb.mxu3 %v14453_v45  ;;  %v7053_v45 = vpop.f32.mrf.mxu2 }
 0x242   : > { %v13362_v46 = vld [vmem:[#allocation3 + $0x1750] sm:$0xf0] }
 0x243   : > { %v16131_v47 = vld [vmem:[#allocation3 + $0x1b14] sm:$0xf]  ;;  %v13365_v57 = vor.u32 %v16003_v43, %v13362_v46  ;;  %7279 = vmatpush.bf16.msrb.mxu0 %v12853_v55  ;;  %v7066_v55 = vpop.f32.mrf.mxu3 }
 0x244   : > { %v13874_v48 = vld [vmem:[#allocation3 + $0x1b50] sm:$0xf0] }
 0x245   : > { %v16259_v50 = vld [vmem:[#allocation3 + $0x1f14] sm:$0xf]  ;;  %v13877_v58 = vor.u32 %v16131_v47, %v13874_v48  ;;  %7292 = vmatpush.bf16.msrb.mxu1 %v13365_v57 }
 0x246   : > { %v14386_v54 = vld [vmem:[#allocation3 + $0x1f50] sm:$0xf0] }
 0x247   : > { %v15859_v59 = vld [vmem:[#allocation3 + $0x1294] sm:$0xf]  ;;  %v14389_v62 = vor.u32 %v16259_v50, %v14386_v54  ;;  %7305 = vmatpush.bf16.msrb.mxu2 %v13877_v58  ;;  %v7054_v54 = vadd.f32 %v7053_v45, %v7041_v37  ;;  %v10808_v45 = vld [vmem:[#allocation3 + $0x318] sm:$0xf] }
 0x248   : > { %v12786_v60 = vld [vmem:[#allocation3 + $0x12d0] sm:$0xf0] }
 0x249   : > { %v15987_v61 = vld [vmem:[#allocation3 + $0x1694] sm:$0xf]  ;;  %v12789_v5 = vor.u32 %v15859_v59, %v12786_v60  ;;  %7318 = vmatpush.bf16.msrb.mxu3 %v14389_v62  ;;  %v17105_v60 = vadd.f32 %v7066_v55, %v7054_v54  ;;  %v7055_v23 = vpop.f32.mrf.mxu2  ;;  %v11832_v54 = vld [vmem:[#allocation3 + $0xb18] sm:$0xf] }
 0x24a   : > { %v13298_v63 = vld [vmem:[#allocation3 + $0x16d0] sm:$0xf0]  ;;  %v15628_v55 = vld [vmem:[#allocation3 + $0xb54] sm:$0xf0] }
 0x24b   : > { %v16115_v0 = vld [vmem:[#allocation3 + $0x1a94] sm:$0xf]  ;;  %v13301_v7 = vor.u32 %v15987_v61, %v13298_v63  ;;  %7280 = vmatpush.bf16.msrb.mxu0 %v12789_v5  ;;  %v7029_v61 = vpop.f32.mrf.mxu0  ;;  %v12216_v23 = vld [vmem:[#allocation3 + $0xe18] sm:$0xf] }
 0x24c   : > { %v13810_v1 = vld [vmem:[#allocation3 + $0x1ad0] sm:$0xf0] }
 0x24d   : > { %v16243_v2 = vld [vmem:[#allocation3 + $0x1e94] sm:$0xf]  ;;  %v13813_v8 = vor.u32 %v16115_v0, %v13810_v1  ;;  %7293 = vmatpush.bf16.msrb.mxu1 %v13301_v7 }
 0x24e   : > { %v14322_v4 = vld [vmem:[#allocation3 + $0x1ed0] sm:$0xf0] }
 0x24f   : > { %v15843_v6 = vld [vmem:[#allocation3 + $0x1214] sm:$0xf]  ;;  %v14325_v12 = vor.u32 %v16243_v2, %v14322_v4  ;;  %7306 = vmatpush.bf16.msrb.mxu2 %v13813_v8  ;;  %v7042_v4 = vpop.f32.mrf.mxu1 }
 0x250   : > { %v12722_v9 = vld [vmem:[#allocation3 + $0x1250] sm:$0xf0]  ;;  %v15484_v4 = vld [vmem:[#allocation3 + $0x6d4] sm:$0xf0] }
 0x251   : > { %v15971_v10 = vld [vmem:[#allocation3 + $0x1614] sm:$0xf]  ;;  %v12725_v21 = vor.u32 %v15843_v6, %v12722_v9  ;;  %7319 = vmatpush.bf16.msrb.mxu3 %v14325_v12 }
 0x252   : > { %v13234_v13 = vld [vmem:[#allocation3 + $0x1650] sm:$0xf0] }
 0x253   : > { %v16099_v14 = vld [vmem:[#allocation3 + $0x1a14] sm:$0xf]  ;;  %v13237_v26 = vor.u32 %v15971_v10, %v13234_v13  ;;  %7281 = vmatpush.bf16.msrb.mxu0 %v12725_v21 }
 0x254   : > { %v13746_v15 = vld [vmem:[#allocation3 + $0x1a50] sm:$0xf0] }
 0x255   : > { %v16227_v16 = vld [vmem:[#allocation3 + $0x1e14] sm:$0xf]  ;;  %v13749_v25 = vor.u32 %v16099_v14, %v13746_v15  ;;  %7294 = vmatpush.bf16.msrb.mxu1 %v13237_v26 }
 0x256   : > { %v14258_v17 = vld [vmem:[#allocation3 + $0x1e50] sm:$0xf0] }
 0x257   : > { %v15827_v27 = vld [vmem:[#allocation3 + $0x1194] sm:$0xf]  ;;  %v14261_v3 = vor.u32 %v16227_v16, %v14258_v17  ;;  %7307 = vmatpush.bf16.msrb.mxu2 %v13749_v25 }
 0x258   : > { %v12658_v28 = vld [vmem:[#allocation3 + $0x11d0] sm:$0xf0] }
 0x259   : > { %v15955_v29 = vld [vmem:[#allocation3 + $0x1594] sm:$0xf]  ;;  %v12661_v51 = vor.u32 %v15827_v27, %v12658_v28  ;;  %7320 = vmatpush.bf16.msrb.mxu3 %v14261_v3  ;;  %v11384_v3 = vld [vmem:[#allocation3 + $0x798] sm:$0xf] }
 0x25a   : > { %v13170_v32 = vld [vmem:[#allocation3 + $0x15d0] sm:$0xf0] }
 0x25b   : > { %v16083_v33 = vld [vmem:[#allocation3 + $0x1994] sm:$0xf]  ;;  %v13173_v39 = vor.u32 %v15955_v29, %v13170_v32  ;;  %7282 = vmatpush.bf16.msrb.mxu0 %v12661_v51  ;;  %v7068_v29 = vpop.f32.mrf.mxu3  ;;  %v12408_v51 = vld [vmem:[#allocation3 + $0xf98] sm:$0xf] }
 0x25c   : > { %v13682_v34 = vld [vmem:[#allocation3 + $0x19d0] sm:$0xf0] }
 0x25d   : > { %v16211_v35 = vld [vmem:[#allocation3 + $0x1d94] sm:$0xf]  ;;  %v13685_v40 = vor.u32 %v16083_v33, %v13682_v34  ;;  %7295 = vmatpush.bf16.msrb.mxu1 %v13173_v39  ;;  %v15516_v33 = vld [vmem:[#allocation3 + $0x7d4] sm:$0xf0] }
 0x25e   : > { %v14194_v36 = vld [vmem:[#allocation3 + $0x1dd0] sm:$0xf0]  ;;  %v11896_v34 = vld [vmem:[#allocation3 + $0xb98] sm:$0xf] }
 0x25f   : > { %v15811_v24 = vld [vmem:[#allocation3 + $0x1114] sm:$0xf]  ;;  %v14197_v46 = vor.u32 %v16211_v35, %v14194_v36  ;;  %7308 = vmatpush.bf16.msrb.mxu2 %v13685_v40  ;;  %v15644_v35 = vld [vmem:[#allocation3 + $0xbd4] sm:$0xf0] }
 0x260   : > { %v12594_v53 = vld [vmem:[#allocation3 + $0x1150] sm:$0xf0]  ;;  %v15772_v39 = vld [vmem:[#allocation3 + $0xfd4] sm:$0xf0] }
 0x261   : > { %v15939_v43 = vld [vmem:[#allocation3 + $0x1514] sm:$0xf]  ;;  %v12597_v59 = vor.u32 %v15811_v24, %v12594_v53  ;;  %7321 = vmatpush.bf16.msrb.mxu3 %v14197_v46  ;;  %v10873_v24 = vor.u32 %v15388_v31, %v10872_v30  ;;  %v11385_v53 = vor.u32 %v15516_v33, %v11384_v3  ;;  %v15372_v46 = vld [vmem:[#allocation3 + $0x354] sm:$0xf0]  ;;  %v7092_v33 = vpop.f32.mrf.mxu1 }
 0x262   : > { %v13106_v47 = vld [vmem:[#allocation3 + $0x1550] sm:$0xf0]  ;;  %v10616_v30 = vld [vmem:[#allocation3 + $0x198] sm:$0xf] }
 0x263   : > { %v16067_v48 = vld [vmem:[#allocation3 + $0x1914] sm:$0xf]  ;;  %v13109_v62 = vor.u32 %v15939_v43, %v13106_v47  ;;  %7283 = vmatpush.bf16.msrb.mxu0 %v12597_v59  ;;  %v11897_v43 = vor.u32 %v15644_v35, %v11896_v34  ;;  %v11320_v47 = vld [vmem:[#allocation3 + $0x718] sm:$0xf]  ;;  %v10809_v59 = vor.u32 %v15372_v46, %v10808_v45 }
 0x264   : > { %v13618_v50 = vld [vmem:[#allocation3 + $0x1950] sm:$0xf0]  ;;  %v15324_v31 = vld [vmem:[#allocation3 + $0x1d4] sm:$0xf0] }
 0x265   : > { %v16195_v57 = vld [vmem:[#allocation3 + $0x1d14] sm:$0xf]  ;;  %v13621_v63 = vor.u32 %v16067_v48, %v13618_v50  ;;  %7296 = vmatpush.bf16.msrb.mxu1 %v13109_v62  ;;  %v12409_v48 = vor.u32 %v15772_v39, %v12408_v51  ;;  %v15500_v50 = vld [vmem:[#allocation3 + $0x754] sm:$0xf0]  ;;  %v11833_v62 = vor.u32 %v15628_v55, %v11832_v54 }
 0x266   : > { %v14130_v58 = vld [vmem:[#allocation3 + $0x1d50] sm:$0xf0]  ;;  %v11321_v61 = vor.u32 %v15500_v50, %v11320_v47  ;;  %v11128_v3 = vld [vmem:[#allocation3 + $0x598] sm:$0xf] }
 0x267   : > { %v15795_v0 = vld [vmem:[#allocation3 + $0x1094] sm:$0xf]  ;;  %v14133_v5 = vor.u32 %v16195_v57, %v14130_v58  ;;  %7309 = vmatpush.bf16.msrb.mxu2 %v13621_v63  ;;  %v12344_v57 = vld [vmem:[#allocation3 + $0xf18] sm:$0xf] }
 0x268   : > { %v12530_v1 = vld [vmem:[#allocation3 + $0x10d0] sm:$0xf0]  ;;  %v15756_v58 = vld [vmem:[#allocation3 + $0xf54] sm:$0xf0] }
 0x269   : > { %v15923_v2 = vld [vmem:[#allocation3 + $0x1494] sm:$0xf]  ;;  %v12533_v11 = vor.u32 %v15795_v0, %v12530_v1  ;;  %7322 = vmatpush.bf16.msrb.mxu3 %v14133_v5  ;;  %v10744_v63 = vld [vmem:[#allocation3 + $0x298] sm:$0xf] }
 0x26a   : > { %v13042_v6 = vld [vmem:[#allocation3 + $0x14d0] sm:$0xf0]  ;;  %v15356_v0 = vld [vmem:[#allocation3 + $0x2d4] sm:$0xf0] }
 0x26b   : > { %v16051_v7 = vld [vmem:[#allocation3 + $0x1894] sm:$0xf]  ;;  %v13045_v14 = vor.u32 %v15923_v2, %v13042_v6  ;;  %7284 = vmatpush.bf16.msrb.mxu0 %v12533_v11  ;;  %v11256_v1 = vld [vmem:[#allocation3 + $0x698] sm:$0xf]  ;;  %v12345_v2 = vor.u32 %v15756_v58, %v12344_v57  ;;  %v7118_v58 = vpop.f32.mrf.mxu3 }
 0x26c   : > { %v13554_v8 = vld [vmem:[#allocation3 + $0x18d0] sm:$0xf0]  ;;  %v11768_v5 = vld [vmem:[#allocation3 + $0xa98] sm:$0xf] }
 0x26d   : > { %v16179_v9 = vld [vmem:[#allocation3 + $0x1c94] sm:$0xf]  ;;  %v13557_v15 = vor.u32 %v16051_v7, %v13554_v8  ;;  %7297 = vmatpush.bf16.msrb.mxu1 %v13045_v14  ;;  %v15612_v6 = vld [vmem:[#allocation3 + $0xad4] sm:$0xf0] }
 0x26e   : > { %v14066_v10 = vld [vmem:[#allocation3 + $0x1cd0] sm:$0xf0]  ;;  %v12280_v7 = vld [vmem:[#allocation3 + $0xe98] sm:$0xf]  ;;  %v11769_v11 = vor.u32 %v15612_v6, %v11768_v5 }
 0x26f   : > { %v15779_v12 = vld [vmem:[#allocation3 + $0x1014] sm:$0xf]  ;;  %v14069_v26 = vor.u32 %v16179_v9, %v14066_v10  ;;  %7310 = vmatpush.bf16.msrb.mxu2 %v13557_v15  ;;  %v15740_v8 = vld [vmem:[#allocation3 + $0xed4] sm:$0xf0]  ;;  %v10745_v9 = vor.u32 %v15356_v0, %v10744_v63  ;;  %v11257_v10 = vor.u32 %v15484_v4, %v11256_v1 }
 0x270   : > { %v12466_v13 = vld [vmem:[#allocation3 + $0x1050] sm:$0xf0]  ;;  %v11192_v14 = vld [vmem:[#allocation3 + $0x618] sm:$0xf]  ;;  %v12281_v15 = vor.u32 %v15740_v8, %v12280_v7  ;;  %v7094_v7 = vpop.f32.mrf.mxu1 }
 0x271   : > { %v15907_v16 = vld [vmem:[#allocation3 + $0x1414] sm:$0xf]  ;;  %v12469_v32 = vor.u32 %v15779_v12, %v12466_v13  ;;  %7323 = vmatpush.bf16.msrb.mxu3 %v14069_v26  ;;  %v10680_v12 = vld [vmem:[#allocation3 + $0x218] sm:$0xf] }
 0x272   : > { %v12978_v17 = vld [vmem:[#allocation3 + $0x1450] sm:$0xf0]  ;;  %v15340_v13 = vld [vmem:[#allocation3 + $0x254] sm:$0xf0] }
 0x273   : > { %v16035_v21 = vld [vmem:[#allocation3 + $0x1814] sm:$0xf]  ;;  %v12981_v36 = vor.u32 %v15907_v16, %v12978_v17  ;;  %7285 = vmatpush.bf16.msrb.mxu0 %v12469_v32  ;;  %v15468_v16 = vld [vmem:[#allocation3 + $0x654] sm:$0xf0] }
 0x274   : > { %v13490_v25 = vld [vmem:[#allocation3 + $0x1850] sm:$0xf0]  ;;  %v11704_v17 = vld [vmem:[#allocation3 + $0xa18] sm:$0xf] }
 0x275   : > { %v16163_v27 = vld [vmem:[#allocation3 + $0x1c14] sm:$0xf]  ;;  %v13493_v37 = vor.u32 %v16035_v21, %v13490_v25  ;;  %7298 = vmatpush.bf16.msrb.mxu1 %v12981_v36  ;;  %v15596_v21 = vld [vmem:[#allocation3 + $0xa54] sm:$0xf0]  ;;  %v10681_v25 = vor.u32 %v15340_v13, %v10680_v12 }
 0x276   : > { %v14002_v28 = vld [vmem:[#allocation3 + $0x1c50] sm:$0xf0]  ;;  %7286 = vmatmul.bf16.vlgmr.msrb.gmra.mxu0 %v17036_v41  ;;  %v15724_v26 = vld [vmem:[#allocation3 + $0xe54] sm:$0xf0]  ;;  %v11705_v29 = vor.u32 %v15596_v21, %v11704_v17 }
 0x277   : > { %v14005_v40 = vor.u32 %v16163_v27, %v14002_v28  ;;  %7311 = vmatpush.bf16.msrb.mxu2 %v13493_v37  ;;  %7330 = vmatpush.bf16.msra.mxu0 %v10873_v24  ;;  %v7079_v27 = vpop.f32.mrf.mxu0  ;;  %v11193_v28 = vor.u32 %v15468_v16, %v11192_v14  ;;  %v12217_v34 = vor.u32 %v15724_v26, %v12216_v23  ;;  %v15452_v35 = vld [vmem:[#allocation3 + $0x5d4] sm:$0xf0] }
 0x278   : > { %7299 = vmatmul.bf16.vlgmr.msrb.gmra.mxu1 %v17040_v44  ;;  %v7080_v32 = vadd.f32 %v7079_v27, %v17105_v60  ;;  %v11640_v36 = vld [vmem:[#allocation3 + $0x998] sm:$0xf]  ;;  %v10617_v24 = vor.u32 %v15324_v31, %v10616_v30 }
 0x279   : > { %7324 = vmatpush.bf16.msrb.mxu3 %v14005_v40  ;;  %7343 = vmatpush.bf16.msra.mxu1 %v11385_v53  ;;  %v15580_v37 = vld [vmem:[#allocation3 + $0x9d4] sm:$0xf0]  ;;  %v11129_v53 = vor.u32 %v15452_v35, %v11128_v3  ;;  %v7120_v3 = vpop.f32.mrf.mxu3 }
 0x27a   : > { %7312 = vmatmul.bf16.vlgmr.msrb.gmra.mxu2 %v17034_v38  ;;  %v12152_v51 = vld [vmem:[#allocation3 + $0xd98] sm:$0xf]  ;;  %v7093_v40 = vadd.f32 %v7092_v33, %v7080_v32 }
 0x27b   : > { %7356 = vmatpush.bf16.msra.mxu2 %v11897_v43  ;;  %7331 = vmatpush.bf16.msra.mxu0 %v10809_v59  ;;  %v15708_v39 = vld [vmem:[#allocation3 + $0xdd4] sm:$0xf0]  ;;  %v11641_v43 = vor.u32 %v15580_v37, %v11640_v36 }
 0x27c   : > { %7325 = vmatmul.bf16.vlgmr.msrb.gmra.mxu3 %v17038_v42  ;;  %v10552_v45 = vld [vmem:[#allocation3 + $0x118] sm:$0xf]  ;;  %v12153_v60 = vor.u32 %v15708_v39, %v12152_v51 }
 0x27d   : > { %7369 = vmatpush.bf16.msra.mxu3 %v12409_v48  ;;  %7344 = vmatpush.bf16.msra.mxu1 %v11321_v61  ;;  %v15308_v46 = vld [vmem:[#allocation3 + $0x154] sm:$0xf0]  ;;  %v7105_v48 = vpop.f32.mrf.mxu2 }
 0x27e   : > { %v11064_v47 = vld [vmem:[#allocation3 + $0x518] sm:$0xf]  ;;  %v7106_v57 = vadd.f32 %v7105_v48, %v7093_v40 }
 0x27f   : > { %7357 = vmatpush.bf16.msra.mxu2 %v11833_v62  ;;  %7332 = vmatpush.bf16.msra.mxu0 %v10745_v9  ;;  %v15436_v50 = vld [vmem:[#allocation3 + $0x554] sm:$0xf0]  ;;  %v10553_v62 = vor.u32 %v15308_v46, %v10552_v45  ;;  %v7081_v0 = vpop.f32.mrf.mxu0 }
 0x280   : > { %v11576_v54 = vld [vmem:[#allocation3 + $0x918] sm:$0xf]  ;;  %v17112_v63 = vadd.f32 %v7118_v58, %v7106_v57  ;;  %v11065_v1 = vor.u32 %v15436_v50, %v11064_v47 }
 0x281   : > { %7370 = vmatpush.bf16.msra.mxu3 %v12345_v2  ;;  %7345 = vmatpush.bf16.msra.mxu1 %v11257_v10  ;;  %v15564_v55 = vld [vmem:[#allocation3 + $0x954] sm:$0xf0] }
 0x282   : > { %v12088_v59 = vld [vmem:[#allocation3 + $0xd18] sm:$0xf]  ;;  %v11577_v2 = vor.u32 %v15564_v55, %v11576_v54 }
 0x283   : > { %7358 = vmatpush.bf16.msra.mxu2 %v11769_v11  ;;  %7333 = vmatpush.bf16.msra.mxu0 %v10681_v25  ;;  %v15692_v61 = vld [vmem:[#allocation3 + $0xd54] sm:$0xf0] }
 0x284   : > { %v10488_v4 = vld [vmem:[#allocation3 + $0x98] sm:$0xf]  ;;  %v12089_v8 = vor.u32 %v15692_v61, %v12088_v59 }
 0x285   : > { %7371 = vmatpush.bf16.msra.mxu3 %v12281_v15  ;;  %7346 = vmatpush.bf16.msra.mxu1 %v11193_v28  ;;  %v15292_v5 = vld [vmem:[#allocation3 + $0xd4] sm:$0xf0]  ;;  %v7107_v27 = vpop.f32.mrf.mxu2 }
 0x286   : > { %v11000_v6 = vld [vmem:[#allocation3 + $0x498] sm:$0xf]  ;;  %v10489_v14 = vor.u32 %v15292_v5, %v10488_v4 }
 0x287   : > { %7359 = vmatpush.bf16.msra.mxu2 %v11705_v29  ;;  %7334 = vmatpush.bf16.msra.mxu0 %v10617_v24  ;;  %v15420_v9 = vld [vmem:[#allocation3 + $0x4d4] sm:$0xf0]  ;;  %v7131_v3 = vpop.f32.mrf.mxu0 }
 0x288   : > { %v11512_v10 = vld [vmem:[#allocation3 + $0x898] sm:$0xf]  ;;  %v11001_v17 = vor.u32 %v15420_v9, %v11000_v6 }
 0x289   : > { %7372 = vmatpush.bf16.msra.mxu3 %v12217_v34  ;;  %7347 = vmatpush.bf16.msra.mxu1 %v11129_v53  ;;  %v15548_v11 = vld [vmem:[#allocation3 + $0x8d4] sm:$0xf0] }
 0x28a   : > { %v12024_v12 = vld [vmem:[#allocation3 + $0xc98] sm:$0xf]  ;;  %v11513_v21 = vor.u32 %v15548_v11, %v11512_v10 }
 0x28b   : > { %7360 = vmatpush.bf16.msra.mxu2 %v11641_v43  ;;  %v15676_v13 = vld [vmem:[#allocation3 + $0xcd4] sm:$0xf0]  ;;  %7335 = vmatpush.bf16.msra.mxu0 %v10553_v62 }
 0x28c   : > { %v10424_v15 = vld [vmem:[#allocation3 + $0x18] sm:$0xf]  ;;  %v12025_v28 = vor.u32 %v15676_v13, %v12024_v12 }
 0x28d   : > { %7373 = vmatpush.bf16.msra.mxu3 %v12153_v60  ;;  %v15276_v16 = vld [vmem:[#allocation3 + $0x54] sm:$0xf0]  ;;  %7348 = vmatpush.bf16.msra.mxu1 %v11065_v1 }
 0x28e   : > { %v10936_v23 = vld [vmem:[#allocation3 + $0x418] sm:$0xf]  ;;  %v10425_v35 = vor.u32 %v15276_v16, %v10424_v15 }
 0x28f   : > { %7361 = vmatpush.bf16.msra.mxu2 %v11577_v2  ;;  %v15404_v26 = vld [vmem:[#allocation3 + $0x454] sm:$0xf0]  ;;  %7336 = vmatpush.bf16.msra.mxu0 %v10489_v14 }
 0x290   : > { %v11448_v25 = vld [vmem:[#allocation3 + $0x818] sm:$0xf]  ;;  %v10937_v39 = vor.u32 %v15404_v26, %v10936_v23 }
 0x291   : > { %7374 = vmatpush.bf16.msra.mxu3 %v12089_v8  ;;  %v15532_v29 = vld [vmem:[#allocation3 + $0x854] sm:$0xf0]  ;;  %7349 = vmatpush.bf16.msra.mxu1 %v11001_v17 }
 0x292   : > { %v11960_v30 = vld [vmem:[#allocation3 + $0xc18] sm:$0xf]  ;;  %v11449_v40 = vor.u32 %v15532_v29, %v11448_v25 }
 0x293   : > { %v15660_v31 = vld [vmem:[#allocation3 + $0xc54] sm:$0xf0]  ;;  %7362 = vmatpush.bf16.msra.mxu2 %v11513_v21  ;;  %7337 = vmatpush.bf16.msra.mxu0 %v10425_v35  ;;  %v17118_v21 = vld [vmem:[#allocation5] sm:$0xff] }
 0x294   : > { %v12920_v32 = vld [vmem:[#allocation3 + $0x1398] sm:$0xf]  ;;  %v11961_v43 = vor.u32 %v15660_v31, %v11960_v30  ;;  %v1530_v23 = vperm.slane %v17118_v21, 4 }
 0x295   : > { %v15900_v33 = vld [vmem:[#allocation3 + $0x13d4] sm:$0xf0]  ;;  %7375 = vmatpush.bf16.msra.mxu3 %v12025_v28  ;;  %7350 = vmatpush.bf16.msra.mxu1 %v10937_v39 }
 0x296   : > { %v13432_v34 = vld [vmem:[#allocation3 + $0x1798] sm:$0xf]  ;;  %v12921_v45 = vor.u32 %v15900_v33, %v12920_v32  ;;  %7338 = vmatmul.bf16.vlgmr.msra.gmra.mxu0 %v17022_v19 }
 0x297   : > { %v16028_v36 = vld [vmem:[#allocation3 + $0x17d4] sm:$0xf0]  ;;  %7363 = vmatpush.bf16.msra.mxu2 %v11449_v40 }
 0x298   : > { %v13944_v37 = vld [vmem:[#allocation3 + $0x1b98] sm:$0xf]  ;;  %v13433_v46 = vor.u32 %v16028_v36, %v13432_v34  ;;  %7382 = vmatpush.bf16.msrb.mxu0 %v12921_v45  ;;  %7351 = vmatmul.bf16.vlgmr.msra.gmra.mxu1 %v17026_v22 }
 0x299   : > { %v16156_v51 = vld [vmem:[#allocation3 + $0x1bd4] sm:$0xf0]  ;;  %7376 = vmatpush.bf16.msra.mxu3 %v11961_v43 }
 0x29a   : > { %v14456_v24 = vld [vmem:[#allocation3 + $0x1f98] sm:$0xf]  ;;  %v13945_v47 = vor.u32 %v16156_v51, %v13944_v37  ;;  %7395 = vmatpush.bf16.msrb.mxu1 %v13433_v46  ;;  %7364 = vmatmul.bf16.vlgmr.msra.gmra.mxu2 %v17020_v18  ;;  %v7132_v37 = vadd.f32 %v7131_v3, %v1530_v23  ;;  %v7144_v51 = vpop.f32.mrf.mxu1 }
 0x29b   : > { %v16284_v53 = vld [vmem:[#allocation3 + $0x1fd4] sm:$0xf0] }
 0x29c   : > { %v12856_v48 = vld [vmem:[#allocation3 + $0x1318] sm:$0xf]  ;;  %v14457_v54 = vor.u32 %v16284_v53, %v14456_v24  ;;  %7408 = vmatpush.bf16.msrb.mxu2 %v13945_v47  ;;  %7377 = vmatmul.bf16.vlgmr.msra.gmra.mxu3 %v17024_v20  ;;  %v7145_v46 = vadd.f32 %v7144_v51, %v7132_v37 }
 0x29d   : > { %v15884_v60 = vld [vmem:[#allocation3 + $0x1354] sm:$0xf0] }
 0x29e   : > { %v13368_v50 = vld [vmem:[#allocation3 + $0x1718] sm:$0xf]  ;;  %v12857_v62 = vor.u32 %v15884_v60, %v12856_v48  ;;  %7421 = vmatpush.bf16.msrb.mxu3 %v14457_v54 }
 0x29f   : > { %v16012_v55 = vld [vmem:[#allocation3 + $0x1754] sm:$0xf0] }
 0x2a0   : > { %v13880_v57 = vld [vmem:[#allocation3 + $0x1b18] sm:$0xf]  ;;  %v13369_v0 = vor.u32 %v16012_v55, %v13368_v50  ;;  %7383 = vmatpush.bf16.msrb.mxu0 %v12857_v62 }
 0x2a1   : > { %v16140_v58 = vld [vmem:[#allocation3 + $0x1b54] sm:$0xf0] }
 0x2a2   : > { %v14392_v59 = vld [vmem:[#allocation3 + $0x1f18] sm:$0xf]  ;;  %v13881_v1 = vor.u32 %v16140_v58, %v13880_v57  ;;  %7396 = vmatpush.bf16.msrb.mxu1 %v13369_v0  ;;  %v7157_v57 = vpop.f32.mrf.mxu2 }
 0x2a3   : > { %v16268_v61 = vld [vmem:[#allocation3 + $0x1f54] sm:$0xf0]  ;;  %v7158_v0 = vadd.f32 %v7157_v57, %v7145_v46  ;;  %v11898_v46 = vld [vmem:[#allocation3 + $0xbd8] sm:$0xf0] }
 0x2a4   : > { %v12792_v2 = vld [vmem:[#allocation3 + $0x1298] sm:$0xf]  ;;  %v14393_v6 = vor.u32 %v16268_v61, %v14392_v59  ;;  %7409 = vmatpush.bf16.msrb.mxu2 %v13881_v1  ;;  %v7170_v1 = vpop.f32.mrf.mxu3 }
 0x2a5   : > { %v15868_v4 = vld [vmem:[#allocation3 + $0x12d4] sm:$0xf0] }
 0x2a6   : > { %v13304_v5 = vld [vmem:[#allocation3 + $0x1698] sm:$0xf]  ;;  %v12793_v12 = vor.u32 %v15868_v4, %v12792_v2  ;;  %7422 = vmatpush.bf16.msrb.mxu3 %v14393_v6  ;;  %v17121_v6 = vadd.f32 %v7170_v1, %v7158_v0  ;;  %v11322_v1 = vld [vmem:[#allocation3 + $0x758] sm:$0xf0] }
 0x2a7   : > { %v15996_v7 = vld [vmem:[#allocation3 + $0x16d4] sm:$0xf0] }
 0x2a8   : > { %v13816_v8 = vld [vmem:[#allocation3 + $0x1a98] sm:$0xf]  ;;  %v13305_v14 = vor.u32 %v15996_v7, %v13304_v5  ;;  %7384 = vmatpush.bf16.msrb.mxu0 %v12793_v12  ;;  %v7133_v7 = vpop.f32.mrf.mxu0 }
 0x2a9   : > { %v16124_v9 = vld [vmem:[#allocation3 + $0x1ad4] sm:$0xf0]  ;;  %v12346_v7 = vld [vmem:[#allocation3 + $0xf58] sm:$0xf0] }
 0x2aa   : > { %v14328_v10 = vld [vmem:[#allocation3 + $0x1e98] sm:$0xf]  ;;  %v13817_v15 = vor.u32 %v16124_v9, %v13816_v8  ;;  %7397 = vmatpush.bf16.msrb.mxu1 %v13305_v14 }
 0x2ab   : > { %v16252_v11 = vld [vmem:[#allocation3 + $0x1ed4] sm:$0xf0] }
 0x2ac   : > { %v12728_v13 = vld [vmem:[#allocation3 + $0x1218] sm:$0xf]  ;;  %v14329_v26 = vor.u32 %v16252_v11, %v14328_v10  ;;  %7410 = vmatpush.bf16.msrb.mxu2 %v13817_v15  ;;  %v7172_v51 = vpop.f32.mrf.mxu3 }
 0x2ad   : > { %v15852_v16 = vld [vmem:[#allocation3 + $0x1254] sm:$0xf0] }
 0x2ae   : > { %v13240_v17 = vld [vmem:[#allocation3 + $0x1618] sm:$0xf]  ;;  %v12729_v31 = vor.u32 %v15852_v16, %v12728_v13  ;;  %7423 = vmatpush.bf16.msrb.mxu3 %v14329_v26  ;;  %v7146_v13 = vpop.f32.mrf.mxu1 }
 0x2af   : > { %v15980_v25 = vld [vmem:[#allocation3 + $0x1654] sm:$0xf0]  ;;  %v15476_v13 = vld [vmem:[#allocation3 + $0x69c] sm:$0xf] }
 0x2b0   : > { %v13752_v27 = vld [vmem:[#allocation3 + $0x1a18] sm:$0xf]  ;;  %v13241_v32 = vor.u32 %v15980_v25, %v13240_v17  ;;  %7385 = vmatpush.bf16.msrb.mxu0 %v12729_v31  ;;  %v7183_v51 = vpop.f32.mrf.mxu0 }
 0x2b1   : > { %v16108_v28 = vld [vmem:[#allocation3 + $0x1a54] sm:$0xf0] }
 0x2b2   : > { %v14264_v29 = vld [vmem:[#allocation3 + $0x1e18] sm:$0xf]  ;;  %v13753_v33 = vor.u32 %v16108_v28, %v13752_v27  ;;  %7398 = vmatpush.bf16.msrb.mxu1 %v13241_v32 }
 0x2b3   : > { %v16236_v30 = vld [vmem:[#allocation3 + $0x1e54] sm:$0xf0] }
 0x2b4   : > { %v12664_v34 = vld [vmem:[#allocation3 + $0x1198] sm:$0xf]  ;;  %v14265_v39 = vor.u32 %v16236_v30, %v14264_v29  ;;  %7411 = vmatpush.bf16.msrb.mxu2 %v13753_v33  ;;  %v7159_v33 = vpop.f32.mrf.mxu2 }
 0x2b5   : > { %v15836_v35 = vld [vmem:[#allocation3 + $0x11d4] sm:$0xf0]  ;;  %v15588_v33 = vld [vmem:[#allocation3 + $0xa1c] sm:$0xf] }
 0x2b6   : > { %v13176_v36 = vld [vmem:[#allocation3 + $0x1598] sm:$0xf]  ;;  %v12665_v47 = vor.u32 %v15836_v35, %v12664_v34  ;;  %7424 = vmatpush.bf16.msrb.mxu3 %v14265_v39  ;;  %v15380_v39 = vld [vmem:[#allocation3 + $0x39c] sm:$0xf] }
 0x2b7   : > { %v15964_v40 = vld [vmem:[#allocation3 + $0x15d4] sm:$0xf0] }
 0x2b8   : > { %v13688_v24 = vld [vmem:[#allocation3 + $0x1998] sm:$0xf]  ;;  %v13177_v48 = vor.u32 %v15964_v40, %v13176_v36  ;;  %7386 = vmatpush.bf16.msrb.mxu0 %v12665_v47  ;;  %v10874_v40 = vld [vmem:[#allocation3 + $0x3d8] sm:$0xf0] }
 0x2b9   : > { %v16092_v53 = vld [vmem:[#allocation3 + $0x19d4] sm:$0xf0] }
 0x2ba   : > { %v14200_v43 = vld [vmem:[#allocation3 + $0x1d98] sm:$0xf]  ;;  %v13689_v60 = vor.u32 %v16092_v53, %v13688_v24  ;;  %7399 = vmatpush.bf16.msrb.mxu1 %v13177_v48  ;;  %v15508_v24 = vld [vmem:[#allocation3 + $0x79c] sm:$0xf] }
 0x2bb   : > { %v16220_v45 = vld [vmem:[#allocation3 + $0x1dd4] sm:$0xf0] }
 0x2bc   : > { %v12600_v50 = vld [vmem:[#allocation3 + $0x1118] sm:$0xf]  ;;  %v14201_v58 = vor.u32 %v16220_v45, %v14200_v43  ;;  %7412 = vmatpush.bf16.msrb.mxu2 %v13689_v60  ;;  %v11386_v43 = vld [vmem:[#allocation3 + $0x7d8] sm:$0xf0] }
 0x2bd   : > { %v15820_v54 = vld [vmem:[#allocation3 + $0x1154] sm:$0xf0]  ;;  %v15636_v45 = vld [vmem:[#allocation3 + $0xb9c] sm:$0xf]  ;;  %v11389_v57 = vor.u32 %v15508_v24, %v11386_v43  ;;  %v7184_v24 = vadd.f32 %v7183_v51, %v17121_v6 }
 0x2be   : > { %v13112_v55 = vld [vmem:[#allocation3 + $0x1518] sm:$0xf]  ;;  %v12601_v5 = vor.u32 %v15820_v54, %v12600_v50  ;;  %7425 = vmatpush.bf16.msrb.mxu3 %v14201_v58  ;;  %v15764_v60 = vld [vmem:[#allocation3 + $0xf9c] sm:$0xf]  ;;  %v11901_v58 = vor.u32 %v15636_v45, %v11898_v46 }
 0x2bf   : > { %v15948_v59 = vld [vmem:[#allocation3 + $0x1554] sm:$0xf0]  ;;  %v12410_v50 = vld [vmem:[#allocation3 + $0xfd8] sm:$0xf0] }
 0x2c0   : > { %v13624_v61 = vld [vmem:[#allocation3 + $0x1918] sm:$0xf]  ;;  %v13113_v8 = vor.u32 %v15948_v59, %v13112_v55  ;;  %7387 = vmatpush.bf16.msrb.mxu0 %v12601_v5  ;;  %v10877_v55 = vor.u32 %v15380_v39, %v10874_v40  ;;  %v15364_v59 = vld [vmem:[#allocation3 + $0x31c] sm:$0xf]  ;;  %v12413_v0 = vor.u32 %v15764_v60, %v12410_v50 }
 0x2c1   : > { %v16076_v62 = vld [vmem:[#allocation3 + $0x1954] sm:$0xf0]  ;;  %v15748_v5 = vld [vmem:[#allocation3 + $0xf1c] sm:$0xf] }
 0x2c2   : > { %v14136_v2 = vld [vmem:[#allocation3 + $0x1d18] sm:$0xf]  ;;  %v13625_v9 = vor.u32 %v16076_v62, %v13624_v61  ;;  %7400 = vmatpush.bf16.msrb.mxu1 %v13113_v8  ;;  %v10810_v61 = vld [vmem:[#allocation3 + $0x358] sm:$0xf0] }
 0x2c3   : > { %v16204_v4 = vld [vmem:[#allocation3 + $0x1d54] sm:$0xf0]  ;;  %v15492_v62 = vld [vmem:[#allocation3 + $0x71c] sm:$0xf]  ;;  %v10813_v8 = vor.u32 %v15364_v59, %v10810_v61 }
 0x2c4   : > { %v12536_v10 = vld [vmem:[#allocation3 + $0x1098] sm:$0xf]  ;;  %v14137_v14 = vor.u32 %v16204_v4, %v14136_v2  ;;  %7413 = vmatpush.bf16.msrb.mxu2 %v13625_v9  ;;  %v15620_v2 = vld [vmem:[#allocation3 + $0xb1c] sm:$0xf]  ;;  %v11325_v9 = vor.u32 %v15492_v62, %v11322_v1  ;;  %v7209_v62 = vpop.f32.mrf.mxu2 }
 0x2c5   : > { %v15804_v11 = vld [vmem:[#allocation3 + $0x10d4] sm:$0xf0]  ;;  %v11834_v4 = vld [vmem:[#allocation3 + $0xb58] sm:$0xf0] }
 0x2c6   : > { %v13048_v12 = vld [vmem:[#allocation3 + $0x1498] sm:$0xf]  ;;  %v12537_v25 = vor.u32 %v15804_v11, %v12536_v10  ;;  %7426 = vmatpush.bf16.msrb.mxu3 %v14137_v14  ;;  %v11837_v10 = vor.u32 %v15620_v2, %v11834_v4  ;;  %v15348_v11 = vld [vmem:[#allocation3 + $0x29c] sm:$0xf]  ;;  %v12349_v14 = vor.u32 %v15748_v5, %v12346_v7  ;;  %v7222_v5 = vpop.f32.mrf.mxu3 }
 0x2c7   : > { %v15932_v15 = vld [vmem:[#allocation3 + $0x14d4] sm:$0xf0]  ;;  %v15316_v43 = vld [vmem:[#allocation3 + $0x19c] sm:$0xf] }
 0x2c8   : > { %v13560_v16 = vld [vmem:[#allocation3 + $0x1898] sm:$0xf]  ;;  %v13049_v29 = vor.u32 %v15932_v15, %v13048_v12  ;;  %7388 = vmatpush.bf16.msrb.mxu0 %v12537_v25  ;;  %v10746_v12 = vld [vmem:[#allocation3 + $0x2d8] sm:$0xf0] }
 0x2c9   : > { %v16060_v17 = vld [vmem:[#allocation3 + $0x18d4] sm:$0xf0]  ;;  %v11258_v15 = vld [vmem:[#allocation3 + $0x6d8] sm:$0xf0]  ;;  %v10749_v25 = vor.u32 %v15348_v11, %v10746_v12 }
 0x2ca   : > { %v14072_v23 = vld [vmem:[#allocation3 + $0x1c98] sm:$0xf]  ;;  %v13561_v30 = vor.u32 %v16060_v17, %v13560_v16  ;;  %7401 = vmatpush.bf16.msrb.mxu1 %v13049_v29  ;;  %v15604_v16 = vld [vmem:[#allocation3 + $0xa9c] sm:$0xf] }
 0x2cb   : > { %v16188_v26 = vld [vmem:[#allocation3 + $0x1cd4] sm:$0xf0]  ;;  %v11770_v17 = vld [vmem:[#allocation3 + $0xad8] sm:$0xf0] }
 0x2cc   : > { %v12472_v27 = vld [vmem:[#allocation3 + $0x1018] sm:$0xf]  ;;  %v14073_v34 = vor.u32 %v16188_v26, %v14072_v23  ;;  %7414 = vmatpush.bf16.msrb.mxu2 %v13561_v30  ;;  %v15732_v23 = vld [vmem:[#allocation3 + $0xe9c] sm:$0xf] }
 0x2cd   : > { %v15788_v28 = vld [vmem:[#allocation3 + $0x1054] sm:$0xf0]  ;;  %v12282_v26 = vld [vmem:[#allocation3 + $0xed8] sm:$0xf0] }
 0x2ce   : > { %v12984_v31 = vld [vmem:[#allocation3 + $0x1418] sm:$0xf]  ;;  %v12473_v53 = vor.u32 %v15788_v28, %v12472_v27  ;;  %7427 = vmatpush.bf16.msrb.mxu3 %v14073_v34  ;;  %v11261_v27 = vor.u32 %v15476_v13, %v11258_v15  ;;  %v11773_v28 = vor.u32 %v15604_v16, %v11770_v17  ;;  %v15332_v29 = vld [vmem:[#allocation3 + $0x21c] sm:$0xf]  ;;  %v7185_v15 = vpop.f32.mrf.mxu0 }
 0x2cf   : > { %v15916_v3 = vld [vmem:[#allocation3 + $0x1454] sm:$0xf0]  ;;  %v10682_v30 = vld [vmem:[#allocation3 + $0x258] sm:$0xf0] }
 0x2d0   : > { %v13496_v32 = vld [vmem:[#allocation3 + $0x1818] sm:$0xf]  ;;  %v12985_v47 = vor.u32 %v15916_v3, %v12984_v31  ;;  %7389 = vmatpush.bf16.msrb.mxu0 %v12473_v53  ;;  %v15460_v31 = vld [vmem:[#allocation3 + $0x61c] sm:$0xf]  ;;  %v12285_v3 = vor.u32 %v15732_v23, %v12282_v26  ;;  %v7196_v53 = vpop.f32.mrf.mxu1 }
 0x2d1   : > { %v16044_v35 = vld [vmem:[#allocation3 + $0x1854] sm:$0xf0]  ;;  %v11706_v34 = vld [vmem:[#allocation3 + $0xa58] sm:$0xf0] }
 0x2d2   : > { %v14008_v36 = vld [vmem:[#allocation3 + $0x1c18] sm:$0xf]  ;;  %v13497_v48 = vor.u32 %v16044_v35, %v13496_v32  ;;  %7402 = vmatpush.bf16.msrb.mxu1 %v12985_v47  ;;  %v11194_v32 = vld [vmem:[#allocation3 + $0x658] sm:$0xf0]  ;;  %v11709_v40 = vor.u32 %v15588_v33, %v11706_v34 }
 0x2d3   : > { %v16172_v37 = vld [vmem:[#allocation3 + $0x1c54] sm:$0xf0]  ;;  %7390 = vmatmul.bf16.vlgmr.msrb.gmra.mxu0 %v17036_v41  ;;  %v15716_v35 = vld [vmem:[#allocation3 + $0xe1c] sm:$0xf]  ;;  %v11197_v39 = vor.u32 %v15460_v31, %v11194_v32 }
 0x2d4   : > { %v14009_v54 = vor.u32 %v16172_v37, %v14008_v36  ;;  %7415 = vmatpush.bf16.msrb.mxu2 %v13497_v48  ;;  %7434 = vmatpush.bf16.msra.mxu0 %v10877_v55  ;;  %v12218_v36 = vld [vmem:[#allocation3 + $0xe58] sm:$0xf0]  ;;  %v10685_v37 = vor.u32 %v15332_v29, %v10682_v30 }
 0x2d5   : > { %7403 = vmatmul.bf16.vlgmr.msrb.gmra.mxu1 %v17040_v44  ;;  %v10618_v45 = vld [vmem:[#allocation3 + $0x1d8] sm:$0xf0]  ;;  %v12221_v47 = vor.u32 %v15716_v35, %v12218_v36 }
 0x2d6   : > { %7428 = vmatpush.bf16.msrb.mxu3 %v14009_v54  ;;  %7447 = vmatpush.bf16.msra.mxu1 %v11389_v57  ;;  %v15444_v46 = vld [vmem:[#allocation3 + $0x59c] sm:$0xf]  ;;  %v7197_v54 = vadd.f32 %v7196_v53, %v7184_v24 }
 0x2d7   : > { %7416 = vmatmul.bf16.vlgmr.msrb.gmra.mxu2 %v17034_v38  ;;  %v11130_v48 = vld [vmem:[#allocation3 + $0x5d8] sm:$0xf0] }
 0x2d8   : > { %7460 = vmatpush.bf16.msra.mxu2 %v11901_v58  ;;  %7435 = vmatpush.bf16.msra.mxu0 %v10813_v8  ;;  %v15572_v60 = vld [vmem:[#allocation3 + $0x99c] sm:$0xf]  ;;  %v10621_v58 = vor.u32 %v15316_v43, %v10618_v45  ;;  %v11133_v59 = vor.u32 %v15444_v46, %v11130_v48  ;;  %v7210_v4 = vadd.f32 %v7209_v62, %v7197_v54  ;;  %v7211_v43 = vpop.f32.mrf.mxu2 }
 0x2d9   : > { %7429 = vmatmul.bf16.vlgmr.msrb.gmra.mxu3 %v17038_v42  ;;  %v11642_v50 = vld [vmem:[#allocation3 + $0x9d8] sm:$0xf0] }
 0x2da   : > { %7473 = vmatpush.bf16.msra.mxu3 %v12413_v0  ;;  %7448 = vmatpush.bf16.msra.mxu1 %v11325_v9  ;;  %v15700_v55 = vld [vmem:[#allocation3 + $0xd9c] sm:$0xf]  ;;  %v11645_v61 = vor.u32 %v15572_v60, %v11642_v50  ;;  %v7223_v12 = vadd.f32 %v7222_v5, %v7210_v4  ;;  %v7224_v60 = vpop.f32.mrf.mxu3 }
 0x2db   : > { %v12154_v57 = vld [vmem:[#allocation3 + $0xdd8] sm:$0xf0] }
 0x2dc   : > { %7461 = vmatpush.bf16.msra.mxu2 %v11837_v10  ;;  %7436 = vmatpush.bf16.msra.mxu0 %v10749_v25  ;;  %v15300_v6 = vld [vmem:[#allocation3 + $0x11c] sm:$0xf]  ;;  %v12157_v2 = vor.u32 %v15700_v55, %v12154_v57  ;;  %v8374_v29 = vmax.f32 %v7223_v12, 0.0 }
 0x2dd   : > { %v10554_v0 = vld [vmem:[#allocation3 + $0x158] sm:$0xf0] }
 0x2de   : > { %7474 = vmatpush.bf16.msra.mxu3 %v12349_v14  ;;  %7449 = vmatpush.bf16.msra.mxu1 %v11261_v27  ;;  %v15428_v1 = vld [vmem:[#allocation3 + $0x51c] sm:$0xf]  ;;  %v10557_v13 = vor.u32 %v15300_v6, %v10554_v0  ;;  %v7198_v27 = vpop.f32.mrf.mxu1 }
 0x2df   : > { %v11066_v7 = vld [vmem:[#allocation3 + $0x558] sm:$0xf0] }
 0x2e0   : > { %7462 = vmatpush.bf16.msra.mxu2 %v11773_v28  ;;  %7437 = vmatpush.bf16.msra.mxu0 %v10685_v37  ;;  %v15556_v8 = vld [vmem:[#allocation3 + $0x91c] sm:$0xf]  ;;  %v11069_v16 = vor.u32 %v15428_v1, %v11066_v7  ;;  %v8370_v28 = vmax.f32 %v17068_v52, 0.0 }
 0x2e1   : > { %v11578_v9 = vld [vmem:[#allocation3 + $0x958] sm:$0xf0] }
 0x2e2   : > { %7475 = vmatpush.bf16.msra.mxu3 %v12285_v3  ;;  %7450 = vmatpush.bf16.msra.mxu1 %v11197_v39  ;;  %v15684_v10 = vld [vmem:[#allocation3 + $0xd1c] sm:$0xf]  ;;  %v11581_v17 = vor.u32 %v15556_v8, %v11578_v9  ;;  %v17129_v34 = vadd.f32 %v8374_v29, %v8370_v28  ;;  %v17131_v35 = vpack.c.bf16 %v8374_v29, %v8370_v28 }
 0x2e3   : > { %v12090_v11 = vld [vmem:[#allocation3 + $0xd58] sm:$0xf0] }
 0x2e4   : > { %7463 = vmatpush.bf16.msra.mxu2 %v11709_v40  ;;  %7438 = vmatpush.bf16.msra.mxu0 %v10621_v58  ;;  %v15284_v14 = vld [vmem:[#allocation3 + $0x9c] sm:$0xf]  ;;  %v12093_v30 = vor.u32 %v15684_v10, %v12090_v11 }
 0x2e5   : > { %v10490_v23 = vld [vmem:[#allocation3 + $0xd8] sm:$0xf0] }
 0x2e6   : > { %7476 = vmatpush.bf16.msra.mxu3 %v12221_v47  ;;  %7451 = vmatpush.bf16.msra.mxu1 %v11133_v59  ;;  %v15412_v26 = vld [vmem:[#allocation3 + $0x49c] sm:$0xf]  ;;  %v10493_v36 = vor.u32 %v15284_v14, %v10490_v23 }
 0x2e7   : > { %v11002_v25 = vld [vmem:[#allocation3 + $0x4d8] sm:$0xf0] }
 0x2e8   : > { %7464 = vmatpush.bf16.msra.mxu2 %v11645_v61  ;;  %v15540_v31 = vld [vmem:[#allocation3 + $0x89c] sm:$0xf]  ;;  %7439 = vmatpush.bf16.msra.mxu0 %v10557_v13  ;;  %v11005_v39 = vor.u32 %v15412_v26, %v11002_v25 }
 0x2e9   : > { %v11514_v3 = vld [vmem:[#allocation3 + $0x8d8] sm:$0xf0] }
 0x2ea   : > { %7477 = vmatpush.bf16.msra.mxu3 %v12157_v2  ;;  %v15668_v32 = vld [vmem:[#allocation3 + $0xc9c] sm:$0xf]  ;;  %7452 = vmatpush.bf16.msra.mxu1 %v11069_v16  ;;  %v11517_v40 = vor.u32 %v15540_v31, %v11514_v3 }
 0x2eb   : > { %v12026_v33 = vld [vmem:[#allocation3 + $0xcd8] sm:$0xf0] }
 0x2ec   : > { %v15268_v37 = vld [vmem:[#allocation3 + $0x1c] sm:$0xf]  ;;  %7465 = vmatpush.bf16.msra.mxu2 %v11581_v17  ;;  %v12029_v45 = vor.u32 %v15668_v32, %v12026_v33  ;;  %7440 = vmatpush.bf16.msra.mxu0 %v10493_v36 }
 0x2ed   : > { %v10426_v51 = vld [vmem:[#allocation3 + $0x58] sm:$0xf0] }
 0x2ee   : > { %v15396_v52 = vld [vmem:[#allocation3 + $0x41c] sm:$0xf]  ;;  %7478 = vmatpush.bf16.msra.mxu3 %v12093_v30  ;;  %v10429_v57 = vor.u32 %v15268_v37, %v10426_v51  ;;  %7453 = vmatpush.bf16.msra.mxu1 %v11005_v39 }
 0x2ef   : > { %v10938_v24 = vld [vmem:[#allocation3 + $0x458] sm:$0xf0] }
 0x2f0   : > { %v15524_v53 = vld [vmem:[#allocation3 + $0x81c] sm:$0xf]  ;;  %7466 = vmatpush.bf16.msra.mxu2 %v11517_v40  ;;  %v10941_v62 = vor.u32 %v15396_v52, %v10938_v24  ;;  %7441 = vmatpush.bf16.msra.mxu0 %v10429_v57  ;;  %v1531_v24 = vperm.slane %v17118_v21, 5 }
 0x2f1   : > { %v11450_v46 = vld [vmem:[#allocation3 + $0x858] sm:$0xf0] }
 0x2f2   : > { %v15652_v47 = vld [vmem:[#allocation3 + $0xc1c] sm:$0xf]  ;;  %v11453_v6 = vor.u32 %v15524_v53, %v11450_v46  ;;  %7479 = vmatpush.bf16.msra.mxu3 %v12029_v45  ;;  %7454 = vmatpush.bf16.msra.mxu1 %v10941_v62  ;;  %v7248_v62 = vpop.f32.mrf.mxu1 }
 0x2f3   : > { %v11962_v48 = vld [vmem:[#allocation3 + $0xc58] sm:$0xf0]  ;;  %7442 = vmatmul.bf16.vlgmr.msra.gmra.mxu0 %v17022_v19 }
 0x2f4   : > { %v15892_v50 = vld [vmem:[#allocation3 + $0x139c] sm:$0xf]  ;;  %v11965_v2 = vor.u32 %v15652_v47, %v11962_v48  ;;  %7467 = vmatpush.bf16.msra.mxu2 %v11453_v6 }
 0x2f5   : > { %v12922_v54 = vld [vmem:[#allocation3 + $0x13d8] sm:$0xf0]  ;;  %7455 = vmatmul.bf16.vlgmr.msra.gmra.mxu1 %v17026_v22 }
 0x2f6   : > { %v16020_v55 = vld [vmem:[#allocation3 + $0x179c] sm:$0xf]  ;;  %v12925_v4 = vor.u32 %v15892_v50, %v12922_v54  ;;  %7480 = vmatpush.bf16.msra.mxu3 %v11965_v2  ;;  %v7235_v50 = vpop.f32.mrf.mxu0 }
 0x2f7   : > { %v13434_v58 = vld [vmem:[#allocation3 + $0x17d8] sm:$0xf0]  ;;  %7468 = vmatmul.bf16.vlgmr.msra.gmra.mxu2 %v17020_v18 }
 0x2f8   : > { %v16148_v59 = vld [vmem:[#allocation3 + $0x1b9c] sm:$0xf]  ;;  %v13437_v5 = vor.u32 %v16020_v55, %v13434_v58  ;;  %7486 = vmatpush.bf16.msrb.mxu0 %v12925_v4 }
 0x2f9   : > { %v13946_v61 = vld [vmem:[#allocation3 + $0x1bd8] sm:$0xf0]  ;;  %7481 = vmatmul.bf16.vlgmr.msra.gmra.mxu3 %v17024_v20 }
 0x2fa   : > { %v16276_v0 = vld [vmem:[#allocation3 + $0x1f9c] sm:$0xf]  ;;  %v13949_v7 = vor.u32 %v16148_v59, %v13946_v61  ;;  %7499 = vmatpush.bf16.msrb.mxu1 %v13437_v5  ;;  %v7236_v61 = vadd.f32 %v7235_v50, %v1531_v24 }
 0x2fb   : > { %v14458_v1 = vld [vmem:[#allocation3 + $0x1fd8] sm:$0xf0] }
 0x2fc   : > { %v15876_v8 = vld [vmem:[#allocation3 + $0x131c] sm:$0xf]  ;;  %v14461_v11 = vor.u32 %v16276_v0, %v14458_v1  ;;  %7512 = vmatpush.bf16.msrb.mxu2 %v13949_v7  ;;  %v7249_v5 = vadd.f32 %v7248_v62, %v7236_v61 }
 0x2fd   : > { %v12858_v9 = vld [vmem:[#allocation3 + $0x1358] sm:$0xf0] }
 0x2fe   : > { %v16004_v10 = vld [vmem:[#allocation3 + $0x171c] sm:$0xf]  ;;  %v12861_v17 = vor.u32 %v15876_v8, %v12858_v9  ;;  %7525 = vmatpush.bf16.msrb.mxu3 %v14461_v11 }
 0x2ff   : > { %v13370_v12 = vld [vmem:[#allocation3 + $0x1758] sm:$0xf0] }
 0x300   : > { %v16132_v13 = vld [vmem:[#allocation3 + $0x1b1c] sm:$0xf]  ;;  %v13373_v23 = vor.u32 %v16004_v10, %v13370_v12  ;;  %7487 = vmatpush.bf16.msrb.mxu0 %v12861_v17 }
 0x301   : > { %v13882_v14 = vld [vmem:[#allocation3 + $0x1b58] sm:$0xf0] }
 0x302   : > { %v16260_v15 = vld [vmem:[#allocation3 + $0x1f1c] sm:$0xf]  ;;  %v13885_v26 = vor.u32 %v16132_v13, %v13882_v14  ;;  %7500 = vmatpush.bf16.msrb.mxu1 %v13373_v23  ;;  %v7261_v13 = vpop.f32.mrf.mxu2 }
 0x303   : > { %v14394_v16 = vld [vmem:[#allocation3 + $0x1f58] sm:$0xf0]  ;;  %v7262_v23 = vadd.f32 %v7261_v13, %v7249_v5  ;;  %v15645_v5 = vld [vmem:[#allocation3 + $0xbdc] sm:$0xf0] }
 0x304   : > { %v15860_v25 = vld [vmem:[#allocation3 + $0x129c] sm:$0xf]  ;;  %v14397_v29 = vor.u32 %v16260_v15, %v14394_v16  ;;  %7513 = vmatpush.bf16.msrb.mxu2 %v13885_v26  ;;  %v7274_v26 = vpop.f32.mrf.mxu3 }
 0x305   : > { %v12794_v27 = vld [vmem:[#allocation3 + $0x12d8] sm:$0xf0] }
 0x306   : > { %v15988_v28 = vld [vmem:[#allocation3 + $0x169c] sm:$0xf]  ;;  %v12797_v36 = vor.u32 %v15860_v25, %v12794_v27  ;;  %7526 = vmatpush.bf16.msrb.mxu3 %v14397_v29  ;;  %v17138_v29 = vadd.f32 %v7274_v26, %v7262_v23  ;;  %v15501_v26 = vld [vmem:[#allocation3 + $0x75c] sm:$0xf0] }
 0x307   : > { %v13306_v30 = vld [vmem:[#allocation3 + $0x16d8] sm:$0xf0] }
 0x308   : > { %v16116_v31 = vld [vmem:[#allocation3 + $0x1a9c] sm:$0xf]  ;;  %v13309_v51 = vor.u32 %v15988_v28, %v13306_v30  ;;  %7488 = vmatpush.bf16.msrb.mxu0 %v12797_v36  ;;  %v7237_v30 = vpop.f32.mrf.mxu0 }
 0x309   : > { %v13818_v3 = vld [vmem:[#allocation3 + $0x1ad8] sm:$0xf0]  ;;  %v15757_v30 = vld [vmem:[#allocation3 + $0xf5c] sm:$0xf0] }
 0x30a   : > { %v16244_v32 = vld [vmem:[#allocation3 + $0x1e9c] sm:$0xf]  ;;  %v13821_v39 = vor.u32 %v16116_v31, %v13818_v3  ;;  %7501 = vmatpush.bf16.msrb.mxu1 %v13309_v51 }
 0x30b   : > { %v14330_v33 = vld [vmem:[#allocation3 + $0x1ed8] sm:$0xf0] }
 0x30c   : > { %v15844_v37 = vld [vmem:[#allocation3 + $0x121c] sm:$0xf]  ;;  %v14333_v53 = vor.u32 %v16244_v32, %v14330_v33  ;;  %7514 = vmatpush.bf16.msrb.mxu2 %v13821_v39  ;;  %v7276_v62 = vpop.f32.mrf.mxu3 }
 0x30d   : > { %v12730_v40 = vld [vmem:[#allocation3 + $0x1258] sm:$0xf0] }
 0x30e   : > { %v15972_v52 = vld [vmem:[#allocation3 + $0x161c] sm:$0xf]  ;;  %v12733_v60 = vor.u32 %v15844_v37, %v12730_v40  ;;  %7527 = vmatpush.bf16.msrb.mxu3 %v14333_v53  ;;  %v7250_v37 = vpop.f32.mrf.mxu1 }
 0x30f   : > { %v13242_v43 = vld [vmem:[#allocation3 + $0x1658] sm:$0xf0]  ;;  %v11264_v37 = vld [vmem:[#allocation3 + $0x6a0] sm:$0xf] }
 0x310   : > { %v16100_v45 = vld [vmem:[#allocation3 + $0x1a1c] sm:$0xf]  ;;  %v13245_v54 = vor.u32 %v15972_v52, %v13242_v43  ;;  %7489 = vmatpush.bf16.msrb.mxu0 %v12733_v60  ;;  %v7287_v62 = vpop.f32.mrf.mxu0 }
 0x311   : > { %v13754_v46 = vld [vmem:[#allocation3 + $0x1a58] sm:$0xf0] }
 0x312   : > { %v16228_v47 = vld [vmem:[#allocation3 + $0x1e1c] sm:$0xf]  ;;  %v13757_v55 = vor.u32 %v16100_v45, %v13754_v46  ;;  %7502 = vmatpush.bf16.msrb.mxu1 %v13245_v54 }
 0x313   : > { %v14266_v48 = vld [vmem:[#allocation3 + $0x1e58] sm:$0xf0] }
 0x314   : > { %v15828_v57 = vld [vmem:[#allocation3 + $0x119c] sm:$0xf]  ;;  %v14269_v21 = vor.u32 %v16228_v47, %v14266_v48  ;;  %7515 = vmatpush.bf16.msrb.mxu2 %v13757_v55  ;;  %v7263_v55 = vpop.f32.mrf.mxu2 }
 0x315   : > { %v12666_v58 = vld [vmem:[#allocation3 + $0x11d8] sm:$0xf0]  ;;  %v11712_v55 = vld [vmem:[#allocation3 + $0xa20] sm:$0xf] }
 0x316   : > { %v15956_v59 = vld [vmem:[#allocation3 + $0x159c] sm:$0xf]  ;;  %v12669_v7 = vor.u32 %v15828_v57, %v12666_v58  ;;  %7528 = vmatpush.bf16.msrb.mxu3 %v14269_v21  ;;  %v10880_v21 = vld [vmem:[#allocation3 + $0x3a0] sm:$0xf] }
 0x317   : > { %v13178_v6 = vld [vmem:[#allocation3 + $0x15d8] sm:$0xf0] }
 0x318   : > { %v16084_v0 = vld [vmem:[#allocation3 + $0x199c] sm:$0xf]  ;;  %v13181_v8 = vor.u32 %v15956_v59, %v13178_v6  ;;  %7490 = vmatpush.bf16.msrb.mxu0 %v12669_v7  ;;  %v15389_v6 = vld [vmem:[#allocation3 + $0x3dc] sm:$0xf0] }
 0x319   : > { %v13690_v1 = vld [vmem:[#allocation3 + $0x19d8] sm:$0xf0] }
 0x31a   : > { %v16212_v2 = vld [vmem:[#allocation3 + $0x1d9c] sm:$0xf]  ;;  %v13693_v9 = vor.u32 %v16084_v0, %v13690_v1  ;;  %7503 = vmatpush.bf16.msrb.mxu1 %v13181_v8  ;;  %v11392_v0 = vld [vmem:[#allocation3 + $0x7a0] sm:$0xf] }
 0x31b   : > { %v14202_v4 = vld [vmem:[#allocation3 + $0x1dd8] sm:$0xf0] }
 0x31c   : > { %v15812_v10 = vld [vmem:[#allocation3 + $0x111c] sm:$0xf]  ;;  %v14205_v14 = vor.u32 %v16212_v2, %v14202_v4  ;;  %7516 = vmatpush.bf16.msrb.mxu2 %v13693_v9  ;;  %v15517_v2 = vld [vmem:[#allocation3 + $0x7dc] sm:$0xf0] }
 0x31d   : > { %v12602_v11 = vld [vmem:[#allocation3 + $0x1158] sm:$0xf0]  ;;  %v11904_v4 = vld [vmem:[#allocation3 + $0xba0] sm:$0xf]  ;;  %v11393_v13 = vor.u32 %v15517_v2, %v11392_v0  ;;  %v7288_v0 = vadd.f32 %v7287_v62, %v17138_v29 }
 0x31e   : > { %v15940_v12 = vld [vmem:[#allocation3 + $0x151c] sm:$0xf]  ;;  %v12605_v28 = vor.u32 %v15812_v10, %v12602_v11  ;;  %7529 = vmatpush.bf16.msrb.mxu3 %v14205_v14  ;;  %v12416_v9 = vld [vmem:[#allocation3 + $0xfa0] sm:$0xf]  ;;  %v11905_v14 = vor.u32 %v15645_v5, %v11904_v4 }
 0x31f   : > { %v13114_v15 = vld [vmem:[#allocation3 + $0x1558] sm:$0xf0]  ;;  %v15773_v10 = vld [vmem:[#allocation3 + $0xfdc] sm:$0xf0] }
 0x320   : > { %v16068_v16 = vld [vmem:[#allocation3 + $0x191c] sm:$0xf]  ;;  %v13117_v31 = vor.u32 %v15940_v12, %v13114_v15  ;;  %7491 = vmatpush.bf16.msrb.mxu0 %v12605_v28  ;;  %v10881_v12 = vor.u32 %v15389_v6, %v10880_v21  ;;  %v10816_v15 = vld [vmem:[#allocation3 + $0x320] sm:$0xf]  ;;  %v12417_v23 = vor.u32 %v15773_v10, %v12416_v9 }
 0x321   : > { %v13626_v17 = vld [vmem:[#allocation3 + $0x1958] sm:$0xf0]  ;;  %v12352_v28 = vld [vmem:[#allocation3 + $0xf20] sm:$0xf] }
 0x322   : > { %v16196_v25 = vld [vmem:[#allocation3 + $0x1d1c] sm:$0xf]  ;;  %v13629_v3 = vor.u32 %v16068_v16, %v13626_v17  ;;  %7504 = vmatpush.bf16.msrb.mxu1 %v13117_v31  ;;  %v15373_v16 = vld [vmem:[#allocation3 + $0x35c] sm:$0xf0] }
 0x323   : > { %v14138_v27 = vld [vmem:[#allocation3 + $0x1d58] sm:$0xf0]  ;;  %v11328_v17 = vld [vmem:[#allocation3 + $0x720] sm:$0xf]  ;;  %v10817_v31 = vor.u32 %v15373_v16, %v10816_v15 }
 0x324   : > { %v15796_v32 = vld [vmem:[#allocation3 + $0x109c] sm:$0xf]  ;;  %v14141_v51 = vor.u32 %v16196_v25, %v14138_v27  ;;  %7517 = vmatpush.bf16.msrb.mxu2 %v13629_v3  ;;  %v11840_v25 = vld [vmem:[#allocation3 + $0xb20] sm:$0xf]  ;;  %v11329_v3 = vor.u32 %v15501_v26, %v11328_v17  ;;  %v7313_v17 = vpop.f32.mrf.mxu2 }
 0x325   : > { %v12538_v33 = vld [vmem:[#allocation3 + $0x10d8] sm:$0xf0]  ;;  %v15629_v27 = vld [vmem:[#allocation3 + $0xb5c] sm:$0xf0] }
 0x326   : > { %v15924_v36 = vld [vmem:[#allocation3 + $0x149c] sm:$0xf]  ;;  %v12541_v43 = vor.u32 %v15796_v32, %v12538_v33  ;;  %7530 = vmatpush.bf16.msrb.mxu3 %v14141_v51  ;;  %v11841_v32 = vor.u32 %v15629_v27, %v11840_v25  ;;  %v10752_v33 = vld [vmem:[#allocation3 + $0x2a0] sm:$0xf]  ;;  %v12353_v51 = vor.u32 %v15757_v30, %v12352_v28  ;;  %v7326_v28 = vpop.f32.mrf.mxu3 }
 0x327   : > { %v13050_v39 = vld [vmem:[#allocation3 + $0x14d8] sm:$0xf0]  ;;  %v10624_v2 = vld [vmem:[#allocation3 + $0x1a0] sm:$0xf] }
 0x328   : > { %v16052_v40 = vld [vmem:[#allocation3 + $0x189c] sm:$0xf]  ;;  %v13053_v47 = vor.u32 %v15924_v36, %v13050_v39  ;;  %7492 = vmatpush.bf16.msrb.mxu0 %v12541_v43  ;;  %v15357_v36 = vld [vmem:[#allocation3 + $0x2dc] sm:$0xf0] }
 0x329   : > { %v13562_v52 = vld [vmem:[#allocation3 + $0x18d8] sm:$0xf0]  ;;  %v15485_v39 = vld [vmem:[#allocation3 + $0x6dc] sm:$0xf0]  ;;  %v10753_v43 = vor.u32 %v15357_v36, %v10752_v33 }
 0x32a   : > { %v16180_v24 = vld [vmem:[#allocation3 + $0x1c9c] sm:$0xf]  ;;  %v13565_v48 = vor.u32 %v16052_v40, %v13562_v52  ;;  %7505 = vmatpush.bf16.msrb.mxu1 %v13053_v47  ;;  %v11776_v40 = vld [vmem:[#allocation3 + $0xaa0] sm:$0xf] }
 0x32b   : > { %v14074_v53 = vld [vmem:[#allocation3 + $0x1cd8] sm:$0xf0]  ;;  %v15613_v52 = vld [vmem:[#allocation3 + $0xadc] sm:$0xf0] }
 0x32c   : > { %v15780_v45 = vld [vmem:[#allocation3 + $0x101c] sm:$0xf]  ;;  %v14077_v57 = vor.u32 %v16180_v24, %v14074_v53  ;;  %7518 = vmatpush.bf16.msrb.mxu2 %v13565_v48  ;;  %v12288_v24 = vld [vmem:[#allocation3 + $0xea0] sm:$0xf] }
 0x32d   : > { %v12474_v46 = vld [vmem:[#allocation3 + $0x1058] sm:$0xf0]  ;;  %v15741_v53 = vld [vmem:[#allocation3 + $0xedc] sm:$0xf0] }
 0x32e   : > { %v15908_v60 = vld [vmem:[#allocation3 + $0x141c] sm:$0xf]  ;;  %v12477_v1 = vor.u32 %v15780_v45, %v12474_v46  ;;  %7531 = vmatpush.bf16.msrb.mxu3 %v14077_v57  ;;  %v11265_v45 = vor.u32 %v15485_v39, %v11264_v37  ;;  %v11777_v46 = vor.u32 %v15613_v52, %v11776_v40  ;;  %v10688_v47 = vld [vmem:[#allocation3 + $0x220] sm:$0xf]  ;;  %v7289_v39 = vpop.f32.mrf.mxu0 }
 0x32f   : > { %v12986_v50 = vld [vmem:[#allocation3 + $0x1458] sm:$0xf0]  ;;  %v15341_v48 = vld [vmem:[#allocation3 + $0x25c] sm:$0xf0] }
 0x330   : > { %v16036_v54 = vld [vmem:[#allocation3 + $0x181c] sm:$0xf]  ;;  %v12989_v7 = vor.u32 %v15908_v60, %v12986_v50  ;;  %7493 = vmatpush.bf16.msrb.mxu0 %v12477_v1  ;;  %v11200_v60 = vld [vmem:[#allocation3 + $0x620] sm:$0xf]  ;;  %v12289_v50 = vor.u32 %v15741_v53, %v12288_v24  ;;  %v7300_v1 = vpop.f32.mrf.mxu1 }
 0x331   : > { %v13498_v58 = vld [vmem:[#allocation3 + $0x1858] sm:$0xf0]  ;;  %v15597_v57 = vld [vmem:[#allocation3 + $0xa5c] sm:$0xf0] }
 0x332   : > { %v16164_v59 = vld [vmem:[#allocation3 + $0x1c1c] sm:$0xf]  ;;  %v13501_v8 = vor.u32 %v16036_v54, %v13498_v58  ;;  %7506 = vmatpush.bf16.msrb.mxu1 %v12989_v7  ;;  %v15469_v54 = vld [vmem:[#allocation3 + $0x65c] sm:$0xf0]  ;;  %v11713_v6 = vor.u32 %v15597_v57, %v11712_v55 }
 0x333   : > { %v14010_v61 = vld [vmem:[#allocation3 + $0x1c58] sm:$0xf0]  ;;  %7494 = vmatmul.bf16.vlgmr.msrb.gmra.mxu0 %v17036_v41  ;;  %v12224_v58 = vld [vmem:[#allocation3 + $0xe20] sm:$0xf]  ;;  %v11201_v21 = vor.u32 %v15469_v54, %v11200_v60 }
 0x334   : > { %v14013_v11 = vor.u32 %v16164_v59, %v14010_v61  ;;  %7519 = vmatpush.bf16.msrb.mxu2 %v13501_v8  ;;  %7538 = vmatpush.bf16.msra.mxu0 %v10881_v12  ;;  %v15725_v59 = vld [vmem:[#allocation3 + $0xe5c] sm:$0xf0]  ;;  %v10689_v61 = vor.u32 %v15341_v48, %v10688_v47 }
 0x335   : > { %7507 = vmatmul.bf16.vlgmr.msrb.gmra.mxu1 %v17040_v44  ;;  %v15325_v4 = vld [vmem:[#allocation3 + $0x1dc] sm:$0xf0]  ;;  %v12225_v7 = vor.u32 %v15725_v59, %v12224_v58 }
 0x336   : > { %7532 = vmatpush.bf16.msrb.mxu3 %v14013_v11  ;;  %7551 = vmatpush.bf16.msra.mxu1 %v11393_v13  ;;  %v11136_v5 = vld [vmem:[#allocation3 + $0x5a0] sm:$0xf]  ;;  %v7301_v11 = vadd.f32 %v7300_v1, %v7288_v0 }
 0x337   : > { %7520 = vmatmul.bf16.vlgmr.msrb.gmra.mxu2 %v17034_v38  ;;  %v15453_v8 = vld [vmem:[#allocation3 + $0x5dc] sm:$0xf0] }
 0x338   : > { %7564 = vmatpush.bf16.msra.mxu2 %v11905_v14  ;;  %7539 = vmatpush.bf16.msra.mxu0 %v10817_v31  ;;  %v11648_v9 = vld [vmem:[#allocation3 + $0x9a0] sm:$0xf]  ;;  %v10625_v14 = vor.u32 %v15325_v4, %v10624_v2  ;;  %v11137_v15 = vor.u32 %v15453_v8, %v11136_v5  ;;  %v7314_v27 = vadd.f32 %v7313_v17, %v7301_v11  ;;  %v7315_v2 = vpop.f32.mrf.mxu2 }
 0x339   : > { %7533 = vmatmul.bf16.vlgmr.msrb.gmra.mxu3 %v17038_v42  ;;  %v15581_v10 = vld [vmem:[#allocation3 + $0x9dc] sm:$0xf0] }
 0x33a   : > { %7577 = vmatpush.bf16.msra.mxu3 %v12417_v23  ;;  %7552 = vmatpush.bf16.msra.mxu1 %v11329_v3  ;;  %v12160_v12 = vld [vmem:[#allocation3 + $0xda0] sm:$0xf]  ;;  %v11649_v16 = vor.u32 %v15581_v10, %v11648_v9  ;;  %v7327_v36 = vadd.f32 %v7326_v28, %v7314_v27  ;;  %v7328_v9 = vpop.f32.mrf.mxu3 }
 0x33b   : > { %v15709_v13 = vld [vmem:[#allocation3 + $0xddc] sm:$0xf0] }
 0x33c   : > { %7565 = vmatpush.bf16.msra.mxu2 %v11841_v32  ;;  %7540 = vmatpush.bf16.msra.mxu0 %v10753_v43  ;;  %v10560_v29 = vld [vmem:[#allocation3 + $0x120] sm:$0xf]  ;;  %v12161_v25 = vor.u32 %v15709_v13, %v12160_v12  ;;  %v8375_v47 = vmax.f32 %v7327_v36, 0.0 }
 0x33d   : > { %v15309_v23 = vld [vmem:[#allocation3 + $0x15c] sm:$0xf0] }
 0x33e   : > { %7578 = vmatpush.bf16.msra.mxu3 %v12353_v51  ;;  %7553 = vmatpush.bf16.msra.mxu1 %v11265_v45  ;;  %v11072_v26 = vld [vmem:[#allocation3 + $0x520] sm:$0xf]  ;;  %v10561_v37 = vor.u32 %v15309_v23, %v10560_v29  ;;  %v7302_v45 = vpop.f32.mrf.mxu1 }
 0x33f   : > { %v15437_v30 = vld [vmem:[#allocation3 + $0x55c] sm:$0xf0] }
 0x340   : > { %7566 = vmatpush.bf16.msra.mxu2 %v11777_v46  ;;  %7541 = vmatpush.bf16.msra.mxu0 %v10689_v61  ;;  %v11584_v31 = vld [vmem:[#allocation3 + $0x920] sm:$0xf]  ;;  %v11073_v40 = vor.u32 %v15437_v30, %v11072_v26  ;;  %v8371_v46 = vmax.f32 %v17082_v49, 0.0 }
 0x341   : > { %v15565_v3 = vld [vmem:[#allocation3 + $0x95c] sm:$0xf0] }
 0x342   : > { %7579 = vmatpush.bf16.msra.mxu3 %v12289_v50  ;;  %7554 = vmatpush.bf16.msra.mxu1 %v11201_v21  ;;  %v12096_v32 = vld [vmem:[#allocation3 + $0xd20] sm:$0xf]  ;;  %v11585_v52 = vor.u32 %v15565_v3, %v11584_v31  ;;  %v17146_v57 = vadd.f32 %v8375_v47, %v8371_v46  ;;  %v17148_v58 = vpack.c.bf16 %v8375_v47, %v8371_v46 }
 0x343   : > { %v15693_v33 = vld [vmem:[#allocation3 + $0xd5c] sm:$0xf0] }
 0x344   : > { %7567 = vmatpush.bf16.msra.mxu2 %v11713_v6  ;;  %7542 = vmatpush.bf16.msra.mxu0 %v10625_v14  ;;  %v10496_v51 = vld [vmem:[#allocation3 + $0xa0] sm:$0xf]  ;;  %v12097_v48 = vor.u32 %v15693_v33, %v12096_v32 }
 0x345   : > { %v15293_v24 = vld [vmem:[#allocation3 + $0xdc] sm:$0xf0] }
 0x346   : > { %7580 = vmatpush.bf16.msra.mxu3 %v12225_v7  ;;  %7555 = vmatpush.bf16.msra.mxu1 %v11137_v15  ;;  %v11008_v53 = vld [vmem:[#allocation3 + $0x4a0] sm:$0xf]  ;;  %v10497_v59 = vor.u32 %v15293_v24, %v10496_v51 }
 0x347   : > { %v15421_v43 = vld [vmem:[#allocation3 + $0x4dc] sm:$0xf0] }
 0x348   : > { %7568 = vmatpush.bf16.msra.mxu2 %v11649_v16  ;;  %v11520_v60 = vld [vmem:[#allocation3 + $0x8a0] sm:$0xf]  ;;  %7543 = vmatpush.bf16.msra.mxu0 %v10561_v37  ;;  %v11009_v21 = vor.u32 %v15421_v43, %v11008_v53 }
 0x349   : > { %v15549_v50 = vld [vmem:[#allocation3 + $0x8dc] sm:$0xf0] }
 0x34a   : > { %7581 = vmatpush.bf16.msra.mxu3 %v12161_v25  ;;  %v12032_v54 = vld [vmem:[#allocation3 + $0xca0] sm:$0xf]  ;;  %7556 = vmatpush.bf16.msra.mxu1 %v11073_v40  ;;  %v11521_v6 = vor.u32 %v15549_v50, %v11520_v60 }
 0x34b   : > { %v15677_v55 = vld [vmem:[#allocation3 + $0xcdc] sm:$0xf0] }
 0x34c   : > { %v10432_v61 = vld [vmem:[#allocation3 + $0x20] sm:$0xf]  ;;  %7569 = vmatpush.bf16.msra.mxu2 %v11585_v52  ;;  %v12033_v4 = vor.u32 %v15677_v55, %v12032_v54  ;;  %7544 = vmatpush.bf16.msra.mxu0 %v10497_v59 }
 0x34d   : > { %v15277_v62 = vld [vmem:[#allocation3 + $0x5c] sm:$0xf0] }
 0x34e   : > { %v10944_v49 = vld [vmem:[#allocation3 + $0x420] sm:$0xf]  ;;  %7582 = vmatpush.bf16.msra.mxu3 %v12097_v48  ;;  %v10433_v13 = vor.u32 %v15277_v62, %v10432_v61  ;;  %7557 = vmatpush.bf16.msra.mxu1 %v11009_v21 }
 0x34f   : > { %v15405_v0 = vld [vmem:[#allocation3 + $0x45c] sm:$0xf0] }
 0x350   : > { %v11456_v1 = vld [vmem:[#allocation3 + $0x820] sm:$0xf]  ;;  %7570 = vmatpush.bf16.msra.mxu2 %v11521_v6  ;;  %v10945_v17 = vor.u32 %v15405_v0, %v10944_v49  ;;  %7545 = vmatpush.bf16.msra.mxu0 %v10433_v13 }
 0x351   : > { %v15533_v5 = vld [vmem:[#allocation3 + $0x85c] sm:$0xf0] }
 0x352   : > { %v11968_v7 = vld [vmem:[#allocation3 + $0xc20] sm:$0xf]  ;;  %v11457_v29 = vor.u32 %v15533_v5, %v11456_v1  ;;  %7583 = vmatpush.bf16.msra.mxu3 %v12033_v4  ;;  %7558 = vmatpush.bf16.msra.mxu1 %v10945_v17 }
 0x353   : > { %v15661_v8 = vld [vmem:[#allocation3 + $0xc5c] sm:$0xf0]  ;;  %7546 = vmatmul.bf16.vlgmr.msra.gmra.mxu0 %v17022_v19 }
 0x354   : > { %v12928_v10 = vld [vmem:[#allocation3 + $0x13a0] sm:$0xf]  ;;  %v11969_v25 = vor.u32 %v15661_v8, %v11968_v7  ;;  %7571 = vmatpush.bf16.msra.mxu2 %v11457_v29  ;;  %v7352_v29 = vpop.f32.mrf.mxu1 }
 0x355   : > { %v15901_v11 = vld [vmem:[#allocation3 + $0x13dc] sm:$0xf0]  ;;  %7559 = vmatmul.bf16.vlgmr.msra.gmra.mxu1 %v17026_v22 }
 0x356   : > { %v13440_v12 = vld [vmem:[#allocation3 + $0x17a0] sm:$0xf]  ;;  %v12929_v27 = vor.u32 %v15901_v11, %v12928_v10  ;;  %7584 = vmatpush.bf16.msra.mxu3 %v11969_v25  ;;  %v7339_v11 = vpop.f32.mrf.mxu0 }
 0x357   : > { %v16029_v14 = vld [vmem:[#allocation3 + $0x17dc] sm:$0xf0]  ;;  %7572 = vmatmul.bf16.vlgmr.msra.gmra.mxu2 %v17020_v18 }
 0x358   : > { %v13952_v15 = vld [vmem:[#allocation3 + $0x1ba0] sm:$0xf]  ;;  %v13441_v28 = vor.u32 %v16029_v14, %v13440_v12  ;;  %7590 = vmatpush.bf16.msrb.mxu0 %v12929_v27 }
 0x359   : > { %v16157_v16 = vld [vmem:[#allocation3 + $0x1bdc] sm:$0xf0]  ;;  %7585 = vmatmul.bf16.vlgmr.msra.gmra.mxu3 %v17024_v20 }
 0x35a   : > { %v14464_v23 = vld [vmem:[#allocation3 + $0x1fa0] sm:$0xf]  ;;  %v13953_v30 = vor.u32 %v16157_v16, %v13952_v15  ;;  %7603 = vmatpush.bf16.msrb.mxu1 %v13441_v28 }
 0x35b   : > { %v16285_v26 = vld [vmem:[#allocation3 + $0x1fdc] sm:$0xf0] }
 0x35c   : > { %v12864_v31 = vld [vmem:[#allocation3 + $0x1320] sm:$0xf]  ;;  %v14465_v33 = vor.u32 %v16285_v26, %v14464_v23  ;;  %7616 = vmatpush.bf16.msrb.mxu2 %v13953_v30 }
 0x35d   : > { %v15885_v3 = vld [vmem:[#allocation3 + $0x135c] sm:$0xf0] }
 0x35e   : > { %v13376_v32 = vld [vmem:[#allocation3 + $0x1720] sm:$0xf]  ;;  %v12865_v52 = vor.u32 %v15885_v3, %v12864_v31  ;;  %7629 = vmatpush.bf16.msrb.mxu3 %v14465_v33 }
 0x35f   : > { %v16013_v36 = vld [vmem:[#allocation3 + $0x175c] sm:$0xf0] }
 0x360   : > { %v13888_v37 = vld [vmem:[#allocation3 + $0x1b20] sm:$0xf]  ;;  %v13377_v24 = vor.u32 %v16013_v36, %v13376_v32  ;;  %7591 = vmatpush.bf16.msrb.mxu0 %v12865_v52 }
 0x361   : > { %v16141_v51 = vld [vmem:[#allocation3 + $0x1b5c] sm:$0xf0] }
 0x362   : > { %v14400_v39 = vld [vmem:[#allocation3 + $0x1f20] sm:$0xf]  ;;  %v13889_v53 = vor.u32 %v16141_v51, %v13888_v37  ;;  %7604 = vmatpush.bf16.msrb.mxu1 %v13377_v24 }
 0x363   : > { %v16269_v40 = vld [vmem:[#allocation3 + $0x1f5c] sm:$0xf0] }
 0x364   : > { %v12800_v43 = vld [vmem:[#allocation3 + $0x12a0] sm:$0xf]  ;;  %v14401_v47 = vor.u32 %v16269_v40, %v14400_v39  ;;  %7617 = vmatpush.bf16.msrb.mxu2 %v13889_v53  ;;  %v7365_v39 = vpop.f32.mrf.mxu2 }
 0x365   : > { %v15869_v45 = vld [vmem:[#allocation3 + $0x12dc] sm:$0xf0] }
 0x366   : > { %v13312_v46 = vld [vmem:[#allocation3 + $0x16a0] sm:$0xf]  ;;  %v12801_v59 = vor.u32 %v15869_v45, %v12800_v43  ;;  %7630 = vmatpush.bf16.msrb.mxu3 %v14401_v47  ;;  %v7378_v45 = vpop.f32.mrf.mxu3 }
 0x367   : > { %v15997_v48 = vld [vmem:[#allocation3 + $0x16dc] sm:$0xf0] }
 0x368   : > { %v13824_v60 = vld [vmem:[#allocation3 + $0x1aa0] sm:$0xf]  ;;  %v13313_v62 = vor.u32 %v15997_v48, %v13312_v46  ;;  %7592 = vmatpush.bf16.msrb.mxu0 %v12801_v59 }
 0x369   : > { %v16125_v50 = vld [vmem:[#allocation3 + $0x1adc] sm:$0xf0] }
 0x36a   : > { %v14336_v54 = vld [vmem:[#allocation3 + $0x1ea0] sm:$0xf]  ;;  %v13825_v21 = vor.u32 %v16125_v50, %v13824_v60  ;;  %7605 = vmatpush.bf16.msrb.mxu1 %v13313_v62  ;;  %v7341_v50 = vpop.f32.mrf.mxu0 }
 0x36b   : > { %v16253_v55 = vld [vmem:[#allocation3 + $0x1edc] sm:$0xf0]  ;;  %v11842_v50 = vld [vmem:[#allocation3 + $0xb60] sm:$0xf0] }
 0x36c   : > { %v12736_v61 = vld [vmem:[#allocation3 + $0x1220] sm:$0xf]  ;;  %v14337_v2 = vor.u32 %v16253_v55, %v14336_v54  ;;  %7618 = vmatpush.bf16.msrb.mxu2 %v13825_v21  ;;  %v7354_v21 = vpop.f32.mrf.mxu1 }
 0x36d   : > { %v15853_v6 = vld [vmem:[#allocation3 + $0x125c] sm:$0xf0]  ;;  %v15349_v21 = vld [vmem:[#allocation3 + $0x2a4] sm:$0xf] }
 0x36e   : > { %v13248_v49 = vld [vmem:[#allocation3 + $0x1620] sm:$0xf]  ;;  %v12737_v10 = vor.u32 %v15853_v6, %v12736_v61  ;;  %7631 = vmatpush.bf16.msrb.mxu3 %v14337_v2 }
 0x36f   : > { %v17154_v0 = vld [vmem:[#allocation5] sm:$0xff] }
 0x370   : > { %v1532_v1 = vperm.slane %v17154_v0, 6  ;;  %v15981_v4 = vld [vmem:[#allocation3 + $0x165c] sm:$0xf0]  ;;  %7593 = vmatpush.bf16.msrb.mxu0 %v12737_v10 }
 0x371   : > { %v13760_v5 = vld [vmem:[#allocation3 + $0x1a20] sm:$0xf]  ;;  %v13249_v12 = vor.u32 %v15981_v4, %v13248_v49 }
 0x372   : > { %v16109_v7 = vld [vmem:[#allocation3 + $0x1a5c] sm:$0xf0]  ;;  %v7340_v17 = vadd.f32 %v7339_v11, %v1532_v1 }
 0x373   : > { %v14272_v8 = vld [vmem:[#allocation3 + $0x1e20] sm:$0xf]  ;;  %v13761_v13 = vor.u32 %v16109_v7, %v13760_v5  ;;  %7606 = vmatpush.bf16.msrb.mxu1 %v13249_v12 }
 0x374   : > { %v16237_v9 = vld [vmem:[#allocation3 + $0x1e5c] sm:$0xf0]  ;;  %v7353_v31 = vadd.f32 %v7352_v29, %v7340_v17 }
 0x375   : > { %v12672_v14 = vld [vmem:[#allocation3 + $0x11a0] sm:$0xf]  ;;  %v14273_v23 = vor.u32 %v16237_v9, %v14272_v8  ;;  %7619 = vmatpush.bf16.msrb.mxu2 %v13761_v13 }
 0x376   : > { %v15837_v15 = vld [vmem:[#allocation3 + $0x11dc] sm:$0xf0]  ;;  %v7366_v43 = vadd.f32 %v7365_v39, %v7353_v31  ;;  %v11394_v31 = vld [vmem:[#allocation3 + $0x7e0] sm:$0xf0] }
 0x377   : > { %v13184_v16 = vld [vmem:[#allocation3 + $0x15a0] sm:$0xf]  ;;  %v12673_v3 = vor.u32 %v15837_v15, %v12672_v14  ;;  %7632 = vmatpush.bf16.msrb.mxu3 %v14273_v23  ;;  %v7367_v15 = vpop.f32.mrf.mxu2 }
 0x378   : > { %v15965_v26 = vld [vmem:[#allocation3 + $0x15dc] sm:$0xf0]  ;;  %v17157_v60 = vadd.f32 %v7378_v45, %v7366_v43  ;;  %v10818_v43 = vld [vmem:[#allocation3 + $0x360] sm:$0xf0] }
 0x379   : > { %v13696_v25 = vld [vmem:[#allocation3 + $0x19a0] sm:$0xf]  ;;  %v13185_v32 = vor.u32 %v15965_v26, %v13184_v16  ;;  %7594 = vmatpush.bf16.msrb.mxu0 %v12673_v3  ;;  %v7380_v26 = vpop.f32.mrf.mxu3  ;;  %v15637_v3 = vld [vmem:[#allocation3 + $0xba4] sm:$0xf] }
 0x37a   : > { %v16093_v27 = vld [vmem:[#allocation3 + $0x19dc] sm:$0xf0]  ;;  %v15493_v45 = vld [vmem:[#allocation3 + $0x724] sm:$0xf] }
 0x37b   : > { %v14208_v28 = vld [vmem:[#allocation3 + $0x1da0] sm:$0xf]  ;;  %v13697_v33 = vor.u32 %v16093_v27, %v13696_v25  ;;  %7607 = vmatpush.bf16.msrb.mxu1 %v13185_v32  ;;  %v15381_v25 = vld [vmem:[#allocation3 + $0x3a4] sm:$0xf] }
 0x37c   : > { %v16221_v30 = vld [vmem:[#allocation3 + $0x1ddc] sm:$0xf0]  ;;  %v10882_v27 = vld [vmem:[#allocation3 + $0x3e0] sm:$0xf0] }
 0x37d   : > { %v12608_v36 = vld [vmem:[#allocation3 + $0x1120] sm:$0xf]  ;;  %v14209_v40 = vor.u32 %v16221_v30, %v14208_v28  ;;  %7620 = vmatpush.bf16.msrb.mxu2 %v13697_v33  ;;  %v15509_v28 = vld [vmem:[#allocation3 + $0x7a4] sm:$0xf] }
 0x37e   : > { %v15821_v37 = vld [vmem:[#allocation3 + $0x115c] sm:$0xf0]  ;;  %v11906_v32 = vld [vmem:[#allocation3 + $0xbe0] sm:$0xf0] }
 0x37f   : > { %v13120_v51 = vld [vmem:[#allocation3 + $0x1520] sm:$0xf]  ;;  %v12609_v48 = vor.u32 %v15821_v37, %v12608_v36  ;;  %7633 = vmatpush.bf16.msrb.mxu3 %v14209_v40  ;;  %v15765_v37 = vld [vmem:[#allocation3 + $0xfa4] sm:$0xf]  ;;  %v10885_v40 = vor.u32 %v15381_v25, %v10882_v27  ;;  %v7391_v27 = vpop.f32.mrf.mxu0 }
 0x380   : > { %v15949_v52 = vld [vmem:[#allocation3 + $0x155c] sm:$0xf0]  ;;  %v12226_v26 = vld [vmem:[#allocation3 + $0xe60] sm:$0xf0] }
 0x381   : > { %v13632_v24 = vld [vmem:[#allocation3 + $0x1920] sm:$0xf]  ;;  %v13121_v54 = vor.u32 %v15949_v52, %v13120_v51  ;;  %7595 = vmatpush.bf16.msrb.mxu0 %v12609_v48  ;;  %v12418_v51 = vld [vmem:[#allocation3 + $0xfe0] sm:$0xf0]  ;;  %v11397_v52 = vor.u32 %v15509_v28, %v11394_v31  ;;  %v7392_v31 = vadd.f32 %v7391_v27, %v17157_v60 }
 0x382   : > { %v16077_v53 = vld [vmem:[#allocation3 + $0x195c] sm:$0xf0]  ;;  %v15621_v48 = vld [vmem:[#allocation3 + $0xb24] sm:$0xf] }
 0x383   : > { %v14144_v46 = vld [vmem:[#allocation3 + $0x1d20] sm:$0xf]  ;;  %v13633_v55 = vor.u32 %v16077_v53, %v13632_v24  ;;  %7608 = vmatpush.bf16.msrb.mxu1 %v13121_v54  ;;  %v11909_v24 = vor.u32 %v15637_v3, %v11906_v32  ;;  %v15365_v53 = vld [vmem:[#allocation3 + $0x324] sm:$0xf]  ;;  %v7404_v3 = vpop.f32.mrf.mxu1 }
 0x384   : > { %v16205_v47 = vld [vmem:[#allocation3 + $0x1d5c] sm:$0xf0]  ;;  %v15749_v54 = vld [vmem:[#allocation3 + $0xf24] sm:$0xf] }
 0x385   : > { %v12544_v59 = vld [vmem:[#allocation3 + $0x10a0] sm:$0xf]  ;;  %v14145_v6 = vor.u32 %v16205_v47, %v14144_v46  ;;  %7621 = vmatpush.bf16.msrb.mxu2 %v13633_v55  ;;  %v12421_v46 = vor.u32 %v15765_v37, %v12418_v51  ;;  %v11330_v47 = vld [vmem:[#allocation3 + $0x760] sm:$0xf0] }
 0x386   : > { %v15805_v61 = vld [vmem:[#allocation3 + $0x10dc] sm:$0xf0]  ;;  %v12354_v55 = vld [vmem:[#allocation3 + $0xf60] sm:$0xf0] }
 0x387   : > { %v13056_v62 = vld [vmem:[#allocation3 + $0x14a0] sm:$0xf]  ;;  %v12545_v7 = vor.u32 %v15805_v61, %v12544_v59  ;;  %7634 = vmatpush.bf16.msrb.mxu3 %v14145_v6  ;;  %v10821_v59 = vor.u32 %v15365_v53, %v10818_v43  ;;  %v11333_v61 = vor.u32 %v15493_v45, %v11330_v47  ;;  %v10754_v6 = vld [vmem:[#allocation3 + $0x2e0] sm:$0xf0]  ;;  %v7417_v47 = vpop.f32.mrf.mxu2 }
 0x388   : > { %v15933_v49 = vld [vmem:[#allocation3 + $0x14dc] sm:$0xf0]  ;;  %v15317_v32 = vld [vmem:[#allocation3 + $0x1a4] sm:$0xf] }
 0x389   : > { %v13568_v1 = vld [vmem:[#allocation3 + $0x18a0] sm:$0xf]  ;;  %v13057_v10 = vor.u32 %v15933_v49, %v13056_v62  ;;  %7596 = vmatpush.bf16.msrb.mxu0 %v12545_v7  ;;  %v11845_v62 = vor.u32 %v15621_v48, %v11842_v50  ;;  %v15477_v49 = vld [vmem:[#allocation3 + $0x6a4] sm:$0xf] }
 0x38a   : > { %v16061_v2 = vld [vmem:[#allocation3 + $0x18dc] sm:$0xf0]  ;;  %v15733_v7 = vld [vmem:[#allocation3 + $0xea4] sm:$0xf] }
 0x38b   : > { %v14080_v4 = vld [vmem:[#allocation3 + $0x1ca0] sm:$0xf]  ;;  %v13569_v11 = vor.u32 %v16061_v2, %v13568_v1  ;;  %7609 = vmatpush.bf16.msrb.mxu1 %v13057_v10  ;;  %v12357_v1 = vor.u32 %v15749_v54, %v12354_v55  ;;  %v11266_v2 = vld [vmem:[#allocation3 + $0x6e0] sm:$0xf0] }
 0x38c   : > { %v16189_v5 = vld [vmem:[#allocation3 + $0x1cdc] sm:$0xf0]  ;;  %v11269_v10 = vor.u32 %v15477_v49, %v11266_v2  ;;  %v11138_v51 = vld [vmem:[#allocation3 + $0x5e0] sm:$0xf0] }
 0x38d   : > { %v12480_v8 = vld [vmem:[#allocation3 + $0x1020] sm:$0xf]  ;;  %v14081_v16 = vor.u32 %v16189_v5, %v14080_v4  ;;  %7622 = vmatpush.bf16.msrb.mxu2 %v13569_v11  ;;  %v15605_v4 = vld [vmem:[#allocation3 + $0xaa4] sm:$0xf] }
 0x38e   : > { %v15789_v9 = vld [vmem:[#allocation3 + $0x105c] sm:$0xf0]  ;;  %v11778_v5 = vld [vmem:[#allocation3 + $0xae0] sm:$0xf0] }
 0x38f   : > { %v12992_v12 = vld [vmem:[#allocation3 + $0x1420] sm:$0xf]  ;;  %v12481_v30 = vor.u32 %v15789_v9, %v12480_v8  ;;  %7635 = vmatpush.bf16.msrb.mxu3 %v14081_v16  ;;  %v12290_v8 = vld [vmem:[#allocation3 + $0xee0] sm:$0xf0]  ;;  %v10757_v9 = vor.u32 %v15349_v21, %v10754_v6  ;;  %v11781_v11 = vor.u32 %v15605_v4, %v11778_v5  ;;  %v7393_v5 = vpop.f32.mrf.mxu0 }
 0x390   : > { %v15917_v13 = vld [vmem:[#allocation3 + $0x145c] sm:$0xf0]  ;;  %v12293_v15 = vor.u32 %v15733_v7, %v12290_v8  ;;  %v11202_v16 = vld [vmem:[#allocation3 + $0x660] sm:$0xf0] }
 0x391   : > { %v13504_v14 = vld [vmem:[#allocation3 + $0x1820] sm:$0xf]  ;;  %v12993_v33 = vor.u32 %v15917_v13, %v12992_v12  ;;  %7597 = vmatpush.bf16.msrb.mxu0 %v12481_v30  ;;  %v15333_v12 = vld [vmem:[#allocation3 + $0x224] sm:$0xf] }
 0x392   : > { %v16045_v17 = vld [vmem:[#allocation3 + $0x185c] sm:$0xf0]  ;;  %v10690_v13 = vld [vmem:[#allocation3 + $0x260] sm:$0xf0] }
 0x393   : > { %v14016_v29 = vld [vmem:[#allocation3 + $0x1c20] sm:$0xf]  ;;  %v13505_v36 = vor.u32 %v16045_v17, %v13504_v14  ;;  %7610 = vmatpush.bf16.msrb.mxu1 %v12993_v33  ;;  %v15461_v14 = vld [vmem:[#allocation3 + $0x624] sm:$0xf]  ;;  %v10693_v25 = vor.u32 %v15333_v12, %v10690_v13  ;;  %v7406_v12 = vpop.f32.mrf.mxu1  ;;  %v8372_v13 = vmax.f32 %v17098_v56, 0.0 }
 0x394   : > { %v16173_v23 = vld [vmem:[#allocation3 + $0x1c5c] sm:$0xf0]  ;;  %7598 = vmatmul.bf16.vlgmr.msrb.gmra.mxu0 %v17036_v41  ;;  %v15589_v17 = vld [vmem:[#allocation3 + $0xa24] sm:$0xf]  ;;  %v11205_v28 = vor.u32 %v15461_v14, %v11202_v16 }
 0x395   : > { %v14017_v39 = vor.u32 %v16173_v23, %v14016_v29  ;;  %7623 = vmatpush.bf16.msrb.mxu2 %v13505_v36  ;;  %7642 = vmatpush.bf16.msra.mxu0 %v10885_v40  ;;  %v11714_v29 = vld [vmem:[#allocation3 + $0xa60] sm:$0xf0] }
 0x396   : > { %7611 = vmatmul.bf16.vlgmr.msrb.gmra.mxu1 %v17040_v44  ;;  %v15717_v23 = vld [vmem:[#allocation3 + $0xe24] sm:$0xf]  ;;  %v11717_v30 = vor.u32 %v15589_v17, %v11714_v29 }
 0x397   : > { %7636 = vmatpush.bf16.msrb.mxu3 %v14017_v39  ;;  %7655 = vmatpush.bf16.msra.mxu1 %v11397_v52  ;;  %v10626_v33 = vld [vmem:[#allocation3 + $0x1e0] sm:$0xf0]  ;;  %v12229_v37 = vor.u32 %v15717_v23, %v12226_v26  ;;  %v7405_v52 = vadd.f32 %v7404_v3, %v7392_v31 }
 0x398   : > { %7624 = vmatmul.bf16.vlgmr.msrb.gmra.mxu2 %v17034_v38  ;;  %v15445_v36 = vld [vmem:[#allocation3 + $0x5a4] sm:$0xf]  ;;  %v10629_v43 = vor.u32 %v15317_v32, %v10626_v33 }
 0x399   : > { %7668 = vmatpush.bf16.msra.mxu2 %v11909_v24  ;;  %7643 = vmatpush.bf16.msra.mxu0 %v10821_v59  ;;  %v15573_v39 = vld [vmem:[#allocation3 + $0x9a4] sm:$0xf]  ;;  %v11141_v45 = vor.u32 %v15445_v36, %v11138_v51  ;;  %v7418_v55 = vadd.f32 %v7417_v47, %v7405_v52  ;;  %v7430_v59 = vpop.f32.mrf.mxu3  ;;  %v7419_v36 = vpop.f32.mrf.mxu2 }
 0x39a   : > { %7637 = vmatmul.bf16.vlgmr.msrb.gmra.mxu3 %v17038_v42  ;;  %v11650_v40 = vld [vmem:[#allocation3 + $0x9e0] sm:$0xf0]  ;;  %v1533_v36 = vperm.slane %v17154_v0, 7 }
 0x39b   : > { %7681 = vmatpush.bf16.msra.mxu3 %v12421_v46  ;;  %7656 = vmatpush.bf16.msra.mxu1 %v11333_v61  ;;  %v15701_v24 = vld [vmem:[#allocation3 + $0xda4] sm:$0xf]  ;;  %v11653_v46 = vor.u32 %v15573_v39, %v11650_v40 }
 0x39c   : > { %v12162_v53 = vld [vmem:[#allocation3 + $0xde0] sm:$0xf0] }
 0x39d   : > { %7669 = vmatpush.bf16.msra.mxu2 %v11845_v62  ;;  %7644 = vmatpush.bf16.msra.mxu0 %v10757_v9  ;;  %v15301_v60 = vld [vmem:[#allocation3 + $0x124] sm:$0xf]  ;;  %v12165_v54 = vor.u32 %v15701_v24, %v12162_v53 }
 0x39e   : > { %v10562_v48 = vld [vmem:[#allocation3 + $0x160] sm:$0xf0] }
 0x39f   : > { %7682 = vmatpush.bf16.msra.mxu3 %v12357_v1  ;;  %7657 = vmatpush.bf16.msra.mxu1 %v11269_v10  ;;  %v15429_v50 = vld [vmem:[#allocation3 + $0x524] sm:$0xf]  ;;  %v7431_v1 = vadd.f32 %v7430_v59, %v7418_v55  ;;  %v10565_v2 = vor.u32 %v15301_v60, %v10562_v48 }
 0x3a0   : > { %v11074_v61 = vld [vmem:[#allocation3 + $0x560] sm:$0xf0] }
 0x3a1   : > { %7670 = vmatpush.bf16.msra.mxu2 %v11781_v11  ;;  %7645 = vmatpush.bf16.msra.mxu0 %v10693_v25  ;;  %v15557_v62 = vld [vmem:[#allocation3 + $0x924] sm:$0xf]  ;;  %v11077_v7 = vor.u32 %v15429_v50, %v11074_v61  ;;  %v8376_v14 = vmax.f32 %v7431_v1, 0.0  ;;  %v7432_v52 = vpop.f32.mrf.mxu3 }
 0x3a2   : > { %v11586_v21 = vld [vmem:[#allocation3 + $0x960] sm:$0xf0] }
 0x3a3   : > { %7683 = vmatpush.bf16.msra.mxu3 %v12293_v15  ;;  %7658 = vmatpush.bf16.msra.mxu1 %v11205_v28  ;;  %v15685_v6 = vld [vmem:[#allocation3 + $0xd24] sm:$0xf]  ;;  %v11589_v8 = vor.u32 %v15557_v62, %v11586_v21  ;;  %v17165_v26 = vadd.f32 %v8376_v14, %v8372_v13  ;;  %v17167_v25 = vpack.c.bf16 %v8376_v14, %v8372_v13 }
 0x3a4   : > { %v12098_v49 = vld [vmem:[#allocation3 + $0xd60] sm:$0xf0] }
 0x3a5   : > { %7671 = vmatpush.bf16.msra.mxu2 %v11717_v30  ;;  %7646 = vmatpush.bf16.msra.mxu0 %v10629_v43  ;;  %v15285_v4 = vld [vmem:[#allocation3 + $0xa4] sm:$0xf]  ;;  %v12101_v15 = vor.u32 %v15685_v6, %v12098_v49 }
 0x3a6   : > { %v10498_v9 = vld [vmem:[#allocation3 + $0xe0] sm:$0xf0] }
 0x3a7   : > { %7684 = vmatpush.bf16.msra.mxu3 %v12229_v37  ;;  %7659 = vmatpush.bf16.msra.mxu1 %v11141_v45  ;;  %v15413_v10 = vld [vmem:[#allocation3 + $0x4a4] sm:$0xf]  ;;  %v10501_v27 = vor.u32 %v15285_v4, %v10498_v9 }
 0x3a8   : > { %v11010_v11 = vld [vmem:[#allocation3 + $0x4e0] sm:$0xf0] }
 0x3a9   : > { %7672 = vmatpush.bf16.msra.mxu2 %v11653_v46  ;;  %v15541_v16 = vld [vmem:[#allocation3 + $0x8a4] sm:$0xf]  ;;  %7647 = vmatpush.bf16.msra.mxu0 %v10565_v2  ;;  %v11013_v31 = vor.u32 %v15413_v10, %v11010_v11 }
 0x3aa   : > { %v11522_v17 = vld [vmem:[#allocation3 + $0x8e0] sm:$0xf0] }
 0x3ab   : > { %7685 = vmatpush.bf16.msra.mxu3 %v12165_v54  ;;  %v15669_v29 = vld [vmem:[#allocation3 + $0xca4] sm:$0xf]  ;;  %7660 = vmatpush.bf16.msra.mxu1 %v11077_v7  ;;  %v11525_v3 = vor.u32 %v15541_v16, %v11522_v17 }
 0x3ac   : > { %v12034_v23 = vld [vmem:[#allocation3 + $0xce0] sm:$0xf0] }
 0x3ad   : > { %v15269_v28 = vld [vmem:[#allocation3 + $0x24] sm:$0xf]  ;;  %7673 = vmatpush.bf16.msra.mxu2 %v11589_v8  ;;  %v12037_v37 = vor.u32 %v15669_v29, %v12034_v23  ;;  %7648 = vmatpush.bf16.msra.mxu0 %v10501_v27 }
 0x3ae   : > { %v10434_v30 = vld [vmem:[#allocation3 + $0x60] sm:$0xf0] }
 0x3af   : > { %v15397_v56 = vld [vmem:[#allocation3 + $0x424] sm:$0xf]  ;;  %7686 = vmatpush.bf16.msra.mxu3 %v12101_v15  ;;  %v10437_v45 = vor.u32 %v15269_v28, %v10434_v30  ;;  %7661 = vmatpush.bf16.msra.mxu1 %v11013_v31 }
 0x3b0   : > { %v10946_v32 = vld [vmem:[#allocation3 + $0x460] sm:$0xf0] }
 0x3b1   : > { %v15525_v33 = vld [vmem:[#allocation3 + $0x824] sm:$0xf]  ;;  %7674 = vmatpush.bf16.msra.mxu2 %v11525_v3  ;;  %v10949_v48 = vor.u32 %v15397_v56, %v10946_v32  ;;  %7649 = vmatpush.bf16.msra.mxu0 %v10437_v45 }
 0x3b2   : > { %v11458_v51 = vld [vmem:[#allocation3 + $0x860] sm:$0xf0] }
 0x3b3   : > { %v15653_v39 = vld [vmem:[#allocation3 + $0xc24] sm:$0xf]  ;;  %v11461_v50 = vor.u32 %v15525_v33, %v11458_v51  ;;  %7687 = vmatpush.bf16.msra.mxu3 %v12037_v37  ;;  %7662 = vmatpush.bf16.msra.mxu1 %v10949_v48 }
 0x3b4   : > { %v11970_v40 = vld [vmem:[#allocation3 + $0xc60] sm:$0xf0]  ;;  %7650 = vmatmul.bf16.vlgmr.msra.gmra.mxu0 %v17022_v19 }
 0x3b5   : > { %v15893_v24 = vld [vmem:[#allocation3 + $0x13a4] sm:$0xf]  ;;  %v11973_v59 = vor.u32 %v15653_v39, %v11970_v40  ;;  %7675 = vmatpush.bf16.msra.mxu2 %v11461_v50 }
 0x3b6   : > { %v12930_v53 = vld [vmem:[#allocation3 + $0x13e0] sm:$0xf0]  ;;  %7663 = vmatmul.bf16.vlgmr.msra.gmra.mxu1 %v17026_v22 }
 0x3b7   : > { %v16021_v43 = vld [vmem:[#allocation3 + $0x17a4] sm:$0xf]  ;;  %v12933_v61 = vor.u32 %v15893_v24, %v12930_v53  ;;  %7688 = vmatpush.bf16.msra.mxu3 %v11973_v59 }
 0x3b8   : > { %v13442_v46 = vld [vmem:[#allocation3 + $0x17e0] sm:$0xf0]  ;;  %7676 = vmatmul.bf16.vlgmr.msra.gmra.mxu2 %v17020_v18 }
 0x3b9   : > { %v16149_v47 = vld [vmem:[#allocation3 + $0x1ba4] sm:$0xf]  ;;  %v13445_v62 = vor.u32 %v16021_v43, %v13442_v46  ;;  %7694 = vmatpush.bf16.msrb.mxu0 %v12933_v61  ;;  %v7443_v43 = vpop.f32.mrf.mxu0 }
 0x3ba   : > { %v13954_v60 = vld [vmem:[#allocation3 + $0x1be0] sm:$0xf0]  ;;  %7689 = vmatmul.bf16.vlgmr.msra.gmra.mxu3 %v17024_v20  ;;  %v7444_v50 = vadd.f32 %v7443_v43, %v1533_v36 }
 0x3bb   : > { %v16277_v54 = vld [vmem:[#allocation3 + $0x1fa4] sm:$0xf]  ;;  %v13957_v21 = vor.u32 %v16149_v47, %v13954_v60  ;;  %7707 = vmatpush.bf16.msrb.mxu1 %v13445_v62 }
 0x3bc   : > { %v14466_v55 = vld [vmem:[#allocation3 + $0x1fe0] sm:$0xf0] }
 0x3bd   : > { %v15877_v6 = vld [vmem:[#allocation3 + $0x1324] sm:$0xf]  ;;  %v14469_v2 = vor.u32 %v16277_v54, %v14466_v55  ;;  %7720 = vmatpush.bf16.msrb.mxu2 %v13957_v21  ;;  %v7456_v54 = vpop.f32.mrf.mxu1 }
 0x3be   : > { %v12866_v49 = vld [vmem:[#allocation3 + $0x1360] sm:$0xf0] }
 0x3bf   : > { %v16005_v1 = vld [vmem:[#allocation3 + $0x1724] sm:$0xf]  ;;  %v12869_v10 = vor.u32 %v15877_v6, %v12866_v49  ;;  %7733 = vmatpush.bf16.msrb.mxu3 %v14469_v2  ;;  %v7457_v6 = vadd.f32 %v7456_v54, %v7444_v50 }
 0x3c0   : > { %v13378_v4 = vld [vmem:[#allocation3 + $0x1760] sm:$0xf0] }
 0x3c1   : > { %v16133_v5 = vld [vmem:[#allocation3 + $0x1b24] sm:$0xf]  ;;  %v13381_v11 = vor.u32 %v16005_v1, %v13378_v4  ;;  %7695 = vmatpush.bf16.msrb.mxu0 %v12869_v10 }
 0x3c2   : > { %v13890_v7 = vld [vmem:[#allocation3 + $0x1b60] sm:$0xf0] }
 0x3c3   : > { %v16261_v8 = vld [vmem:[#allocation3 + $0x1f24] sm:$0xf]  ;;  %v13893_v12 = vor.u32 %v16133_v5, %v13890_v7  ;;  %7708 = vmatpush.bf16.msrb.mxu1 %v13381_v11 }
 0x3c4   : > { %v14402_v9 = vld [vmem:[#allocation3 + $0x1f60] sm:$0xf0] }
 0x3c5   : > { %v15861_v13 = vld [vmem:[#allocation3 + $0x12a4] sm:$0xf]  ;;  %v14405_v16 = vor.u32 %v16261_v8, %v14402_v9  ;;  %7721 = vmatpush.bf16.msrb.mxu2 %v13893_v12  ;;  %v7469_v8 = vpop.f32.mrf.mxu2 }
 0x3c6   : > { %v12802_v14 = vld [vmem:[#allocation3 + $0x12e0] sm:$0xf0] }
 0x3c7   : > { %v15989_v15 = vld [vmem:[#allocation3 + $0x16a4] sm:$0xf]  ;;  %v12805_v30 = vor.u32 %v15861_v13, %v12802_v14  ;;  %7734 = vmatpush.bf16.msrb.mxu3 %v14405_v16  ;;  %v7470_v13 = vadd.f32 %v7469_v8, %v7457_v6  ;;  %v7482_v14 = vpop.f32.mrf.mxu3  ;;  %v15518_v6 = vld [vmem:[#allocation3 + $0x7e4] sm:$0xf0] }
 0x3c8   : > { %v13314_v17 = vld [vmem:[#allocation3 + $0x16e0] sm:$0xf0] }
 0x3c9   : > { %v16117_v29 = vld [vmem:[#allocation3 + $0x1aa4] sm:$0xf]  ;;  %v13317_v3 = vor.u32 %v15989_v15, %v13314_v17  ;;  %7696 = vmatpush.bf16.msrb.mxu0 %v12805_v30 }
 0x3ca   : > { %v13826_v23 = vld [vmem:[#allocation3 + $0x1ae0] sm:$0xf0] }
 0x3cb   : > { %v16245_v27 = vld [vmem:[#allocation3 + $0x1ea4] sm:$0xf]  ;;  %v13829_v56 = vor.u32 %v16117_v29, %v13826_v23  ;;  %7709 = vmatpush.bf16.msrb.mxu1 %v13317_v3  ;;  %v17174_v29 = vadd.f32 %v7482_v14, %v7470_v13  ;;  %v7445_v23 = vpop.f32.mrf.mxu0  ;;  %v15374_v13 = vld [vmem:[#allocation3 + $0x364] sm:$0xf0] }
 0x3cc   : > { %v14338_v28 = vld [vmem:[#allocation3 + $0x1ee0] sm:$0xf0]  ;;  %v11336_v14 = vld [vmem:[#allocation3 + $0x728] sm:$0xf] }
 0x3cd   : > { %v15845_v31 = vld [vmem:[#allocation3 + $0x1224] sm:$0xf]  ;;  %v14341_v37 = vor.u32 %v16245_v27, %v14338_v28  ;;  %7722 = vmatpush.bf16.msrb.mxu2 %v13829_v56  ;;  %v7458_v56 = vpop.f32.mrf.mxu1  ;;  %v15630_v23 = vld [vmem:[#allocation3 + $0xb64] sm:$0xf0] }
 0x3ce   : > { %v12738_v32 = vld [vmem:[#allocation3 + $0x1260] sm:$0xf0]  ;;  %v10760_v56 = vld [vmem:[#allocation3 + $0x2a8] sm:$0xf] }
 0x3cf   : > { %v15973_v33 = vld [vmem:[#allocation3 + $0x1624] sm:$0xf]  ;;  %v12741_v53 = vor.u32 %v15845_v31, %v12738_v32  ;;  %7735 = vmatpush.bf16.msrb.mxu3 %v14341_v37 }
 0x3d0   : > { %v13250_v51 = vld [vmem:[#allocation3 + $0x1660] sm:$0xf0] }
 0x3d1   : > { %v16101_v39 = vld [vmem:[#allocation3 + $0x1a24] sm:$0xf]  ;;  %v13253_v45 = vor.u32 %v15973_v33, %v13250_v51  ;;  %7697 = vmatpush.bf16.msrb.mxu0 %v12741_v53 }
 0x3d2   : > { %v13762_v40 = vld [vmem:[#allocation3 + $0x1a60] sm:$0xf0] }
 0x3d3   : > { %v16229_v52 = vld [vmem:[#allocation3 + $0x1e24] sm:$0xf]  ;;  %v13765_v46 = vor.u32 %v16101_v39, %v13762_v40  ;;  %7710 = vmatpush.bf16.msrb.mxu1 %v13253_v45 }
 0x3d4   : > { %v14274_v24 = vld [vmem:[#allocation3 + $0x1e60] sm:$0xf0] }
 0x3d5   : > { %v15829_v47 = vld [vmem:[#allocation3 + $0x11a4] sm:$0xf]  ;;  %v14277_v0 = vor.u32 %v16229_v52, %v14274_v24  ;;  %7723 = vmatpush.bf16.msrb.mxu2 %v13765_v46 }
 0x3d6   : > { %v12674_v60 = vld [vmem:[#allocation3 + $0x11e0] sm:$0xf0] }
 0x3d7   : > { %v15957_v48 = vld [vmem:[#allocation3 + $0x15a4] sm:$0xf]  ;;  %v12677_v49 = vor.u32 %v15829_v47, %v12674_v60  ;;  %7736 = vmatpush.bf16.msrb.mxu3 %v14277_v0  ;;  %v7471_v60 = vpop.f32.mrf.mxu2 }
 0x3d8   : > { %v13186_v55 = vld [vmem:[#allocation3 + $0x15e0] sm:$0xf0] }
 0x3d9   : > { %v16085_v59 = vld [vmem:[#allocation3 + $0x19a4] sm:$0xf]  ;;  %v13189_v1 = vor.u32 %v15957_v48, %v13186_v55  ;;  %7698 = vmatpush.bf16.msrb.mxu0 %v12677_v49  ;;  %v7484_v55 = vpop.f32.mrf.mxu3  ;;  %v11912_v49 = vld [vmem:[#allocation3 + $0xba8] sm:$0xf] }
 0x3da   : > { %v13698_v61 = vld [vmem:[#allocation3 + $0x19e0] sm:$0xf0]  ;;  %v15726_v55 = vld [vmem:[#allocation3 + $0xe64] sm:$0xf0] }
 0x3db   : > { %v16213_v62 = vld [vmem:[#allocation3 + $0x1da4] sm:$0xf]  ;;  %v13701_v2 = vor.u32 %v16085_v59, %v13698_v61  ;;  %7711 = vmatpush.bf16.msrb.mxu1 %v13189_v1  ;;  %v10888_v59 = vld [vmem:[#allocation3 + $0x3a8] sm:$0xf] }
 0x3dc   : > { %v14210_v21 = vld [vmem:[#allocation3 + $0x1de0] sm:$0xf0]  ;;  %v15390_v61 = vld [vmem:[#allocation3 + $0x3e4] sm:$0xf0] }
 0x3dd   : > { %v15813_v4 = vld [vmem:[#allocation3 + $0x1124] sm:$0xf]  ;;  %v14213_v9 = vor.u32 %v16213_v62, %v14210_v21  ;;  %7724 = vmatpush.bf16.msrb.mxu2 %v13701_v2  ;;  %v11400_v62 = vld [vmem:[#allocation3 + $0x7a8] sm:$0xf] }
 0x3de   : > { %v12610_v5 = vld [vmem:[#allocation3 + $0x1160] sm:$0xf0]  ;;  %v15646_v1 = vld [vmem:[#allocation3 + $0xbe4] sm:$0xf0] }
 0x3df   : > { %v15941_v7 = vld [vmem:[#allocation3 + $0x1524] sm:$0xf]  ;;  %v12613_v17 = vor.u32 %v15813_v4, %v12610_v5  ;;  %7737 = vmatpush.bf16.msrb.mxu3 %v14213_v9  ;;  %v12424_v5 = vld [vmem:[#allocation3 + $0xfa8] sm:$0xf]  ;;  %v10889_v9 = vor.u32 %v15390_v61, %v10888_v59  ;;  %v7495_v61 = vpop.f32.mrf.mxu0 }
 0x3e0   : > { %v13122_v10 = vld [vmem:[#allocation3 + $0x1560] sm:$0xf0] }
 0x3e1   : > { %v16069_v11 = vld [vmem:[#allocation3 + $0x1924] sm:$0xf]  ;;  %v13125_v27 = vor.u32 %v15941_v7, %v13122_v10  ;;  %7699 = vmatpush.bf16.msrb.mxu0 %v12613_v17  ;;  %v15774_v7 = vld [vmem:[#allocation3 + $0xfe4] sm:$0xf0]  ;;  %v11401_v10 = vor.u32 %v15518_v6, %v11400_v62  ;;  %v7496_v6 = vadd.f32 %v7495_v61, %v17174_v29 }
 0x3e2   : > { %v13634_v12 = vld [vmem:[#allocation3 + $0x1960] sm:$0xf0]  ;;  %v11848_v17 = vld [vmem:[#allocation3 + $0xb28] sm:$0xf] }
 0x3e3   : > { %v16197_v15 = vld [vmem:[#allocation3 + $0x1d24] sm:$0xf]  ;;  %v13637_v28 = vor.u32 %v16069_v11, %v13634_v12  ;;  %7712 = vmatpush.bf16.msrb.mxu1 %v13125_v27  ;;  %v11913_v11 = vor.u32 %v15646_v1, %v11912_v49  ;;  %v10824_v12 = vld [vmem:[#allocation3 + $0x328] sm:$0xf]  ;;  %v7508_v49 = vpop.f32.mrf.mxu1 }
 0x3e4   : > { %v14146_v16 = vld [vmem:[#allocation3 + $0x1d60] sm:$0xf0]  ;;  %v12360_v27 = vld [vmem:[#allocation3 + $0xf28] sm:$0xf] }
 0x3e5   : > { %v15797_v30 = vld [vmem:[#allocation3 + $0x10a4] sm:$0xf]  ;;  %v14149_v32 = vor.u32 %v16197_v15, %v14146_v16  ;;  %7725 = vmatpush.bf16.msrb.mxu2 %v13637_v28  ;;  %v12425_v15 = vor.u32 %v15774_v7, %v12424_v5  ;;  %v15502_v16 = vld [vmem:[#allocation3 + $0x764] sm:$0xf0] }
 0x3e6   : > { %v12546_v31 = vld [vmem:[#allocation3 + $0x10e0] sm:$0xf0]  ;;  %v15758_v28 = vld [vmem:[#allocation3 + $0xf64] sm:$0xf0] }
 0x3e7   : > { %v15925_v3 = vld [vmem:[#allocation3 + $0x14a4] sm:$0xf]  ;;  %v12549_v40 = vor.u32 %v15797_v30, %v12546_v31  ;;  %7738 = vmatpush.bf16.msrb.mxu3 %v14149_v32  ;;  %v10825_v30 = vor.u32 %v15374_v13, %v10824_v12  ;;  %v11337_v31 = vor.u32 %v15502_v16, %v11336_v14  ;;  %v15358_v32 = vld [vmem:[#allocation3 + $0x2e4] sm:$0xf0]  ;;  %v7521_v16 = vpop.f32.mrf.mxu2 }
 0x3e8   : > { %v13058_v33 = vld [vmem:[#allocation3 + $0x14e0] sm:$0xf0]  ;;  %v10632_v1 = vld [vmem:[#allocation3 + $0x1a8] sm:$0xf] }
 0x3e9   : > { %v16053_v36 = vld [vmem:[#allocation3 + $0x18a4] sm:$0xf]  ;;  %v13061_v53 = vor.u32 %v15925_v3, %v13058_v33  ;;  %7700 = vmatpush.bf16.msrb.mxu0 %v12549_v40  ;;  %v11849_v3 = vor.u32 %v15630_v23, %v11848_v17  ;;  %v11272_v33 = vld [vmem:[#allocation3 + $0x6a8] sm:$0xf] }
 0x3ea   : > { %v13570_v37 = vld [vmem:[#allocation3 + $0x18e0] sm:$0xf0]  ;;  %v12296_v40 = vld [vmem:[#allocation3 + $0xea8] sm:$0xf] }
 0x3eb   : > { %v16181_v51 = vld [vmem:[#allocation3 + $0x1ca4] sm:$0xf]  ;;  %v13573_v43 = vor.u32 %v16053_v36, %v13570_v37  ;;  %7713 = vmatpush.bf16.msrb.mxu1 %v13061_v53  ;;  %v12361_v36 = vor.u32 %v15758_v28, %v12360_v27  ;;  %v15486_v37 = vld [vmem:[#allocation3 + $0x6e4] sm:$0xf0] }
 0x3ec   : > { %v14082_v39 = vld [vmem:[#allocation3 + $0x1ce0] sm:$0xf0]  ;;  %v11273_v53 = vor.u32 %v15486_v37, %v11272_v33  ;;  %v15454_v7 = vld [vmem:[#allocation3 + $0x5e4] sm:$0xf0] }
 0x3ed   : > { %v15781_v52 = vld [vmem:[#allocation3 + $0x1024] sm:$0xf]  ;;  %v14085_v48 = vor.u32 %v16181_v51, %v14082_v39  ;;  %7726 = vmatpush.bf16.msrb.mxu2 %v13573_v43  ;;  %v11784_v51 = vld [vmem:[#allocation3 + $0xaa8] sm:$0xf] }
 0x3ee   : > { %v12482_v24 = vld [vmem:[#allocation3 + $0x1060] sm:$0xf0]  ;;  %v15614_v39 = vld [vmem:[#allocation3 + $0xae4] sm:$0xf0] }
 0x3ef   : > { %v15909_v45 = vld [vmem:[#allocation3 + $0x1424] sm:$0xf]  ;;  %v12485_v21 = vor.u32 %v15781_v52, %v12482_v24  ;;  %7739 = vmatpush.bf16.msrb.mxu3 %v14085_v48  ;;  %v15742_v52 = vld [vmem:[#allocation3 + $0xee4] sm:$0xf0]  ;;  %v10761_v24 = vor.u32 %v15358_v32, %v10760_v56  ;;  %v11785_v43 = vor.u32 %v15614_v39, %v11784_v51  ;;  %v7497_v39 = vpop.f32.mrf.mxu0 }
 0x3f0   : > { %v12994_v46 = vld [vmem:[#allocation3 + $0x1460] sm:$0xf0]  ;;  %v12297_v60 = vor.u32 %v15742_v52, %v12296_v40  ;;  %v15470_v48 = vld [vmem:[#allocation3 + $0x664] sm:$0xf0] }
 0x3f1   : > { %v16037_v47 = vld [vmem:[#allocation3 + $0x1824] sm:$0xf]  ;;  %v12997_v2 = vor.u32 %v15909_v45, %v12994_v46  ;;  %7701 = vmatpush.bf16.msrb.mxu0 %v12485_v21  ;;  %v10696_v45 = vld [vmem:[#allocation3 + $0x228] sm:$0xf] }
 0x3f2   : > { %v13506_v50 = vld [vmem:[#allocation3 + $0x1860] sm:$0xf0]  ;;  %v15342_v46 = vld [vmem:[#allocation3 + $0x264] sm:$0xf0] }
 0x3f3   : > { %v16165_v54 = vld [vmem:[#allocation3 + $0x1c24] sm:$0xf]  ;;  %v13509_v4 = vor.u32 %v16037_v47, %v13506_v50  ;;  %7714 = vmatpush.bf16.msrb.mxu1 %v12997_v2  ;;  %v11208_v47 = vld [vmem:[#allocation3 + $0x628] sm:$0xf]  ;;  %v10697_v59 = vor.u32 %v15342_v46, %v10696_v45  ;;  %v7510_v45 = vpop.f32.mrf.mxu1  ;;  %v8373_v46 = vmax.f32 %v17112_v63, 0.0 }
 0x3f4   : > { %v14018_v0 = vld [vmem:[#allocation3 + $0x1c60] sm:$0xf0]  ;;  %7702 = vmatmul.bf16.vlgmr.msrb.gmra.mxu0 %v17036_v41  ;;  %v11720_v50 = vld [vmem:[#allocation3 + $0xa28] sm:$0xf]  ;;  %v11209_v62 = vor.u32 %v15470_v48, %v11208_v47 }
 0x3f5   : > { %v14021_v8 = vor.u32 %v16165_v54, %v14018_v0  ;;  %7727 = vmatpush.bf16.msrb.mxu2 %v13509_v4  ;;  %7746 = vmatpush.bf16.msra.mxu0 %v10889_v9  ;;  %v15598_v54 = vld [vmem:[#allocation3 + $0xa64] sm:$0xf0] }
 0x3f6   : > { %7715 = vmatmul.bf16.vlgmr.msrb.gmra.mxu1 %v17040_v44  ;;  %v12232_v0 = vld [vmem:[#allocation3 + $0xe28] sm:$0xf]  ;;  %v11721_v21 = vor.u32 %v15598_v54, %v11720_v50 }
 0x3f7   : > { %7740 = vmatpush.bf16.msrb.mxu3 %v14021_v8  ;;  %7759 = vmatpush.bf16.msra.mxu1 %v11401_v10  ;;  %v15326_v2 = vld [vmem:[#allocation3 + $0x1e4] sm:$0xf0]  ;;  %v12233_v5 = vor.u32 %v15726_v55, %v12232_v0  ;;  %v7509_v10 = vadd.f32 %v7508_v49, %v7496_v6 }
 0x3f8   : > { %7728 = vmatmul.bf16.vlgmr.msrb.gmra.mxu2 %v17034_v38  ;;  %v11144_v4 = vld [vmem:[#allocation3 + $0x5a8] sm:$0xf]  ;;  %v10633_v13 = vor.u32 %v15326_v2, %v10632_v1 }
 0x3f9   : > { %7772 = vmatpush.bf16.msra.mxu2 %v11913_v11  ;;  %7747 = vmatpush.bf16.msra.mxu0 %v10825_v30  ;;  %v11656_v8 = vld [vmem:[#allocation3 + $0x9a8] sm:$0xf]  ;;  %v11145_v14 = vor.u32 %v15454_v7, %v11144_v4  ;;  %v7522_v28 = vadd.f32 %v7521_v16, %v7509_v10  ;;  %v7534_v30 = vpop.f32.mrf.mxu3  ;;  %v7523_v4 = vpop.f32.mrf.mxu2 }
 0x3fa   : > { %7741 = vmatmul.bf16.vlgmr.msrb.gmra.mxu3 %v17038_v42  ;;  %v15582_v9 = vld [vmem:[#allocation3 + $0x9e4] sm:$0xf0] }
 0x3fb   : > { %7785 = vmatpush.bf16.msra.mxu3 %v12425_v15  ;;  %7760 = vmatpush.bf16.msra.mxu1 %v11337_v31  ;;  %v12168_v11 = vld [vmem:[#allocation3 + $0xda8] sm:$0xf]  ;;  %v11657_v15 = vor.u32 %v15582_v9, %v11656_v8 }
 0x3fc   : > { %v15710_v12 = vld [vmem:[#allocation3 + $0xde4] sm:$0xf0] }
 0x3fd   : > { %7773 = vmatpush.bf16.msra.mxu2 %v11849_v3  ;;  %7748 = vmatpush.bf16.msra.mxu0 %v10761_v24  ;;  %v10568_v29 = vld [vmem:[#allocation3 + $0x128] sm:$0xf]  ;;  %v12169_v27 = vor.u32 %v15710_v12, %v12168_v11 }
 0x3fe   : > { %v15310_v17 = vld [vmem:[#allocation3 + $0x164] sm:$0xf0] }
 0x3ff   : > { %7786 = vmatpush.bf16.msra.mxu3 %v12361_v36  ;;  %7761 = vmatpush.bf16.msra.mxu1 %v11273_v53  ;;  %v11080_v23 = vld [vmem:[#allocation3 + $0x528] sm:$0xf]  ;;  %v7535_v36 = vadd.f32 %v7534_v30, %v7522_v28  ;;  %v10569_v37 = vor.u32 %v15310_v17, %v10568_v29 }
 0x400   : > { %v15438_v31 = vld [vmem:[#allocation3 + $0x564] sm:$0xf0] }
 0x401   : > { %7774 = vmatpush.bf16.msra.mxu2 %v11785_v43  ;;  %7749 = vmatpush.bf16.msra.mxu0 %v10697_v59  ;;  %v11592_v3 = vld [vmem:[#allocation3 + $0x928] sm:$0xf]  ;;  %v11081_v40 = vor.u32 %v15438_v31, %v11080_v23  ;;  %v8377_v47 = vmax.f32 %v7535_v36, 0.0  ;;  %v7536_v10 = vpop.f32.mrf.mxu3 }
 0x402   : > { %v15566_v56 = vld [vmem:[#allocation3 + $0x964] sm:$0xf0] }
 0x403   : > { %7787 = vmatpush.bf16.msra.mxu3 %v12297_v60  ;;  %7762 = vmatpush.bf16.msra.mxu1 %v11209_v62  ;;  %v12104_v32 = vld [vmem:[#allocation3 + $0xd28] sm:$0xf]  ;;  %v11593_v52 = vor.u32 %v15566_v56, %v11592_v3  ;;  %v17182_v55 = vadd.f32 %v8377_v47, %v8373_v46  ;;  %v17184_v59 = vpack.c.bf16 %v8377_v47, %v8373_v46 }
 0x404   : > { %v15694_v33 = vld [vmem:[#allocation3 + $0xd64] sm:$0xf0] }
 0x405   : > { %7775 = vmatpush.bf16.msra.mxu2 %v11721_v21  ;;  %7750 = vmatpush.bf16.msra.mxu0 %v10633_v13  ;;  %v10504_v51 = vld [vmem:[#allocation3 + $0xa8] sm:$0xf]  ;;  %v12105_v60 = vor.u32 %v15694_v33, %v12104_v32 }
 0x406   : > { %v15294_v24 = vld [vmem:[#allocation3 + $0xe4] sm:$0xf0] }
 0x407   : > { %7788 = vmatpush.bf16.msra.mxu3 %v12233_v5  ;;  %7763 = vmatpush.bf16.msra.mxu1 %v11145_v14  ;;  %v11016_v53 = vld [vmem:[#allocation3 + $0x4a8] sm:$0xf]  ;;  %v10505_v61 = vor.u32 %v15294_v24, %v10504_v51 }
 0x408   : > { %v15422_v43 = vld [vmem:[#allocation3 + $0x4e4] sm:$0xf0] }
 0x409   : > { %7776 = vmatpush.bf16.msra.mxu2 %v11657_v15  ;;  %v11528_v48 = vld [vmem:[#allocation3 + $0x8a8] sm:$0xf]  ;;  %7751 = vmatpush.bf16.msra.mxu0 %v10569_v37  ;;  %v11017_v6 = vor.u32 %v15422_v43, %v11016_v53 }
 0x40a   : > { %v15550_v50 = vld [vmem:[#allocation3 + $0x8e4] sm:$0xf0] }
 0x40b   : > { %7789 = vmatpush.bf16.msra.mxu3 %v12169_v27  ;;  %v12040_v54 = vld [vmem:[#allocation3 + $0xca8] sm:$0xf]  ;;  %7764 = vmatpush.bf16.msra.mxu1 %v11081_v40  ;;  %v11529_v49 = vor.u32 %v15550_v50, %v11528_v48 }
 0x40c   : > { %v15678_v0 = vld [vmem:[#allocation3 + $0xce4] sm:$0xf0] }
 0x40d   : > { %v10440_v62 = vld [vmem:[#allocation3 + $0x28] sm:$0xf]  ;;  %7777 = vmatpush.bf16.msra.mxu2 %v11593_v52  ;;  %v12041_v5 = vor.u32 %v15678_v0, %v12040_v54  ;;  %7752 = vmatpush.bf16.msra.mxu0 %v10505_v61 }
 0x40e   : > { %v15278_v21 = vld [vmem:[#allocation3 + $0x64] sm:$0xf0] }
 0x40f   : > { %v10952_v63 = vld [vmem:[#allocation3 + $0x428] sm:$0xf]  ;;  %7790 = vmatpush.bf16.msra.mxu3 %v12105_v60  ;;  %v10441_v14 = vor.u32 %v15278_v21, %v10440_v62  ;;  %7765 = vmatpush.bf16.msra.mxu1 %v11017_v6 }
 0x410   : > { %v15406_v1 = vld [vmem:[#allocation3 + $0x464] sm:$0xf0] }
 0x411   : > { %v11464_v2 = vld [vmem:[#allocation3 + $0x828] sm:$0xf]  ;;  %7778 = vmatpush.bf16.msra.mxu2 %v11529_v49  ;;  %v10953_v17 = vor.u32 %v15406_v1, %v10952_v63  ;;  %7753 = vmatpush.bf16.msra.mxu0 %v10441_v14  ;;  %v7547_v14 = vpop.f32.mrf.mxu0 }
 0x412   : > { %v15534_v7 = vld [vmem:[#allocation3 + $0x864] sm:$0xf0] }
 0x413   : > { %v11976_v8 = vld [vmem:[#allocation3 + $0xc28] sm:$0xf]  ;;  %v11465_v23 = vor.u32 %v15534_v7, %v11464_v2  ;;  %7791 = vmatpush.bf16.msra.mxu3 %v12041_v5  ;;  %7766 = vmatpush.bf16.msra.mxu1 %v10953_v17 }
 0x414   : > { %v15662_v9 = vld [vmem:[#allocation3 + $0xc64] sm:$0xf0]  ;;  %7754 = vmatmul.bf16.vlgmr.msra.gmra.mxu0 %v17022_v19 }
 0x415   : > { %v12936_v11 = vld [vmem:[#allocation3 + $0x13a8] sm:$0xf]  ;;  %v11977_v30 = vor.u32 %v15662_v9, %v11976_v8  ;;  %7779 = vmatpush.bf16.msra.mxu2 %v11465_v23 }
 0x416   : > { %v15902_v12 = vld [vmem:[#allocation3 + $0x13e4] sm:$0xf0]  ;;  %7767 = vmatmul.bf16.vlgmr.msra.gmra.mxu1 %v17026_v22 }
 0x417   : > { %v13448_v13 = vld [vmem:[#allocation3 + $0x17a8] sm:$0xf]  ;;  %v12937_v31 = vor.u32 %v15902_v12, %v12936_v11  ;;  %7792 = vmatpush.bf16.msra.mxu3 %v11977_v30 }
 0x418   : > { %v16030_v15 = vld [vmem:[#allocation3 + $0x17e4] sm:$0xf0]  ;;  %7780 = vmatmul.bf16.vlgmr.msra.gmra.mxu2 %v17020_v18 }
 0x419   : > { %v13960_v16 = vld [vmem:[#allocation3 + $0x1ba8] sm:$0xf]  ;;  %v13449_v3 = vor.u32 %v16030_v15, %v13448_v13  ;;  %7798 = vmatpush.bf16.msrb.mxu0 %v12937_v31 }
 0x41a   : > { %v16158_v29 = vld [vmem:[#allocation3 + $0x1be4] sm:$0xf0]  ;;  %7793 = vmatmul.bf16.vlgmr.msra.gmra.mxu3 %v17024_v20 }
 0x41b   : > { %v14472_v27 = vld [vmem:[#allocation3 + $0x1fa8] sm:$0xf]  ;;  %v13961_v56 = vor.u32 %v16158_v29, %v13960_v16  ;;  %7811 = vmatpush.bf16.msrb.mxu1 %v13449_v3 }
 0x41c   : > { %v16286_v28 = vld [vmem:[#allocation3 + $0x1fe4] sm:$0xf0] }
 0x41d   : > { %v12872_v32 = vld [vmem:[#allocation3 + $0x1328] sm:$0xf]  ;;  %v14473_v37 = vor.u32 %v16286_v28, %v14472_v27  ;;  %7824 = vmatpush.bf16.msrb.mxu2 %v13961_v56  ;;  %v7560_v28 = vpop.f32.mrf.mxu1 }
 0x41e   : > { %v15886_v33 = vld [vmem:[#allocation3 + $0x1364] sm:$0xf0] }
 0x41f   : > { %v13384_v36 = vld [vmem:[#allocation3 + $0x1728] sm:$0xf]  ;;  %v12873_v53 = vor.u32 %v15886_v33, %v12872_v32  ;;  %7837 = vmatpush.bf16.msrb.mxu3 %v14473_v37 }
 0x420   : > { %v16014_v51 = vld [vmem:[#allocation3 + $0x1764] sm:$0xf0] }
 0x421   : > { %v13896_v39 = vld [vmem:[#allocation3 + $0x1b28] sm:$0xf]  ;;  %v13385_v45 = vor.u32 %v16014_v51, %v13384_v36  ;;  %7799 = vmatpush.bf16.msrb.mxu0 %v12873_v53  ;;  %v7573_v53 = vpop.f32.mrf.mxu2 }
 0x422   : > { %v16142_v40 = vld [vmem:[#allocation3 + $0x1b64] sm:$0xf0] }
 0x423   : > { %v14408_v52 = vld [vmem:[#allocation3 + $0x1f28] sm:$0xf]  ;;  %v13897_v46 = vor.u32 %v16142_v40, %v13896_v39  ;;  %7812 = vmatpush.bf16.msrb.mxu1 %v13385_v45 }
 0x424   : > { %v16270_v24 = vld [vmem:[#allocation3 + $0x1f64] sm:$0xf0] }
 0x425   : > { %v12808_v43 = vld [vmem:[#allocation3 + $0x12a8] sm:$0xf]  ;;  %v14409_v50 = vor.u32 %v16270_v24, %v14408_v52  ;;  %7825 = vmatpush.bf16.msrb.mxu2 %v13897_v46 }
 0x426   : > { %v15870_v47 = vld [vmem:[#allocation3 + $0x12e4] sm:$0xf0] }
 0x427   : > { %v13320_v60 = vld [vmem:[#allocation3 + $0x16a8] sm:$0xf]  ;;  %v12809_v6 = vor.u32 %v15870_v47, %v12808_v43  ;;  %7838 = vmatpush.bf16.msrb.mxu3 %v14409_v50 }
 0x428   : > { %v15998_v48 = vld [vmem:[#allocation3 + $0x16e4] sm:$0xf0] }
 0x429   : > { %v13832_v54 = vld [vmem:[#allocation3 + $0x1aa8] sm:$0xf]  ;;  %v13321_v63 = vor.u32 %v15998_v48, %v13320_v60  ;;  %7800 = vmatpush.bf16.msrb.mxu0 %v12809_v6  ;;  %v7586_v48 = vpop.f32.mrf.mxu3 }
 0x42a   : > { %v16126_v0 = vld [vmem:[#allocation3 + $0x1ae4] sm:$0xf0] }
 0x42b   : > { %v17187_v61 = vld [vmem:[#allocation5 + $0x8] sm:$0xff]  ;;  %v13833_v1 = vor.u32 %v16126_v0, %v13832_v54  ;;  %7813 = vmatpush.bf16.msrb.mxu1 %v13321_v63 }
 0x42c   : > { %v14344_v62 = vld [vmem:[#allocation3 + $0x1ea8] sm:$0xf]  ;;  %v1534_v5 = vperm.slane %v17187_v61, 0 }
 0x42d   : > { %v16254_v21 = vld [vmem:[#allocation3 + $0x1ee4] sm:$0xf0]  ;;  %7826 = vmatpush.bf16.msrb.mxu2 %v13833_v1 }
 0x42e   : > { %v12744_v49 = vld [vmem:[#allocation3 + $0x1228] sm:$0xf]  ;;  %v14345_v7 = vor.u32 %v16254_v21, %v14344_v62  ;;  %v7548_v27 = vadd.f32 %v7547_v14, %v1534_v5  ;;  %v7549_v21 = vpop.f32.mrf.mxu0 }
 0x42f   : > { %v15854_v2 = vld [vmem:[#allocation3 + $0x1264] sm:$0xf0]  ;;  %v11338_v21 = vld [vmem:[#allocation3 + $0x768] sm:$0xf0] }
 0x430   : > { %v13256_v4 = vld [vmem:[#allocation3 + $0x1628] sm:$0xf]  ;;  %v12745_v13 = vor.u32 %v15854_v2, %v12744_v49  ;;  %7839 = vmatpush.bf16.msrb.mxu3 %v14345_v7  ;;  %v7561_v36 = vadd.f32 %v7560_v28, %v7548_v27  ;;  %v7575_v27 = vpop.f32.mrf.mxu2 }
 0x431   : > { %v15982_v8 = vld [vmem:[#allocation3 + $0x1664] sm:$0xf0]  ;;  %v10698_v27 = vld [vmem:[#allocation3 + $0x268] sm:$0xf0] }
 0x432   : > { %v13768_v9 = vld [vmem:[#allocation3 + $0x1a28] sm:$0xf]  ;;  %v13257_v15 = vor.u32 %v15982_v8, %v13256_v4  ;;  %7801 = vmatpush.bf16.msrb.mxu0 %v12745_v13  ;;  %v7574_v60 = vadd.f32 %v7573_v53, %v7561_v36  ;;  %v7562_v4 = vpop.f32.mrf.mxu1  ;;  %v15510_v36 = vld [vmem:[#allocation3 + $0x7ac] sm:$0xf] }
 0x433   : > { %v16110_v10 = vld [vmem:[#allocation3 + $0x1a64] sm:$0xf0]  ;;  %v15766_v53 = vld [vmem:[#allocation3 + $0xfac] sm:$0xf] }
 0x434   : > { %v14280_v11 = vld [vmem:[#allocation3 + $0x1e28] sm:$0xf]  ;;  %v13769_v16 = vor.u32 %v16110_v10, %v13768_v9  ;;  %7814 = vmatpush.bf16.msrb.mxu1 %v13257_v15  ;;  %v17193_v62 = vadd.f32 %v7586_v48, %v7574_v60  ;;  %v15366_v48 = vld [vmem:[#allocation3 + $0x32c] sm:$0xf] }
 0x435   : > { %v16238_v12 = vld [vmem:[#allocation3 + $0x1e64] sm:$0xf0] }
 0x436   : > { %v12680_v29 = vld [vmem:[#allocation3 + $0x11a8] sm:$0xf]  ;;  %v14281_v30 = vor.u32 %v16238_v12, %v14280_v11  ;;  %7827 = vmatpush.bf16.msrb.mxu2 %v13769_v16 }
 0x437   : > { %v15838_v17 = vld [vmem:[#allocation3 + $0x11e4] sm:$0xf0] }
 0x438   : > { %v13192_v23 = vld [vmem:[#allocation3 + $0x15a8] sm:$0xf]  ;;  %v12681_v37 = vor.u32 %v15838_v17, %v12680_v29  ;;  %7840 = vmatpush.bf16.msrb.mxu3 %v14281_v30 }
 0x439   : > { %v15966_v31 = vld [vmem:[#allocation3 + $0x15e4] sm:$0xf0] }
 0x43a   : > { %v13704_v3 = vld [vmem:[#allocation3 + $0x19a8] sm:$0xf]  ;;  %v13193_v51 = vor.u32 %v15966_v31, %v13192_v23  ;;  %7802 = vmatpush.bf16.msrb.mxu0 %v12681_v37 }
 0x43b   : > { %v16094_v56 = vld [vmem:[#allocation3 + $0x19e4] sm:$0xf0] }
 0x43c   : > { %v14216_v32 = vld [vmem:[#allocation3 + $0x1da8] sm:$0xf]  ;;  %v13705_v39 = vor.u32 %v16094_v56, %v13704_v3  ;;  %7815 = vmatpush.bf16.msrb.mxu1 %v13193_v51  ;;  %v7588_v56 = vpop.f32.mrf.mxu3  ;;  %v11402_v51 = vld [vmem:[#allocation3 + $0x7e8] sm:$0xf0] }
 0x43d   : > { %v16222_v33 = vld [vmem:[#allocation3 + $0x1de4] sm:$0xf0]  ;;  %v11722_v56 = vld [vmem:[#allocation3 + $0xa68] sm:$0xf0] }
 0x43e   : > { %v12616_v40 = vld [vmem:[#allocation3 + $0x1128] sm:$0xf]  ;;  %v14217_v43 = vor.u32 %v16222_v33, %v14216_v32  ;;  %7828 = vmatpush.bf16.msrb.mxu2 %v13705_v39  ;;  %v15382_v32 = vld [vmem:[#allocation3 + $0x3ac] sm:$0xf] }
 0x43f   : > { %v15822_v52 = vld [vmem:[#allocation3 + $0x1164] sm:$0xf0]  ;;  %v10890_v33 = vld [vmem:[#allocation3 + $0x3e8] sm:$0xf0] }
 0x440   : > { %v13128_v24 = vld [vmem:[#allocation3 + $0x1528] sm:$0xf]  ;;  %v12617_v0 = vor.u32 %v15822_v52, %v12616_v40  ;;  %7841 = vmatpush.bf16.msrb.mxu3 %v14217_v43  ;;  %v15638_v39 = vld [vmem:[#allocation3 + $0xbac] sm:$0xf] }
 0x441   : > { %v15950_v45 = vld [vmem:[#allocation3 + $0x1564] sm:$0xf0]  ;;  %v11914_v40 = vld [vmem:[#allocation3 + $0xbe8] sm:$0xf0] }
 0x442   : > { %v13640_v46 = vld [vmem:[#allocation3 + $0x1928] sm:$0xf]  ;;  %v13129_v6 = vor.u32 %v15950_v45, %v13128_v24  ;;  %7803 = vmatpush.bf16.msrb.mxu0 %v12617_v0  ;;  %v12426_v43 = vld [vmem:[#allocation3 + $0xfe8] sm:$0xf0]  ;;  %v11917_v60 = vor.u32 %v15638_v39, %v11914_v40 }
 0x443   : > { %v16078_v47 = vld [vmem:[#allocation3 + $0x1964] sm:$0xf0]  ;;  %v12429_v0 = vor.u32 %v15766_v53, %v12426_v43  ;;  %v10634_v53 = vld [vmem:[#allocation3 + $0x1e8] sm:$0xf0] }
 0x444   : > { %v14152_v50 = vld [vmem:[#allocation3 + $0x1d28] sm:$0xf]  ;;  %v13641_v49 = vor.u32 %v16078_v47, %v13640_v46  ;;  %7816 = vmatpush.bf16.msrb.mxu1 %v13129_v6  ;;  %v10893_v46 = vor.u32 %v15382_v32, %v10890_v33  ;;  %v11405_v47 = vor.u32 %v15510_v36, %v11402_v51  ;;  %v15622_v6 = vld [vmem:[#allocation3 + $0xb2c] sm:$0xf] }
 0x445   : > { %v16206_v54 = vld [vmem:[#allocation3 + $0x1d64] sm:$0xf0]  ;;  %v15718_v32 = vld [vmem:[#allocation3 + $0xe2c] sm:$0xf] }
 0x446   : > { %v12552_v63 = vld [vmem:[#allocation3 + $0x10a8] sm:$0xf]  ;;  %v14153_v5 = vor.u32 %v16206_v54, %v14152_v50  ;;  %7829 = vmatpush.bf16.msrb.mxu2 %v13641_v49  ;;  %v10826_v50 = vld [vmem:[#allocation3 + $0x368] sm:$0xf0] }
 0x447   : > { %v15806_v1 = vld [vmem:[#allocation3 + $0x10e4] sm:$0xf0]  ;;  %v15494_v54 = vld [vmem:[#allocation3 + $0x72c] sm:$0xf] }
 0x448   : > { %v13064_v2 = vld [vmem:[#allocation3 + $0x14a8] sm:$0xf]  ;;  %v12553_v12 = vor.u32 %v15806_v1, %v12552_v63  ;;  %7842 = vmatpush.bf16.msrb.mxu3 %v14153_v5  ;;  %v11850_v49 = vld [vmem:[#allocation3 + $0xb68] sm:$0xf0]  ;;  %v11341_v4 = vor.u32 %v15494_v54, %v11338_v21 }
 0x449   : > { %v15934_v7 = vld [vmem:[#allocation3 + $0x14e4] sm:$0xf0]  ;;  %v15750_v63 = vld [vmem:[#allocation3 + $0xf2c] sm:$0xf]  ;;  %v11853_v5 = vor.u32 %v15622_v6, %v11850_v49  ;;  %v7625_v49 = vpop.f32.mrf.mxu2 }
 0x44a   : > { %v13576_v8 = vld [vmem:[#allocation3 + $0x18a8] sm:$0xf]  ;;  %v13065_v15 = vor.u32 %v15934_v7, %v13064_v2  ;;  %7804 = vmatpush.bf16.msrb.mxu0 %v12553_v12  ;;  %v12362_v1 = vld [vmem:[#allocation3 + $0xf68] sm:$0xf0]  ;;  %v10829_v2 = vor.u32 %v15366_v48, %v10826_v50 }
 0x44b   : > { %v16062_v9 = vld [vmem:[#allocation3 + $0x18e4] sm:$0xf0]  ;;  %v15350_v7 = vld [vmem:[#allocation3 + $0x2ac] sm:$0xf] }
 0x44c   : > { %v14088_v10 = vld [vmem:[#allocation3 + $0x1ca8] sm:$0xf]  ;;  %v13577_v16 = vor.u32 %v16062_v9, %v13576_v8  ;;  %7817 = vmatpush.bf16.msrb.mxu1 %v13065_v15  ;;  %v10762_v8 = vld [vmem:[#allocation3 + $0x2e8] sm:$0xf0] }
 0x44d   : > { %v16190_v11 = vld [vmem:[#allocation3 + $0x1ce4] sm:$0xf0]  ;;  %v15478_v9 = vld [vmem:[#allocation3 + $0x6ac] sm:$0xf] }
 0x44e   : > { %v12488_v13 = vld [vmem:[#allocation3 + $0x1028] sm:$0xf]  ;;  %v14089_v28 = vor.u32 %v16190_v11, %v14088_v10  ;;  %7830 = vmatpush.bf16.msrb.mxu2 %v13577_v16  ;;  %v12365_v10 = vor.u32 %v15750_v63, %v12362_v1  ;;  %v11274_v11 = vld [vmem:[#allocation3 + $0x6e8] sm:$0xf0]  ;;  %v10765_v16 = vor.u32 %v15350_v7, %v10762_v8 }
 0x44f   : > { %v15790_v14 = vld [vmem:[#allocation3 + $0x1064] sm:$0xf0]  ;;  %v15606_v12 = vld [vmem:[#allocation3 + $0xaac] sm:$0xf] }
 0x450   : > { %v13000_v29 = vld [vmem:[#allocation3 + $0x1428] sm:$0xf]  ;;  %v12489_v37 = vor.u32 %v15790_v14, %v12488_v13  ;;  %7843 = vmatpush.bf16.msrb.mxu3 %v14089_v28  ;;  %v11786_v13 = vld [vmem:[#allocation3 + $0xae8] sm:$0xf0] }
 0x451   : > { %v15918_v17 = vld [vmem:[#allocation3 + $0x1464] sm:$0xf0]  ;;  %v15734_v14 = vld [vmem:[#allocation3 + $0xeac] sm:$0xf] }
 0x452   : > { %v13512_v23 = vld [vmem:[#allocation3 + $0x1828] sm:$0xf]  ;;  %v13001_v52 = vor.u32 %v15918_v17, %v13000_v29  ;;  %7805 = vmatpush.bf16.msrb.mxu0 %v12489_v37  ;;  %v12298_v15 = vld [vmem:[#allocation3 + $0xee8] sm:$0xf0]  ;;  %v11277_v29 = vor.u32 %v15478_v9, %v11274_v11  ;;  %v11789_v17 = vor.u32 %v15606_v12, %v11786_v13  ;;  %v7599_v37 = vpop.f32.mrf.mxu0 }
 0x453   : > { %v16046_v30 = vld [vmem:[#allocation3 + $0x1864] sm:$0xf0]  ;;  %v15462_v28 = vld [vmem:[#allocation3 + $0x62c] sm:$0xf]  ;;  %v7600_v40 = vadd.f32 %v7599_v37, %v17193_v62 }
 0x454   : > { %v14024_v31 = vld [vmem:[#allocation3 + $0x1c28] sm:$0xf]  ;;  %v13513_v24 = vor.u32 %v16046_v30, %v13512_v23  ;;  %7818 = vmatpush.bf16.msrb.mxu1 %v13001_v52  ;;  %v15334_v23 = vld [vmem:[#allocation3 + $0x22c] sm:$0xf]  ;;  %v12301_v30 = vor.u32 %v15734_v14, %v12298_v15  ;;  %v7612_v52 = vpop.f32.mrf.mxu1 }
 0x455   : > { %v16174_v3 = vld [vmem:[#allocation3 + $0x1c64] sm:$0xf0]  ;;  %7806 = vmatmul.bf16.vlgmr.msrb.gmra.mxu0 %v17036_v41  ;;  %v12234_v33 = vld [vmem:[#allocation3 + $0xe68] sm:$0xf0]  ;;  %v10701_v36 = vor.u32 %v15334_v23, %v10698_v27  ;;  %v7613_v48 = vadd.f32 %v7612_v52, %v7600_v40 }
 0x456   : > { %v14025_v45 = vor.u32 %v16174_v3, %v14024_v31  ;;  %7831 = vmatpush.bf16.msrb.mxu2 %v13513_v24  ;;  %7850 = vmatpush.bf16.msra.mxu0 %v10893_v46  ;;  %v11210_v31 = vld [vmem:[#allocation3 + $0x668] sm:$0xf0] }
 0x457   : > { %7819 = vmatmul.bf16.vlgmr.msrb.gmra.mxu1 %v17040_v44  ;;  %v15590_v3 = vld [vmem:[#allocation3 + $0xa2c] sm:$0xf]  ;;  %v11213_v51 = vor.u32 %v15462_v28, %v11210_v31 }
 0x458   : > { %7844 = vmatpush.bf16.msrb.mxu3 %v14025_v45  ;;  %7863 = vmatpush.bf16.msra.mxu1 %v11405_v47  ;;  %v11725_v39 = vor.u32 %v15590_v3, %v11722_v56  ;;  %v15318_v24 = vld [vmem:[#allocation3 + $0x1ac] sm:$0xf]  ;;  %v12237_v45 = vor.u32 %v15718_v32, %v12234_v33 }
 0x459   : > { %7832 = vmatmul.bf16.vlgmr.msrb.gmra.mxu2 %v17034_v38  ;;  %v15446_v43 = vld [vmem:[#allocation3 + $0x5ac] sm:$0xf] }
 0x45a   : > { %7876 = vmatpush.bf16.msra.mxu2 %v11917_v60  ;;  %7851 = vmatpush.bf16.msra.mxu0 %v10829_v2  ;;  %v11146_v46 = vld [vmem:[#allocation3 + $0x5e8] sm:$0xf0]  ;;  %v7601_v14 = vpop.f32.mrf.mxu0 }
 0x45b   : > { %7845 = vmatmul.bf16.vlgmr.msrb.gmra.mxu3 %v17038_v42  ;;  %v15574_v47 = vld [vmem:[#allocation3 + $0x9ac] sm:$0xf]  ;;  %v11149_v21 = vor.u32 %v15446_v43, %v11146_v46 }
 0x45c   : > { %7889 = vmatpush.bf16.msra.mxu3 %v12429_v0  ;;  %7864 = vmatpush.bf16.msra.mxu1 %v11341_v4  ;;  %v11658_v60 = vld [vmem:[#allocation3 + $0x9e8] sm:$0xf0]  ;;  %v10637_v0 = vor.u32 %v15318_v24, %v10634_v53  ;;  %v7626_v4 = vadd.f32 %v7625_v49, %v7613_v48  ;;  %v7614_v27 = vpop.f32.mrf.mxu1  ;;  %v7627_v53 = vpop.f32.mrf.mxu2 }
 0x45d   : > { %v15702_v50 = vld [vmem:[#allocation3 + $0xdac] sm:$0xf]  ;;  %v11661_v6 = vor.u32 %v15574_v47, %v11658_v60 }
 0x45e   : > { %7877 = vmatpush.bf16.msra.mxu2 %v11853_v5  ;;  %7852 = vmatpush.bf16.msra.mxu0 %v10765_v16  ;;  %v12170_v54 = vld [vmem:[#allocation3 + $0xde8] sm:$0xf0]  ;;  %v7638_v5 = vpop.f32.mrf.mxu3 }
 0x45f   : > { %v15302_v62 = vld [vmem:[#allocation3 + $0x12c] sm:$0xf]  ;;  %v12173_v2 = vor.u32 %v15702_v50, %v12170_v54  ;;  %v17200_v12 = vadd.f32 %v7638_v5, %v7626_v4 }
 0x460   : > { %7890 = vmatpush.bf16.msra.mxu3 %v12365_v10  ;;  %7865 = vmatpush.bf16.msra.mxu1 %v11277_v29  ;;  %v10570_v63 = vld [vmem:[#allocation3 + $0x168] sm:$0xf0] }
 0x461   : > { %v15430_v1 = vld [vmem:[#allocation3 + $0x52c] sm:$0xf]  ;;  %v10573_v13 = vor.u32 %v15302_v62, %v10570_v63 }
 0x462   : > { %7878 = vmatpush.bf16.msra.mxu2 %v11789_v17  ;;  %7853 = vmatpush.bf16.msra.mxu0 %v10701_v36  ;;  %v11082_v7 = vld [vmem:[#allocation3 + $0x568] sm:$0xf0] }
 0x463   : > { %v15558_v8 = vld [vmem:[#allocation3 + $0x92c] sm:$0xf]  ;;  %v11085_v15 = vor.u32 %v15430_v1, %v11082_v7 }
 0x464   : > { %7891 = vmatpush.bf16.msra.mxu3 %v12301_v30  ;;  %7866 = vmatpush.bf16.msra.mxu1 %v11213_v51  ;;  %v11594_v9 = vld [vmem:[#allocation3 + $0x968] sm:$0xf0] }
 0x465   : > { %v15686_v10 = vld [vmem:[#allocation3 + $0xd2c] sm:$0xf]  ;;  %v11597_v16 = vor.u32 %v15558_v8, %v11594_v9 }
 0x466   : > { %7879 = vmatpush.bf16.msra.mxu2 %v11725_v39  ;;  %v12106_v11 = vld [vmem:[#allocation3 + $0xd68] sm:$0xf0]  ;;  %7854 = vmatpush.bf16.msra.mxu0 %v10637_v0  ;;  %v7640_v60 = vpop.f32.mrf.mxu3 }
 0x467   : > { %v15286_v29 = vld [vmem:[#allocation3 + $0xac] sm:$0xf]  ;;  %v12109_v28 = vor.u32 %v15686_v10, %v12106_v11 }
 0x468   : > { %7892 = vmatpush.bf16.msra.mxu3 %v12237_v45  ;;  %7867 = vmatpush.bf16.msra.mxu1 %v11149_v21  ;;  %v10506_v17 = vld [vmem:[#allocation3 + $0xe8] sm:$0xf0] }
 0x469   : > { %v15414_v23 = vld [vmem:[#allocation3 + $0x4ac] sm:$0xf]  ;;  %v10509_v33 = vor.u32 %v15286_v29, %v10506_v17 }
 0x46a   : > { %7880 = vmatpush.bf16.msra.mxu2 %v11661_v6  ;;  %v11018_v30 = vld [vmem:[#allocation3 + $0x4e8] sm:$0xf0]  ;;  %7855 = vmatpush.bf16.msra.mxu0 %v10573_v13 }
 0x46b   : > { %v15542_v31 = vld [vmem:[#allocation3 + $0x8ac] sm:$0xf]  ;;  %v11021_v51 = vor.u32 %v15414_v23, %v11018_v30 }
 0x46c   : > { %7893 = vmatpush.bf16.msra.mxu3 %v12173_v2  ;;  %v11530_v3 = vld [vmem:[#allocation3 + $0x8e8] sm:$0xf0]  ;;  %7868 = vmatpush.bf16.msra.mxu1 %v11085_v15 }
 0x46d   : > { %v15670_v56 = vld [vmem:[#allocation3 + $0xcac] sm:$0xf]  ;;  %v11533_v39 = vor.u32 %v15542_v31, %v11530_v3 }
 0x46e   : > { %v12042_v32 = vld [vmem:[#allocation3 + $0xce8] sm:$0xf0]  ;;  %7881 = vmatpush.bf16.msra.mxu2 %v11597_v16  ;;  %7856 = vmatpush.bf16.msra.mxu0 %v10509_v33 }
 0x46f   : > { %v15270_v36 = vld [vmem:[#allocation3 + $0x2c] sm:$0xf]  ;;  %v12045_v43 = vor.u32 %v15670_v56, %v12042_v32 }
 0x470   : > { %v10442_v37 = vld [vmem:[#allocation3 + $0x68] sm:$0xf0]  ;;  %7894 = vmatpush.bf16.msra.mxu3 %v12109_v28  ;;  %7869 = vmatpush.bf16.msra.mxu1 %v11021_v51 }
 0x471   : > { %v15398_v40 = vld [vmem:[#allocation3 + $0x42c] sm:$0xf]  ;;  %v10445_v0 = vor.u32 %v15270_v36, %v10442_v37 }
 0x472   : > { %v10954_v52 = vld [vmem:[#allocation3 + $0x468] sm:$0xf0]  ;;  %7882 = vmatpush.bf16.msra.mxu2 %v11533_v39 }
 0x473   : > { %v15526_v24 = vld [vmem:[#allocation3 + $0x82c] sm:$0xf]  ;;  %v10957_v62 = vor.u32 %v15398_v40, %v10954_v52  ;;  %7857 = vmatpush.bf16.msra.mxu0 %v10445_v0 }
 0x474   : > { %v11466_v45 = vld [vmem:[#allocation3 + $0x868] sm:$0xf0]  ;;  %7895 = vmatpush.bf16.msra.mxu3 %v12045_v43 }
 0x475   : > { %v15654_v46 = vld [vmem:[#allocation3 + $0xc2c] sm:$0xf]  ;;  %v11469_v63 = vor.u32 %v15526_v24, %v11466_v45  ;;  %7870 = vmatpush.bf16.msra.mxu1 %v10957_v62  ;;  %v1535_v45 = vperm.slane %v17187_v61, 1 }
 0x476   : > { %v11978_v47 = vld [vmem:[#allocation3 + $0xc68] sm:$0xf0]  ;;  %7858 = vmatmul.bf16.vlgmr.msra.gmra.mxu0 %v17022_v19 }
 0x477   : > { %v15894_v48 = vld [vmem:[#allocation3 + $0x13ac] sm:$0xf]  ;;  %v11981_v4 = vor.u32 %v15654_v46, %v11978_v47  ;;  %7883 = vmatpush.bf16.msra.mxu2 %v11469_v63 }
 0x478   : > { %v12938_v50 = vld [vmem:[#allocation3 + $0x13e8] sm:$0xf0]  ;;  %7871 = vmatmul.bf16.vlgmr.msra.gmra.mxu1 %v17026_v22 }
 0x479   : > { %v16022_v54 = vld [vmem:[#allocation3 + $0x17ac] sm:$0xf]  ;;  %v12941_v5 = vor.u32 %v15894_v48, %v12938_v50  ;;  %7896 = vmatpush.bf16.msra.mxu3 %v11981_v4  ;;  %v7664_v4 = vpop.f32.mrf.mxu1 }
 0x47a   : > { %v13450_v21 = vld [vmem:[#allocation3 + $0x17e8] sm:$0xf0]  ;;  %7884 = vmatmul.bf16.vlgmr.msra.gmra.mxu2 %v17020_v18 }
 0x47b   : > { %v16150_v6 = vld [vmem:[#allocation3 + $0x1bac] sm:$0xf]  ;;  %v13453_v7 = vor.u32 %v16022_v54, %v13450_v21  ;;  %7902 = vmatpush.bf16.msrb.mxu0 %v12941_v5  ;;  %v7651_v21 = vpop.f32.mrf.mxu0 }
 0x47c   : > { %v13962_v49 = vld [vmem:[#allocation3 + $0x1be8] sm:$0xf0]  ;;  %7897 = vmatmul.bf16.vlgmr.msra.gmra.mxu3 %v17024_v20 }
 0x47d   : > { %v16278_v1 = vld [vmem:[#allocation3 + $0x1fac] sm:$0xf]  ;;  %v13965_v8 = vor.u32 %v16150_v6, %v13962_v49  ;;  %7915 = vmatpush.bf16.msrb.mxu1 %v13453_v7 }
 0x47e   : > { %v14474_v2 = vld [vmem:[#allocation3 + $0x1fe8] sm:$0xf0] }
 0x47f   : > { %v15878_v9 = vld [vmem:[#allocation3 + $0x132c] sm:$0xf]  ;;  %v14477_v13 = vor.u32 %v16278_v1, %v14474_v2  ;;  %7928 = vmatpush.bf16.msrb.mxu2 %v13965_v8  ;;  %v7652_v2 = vadd.f32 %v7651_v21, %v1535_v45 }
 0x480   : > { %v12874_v10 = vld [vmem:[#allocation3 + $0x1368] sm:$0xf0] }
 0x481   : > { %v16006_v11 = vld [vmem:[#allocation3 + $0x172c] sm:$0xf]  ;;  %v12877_v23 = vor.u32 %v15878_v9, %v12874_v10  ;;  %7941 = vmatpush.bf16.msrb.mxu3 %v14477_v13 }
 0x482   : > { %v13386_v14 = vld [vmem:[#allocation3 + $0x1768] sm:$0xf0] }
 0x483   : > { %v16134_v15 = vld [vmem:[#allocation3 + $0x1b2c] sm:$0xf]  ;;  %v13389_v27 = vor.u32 %v16006_v11, %v13386_v14  ;;  %7903 = vmatpush.bf16.msrb.mxu0 %v12877_v23  ;;  %v7665_v11 = vadd.f32 %v7664_v4, %v7652_v2  ;;  %v7677_v23 = vpop.f32.mrf.mxu2 }
 0x484   : > { %v13898_v16 = vld [vmem:[#allocation3 + $0x1b68] sm:$0xf0] }
 0x485   : > { %v16262_v29 = vld [vmem:[#allocation3 + $0x1f2c] sm:$0xf]  ;;  %v13901_v28 = vor.u32 %v16134_v15, %v13898_v16  ;;  %7916 = vmatpush.bf16.msrb.mxu1 %v13389_v27 }
 0x486   : > { %v14410_v17 = vld [vmem:[#allocation3 + $0x1f68] sm:$0xf0] }
 0x487   : > { %v15862_v30 = vld [vmem:[#allocation3 + $0x12ac] sm:$0xf]  ;;  %v14413_v56 = vor.u32 %v16262_v29, %v14410_v17  ;;  %7929 = vmatpush.bf16.msrb.mxu2 %v13901_v28 }
 0x488   : > { %v12810_v31 = vld [vmem:[#allocation3 + $0x12e8] sm:$0xf0] }
 0x489   : > { %v15990_v3 = vld [vmem:[#allocation3 + $0x16ac] sm:$0xf]  ;;  %v12813_v39 = vor.u32 %v15862_v30, %v12810_v31  ;;  %7942 = vmatpush.bf16.msrb.mxu3 %v14413_v56  ;;  %v7690_v56 = vpop.f32.mrf.mxu3 }
 0x48a   : > { %v13322_v32 = vld [vmem:[#allocation3 + $0x16e8] sm:$0xf0] }
 0x48b   : > { %v16118_v33 = vld [vmem:[#allocation3 + $0x1aac] sm:$0xf]  ;;  %v13325_v52 = vor.u32 %v15990_v3, %v13322_v32  ;;  %7904 = vmatpush.bf16.msrb.mxu0 %v12813_v39  ;;  %v7678_v3 = vadd.f32 %v7677_v23, %v7665_v11  ;;  %v7679_v2 = vpop.f32.mrf.mxu2  ;;  %v11408_v11 = vld [vmem:[#allocation3 + $0x7b0] sm:$0xf] }
 0x48c   : > { %v13834_v36 = vld [vmem:[#allocation3 + $0x1ae8] sm:$0xf0]  ;;  %v12432_v23 = vld [vmem:[#allocation3 + $0xfb0] sm:$0xf] }
 0x48d   : > { %v16246_v37 = vld [vmem:[#allocation3 + $0x1eac] sm:$0xf]  ;;  %v13837_v24 = vor.u32 %v16118_v33, %v13834_v36  ;;  %7917 = vmatpush.bf16.msrb.mxu1 %v13325_v52  ;;  %v15343_v2 = vld [vmem:[#allocation3 + $0x26c] sm:$0xf0] }
 0x48e   : > { %v14346_v51 = vld [vmem:[#allocation3 + $0x1ee8] sm:$0xf0] }
 0x48f   : > { %v15846_v40 = vld [vmem:[#allocation3 + $0x122c] sm:$0xf]  ;;  %v14349_v46 = vor.u32 %v16246_v37, %v14346_v51  ;;  %7930 = vmatpush.bf16.msrb.mxu2 %v13837_v24  ;;  %v17207_v37 = vadd.f32 %v7690_v56, %v7678_v3  ;;  %v7653_v51 = vpop.f32.mrf.mxu0  ;;  %v10832_v56 = vld [vmem:[#allocation3 + $0x330] sm:$0xf] }
 0x490   : > { %v12746_v53 = vld [vmem:[#allocation3 + $0x1268] sm:$0xf0]  ;;  %v15503_v51 = vld [vmem:[#allocation3 + $0x76c] sm:$0xf0] }
 0x491   : > { %v15974_v43 = vld [vmem:[#allocation3 + $0x162c] sm:$0xf]  ;;  %v12749_v0 = vor.u32 %v15846_v40, %v12746_v53  ;;  %7943 = vmatpush.bf16.msrb.mxu3 %v14349_v46 }
 0x492   : > { %v13258_v47 = vld [vmem:[#allocation3 + $0x1668] sm:$0xf0] }
 0x493   : > { %v16102_v60 = vld [vmem:[#allocation3 + $0x1a2c] sm:$0xf]  ;;  %v13261_v6 = vor.u32 %v15974_v43, %v13258_v47  ;;  %7905 = vmatpush.bf16.msrb.mxu0 %v12749_v0  ;;  %v7666_v43 = vpop.f32.mrf.mxu1 }
 0x494   : > { %v13770_v48 = vld [vmem:[#allocation3 + $0x1a68] sm:$0xf0] }
 0x495   : > { %v16230_v50 = vld [vmem:[#allocation3 + $0x1e2c] sm:$0xf]  ;;  %v13773_v49 = vor.u32 %v16102_v60, %v13770_v48  ;;  %7918 = vmatpush.bf16.msrb.mxu1 %v13261_v6 }
 0x496   : > { %v14282_v54 = vld [vmem:[#allocation3 + $0x1e68] sm:$0xf0] }
 0x497   : > { %v15830_v62 = vld [vmem:[#allocation3 + $0x11ac] sm:$0xf]  ;;  %v14285_v61 = vor.u32 %v16230_v50, %v14282_v54  ;;  %7931 = vmatpush.bf16.msrb.mxu2 %v13773_v49 }
 0x498   : > { %v12682_v63 = vld [vmem:[#allocation3 + $0x11e8] sm:$0xf0] }
 0x499   : > { %v15958_v1 = vld [vmem:[#allocation3 + $0x15ac] sm:$0xf]  ;;  %v12685_v13 = vor.u32 %v15830_v62, %v12682_v63  ;;  %7944 = vmatpush.bf16.msrb.mxu3 %v14285_v61 }
 0x49a   : > { %v13194_v5 = vld [vmem:[#allocation3 + $0x15e8] sm:$0xf0] }
 0x49b   : > { %v16086_v7 = vld [vmem:[#allocation3 + $0x19ac] sm:$0xf]  ;;  %v13197_v14 = vor.u32 %v15958_v1, %v13194_v5  ;;  %7906 = vmatpush.bf16.msrb.mxu0 %v12685_v13 }
 0x49c   : > { %v13706_v8 = vld [vmem:[#allocation3 + $0x19e8] sm:$0xf0] }
 0x49d   : > { %v16214_v9 = vld [vmem:[#allocation3 + $0x1dac] sm:$0xf]  ;;  %v13709_v15 = vor.u32 %v16086_v7, %v13706_v8  ;;  %7919 = vmatpush.bf16.msrb.mxu1 %v13197_v14  ;;  %v7692_v8 = vpop.f32.mrf.mxu3  ;;  %v15519_v14 = vld [vmem:[#allocation3 + $0x7ec] sm:$0xf0] }
 0x49e   : > { %v14218_v10 = vld [vmem:[#allocation3 + $0x1de8] sm:$0xf0]  ;;  %v15599_v8 = vld [vmem:[#allocation3 + $0xa6c] sm:$0xf0] }
 0x49f   : > { %v15814_v16 = vld [vmem:[#allocation3 + $0x112c] sm:$0xf]  ;;  %v14221_v27 = vor.u32 %v16214_v9, %v14218_v10  ;;  %7932 = vmatpush.bf16.msrb.mxu2 %v13709_v15  ;;  %v10896_v9 = vld [vmem:[#allocation3 + $0x3b0] sm:$0xf] }
 0x4a0   : > { %v12618_v29 = vld [vmem:[#allocation3 + $0x1168] sm:$0xf0]  ;;  %v15391_v10 = vld [vmem:[#allocation3 + $0x3ec] sm:$0xf0] }
 0x4a1   : > { %v15942_v17 = vld [vmem:[#allocation3 + $0x152c] sm:$0xf]  ;;  %v12621_v36 = vor.u32 %v15814_v16, %v12618_v29  ;;  %7945 = vmatpush.bf16.msrb.mxu3 %v14221_v27  ;;  %v11920_v15 = vld [vmem:[#allocation3 + $0xbb0] sm:$0xf] }
 0x4a2   : > { %v13130_v28 = vld [vmem:[#allocation3 + $0x1568] sm:$0xf0]  ;;  %v15647_v16 = vld [vmem:[#allocation3 + $0xbec] sm:$0xf0] }
 0x4a3   : > { %v16070_v30 = vld [vmem:[#allocation3 + $0x192c] sm:$0xf]  ;;  %v13133_v39 = vor.u32 %v15942_v17, %v13130_v28  ;;  %7907 = vmatpush.bf16.msrb.mxu0 %v12621_v36  ;;  %v15775_v27 = vld [vmem:[#allocation3 + $0xfec] sm:$0xf0]  ;;  %v11921_v3 = vor.u32 %v15647_v16, %v11920_v15 }
 0x4a4   : > { %v13642_v31 = vld [vmem:[#allocation3 + $0x1968] sm:$0xf0]  ;;  %v12433_v36 = vor.u32 %v15775_v27, %v12432_v23  ;;  %v15327_v23 = vld [vmem:[#allocation3 + $0x1ec] sm:$0xf0] }
 0x4a5   : > { %v16198_v32 = vld [vmem:[#allocation3 + $0x1d2c] sm:$0xf]  ;;  %v13645_v40 = vor.u32 %v16070_v30, %v13642_v31  ;;  %7920 = vmatpush.bf16.msrb.mxu1 %v13133_v39  ;;  %v10897_v30 = vor.u32 %v15391_v10, %v10896_v9  ;;  %v11409_v31 = vor.u32 %v15519_v14, %v11408_v11  ;;  %v11856_v39 = vld [vmem:[#allocation3 + $0xb30] sm:$0xf] }
 0x4a6   : > { %v14154_v33 = vld [vmem:[#allocation3 + $0x1d68] sm:$0xf0]  ;;  %v12240_v9 = vld [vmem:[#allocation3 + $0xe30] sm:$0xf] }
 0x4a7   : > { %v15798_v52 = vld [vmem:[#allocation3 + $0x10ac] sm:$0xf]  ;;  %v14157_v45 = vor.u32 %v16198_v32, %v14154_v33  ;;  %7933 = vmatpush.bf16.msrb.mxu2 %v13645_v40  ;;  %v15375_v32 = vld [vmem:[#allocation3 + $0x36c] sm:$0xf0] }
 0x4a8   : > { %v12554_v24 = vld [vmem:[#allocation3 + $0x10e8] sm:$0xf0]  ;;  %v11344_v33 = vld [vmem:[#allocation3 + $0x730] sm:$0xf] }
 0x4a9   : > { %v15926_v53 = vld [vmem:[#allocation3 + $0x14ac] sm:$0xf]  ;;  %v12557_v54 = vor.u32 %v15798_v52, %v12554_v24  ;;  %7946 = vmatpush.bf16.msrb.mxu3 %v14157_v45  ;;  %v15631_v40 = vld [vmem:[#allocation3 + $0xb6c] sm:$0xf0]  ;;  %v11345_v43 = vor.u32 %v15503_v51, %v11344_v33 }
 0x4aa   : > { %v13066_v46 = vld [vmem:[#allocation3 + $0x14e8] sm:$0xf0]  ;;  %v12368_v52 = vld [vmem:[#allocation3 + $0xf30] sm:$0xf]  ;;  %v11857_v45 = vor.u32 %v15631_v40, %v11856_v39  ;;  %v7729_v40 = vpop.f32.mrf.mxu2 }
 0x4ab   : > { %v16054_v47 = vld [vmem:[#allocation3 + $0x18ac] sm:$0xf]  ;;  %v13069_v6 = vor.u32 %v15926_v53, %v13066_v46  ;;  %7908 = vmatpush.bf16.msrb.mxu0 %v12557_v54  ;;  %v15759_v24 = vld [vmem:[#allocation3 + $0xf6c] sm:$0xf0]  ;;  %v10833_v53 = vor.u32 %v15375_v32, %v10832_v56 }
 0x4ac   : > { %v13578_v60 = vld [vmem:[#allocation3 + $0x18e8] sm:$0xf0]  ;;  %v10768_v46 = vld [vmem:[#allocation3 + $0x2b0] sm:$0xf] }
 0x4ad   : > { %v16182_v48 = vld [vmem:[#allocation3 + $0x1cac] sm:$0xf]  ;;  %v13581_v49 = vor.u32 %v16054_v47, %v13578_v60  ;;  %7921 = vmatpush.bf16.msrb.mxu1 %v13069_v6  ;;  %v15359_v47 = vld [vmem:[#allocation3 + $0x2ec] sm:$0xf0] }
 0x4ae   : > { %v14090_v50 = vld [vmem:[#allocation3 + $0x1ce8] sm:$0xf0]  ;;  %v11280_v60 = vld [vmem:[#allocation3 + $0x6b0] sm:$0xf] }
 0x4af   : > { %v15782_v0 = vld [vmem:[#allocation3 + $0x102c] sm:$0xf]  ;;  %v14093_v4 = vor.u32 %v16182_v48, %v14090_v50  ;;  %7934 = vmatpush.bf16.msrb.mxu2 %v13581_v49  ;;  %v12369_v48 = vor.u32 %v15759_v24, %v12368_v52  ;;  %v15487_v50 = vld [vmem:[#allocation3 + $0x6ec] sm:$0xf0]  ;;  %v10769_v49 = vor.u32 %v15359_v47, %v10768_v46 }
 0x4b0   : > { %v12490_v21 = vld [vmem:[#allocation3 + $0x1068] sm:$0xf0]  ;;  %v11792_v54 = vld [vmem:[#allocation3 + $0xab0] sm:$0xf] }
 0x4b1   : > { %v15910_v62 = vld [vmem:[#allocation3 + $0x142c] sm:$0xf]  ;;  %v12493_v13 = vor.u32 %v15782_v0, %v12490_v21  ;;  %7947 = vmatpush.bf16.msrb.mxu3 %v14093_v4  ;;  %v15615_v0 = vld [vmem:[#allocation3 + $0xaec] sm:$0xf0] }
 0x4b2   : > { %v13002_v63 = vld [vmem:[#allocation3 + $0x1468] sm:$0xf0]  ;;  %v12304_v21 = vld [vmem:[#allocation3 + $0xeb0] sm:$0xf] }
 0x4b3   : > { %v16038_v1 = vld [vmem:[#allocation3 + $0x182c] sm:$0xf]  ;;  %v13005_v29 = vor.u32 %v15910_v62, %v13002_v63  ;;  %7909 = vmatpush.bf16.msrb.mxu0 %v12493_v13  ;;  %v15743_v6 = vld [vmem:[#allocation3 + $0xeec] sm:$0xf0]  ;;  %v11281_v62 = vor.u32 %v15487_v50, %v11280_v60  ;;  %v11793_v63 = vor.u32 %v15615_v0, %v11792_v54  ;;  %v7703_v13 = vpop.f32.mrf.mxu0 }
 0x4b4   : > { %v13514_v61 = vld [vmem:[#allocation3 + $0x1868] sm:$0xf0]  ;;  %v11216_v4 = vld [vmem:[#allocation3 + $0x630] sm:$0xf]  ;;  %v7704_v16 = vadd.f32 %v7703_v13, %v17207_v37 }
 0x4b5   : > { %v16166_v5 = vld [vmem:[#allocation3 + $0x1c2c] sm:$0xf]  ;;  %v13517_v17 = vor.u32 %v16038_v1, %v13514_v61  ;;  %7922 = vmatpush.bf16.msrb.mxu1 %v13005_v29  ;;  %v10704_v1 = vld [vmem:[#allocation3 + $0x230] sm:$0xf]  ;;  %v12305_v61 = vor.u32 %v15743_v6, %v12304_v21  ;;  %v7716_v29 = vpop.f32.mrf.mxu1 }
 0x4b6   : > { %v14026_v7 = vld [vmem:[#allocation3 + $0x1c68] sm:$0xf0]  ;;  %7910 = vmatmul.bf16.vlgmr.msrb.gmra.mxu0 %v17036_v41  ;;  %v15727_v10 = vld [vmem:[#allocation3 + $0xe6c] sm:$0xf0]  ;;  %v10705_v11 = vor.u32 %v15343_v2, %v10704_v1  ;;  %v7717_v56 = vadd.f32 %v7716_v29, %v7704_v16 }
 0x4b7   : > { %v14029_v28 = vor.u32 %v16166_v5, %v14026_v7  ;;  %7935 = vmatpush.bf16.msrb.mxu2 %v13517_v17  ;;  %7954 = vmatpush.bf16.msra.mxu0 %v10897_v30  ;;  %v15471_v5 = vld [vmem:[#allocation3 + $0x66c] sm:$0xf0] }
 0x4b8   : > { %7923 = vmatmul.bf16.vlgmr.msrb.gmra.mxu1 %v17040_v44  ;;  %v11728_v7 = vld [vmem:[#allocation3 + $0xa30] sm:$0xf]  ;;  %v11217_v14 = vor.u32 %v15471_v5, %v11216_v4 }
 0x4b9   : > { %7948 = vmatpush.bf16.msrb.mxu3 %v14029_v28  ;;  %7967 = vmatpush.bf16.msra.mxu1 %v11409_v31  ;;  %v11729_v15 = vor.u32 %v15599_v8, %v11728_v7  ;;  %v10640_v17 = vld [vmem:[#allocation3 + $0x1b0] sm:$0xf]  ;;  %v12241_v28 = vor.u32 %v15727_v10, %v12240_v9 }
 0x4ba   : > { %7936 = vmatmul.bf16.vlgmr.msrb.gmra.mxu2 %v17034_v38  ;;  %v11152_v27 = vld [vmem:[#allocation3 + $0x5b0] sm:$0xf] }
 0x4bb   : > { %7980 = vmatpush.bf16.msra.mxu2 %v11921_v3  ;;  %7955 = vmatpush.bf16.msra.mxu0 %v10833_v53  ;;  %v15455_v30 = vld [vmem:[#allocation3 + $0x5ec] sm:$0xf0]  ;;  %v7705_v21 = vpop.f32.mrf.mxu0 }
 0x4bc   : > { %7949 = vmatmul.bf16.vlgmr.msrb.gmra.mxu3 %v17038_v42  ;;  %v11664_v31 = vld [vmem:[#allocation3 + $0x9b0] sm:$0xf]  ;;  %v11153_v51 = vor.u32 %v15455_v30, %v11152_v27 }
 0x4bd   : > { %7993 = vmatpush.bf16.msra.mxu3 %v12433_v36  ;;  %7968 = vmatpush.bf16.msra.mxu1 %v11345_v43  ;;  %v15583_v3 = vld [vmem:[#allocation3 + $0x9ec] sm:$0xf0]  ;;  %v10641_v36 = vor.u32 %v15327_v23, %v10640_v17  ;;  %v7730_v43 = vadd.f32 %v7729_v40, %v7717_v56  ;;  %v7718_v2 = vpop.f32.mrf.mxu1  ;;  %v7731_v23 = vpop.f32.mrf.mxu2 }
 0x4be   : > { %v12176_v32 = vld [vmem:[#allocation3 + $0xdb0] sm:$0xf]  ;;  %v11665_v39 = vor.u32 %v15583_v3, %v11664_v31 }
 0x4bf   : > { %7981 = vmatpush.bf16.msra.mxu2 %v11857_v45  ;;  %7956 = vmatpush.bf16.msra.mxu0 %v10769_v49  ;;  %v15711_v33 = vld [vmem:[#allocation3 + $0xdec] sm:$0xf0]  ;;  %v7742_v45 = vpop.f32.mrf.mxu3 }
 0x4c0   : > { %v10576_v37 = vld [vmem:[#allocation3 + $0x130] sm:$0xf]  ;;  %v12177_v53 = vor.u32 %v15711_v33, %v12176_v32  ;;  %v17214_v54 = vadd.f32 %v7742_v45, %v7730_v43 }
 0x4c1   : > { %7994 = vmatpush.bf16.msra.mxu3 %v12369_v48  ;;  %7969 = vmatpush.bf16.msra.mxu1 %v11281_v62  ;;  %v15311_v52 = vld [vmem:[#allocation3 + $0x16c] sm:$0xf0] }
 0x4c2   : > { %v11088_v24 = vld [vmem:[#allocation3 + $0x530] sm:$0xf]  ;;  %v10577_v0 = vor.u32 %v15311_v52, %v10576_v37 }
 0x4c3   : > { %7982 = vmatpush.bf16.msra.mxu2 %v11793_v63  ;;  %7957 = vmatpush.bf16.msra.mxu0 %v10705_v11  ;;  %v15439_v46 = vld [vmem:[#allocation3 + $0x56c] sm:$0xf0] }
 0x4c4   : > { %v11600_v47 = vld [vmem:[#allocation3 + $0x930] sm:$0xf]  ;;  %v11089_v6 = vor.u32 %v15439_v46, %v11088_v24 }
 0x4c5   : > { %7995 = vmatpush.bf16.msra.mxu3 %v12305_v61  ;;  %7970 = vmatpush.bf16.msra.mxu1 %v11217_v14  ;;  %v15567_v60 = vld [vmem:[#allocation3 + $0x96c] sm:$0xf0] }
 0x4c6   : > { %v12112_v48 = vld [vmem:[#allocation3 + $0xd30] sm:$0xf]  ;;  %v11601_v49 = vor.u32 %v15567_v60, %v11600_v47 }
 0x4c7   : > { %7983 = vmatpush.bf16.msra.mxu2 %v11729_v15  ;;  %v15695_v50 = vld [vmem:[#allocation3 + $0xd6c] sm:$0xf0]  ;;  %7958 = vmatpush.bf16.msra.mxu0 %v10641_v36  ;;  %v7744_v3 = vpop.f32.mrf.mxu3 }
 0x4c8   : > { %v10512_v62 = vld [vmem:[#allocation3 + $0xb0] sm:$0xf]  ;;  %v12113_v4 = vor.u32 %v15695_v50, %v12112_v48 }
 0x4c9   : > { %7996 = vmatpush.bf16.msra.mxu3 %v12241_v28  ;;  %7971 = vmatpush.bf16.msra.mxu1 %v11153_v51  ;;  %v15295_v63 = vld [vmem:[#allocation3 + $0xec] sm:$0xf0] }
 0x4ca   : > { %v11024_v1 = vld [vmem:[#allocation3 + $0x4b0] sm:$0xf]  ;;  %v10513_v10 = vor.u32 %v15295_v63, %v10512_v62 }
 0x4cb   : > { %7984 = vmatpush.bf16.msra.mxu2 %v11665_v39  ;;  %v15423_v61 = vld [vmem:[#allocation3 + $0x4ec] sm:$0xf0]  ;;  %7959 = vmatpush.bf16.msra.mxu0 %v10577_v0 }
 0x4cc   : > { %v11536_v5 = vld [vmem:[#allocation3 + $0x8b0] sm:$0xf]  ;;  %v11025_v14 = vor.u32 %v15423_v61, %v11024_v1 }
 0x4cd   : > { %7997 = vmatpush.bf16.msra.mxu3 %v12177_v53  ;;  %v15551_v7 = vld [vmem:[#allocation3 + $0x8ec] sm:$0xf0]  ;;  %7972 = vmatpush.bf16.msra.mxu1 %v11089_v6 }
 0x4ce   : > { %v12048_v8 = vld [vmem:[#allocation3 + $0xcb0] sm:$0xf]  ;;  %v11537_v15 = vor.u32 %v15551_v7, %v11536_v5 }
 0x4cf   : > { %v15679_v9 = vld [vmem:[#allocation3 + $0xcec] sm:$0xf0]  ;;  %7985 = vmatpush.bf16.msra.mxu2 %v11601_v49  ;;  %7960 = vmatpush.bf16.msra.mxu0 %v10513_v10 }
 0x4d0   : > { %v10448_v11 = vld [vmem:[#allocation3 + $0x30] sm:$0xf]  ;;  %v12049_v27 = vor.u32 %v15679_v9, %v12048_v8 }
 0x4d1   : > { %v15279_v13 = vld [vmem:[#allocation3 + $0x6c] sm:$0xf0]  ;;  %7998 = vmatpush.bf16.msra.mxu3 %v12113_v4  ;;  %7973 = vmatpush.bf16.msra.mxu1 %v11025_v14 }
 0x4d2   : > { %v10960_v16 = vld [vmem:[#allocation3 + $0x430] sm:$0xf]  ;;  %v10449_v36 = vor.u32 %v15279_v13, %v10448_v11 }
 0x4d3   : > { %v15407_v29 = vld [vmem:[#allocation3 + $0x46c] sm:$0xf0]  ;;  %7986 = vmatpush.bf16.msra.mxu2 %v11537_v15 }
 0x4d4   : > { %v11472_v17 = vld [vmem:[#allocation3 + $0x830] sm:$0xf]  ;;  %v10961_v37 = vor.u32 %v15407_v29, %v10960_v16  ;;  %7961 = vmatpush.bf16.msra.mxu0 %v10449_v36 }
 0x4d5   : > { %v15535_v28 = vld [vmem:[#allocation3 + $0x86c] sm:$0xf0]  ;;  %7999 = vmatpush.bf16.msra.mxu3 %v12049_v27 }
 0x4d6   : > { %v11984_v30 = vld [vmem:[#allocation3 + $0xc30] sm:$0xf]  ;;  %v11473_v52 = vor.u32 %v15535_v28, %v11472_v17  ;;  %7974 = vmatpush.bf16.msra.mxu1 %v10961_v37  ;;  %v17220_v28 = vld [vmem:[#allocation5 + $0x8] sm:$0xff] }
 0x4d7   : > { %v15663_v31 = vld [vmem:[#allocation3 + $0xc6c] sm:$0xf0]  ;;  %7962 = vmatmul.bf16.vlgmr.msra.gmra.mxu0 %v17022_v19 }
 0x4d8   : > { %v12944_v56 = vld [vmem:[#allocation3 + $0x13b0] sm:$0xf]  ;;  %v11985_v43 = vor.u32 %v15663_v31, %v11984_v30  ;;  %7987 = vmatpush.bf16.msra.mxu2 %v11473_v52  ;;  %v1536_v30 = vperm.slane %v17220_v28, 2 }
 0x4d9   : > { %v15903_v32 = vld [vmem:[#allocation3 + $0x13ec] sm:$0xf0]  ;;  %7975 = vmatmul.bf16.vlgmr.msra.gmra.mxu1 %v17026_v22 }
 0x4da   : > { %v13456_v33 = vld [vmem:[#allocation3 + $0x17b0] sm:$0xf]  ;;  %v12945_v45 = vor.u32 %v15903_v32, %v12944_v56  ;;  %8000 = vmatpush.bf16.msra.mxu3 %v11985_v43 }
 0x4db   : > { %v16031_v51 = vld [vmem:[#allocation3 + $0x17ec] sm:$0xf0]  ;;  %7988 = vmatmul.bf16.vlgmr.msra.gmra.mxu2 %v17020_v18 }
 0x4dc   : > { %v13968_v39 = vld [vmem:[#allocation3 + $0x1bb0] sm:$0xf]  ;;  %v13457_v46 = vor.u32 %v16031_v51, %v13456_v33  ;;  %8006 = vmatpush.bf16.msrb.mxu0 %v12945_v45  ;;  %v7768_v45 = vpop.f32.mrf.mxu1 }
 0x4dd   : > { %v16159_v40 = vld [vmem:[#allocation3 + $0x1bec] sm:$0xf0]  ;;  %8001 = vmatmul.bf16.vlgmr.msra.gmra.mxu3 %v17024_v20 }
 0x4de   : > { %v14480_v24 = vld [vmem:[#allocation3 + $0x1fb0] sm:$0xf]  ;;  %v13969_v47 = vor.u32 %v16159_v40, %v13968_v39  ;;  %8019 = vmatpush.bf16.msrb.mxu1 %v13457_v46  ;;  %v7755_v39 = vpop.f32.mrf.mxu0 }
 0x4df   : > { %v16287_v53 = vld [vmem:[#allocation3 + $0x1fec] sm:$0xf0]  ;;  %v7756_v43 = vadd.f32 %v7755_v39, %v1536_v30 }
 0x4e0   : > { %v12880_v60 = vld [vmem:[#allocation3 + $0x1330] sm:$0xf]  ;;  %v14481_v0 = vor.u32 %v16287_v53, %v14480_v24  ;;  %8032 = vmatpush.bf16.msrb.mxu2 %v13969_v47 }
 0x4e1   : > { %v15887_v48 = vld [vmem:[#allocation3 + $0x136c] sm:$0xf0] }
 0x4e2   : > { %v13392_v50 = vld [vmem:[#allocation3 + $0x1730] sm:$0xf]  ;;  %v12881_v1 = vor.u32 %v15887_v48, %v12880_v60  ;;  %8045 = vmatpush.bf16.msrb.mxu3 %v14481_v0 }
 0x4e3   : > { %v16015_v21 = vld [vmem:[#allocation3 + $0x176c] sm:$0xf0] }
 0x4e4   : > { %v13904_v6 = vld [vmem:[#allocation3 + $0x1b30] sm:$0xf]  ;;  %v13393_v2 = vor.u32 %v16015_v21, %v13392_v50  ;;  %8007 = vmatpush.bf16.msrb.mxu0 %v12881_v1  ;;  %v7769_v21 = vadd.f32 %v7768_v45, %v7756_v43 }
 0x4e5   : > { %v16143_v49 = vld [vmem:[#allocation3 + $0x1b6c] sm:$0xf0] }
 0x4e6   : > { %v14416_v62 = vld [vmem:[#allocation3 + $0x1f30] sm:$0xf]  ;;  %v13905_v4 = vor.u32 %v16143_v49, %v13904_v6  ;;  %8020 = vmatpush.bf16.msrb.mxu1 %v13393_v2 }
 0x4e7   : > { %v16271_v63 = vld [vmem:[#allocation3 + $0x1f6c] sm:$0xf0] }
 0x4e8   : > { %v12816_v61 = vld [vmem:[#allocation3 + $0x12b0] sm:$0xf]  ;;  %v14417_v8 = vor.u32 %v16271_v63, %v14416_v62  ;;  %8033 = vmatpush.bf16.msrb.mxu2 %v13905_v4  ;;  %v7781_v4 = vpop.f32.mrf.mxu2 }
 0x4e9   : > { %v15871_v5 = vld [vmem:[#allocation3 + $0x12ec] sm:$0xf0] }
 0x4ea   : > { %v13328_v7 = vld [vmem:[#allocation3 + $0x16b0] sm:$0xf]  ;;  %v12817_v15 = vor.u32 %v15871_v5, %v12816_v61  ;;  %8046 = vmatpush.bf16.msrb.mxu3 %v14417_v8 }
 0x4eb   : > { %v15999_v9 = vld [vmem:[#allocation3 + $0x16ec] sm:$0xf0] }
 0x4ec   : > { %v13840_v10 = vld [vmem:[#allocation3 + $0x1ab0] sm:$0xf]  ;;  %v13329_v29 = vor.u32 %v15999_v9, %v13328_v7  ;;  %8008 = vmatpush.bf16.msrb.mxu0 %v12817_v15  ;;  %v7782_v9 = vadd.f32 %v7781_v4, %v7769_v21  ;;  %v15383_v21 = vld [vmem:[#allocation3 + $0x3b4] sm:$0xf] }
 0x4ed   : > { %v16127_v11 = vld [vmem:[#allocation3 + $0x1aec] sm:$0xf0] }
 0x4ee   : > { %v14352_v13 = vld [vmem:[#allocation3 + $0x1eb0] sm:$0xf]  ;;  %v13841_v17 = vor.u32 %v16127_v11, %v13840_v10  ;;  %8021 = vmatpush.bf16.msrb.mxu1 %v13329_v29  ;;  %v7794_v10 = vpop.f32.mrf.mxu3 }
 0x4ef   : > { %v16255_v14 = vld [vmem:[#allocation3 + $0x1eec] sm:$0xf0]  ;;  %v17223_v15 = vadd.f32 %v7794_v10, %v7782_v9 }
 0x4f0   : > { %v12752_v16 = vld [vmem:[#allocation3 + $0x1230] sm:$0xf]  ;;  %v14353_v31 = vor.u32 %v16255_v14, %v14352_v13  ;;  %8034 = vmatpush.bf16.msrb.mxu2 %v13841_v17 }
 0x4f1   : > { %v15855_v23 = vld [vmem:[#allocation3 + $0x126c] sm:$0xf0] }
 0x4f2   : > { %v13264_v27 = vld [vmem:[#allocation3 + $0x1630] sm:$0xf]  ;;  %v12753_v51 = vor.u32 %v15855_v23, %v12752_v16  ;;  %8047 = vmatpush.bf16.msrb.mxu3 %v14353_v31  ;;  %v7757_v16 = vpop.f32.mrf.mxu0  ;;  %v7770_v31 = vpop.f32.mrf.mxu1 }
 0x4f3   : > { %v15983_v3 = vld [vmem:[#allocation3 + $0x166c] sm:$0xf0]  ;;  %v15495_v16 = vld [vmem:[#allocation3 + $0x734] sm:$0xf] }
 0x4f4   : > { %v13776_v56 = vld [vmem:[#allocation3 + $0x1a30] sm:$0xf]  ;;  %v13265_v40 = vor.u32 %v15983_v3, %v13264_v27  ;;  %8009 = vmatpush.bf16.msrb.mxu0 %v12753_v51  ;;  %v12370_v31 = vld [vmem:[#allocation3 + $0xf70] sm:$0xf0] }
 0x4f5   : > { %v16111_v32 = vld [vmem:[#allocation3 + $0x1a6c] sm:$0xf0] }
 0x4f6   : > { %v14288_v33 = vld [vmem:[#allocation3 + $0x1e30] sm:$0xf]  ;;  %v13777_v37 = vor.u32 %v16111_v32, %v13776_v56  ;;  %8022 = vmatpush.bf16.msrb.mxu1 %v13265_v40 }
 0x4f7   : > { %v16239_v36 = vld [vmem:[#allocation3 + $0x1e6c] sm:$0xf0] }
 0x4f8   : > { %v12688_v52 = vld [vmem:[#allocation3 + $0x11b0] sm:$0xf]  ;;  %v14289_v46 = vor.u32 %v16239_v36, %v14288_v33  ;;  %8035 = vmatpush.bf16.msrb.mxu2 %v13777_v37 }
 0x4f9   : > { %v15839_v24 = vld [vmem:[#allocation3 + $0x11ec] sm:$0xf0] }
 0x4fa   : > { %v13200_v53 = vld [vmem:[#allocation3 + $0x15b0] sm:$0xf]  ;;  %v12689_v6 = vor.u32 %v15839_v24, %v12688_v52  ;;  %8048 = vmatpush.bf16.msrb.mxu3 %v14289_v46  ;;  %v7783_v46 = vpop.f32.mrf.mxu2 }
 0x4fb   : > { %v15967_v47 = vld [vmem:[#allocation3 + $0x15ec] sm:$0xf0] }
 0x4fc   : > { %v13712_v60 = vld [vmem:[#allocation3 + $0x19b0] sm:$0xf]  ;;  %v13201_v49 = vor.u32 %v15967_v47, %v13200_v53  ;;  %8010 = vmatpush.bf16.msrb.mxu0 %v12689_v6  ;;  %v10898_v6 = vld [vmem:[#allocation3 + $0x3f0] sm:$0xf0] }
 0x4fd   : > { %v16095_v48 = vld [vmem:[#allocation3 + $0x19ec] sm:$0xf0]  ;;  %v10901_v9 = vor.u32 %v15383_v21, %v10898_v6  ;;  %v15591_v21 = vld [vmem:[#allocation3 + $0xa34] sm:$0xf] }
 0x4fe   : > { %v14224_v50 = vld [vmem:[#allocation3 + $0x1db0] sm:$0xf]  ;;  %v13713_v62 = vor.u32 %v16095_v48, %v13712_v60  ;;  %8023 = vmatpush.bf16.msrb.mxu1 %v13201_v49  ;;  %v15511_v49 = vld [vmem:[#allocation3 + $0x7b4] sm:$0xf] }
 0x4ff   : > { %v16223_v0 = vld [vmem:[#allocation3 + $0x1dec] sm:$0xf0]  ;;  %v11730_v6 = vld [vmem:[#allocation3 + $0xa70] sm:$0xf0] }
 0x500   : > { %v12624_v63 = vld [vmem:[#allocation3 + $0x1130] sm:$0xf]  ;;  %v14225_v61 = vor.u32 %v16223_v0, %v14224_v50  ;;  %8036 = vmatpush.bf16.msrb.mxu2 %v13713_v62  ;;  %v7796_v0 = vpop.f32.mrf.mxu3 }
 0x501   : > { %v15823_v1 = vld [vmem:[#allocation3 + $0x116c] sm:$0xf0]  ;;  %v11218_v0 = vld [vmem:[#allocation3 + $0x670] sm:$0xf0] }
 0x502   : > { %v13136_v2 = vld [vmem:[#allocation3 + $0x1530] sm:$0xf]  ;;  %v12625_v14 = vor.u32 %v15823_v1, %v12624_v63  ;;  %8049 = vmatpush.bf16.msrb.mxu3 %v14225_v61  ;;  %v11410_v63 = vld [vmem:[#allocation3 + $0x7f0] sm:$0xf0] }
 0x503   : > { %v15951_v5 = vld [vmem:[#allocation3 + $0x156c] sm:$0xf0]  ;;  %v15639_v1 = vld [vmem:[#allocation3 + $0xbb4] sm:$0xf]  ;;  %v11413_v10 = vor.u32 %v15511_v49, %v11410_v63 }
 0x504   : > { %v13648_v7 = vld [vmem:[#allocation3 + $0x1930] sm:$0xf]  ;;  %v13137_v29 = vor.u32 %v15951_v5, %v13136_v2  ;;  %8011 = vmatpush.bf16.msrb.mxu0 %v12625_v14  ;;  %v11922_v2 = vld [vmem:[#allocation3 + $0xbf0] sm:$0xf0] }
 0x505   : > { %v16079_v8 = vld [vmem:[#allocation3 + $0x196c] sm:$0xf0]  ;;  %v15767_v5 = vld [vmem:[#allocation3 + $0xfb4] sm:$0xf] }
 0x506   : > { %v14160_v11 = vld [vmem:[#allocation3 + $0x1d30] sm:$0xf]  ;;  %v13649_v17 = vor.u32 %v16079_v8, %v13648_v7  ;;  %8024 = vmatpush.bf16.msrb.mxu1 %v13137_v29  ;;  %v12434_v7 = vld [vmem:[#allocation3 + $0xff0] sm:$0xf0] }
 0x507   : > { %v16207_v13 = vld [vmem:[#allocation3 + $0x1d6c] sm:$0xf0]  ;;  %v10834_v14 = vld [vmem:[#allocation3 + $0x370] sm:$0xf0]  ;;  %v12437_v29 = vor.u32 %v15767_v5, %v12434_v7  ;;  %v7820_v5 = vpop.f32.mrf.mxu1 }
 0x508   : > { %v12560_v23 = vld [vmem:[#allocation3 + $0x10b0] sm:$0xf]  ;;  %v14161_v3 = vor.u32 %v16207_v13, %v14160_v11  ;;  %8037 = vmatpush.bf16.msrb.mxu2 %v13649_v17  ;;  %v11925_v11 = vor.u32 %v15639_v1, %v11922_v2  ;;  %v15367_v13 = vld [vmem:[#allocation3 + $0x334] sm:$0xf]  ;;  %v7807_v1 = vpop.f32.mrf.mxu0 }
 0x509   : > { %v15807_v27 = vld [vmem:[#allocation3 + $0x10ec] sm:$0xf0]  ;;  %v11346_v17 = vld [vmem:[#allocation3 + $0x770] sm:$0xf0] }
 0x50a   : > { %v13072_v30 = vld [vmem:[#allocation3 + $0x14b0] sm:$0xf]  ;;  %v12561_v39 = vor.u32 %v15807_v27, %v12560_v23  ;;  %8050 = vmatpush.bf16.msrb.mxu3 %v14161_v3  ;;  %v15623_v23 = vld [vmem:[#allocation3 + $0xb34] sm:$0xf]  ;;  %v10837_v3 = vor.u32 %v15367_v13, %v10834_v14 }
 0x50b   : > { %v15935_v56 = vld [vmem:[#allocation3 + $0x14ec] sm:$0xf0]  ;;  %v11858_v27 = vld [vmem:[#allocation3 + $0xb70] sm:$0xf0] }
 0x50c   : > { %v13584_v32 = vld [vmem:[#allocation3 + $0x18b0] sm:$0xf]  ;;  %v13073_v52 = vor.u32 %v15935_v56, %v13072_v30  ;;  %8012 = vmatpush.bf16.msrb.mxu0 %v12561_v39  ;;  %v15751_v30 = vld [vmem:[#allocation3 + $0xf34] sm:$0xf]  ;;  %v11349_v56 = vor.u32 %v15495_v16, %v11346_v17 }
 0x50d   : > { %v16063_v33 = vld [vmem:[#allocation3 + $0x18ec] sm:$0xf0]  ;;  %v12373_v39 = vor.u32 %v15751_v30, %v12370_v31  ;;  %v15719_v49 = vld [vmem:[#allocation3 + $0xe34] sm:$0xf]  ;;  %v7833_v31 = vpop.f32.mrf.mxu2 }
 0x50e   : > { %v14096_v36 = vld [vmem:[#allocation3 + $0x1cb0] sm:$0xf]  ;;  %v13585_v24 = vor.u32 %v16063_v33, %v13584_v32  ;;  %8025 = vmatpush.bf16.msrb.mxu1 %v13073_v52  ;;  %v11861_v32 = vor.u32 %v15623_v23, %v11858_v27  ;;  %v15351_v33 = vld [vmem:[#allocation3 + $0x2b4] sm:$0xf] }
 0x50f   : > { %v16191_v51 = vld [vmem:[#allocation3 + $0x1cec] sm:$0xf0]  ;;  %v11794_v52 = vld [vmem:[#allocation3 + $0xaf0] sm:$0xf0] }
 0x510   : > { %v12496_v40 = vld [vmem:[#allocation3 + $0x1030] sm:$0xf]  ;;  %v14097_v47 = vor.u32 %v16191_v51, %v14096_v36  ;;  %8038 = vmatpush.bf16.msrb.mxu2 %v13585_v24  ;;  %v10770_v36 = vld [vmem:[#allocation3 + $0x2f0] sm:$0xf0] }
 0x511   : > { %v15791_v37 = vld [vmem:[#allocation3 + $0x106c] sm:$0xf0]  ;;  %v15479_v51 = vld [vmem:[#allocation3 + $0x6b4] sm:$0xf] }
 0x512   : > { %v13008_v53 = vld [vmem:[#allocation3 + $0x1430] sm:$0xf]  ;;  %v12497_v62 = vor.u32 %v15791_v37, %v12496_v40  ;;  %8051 = vmatpush.bf16.msrb.mxu3 %v14097_v47  ;;  %v11282_v40 = vld [vmem:[#allocation3 + $0x6f0] sm:$0xf0] }
 0x513   : > { %v15919_v43 = vld [vmem:[#allocation3 + $0x146c] sm:$0xf0]  ;;  %v15607_v37 = vld [vmem:[#allocation3 + $0xab4] sm:$0xf] }
 0x514   : > { %v13520_v45 = vld [vmem:[#allocation3 + $0x1830] sm:$0xf]  ;;  %v13009_v4 = vor.u32 %v15919_v43, %v13008_v53  ;;  %8013 = vmatpush.bf16.msrb.mxu0 %v12497_v62  ;;  %v15735_v24 = vld [vmem:[#allocation3 + $0xeb4] sm:$0xf]  ;;  %v10773_v43 = vor.u32 %v15351_v33, %v10770_v36  ;;  %v11797_v46 = vor.u32 %v15607_v37, %v11794_v52  ;;  %v7846_v36 = vpop.f32.mrf.mxu3 }
 0x515   : > { %v16047_v60 = vld [vmem:[#allocation3 + $0x186c] sm:$0xf0]  ;;  %v12306_v53 = vld [vmem:[#allocation3 + $0xef0] sm:$0xf0] }
 0x516   : > { %v14032_v48 = vld [vmem:[#allocation3 + $0x1c30] sm:$0xf]  ;;  %v13521_v61 = vor.u32 %v16047_v60, %v13520_v45  ;;  %8026 = vmatpush.bf16.msrb.mxu1 %v13009_v4  ;;  %v11285_v45 = vor.u32 %v15479_v51, %v11282_v40  ;;  %v15335_v47 = vld [vmem:[#allocation3 + $0x234] sm:$0xf]  ;;  %v11733_v4 = vor.u32 %v15591_v21, %v11730_v6 }
 0x517   : > { %v16175_v50 = vld [vmem:[#allocation3 + $0x1c6c] sm:$0xf0]  ;;  %8014 = vmatmul.bf16.vlgmr.msrb.gmra.mxu0 %v17036_v41  ;;  %v10706_v60 = vld [vmem:[#allocation3 + $0x270] sm:$0xf0] }
 0x518   : > { %v14033_v8 = vor.u32 %v16175_v50, %v14032_v48  ;;  %8039 = vmatpush.bf16.msrb.mxu2 %v13521_v61  ;;  %8058 = vmatpush.bf16.msra.mxu0 %v10901_v9  ;;  %v15463_v48 = vld [vmem:[#allocation3 + $0x634] sm:$0xf]  ;;  %v12309_v50 = vor.u32 %v15735_v24, %v12306_v53  ;;  %v10709_v63 = vor.u32 %v15335_v47, %v10706_v60 }
 0x519   : > { %8027 = vmatmul.bf16.vlgmr.msrb.gmra.mxu1 %v17040_v44  ;;  %v12242_v62 = vld [vmem:[#allocation3 + $0xe70] sm:$0xf0]  ;;  %v11221_v2 = vor.u32 %v15463_v48, %v11218_v0  ;;  %v7808_v61 = vadd.f32 %v7807_v1, %v17223_v15 }
 0x51a   : > { %8052 = vmatpush.bf16.msrb.mxu3 %v14033_v8  ;;  %8071 = vmatpush.bf16.msra.mxu1 %v11413_v10  ;;  %v15319_v7 = vld [vmem:[#allocation3 + $0x1b4] sm:$0xf]  ;;  %v12245_v10 = vor.u32 %v15719_v49, %v12242_v62 }
 0x51b   : > { %8040 = vmatmul.bf16.vlgmr.msrb.gmra.mxu2 %v17034_v38  ;;  %v10642_v8 = vld [vmem:[#allocation3 + $0x1f0] sm:$0xf0]  ;;  %v7821_v16 = vadd.f32 %v7820_v5, %v7808_v61 }
 0x51c   : > { %8084 = vmatpush.bf16.msra.mxu2 %v11925_v11  ;;  %8059 = vmatpush.bf16.msra.mxu0 %v10837_v3  ;;  %v15447_v9 = vld [vmem:[#allocation3 + $0x5b4] sm:$0xf]  ;;  %v10645_v23 = vor.u32 %v15319_v7, %v10642_v8 }
 0x51d   : > { %8053 = vmatmul.bf16.vlgmr.msrb.gmra.mxu3 %v17038_v42  ;;  %v11154_v11 = vld [vmem:[#allocation3 + $0x5f0] sm:$0xf0]  ;;  %v7834_v33 = vadd.f32 %v7833_v31, %v7821_v16 }
 0x51e   : > { %8097 = vmatpush.bf16.msra.mxu3 %v12437_v29  ;;  %8072 = vmatpush.bf16.msra.mxu1 %v11349_v56  ;;  %v15575_v13 = vld [vmem:[#allocation3 + $0x9b4] sm:$0xf]  ;;  %v11157_v27 = vor.u32 %v15447_v9, %v11154_v11 }
 0x51f   : > { %v11666_v14 = vld [vmem:[#allocation3 + $0x9f0] sm:$0xf0]  ;;  %v17230_v24 = vadd.f32 %v7846_v36, %v7834_v33 }
 0x520   : > { %8085 = vmatpush.bf16.msra.mxu2 %v11861_v32  ;;  %8060 = vmatpush.bf16.msra.mxu0 %v10773_v43  ;;  %v15703_v29 = vld [vmem:[#allocation3 + $0xdb4] sm:$0xf]  ;;  %v11669_v30 = vor.u32 %v15575_v13, %v11666_v14  ;;  %v7809_v43 = vpop.f32.mrf.mxu0 }
 0x521   : > { %v12178_v17 = vld [vmem:[#allocation3 + $0xdf0] sm:$0xf0] }
 0x522   : > { %8098 = vmatpush.bf16.msra.mxu3 %v12373_v39  ;;  %8073 = vmatpush.bf16.msra.mxu1 %v11285_v45  ;;  %v15303_v15 = vld [vmem:[#allocation3 + $0x134] sm:$0xf]  ;;  %v12181_v32 = vor.u32 %v15703_v29, %v12178_v17  ;;  %v7848_v29 = vpop.f32.mrf.mxu3 }
 0x523   : > { %v10578_v3 = vld [vmem:[#allocation3 + $0x170] sm:$0xf0] }
 0x524   : > { %8086 = vmatpush.bf16.msra.mxu2 %v11797_v46  ;;  %8061 = vmatpush.bf16.msra.mxu0 %v10709_v63  ;;  %v15431_v56 = vld [vmem:[#allocation3 + $0x534] sm:$0xf]  ;;  %v10581_v53 = vor.u32 %v15303_v15, %v10578_v3 }
 0x525   : > { %v11090_v51 = vld [vmem:[#allocation3 + $0x570] sm:$0xf0] }
 0x526   : > { %8099 = vmatpush.bf16.msra.mxu3 %v12309_v50  ;;  %8074 = vmatpush.bf16.msra.mxu1 %v11221_v2  ;;  %v15559_v39 = vld [vmem:[#allocation3 + $0x934] sm:$0xf]  ;;  %v11093_v45 = vor.u32 %v15431_v56, %v11090_v51  ;;  %v7822_v50 = vpop.f32.mrf.mxu1 }
 0x527   : > { %v11602_v40 = vld [vmem:[#allocation3 + $0x970] sm:$0xf0] }
 0x528   : > { %8087 = vmatpush.bf16.msra.mxu2 %v11733_v4  ;;  %v15687_v37 = vld [vmem:[#allocation3 + $0xd34] sm:$0xf]  ;;  %8062 = vmatpush.bf16.msra.mxu0 %v10645_v23  ;;  %v11605_v46 = vor.u32 %v15559_v39, %v11602_v40 }
 0x529   : > { %v12114_v52 = vld [vmem:[#allocation3 + $0xd70] sm:$0xf0] }
 0x52a   : > { %8100 = vmatpush.bf16.msra.mxu3 %v12245_v10  ;;  %8075 = vmatpush.bf16.msra.mxu1 %v11157_v27  ;;  %v15287_v47 = vld [vmem:[#allocation3 + $0xb4] sm:$0xf]  ;;  %v12117_v0 = vor.u32 %v15687_v37, %v12114_v52  ;;  %v7835_v10 = vpop.f32.mrf.mxu2 }
 0x52b   : > { %v10514_v60 = vld [vmem:[#allocation3 + $0xf0] sm:$0xf0] }
 0x52c   : > { %8088 = vmatpush.bf16.msra.mxu2 %v11669_v30  ;;  %v15415_v48 = vld [vmem:[#allocation3 + $0x4b4] sm:$0xf]  ;;  %8063 = vmatpush.bf16.msra.mxu0 %v10581_v53  ;;  %v10517_v1 = vor.u32 %v15287_v47, %v10514_v60 }
 0x52d   : > { %v11026_v21 = vld [vmem:[#allocation3 + $0x4f0] sm:$0xf0] }
 0x52e   : > { %8101 = vmatpush.bf16.msra.mxu3 %v12181_v32  ;;  %v15543_v6 = vld [vmem:[#allocation3 + $0x8b4] sm:$0xf]  ;;  %8076 = vmatpush.bf16.msra.mxu1 %v11093_v45  ;;  %v11029_v61 = vor.u32 %v15415_v48, %v11026_v21 }
 0x52f   : > { %v11538_v49 = vld [vmem:[#allocation3 + $0x8f0] sm:$0xf0] }
 0x530   : > { %v15671_v62 = vld [vmem:[#allocation3 + $0xcb4] sm:$0xf]  ;;  %8089 = vmatpush.bf16.msra.mxu2 %v11605_v46  ;;  %v11541_v5 = vor.u32 %v15543_v6, %v11538_v49  ;;  %8064 = vmatpush.bf16.msra.mxu0 %v10517_v1 }
 0x531   : > { %v12050_v63 = vld [vmem:[#allocation3 + $0xcf0] sm:$0xf0] }
 0x532   : > { %v15271_v2 = vld [vmem:[#allocation3 + $0x34] sm:$0xf]  ;;  %8102 = vmatpush.bf16.msra.mxu3 %v12117_v0  ;;  %v12053_v11 = vor.u32 %v15671_v62, %v12050_v63  ;;  %8077 = vmatpush.bf16.msra.mxu1 %v11029_v61 }
 0x533   : > { %v10450_v4 = vld [vmem:[#allocation3 + $0x70] sm:$0xf0] }
 0x534   : > { %v15399_v7 = vld [vmem:[#allocation3 + $0x434] sm:$0xf]  ;;  %v10453_v30 = vor.u32 %v15271_v2, %v10450_v4  ;;  %8090 = vmatpush.bf16.msra.mxu2 %v11541_v5 }
 0x535   : > { %v10962_v8 = vld [vmem:[#allocation3 + $0x470] sm:$0xf0] }
 0x536   : > { %v15527_v9 = vld [vmem:[#allocation3 + $0x834] sm:$0xf]  ;;  %v10965_v56 = vor.u32 %v15399_v7, %v10962_v8  ;;  %8103 = vmatpush.bf16.msra.mxu3 %v12053_v11  ;;  %8065 = vmatpush.bf16.msra.mxu0 %v10453_v30 }
 0x537   : > { %v11474_v13 = vld [vmem:[#allocation3 + $0x870] sm:$0xf0] }
 0x538   : > { %v15655_v14 = vld [vmem:[#allocation3 + $0xc34] sm:$0xf]  ;;  %v11477_v32 = vor.u32 %v15527_v9, %v11474_v13  ;;  %8078 = vmatpush.bf16.msra.mxu1 %v10965_v56 }
 0x539   : > { %v11986_v16 = vld [vmem:[#allocation3 + $0xc70] sm:$0xf0]  ;;  %8066 = vmatmul.bf16.vlgmr.msra.gmra.mxu0 %v17022_v19 }
 0x53a   : > { %v15895_v17 = vld [vmem:[#allocation3 + $0x13b4] sm:$0xf]  ;;  %v11989_v51 = vor.u32 %v15655_v14, %v11986_v16  ;;  %8091 = vmatpush.bf16.msra.mxu2 %v11477_v32  ;;  %v1537_v16 = vperm.slane %v17220_v28, 3 }
 0x53b   : > { %v12946_v23 = vld [vmem:[#allocation3 + $0x13f0] sm:$0xf0]  ;;  %8079 = vmatmul.bf16.vlgmr.msra.gmra.mxu1 %v17026_v22 }
 0x53c   : > { %v16023_v27 = vld [vmem:[#allocation3 + $0x17b4] sm:$0xf]  ;;  %v12949_v39 = vor.u32 %v15895_v17, %v12946_v23  ;;  %8104 = vmatpush.bf16.msra.mxu3 %v11989_v51 }
 0x53d   : > { %v13458_v31 = vld [vmem:[#allocation3 + $0x17f0] sm:$0xf0]  ;;  %8092 = vmatmul.bf16.vlgmr.msra.gmra.mxu2 %v17020_v18 }
 0x53e   : > { %v16151_v15 = vld [vmem:[#allocation3 + $0x1bb4] sm:$0xf]  ;;  %v13461_v40 = vor.u32 %v16023_v27, %v13458_v31  ;;  %8110 = vmatpush.bf16.msrb.mxu0 %v12949_v39 }
 0x53f   : > { %v13970_v3 = vld [vmem:[#allocation3 + $0x1bf0] sm:$0xf0]  ;;  %8105 = vmatmul.bf16.vlgmr.msra.gmra.mxu3 %v17024_v20 }
 0x540   : > { %v16279_v33 = vld [vmem:[#allocation3 + $0x1fb4] sm:$0xf]  ;;  %v13973_v37 = vor.u32 %v16151_v15, %v13970_v3  ;;  %8123 = vmatpush.bf16.msrb.mxu1 %v13461_v40  ;;  %v7859_v3 = vpop.f32.mrf.mxu0  ;;  %v7872_v40 = vpop.f32.mrf.mxu1 }
 0x541   : > { %v14482_v36 = vld [vmem:[#allocation3 + $0x1ff0] sm:$0xf0]  ;;  %v7860_v39 = vadd.f32 %v7859_v3, %v1537_v16 }
 0x542   : > { %v15879_v52 = vld [vmem:[#allocation3 + $0x1334] sm:$0xf]  ;;  %v14485_v45 = vor.u32 %v16279_v33, %v14482_v36  ;;  %8136 = vmatpush.bf16.msrb.mxu2 %v13973_v37 }
 0x543   : > { %v12882_v53 = vld [vmem:[#allocation3 + $0x1370] sm:$0xf0] }
 0x544   : > { %v16007_v43 = vld [vmem:[#allocation3 + $0x1734] sm:$0xf]  ;;  %v12885_v0 = vor.u32 %v15879_v52, %v12882_v53  ;;  %8149 = vmatpush.bf16.msrb.mxu3 %v14485_v45 }
 0x545   : > { %v13394_v46 = vld [vmem:[#allocation3 + $0x1770] sm:$0xf0] }
 0x546   : > { %v16135_v47 = vld [vmem:[#allocation3 + $0x1b34] sm:$0xf]  ;;  %v13397_v21 = vor.u32 %v16007_v43, %v13394_v46  ;;  %8111 = vmatpush.bf16.msrb.mxu0 %v12885_v0  ;;  %v7873_v46 = vadd.f32 %v7872_v40, %v7860_v39 }
 0x547   : > { %v13906_v60 = vld [vmem:[#allocation3 + $0x1b70] sm:$0xf0] }
 0x548   : > { %v16263_v48 = vld [vmem:[#allocation3 + $0x1f34] sm:$0xf]  ;;  %v13909_v6 = vor.u32 %v16135_v47, %v13906_v60  ;;  %8124 = vmatpush.bf16.msrb.mxu1 %v13397_v21 }
 0x549   : > { %v14418_v50 = vld [vmem:[#allocation3 + $0x1f70] sm:$0xf0] }
 0x54a   : > { %v15863_v49 = vld [vmem:[#allocation3 + $0x12b4] sm:$0xf]  ;;  %v14421_v1 = vor.u32 %v16263_v48, %v14418_v50  ;;  %8137 = vmatpush.bf16.msrb.mxu2 %v13909_v6  ;;  %v7885_v6 = vpop.f32.mrf.mxu2 }
 0x54b   : > { %v12818_v62 = vld [vmem:[#allocation3 + $0x12f0] sm:$0xf0] }
 0x54c   : > { %v15991_v63 = vld [vmem:[#allocation3 + $0x16b4] sm:$0xf]  ;;  %v12821_v8 = vor.u32 %v15863_v49, %v12818_v62  ;;  %8150 = vmatpush.bf16.msrb.mxu3 %v14421_v1 }
 0x54d   : > { %v13330_v2 = vld [vmem:[#allocation3 + $0x16f0] sm:$0xf0] }
 0x54e   : > { %v16119_v4 = vld [vmem:[#allocation3 + $0x1ab4] sm:$0xf]  ;;  %v13333_v10 = vor.u32 %v15991_v63, %v13330_v2  ;;  %8112 = vmatpush.bf16.msrb.mxu0 %v12821_v8  ;;  %v7886_v2 = vadd.f32 %v7885_v6, %v7873_v46  ;;  %v10904_v46 = vld [vmem:[#allocation3 + $0x3b8] sm:$0xf] }
 0x54f   : > { %v13842_v61 = vld [vmem:[#allocation3 + $0x1af0] sm:$0xf0] }
 0x550   : > { %v16247_v5 = vld [vmem:[#allocation3 + $0x1eb4] sm:$0xf]  ;;  %v13845_v11 = vor.u32 %v16119_v4, %v13842_v61  ;;  %8125 = vmatpush.bf16.msrb.mxu1 %v13333_v10  ;;  %v7898_v4 = vpop.f32.mrf.mxu3 }
 0x551   : > { %v14354_v7 = vld [vmem:[#allocation3 + $0x1ef0] sm:$0xf0]  ;;  %v17237_v8 = vadd.f32 %v7898_v4, %v7886_v2 }
 0x552   : > { %v15847_v9 = vld [vmem:[#allocation3 + $0x1234] sm:$0xf]  ;;  %v14357_v29 = vor.u32 %v16247_v5, %v14354_v7  ;;  %8138 = vmatpush.bf16.msrb.mxu2 %v13845_v11 }
 0x553   : > { %v12754_v13 = vld [vmem:[#allocation3 + $0x1270] sm:$0xf0] }
 0x554   : > { %v15975_v14 = vld [vmem:[#allocation3 + $0x1634] sm:$0xf]  ;;  %v12757_v15 = vor.u32 %v15847_v9, %v12754_v13  ;;  %8151 = vmatpush.bf16.msrb.mxu3 %v14357_v29  ;;  %v7861_v9 = vpop.f32.mrf.mxu0  ;;  %v7874_v29 = vpop.f32.mrf.mxu1 }
 0x555   : > { %v13266_v17 = vld [vmem:[#allocation3 + $0x1670] sm:$0xf0]  ;;  %v11352_v9 = vld [vmem:[#allocation3 + $0x738] sm:$0xf] }
 0x556   : > { %v16103_v23 = vld [vmem:[#allocation3 + $0x1a34] sm:$0xf]  ;;  %v13269_v56 = vor.u32 %v15975_v14, %v13266_v17  ;;  %8113 = vmatpush.bf16.msrb.mxu0 %v12757_v15  ;;  %v15760_v29 = vld [vmem:[#allocation3 + $0xf74] sm:$0xf0] }
 0x557   : > { %v13778_v27 = vld [vmem:[#allocation3 + $0x1a70] sm:$0xf0] }
 0x558   : > { %v16231_v30 = vld [vmem:[#allocation3 + $0x1e34] sm:$0xf]  ;;  %v13781_v32 = vor.u32 %v16103_v23, %v13778_v27  ;;  %8126 = vmatpush.bf16.msrb.mxu1 %v13269_v56 }
 0x559   : > { %v14290_v31 = vld [vmem:[#allocation3 + $0x1e70] sm:$0xf0] }
 0x55a   : > { %v15831_v33 = vld [vmem:[#allocation3 + $0x11b4] sm:$0xf]  ;;  %v14293_v28 = vor.u32 %v16231_v30, %v14290_v31  ;;  %8139 = vmatpush.bf16.msrb.mxu2 %v13781_v32 }
 0x55b   : > { %v12690_v36 = vld [vmem:[#allocation3 + $0x11f0] sm:$0xf0] }
 0x55c   : > { %v15959_v51 = vld [vmem:[#allocation3 + $0x15b4] sm:$0xf]  ;;  %v12693_v47 = vor.u32 %v15831_v33, %v12690_v36  ;;  %8152 = vmatpush.bf16.msrb.mxu3 %v14293_v28  ;;  %v7887_v28 = vpop.f32.mrf.mxu2 }
 0x55d   : > { %v13202_v37 = vld [vmem:[#allocation3 + $0x15f0] sm:$0xf0] }
 0x55e   : > { %v16087_v52 = vld [vmem:[#allocation3 + $0x19b4] sm:$0xf]  ;;  %v13205_v60 = vor.u32 %v15959_v51, %v13202_v37  ;;  %8114 = vmatpush.bf16.msrb.mxu0 %v12693_v47  ;;  %v15392_v47 = vld [vmem:[#allocation3 + $0x3f4] sm:$0xf0] }
 0x55f   : > { %v13714_v53 = vld [vmem:[#allocation3 + $0x19f0] sm:$0xf0]  ;;  %v10905_v2 = vor.u32 %v15392_v47, %v10904_v46  ;;  %v11736_v46 = vld [vmem:[#allocation3 + $0xa38] sm:$0xf] }
 0x560   : > { %v16215_v43 = vld [vmem:[#allocation3 + $0x1db4] sm:$0xf]  ;;  %v13717_v48 = vor.u32 %v16087_v52, %v13714_v53  ;;  %8127 = vmatpush.bf16.msrb.mxu1 %v13205_v60  ;;  %v11416_v60 = vld [vmem:[#allocation3 + $0x7b8] sm:$0xf] }
 0x561   : > { %v14226_v45 = vld [vmem:[#allocation3 + $0x1df0] sm:$0xf0]  ;;  %v15600_v47 = vld [vmem:[#allocation3 + $0xa74] sm:$0xf0] }
 0x562   : > { %v15815_v50 = vld [vmem:[#allocation3 + $0x1134] sm:$0xf]  ;;  %v14229_v49 = vor.u32 %v16215_v43, %v14226_v45  ;;  %8140 = vmatpush.bf16.msrb.mxu2 %v13717_v48  ;;  %v7900_v45 = vpop.f32.mrf.mxu3 }
 0x563   : > { %v12626_v0 = vld [vmem:[#allocation3 + $0x1170] sm:$0xf0]  ;;  %v15472_v45 = vld [vmem:[#allocation3 + $0x674] sm:$0xf0] }
 0x564   : > { %v15943_v21 = vld [vmem:[#allocation3 + $0x1534] sm:$0xf]  ;;  %v12629_v7 = vor.u32 %v15815_v50, %v12626_v0  ;;  %8153 = vmatpush.bf16.msrb.mxu3 %v14229_v49  ;;  %v15520_v50 = vld [vmem:[#allocation3 + $0x7f4] sm:$0xf0] }
 0x565   : > { %v13138_v62 = vld [vmem:[#allocation3 + $0x1570] sm:$0xf0]  ;;  %v11928_v0 = vld [vmem:[#allocation3 + $0xbb8] sm:$0xf]  ;;  %v11417_v4 = vor.u32 %v15520_v50, %v11416_v60 }
 0x566   : > { %v16071_v63 = vld [vmem:[#allocation3 + $0x1934] sm:$0xf]  ;;  %v13141_v10 = vor.u32 %v15943_v21, %v13138_v62  ;;  %8115 = vmatpush.bf16.msrb.mxu0 %v12629_v7  ;;  %v15648_v21 = vld [vmem:[#allocation3 + $0xbf4] sm:$0xf0] }
 0x567   : > { %v13650_v1 = vld [vmem:[#allocation3 + $0x1970] sm:$0xf0]  ;;  %v12440_v62 = vld [vmem:[#allocation3 + $0xfb8] sm:$0xf] }
 0x568   : > { %v16199_v61 = vld [vmem:[#allocation3 + $0x1d34] sm:$0xf]  ;;  %v13653_v11 = vor.u32 %v16071_v63, %v13650_v1  ;;  %8128 = vmatpush.bf16.msrb.mxu1 %v13141_v10  ;;  %v15776_v63 = vld [vmem:[#allocation3 + $0xff4] sm:$0xf0] }
 0x569   : > { %v14162_v5 = vld [vmem:[#allocation3 + $0x1d70] sm:$0xf0]  ;;  %v15376_v7 = vld [vmem:[#allocation3 + $0x374] sm:$0xf0]  ;;  %v12441_v10 = vor.u32 %v15776_v63, %v12440_v62  ;;  %v7924_v62 = vpop.f32.mrf.mxu1 }
 0x56a   : > { %v15799_v13 = vld [vmem:[#allocation3 + $0x10b4] sm:$0xf]  ;;  %v14165_v17 = vor.u32 %v16199_v61, %v14162_v5  ;;  %8141 = vmatpush.bf16.msrb.mxu2 %v13653_v11  ;;  %v11929_v61 = vor.u32 %v15648_v21, %v11928_v0  ;;  %v10840_v5 = vld [vmem:[#allocation3 + $0x338] sm:$0xf]  ;;  %v7911_v0 = vpop.f32.mrf.mxu0 }
 0x56b   : > { %v12562_v14 = vld [vmem:[#allocation3 + $0x10f0] sm:$0xf0]  ;;  %v15504_v11 = vld [vmem:[#allocation3 + $0x774] sm:$0xf0] }
 0x56c   : > { %v15927_v16 = vld [vmem:[#allocation3 + $0x14b4] sm:$0xf]  ;;  %v12565_v3 = vor.u32 %v15799_v13, %v12562_v14  ;;  %8154 = vmatpush.bf16.msrb.mxu3 %v14165_v17  ;;  %v11864_v13 = vld [vmem:[#allocation3 + $0xb38] sm:$0xf]  ;;  %v10841_v17 = vor.u32 %v15376_v7, %v10840_v5 }
 0x56d   : > { %v13074_v23 = vld [vmem:[#allocation3 + $0x14f0] sm:$0xf0]  ;;  %v15632_v14 = vld [vmem:[#allocation3 + $0xb74] sm:$0xf0] }
 0x56e   : > { %v16055_v27 = vld [vmem:[#allocation3 + $0x18b4] sm:$0xf]  ;;  %v13077_v33 = vor.u32 %v15927_v16, %v13074_v23  ;;  %8116 = vmatpush.bf16.msrb.mxu0 %v12565_v3  ;;  %v12376_v16 = vld [vmem:[#allocation3 + $0xf38] sm:$0xf]  ;;  %v11353_v23 = vor.u32 %v15504_v11, %v11352_v9 }
 0x56f   : > { %v13586_v30 = vld [vmem:[#allocation3 + $0x18f0] sm:$0xf0]  ;;  %v12377_v3 = vor.u32 %v15760_v29, %v12376_v16  ;;  %v12248_v60 = vld [vmem:[#allocation3 + $0xe38] sm:$0xf]  ;;  %v7937_v29 = vpop.f32.mrf.mxu2 }
 0x570   : > { %v16183_v31 = vld [vmem:[#allocation3 + $0x1cb4] sm:$0xf]  ;;  %v13589_v36 = vor.u32 %v16055_v27, %v13586_v30  ;;  %8129 = vmatpush.bf16.msrb.mxu1 %v13077_v33  ;;  %v11865_v27 = vor.u32 %v15632_v14, %v11864_v13  ;;  %v10776_v30 = vld [vmem:[#allocation3 + $0x2b8] sm:$0xf] }
 0x571   : > { %v14098_v15 = vld [vmem:[#allocation3 + $0x1cf0] sm:$0xf0]  ;;  %v15616_v33 = vld [vmem:[#allocation3 + $0xaf4] sm:$0xf0] }
 0x572   : > { %v15783_v56 = vld [vmem:[#allocation3 + $0x1034] sm:$0xf]  ;;  %v14101_v37 = vor.u32 %v16183_v31, %v14098_v15  ;;  %8142 = vmatpush.bf16.msrb.mxu2 %v13589_v36  ;;  %v15360_v31 = vld [vmem:[#allocation3 + $0x2f4] sm:$0xf0] }
 0x573   : > { %v12498_v32 = vld [vmem:[#allocation3 + $0x1070] sm:$0xf0]  ;;  %v11288_v15 = vld [vmem:[#allocation3 + $0x6b8] sm:$0xf] }
 0x574   : > { %v15911_v51 = vld [vmem:[#allocation3 + $0x1434] sm:$0xf]  ;;  %v12501_v48 = vor.u32 %v15783_v56, %v12498_v32  ;;  %8155 = vmatpush.bf16.msrb.mxu3 %v14101_v37  ;;  %v15488_v56 = vld [vmem:[#allocation3 + $0x6f4] sm:$0xf0] }
 0x575   : > { %v13010_v39 = vld [vmem:[#allocation3 + $0x1470] sm:$0xf0]  ;;  %v11800_v32 = vld [vmem:[#allocation3 + $0xab8] sm:$0xf] }
 0x576   : > { %v16039_v40 = vld [vmem:[#allocation3 + $0x1834] sm:$0xf]  ;;  %v13013_v6 = vor.u32 %v15911_v51, %v13010_v39  ;;  %8117 = vmatpush.bf16.msrb.mxu0 %v12501_v48  ;;  %v12312_v36 = vld [vmem:[#allocation3 + $0xeb8] sm:$0xf]  ;;  %v10777_v39 = vor.u32 %v15360_v31, %v10776_v30  ;;  %v11801_v28 = vor.u32 %v15616_v33, %v11800_v32  ;;  %v7950_v31 = vpop.f32.mrf.mxu3 }
 0x577   : > { %v13522_v52 = vld [vmem:[#allocation3 + $0x1870] sm:$0xf0]  ;;  %v15744_v51 = vld [vmem:[#allocation3 + $0xef4] sm:$0xf0] }
 0x578   : > { %v16167_v53 = vld [vmem:[#allocation3 + $0x1c34] sm:$0xf]  ;;  %v13525_v49 = vor.u32 %v16039_v40, %v13522_v52  ;;  %8130 = vmatpush.bf16.msrb.mxu1 %v13013_v6  ;;  %v11289_v40 = vor.u32 %v15488_v56, %v11288_v15  ;;  %v10712_v37 = vld [vmem:[#allocation3 + $0x238] sm:$0xf]  ;;  %v11737_v6 = vor.u32 %v15600_v47, %v11736_v46 }
 0x579   : > { %v14034_v43 = vld [vmem:[#allocation3 + $0x1c70] sm:$0xf0]  ;;  %8118 = vmatmul.bf16.vlgmr.msrb.gmra.mxu0 %v17036_v41  ;;  %v15344_v52 = vld [vmem:[#allocation3 + $0x274] sm:$0xf0] }
 0x57a   : > { %v14037_v1 = vor.u32 %v16167_v53, %v14034_v43  ;;  %8143 = vmatpush.bf16.msrb.mxu2 %v13525_v49  ;;  %8162 = vmatpush.bf16.msra.mxu0 %v10905_v2  ;;  %v11224_v53 = vld [vmem:[#allocation3 + $0x638] sm:$0xf]  ;;  %v12313_v43 = vor.u32 %v15744_v51, %v12312_v36  ;;  %v10713_v50 = vor.u32 %v15344_v52, %v10712_v37 }
 0x57b   : > { %8131 = vmatmul.bf16.vlgmr.msrb.gmra.mxu1 %v17040_v44  ;;  %v15728_v48 = vld [vmem:[#allocation3 + $0xe74] sm:$0xf0]  ;;  %v11225_v21 = vor.u32 %v15472_v45, %v11224_v53  ;;  %v7912_v49 = vadd.f32 %v7911_v0, %v17237_v8 }
 0x57c   : > { %8156 = vmatpush.bf16.msrb.mxu3 %v14037_v1  ;;  %8175 = vmatpush.bf16.msra.mxu1 %v11417_v4  ;;  %v10648_v63 = vld [vmem:[#allocation3 + $0x1b8] sm:$0xf]  ;;  %v12249_v4 = vor.u32 %v15728_v48, %v12248_v60 }
 0x57d   : > { %8144 = vmatmul.bf16.vlgmr.msrb.gmra.mxu2 %v17034_v38  ;;  %v15328_v1 = vld [vmem:[#allocation3 + $0x1f4] sm:$0xf0]  ;;  %v7925_v9 = vadd.f32 %v7924_v62, %v7912_v49 }
 0x57e   : > { %8188 = vmatpush.bf16.msra.mxu2 %v11929_v61  ;;  %8163 = vmatpush.bf16.msra.mxu0 %v10841_v17  ;;  %v11160_v2 = vld [vmem:[#allocation3 + $0x5b8] sm:$0xf]  ;;  %v10649_v13 = vor.u32 %v15328_v1, %v10648_v63 }
 0x57f   : > { %8157 = vmatmul.bf16.vlgmr.msrb.gmra.mxu3 %v17038_v42  ;;  %v15456_v61 = vld [vmem:[#allocation3 + $0x5f4] sm:$0xf0]  ;;  %v7938_v30 = vadd.f32 %v7937_v29, %v7925_v9 }
 0x580   : > { %8201 = vmatpush.bf16.msra.mxu3 %v12441_v10  ;;  %8176 = vmatpush.bf16.msra.mxu1 %v11353_v23  ;;  %v11672_v5 = vld [vmem:[#allocation3 + $0x9b8] sm:$0xf]  ;;  %v11161_v14 = vor.u32 %v15456_v61, %v11160_v2 }
 0x581   : > { %v15584_v7 = vld [vmem:[#allocation3 + $0x9f4] sm:$0xf0]  ;;  %v17244_v36 = vadd.f32 %v7950_v31, %v7938_v30 }
 0x582   : > { %8189 = vmatpush.bf16.msra.mxu2 %v11865_v27  ;;  %8164 = vmatpush.bf16.msra.mxu0 %v10777_v39  ;;  %v12184_v10 = vld [vmem:[#allocation3 + $0xdb8] sm:$0xf]  ;;  %v11673_v16 = vor.u32 %v15584_v7, %v11672_v5  ;;  %v7913_v39 = vpop.f32.mrf.mxu0 }
 0x583   : > { %v15712_v11 = vld [vmem:[#allocation3 + $0xdf4] sm:$0xf0] }
 0x584   : > { %8202 = vmatpush.bf16.msra.mxu3 %v12377_v3  ;;  %8177 = vmatpush.bf16.msra.mxu1 %v11289_v40  ;;  %v10584_v8 = vld [vmem:[#allocation3 + $0x138] sm:$0xf]  ;;  %v12185_v27 = vor.u32 %v15712_v11, %v12184_v10  ;;  %v7952_v10 = vpop.f32.mrf.mxu3 }
 0x585   : > { %v15312_v17 = vld [vmem:[#allocation3 + $0x174] sm:$0xf0] }
 0x586   : > { %8190 = vmatpush.bf16.msra.mxu2 %v11801_v28  ;;  %8165 = vmatpush.bf16.msra.mxu0 %v10713_v50  ;;  %v11096_v23 = vld [vmem:[#allocation3 + $0x538] sm:$0xf]  ;;  %v10585_v51 = vor.u32 %v15312_v17, %v10584_v8 }
 0x587   : > { %v15440_v15 = vld [vmem:[#allocation3 + $0x574] sm:$0xf0] }
 0x588   : > { %8203 = vmatpush.bf16.msra.mxu3 %v12313_v43  ;;  %8178 = vmatpush.bf16.msra.mxu1 %v11225_v21  ;;  %v11608_v3 = vld [vmem:[#allocation3 + $0x938] sm:$0xf]  ;;  %v11097_v40 = vor.u32 %v15440_v15, %v11096_v23  ;;  %v7926_v43 = vpop.f32.mrf.mxu1 }
 0x589   : > { %v15568_v56 = vld [vmem:[#allocation3 + $0x974] sm:$0xf0] }
 0x58a   : > { %8191 = vmatpush.bf16.msra.mxu2 %v11737_v6  ;;  %v12120_v32 = vld [vmem:[#allocation3 + $0xd38] sm:$0xf]  ;;  %8166 = vmatpush.bf16.msra.mxu0 %v10649_v13  ;;  %v11609_v28 = vor.u32 %v15568_v56, %v11608_v3 }
 0x58b   : > { %v15696_v33 = vld [vmem:[#allocation3 + $0xd74] sm:$0xf0] }
 0x58c   : > { %8204 = vmatpush.bf16.msra.mxu3 %v12249_v4  ;;  %8179 = vmatpush.bf16.msra.mxu1 %v11161_v14  ;;  %v10520_v37 = vld [vmem:[#allocation3 + $0xb8] sm:$0xf]  ;;  %v12121_v45 = vor.u32 %v15696_v33, %v12120_v32  ;;  %v7939_v4 = vpop.f32.mrf.mxu2 }
 0x58d   : > { %v15296_v52 = vld [vmem:[#allocation3 + $0xf4] sm:$0xf0] }
 0x58e   : > { %8192 = vmatpush.bf16.msra.mxu2 %v11673_v16  ;;  %v11032_v53 = vld [vmem:[#allocation3 + $0x4b8] sm:$0xf]  ;;  %8167 = vmatpush.bf16.msra.mxu0 %v10585_v51  ;;  %v10521_v0 = vor.u32 %v15296_v52, %v10520_v37 }
 0x58f   : > { %v15424_v46 = vld [vmem:[#allocation3 + $0x4f4] sm:$0xf0] }
 0x590   : > { %8205 = vmatpush.bf16.msra.mxu3 %v12185_v27  ;;  %v11544_v47 = vld [vmem:[#allocation3 + $0x8b8] sm:$0xf]  ;;  %8180 = vmatpush.bf16.msra.mxu1 %v11097_v40  ;;  %v11033_v49 = vor.u32 %v15424_v46, %v11032_v53 }
 0x591   : > { %v15552_v60 = vld [vmem:[#allocation3 + $0x8f4] sm:$0xf0] }
 0x592   : > { %v12056_v48 = vld [vmem:[#allocation3 + $0xcb8] sm:$0xf]  ;;  %8193 = vmatpush.bf16.msra.mxu2 %v11609_v28  ;;  %v11545_v62 = vor.u32 %v15552_v60, %v11544_v47  ;;  %8168 = vmatpush.bf16.msra.mxu0 %v10521_v0 }
 0x593   : > { %v15680_v50 = vld [vmem:[#allocation3 + $0xcf4] sm:$0xf0] }
 0x594   : > { %v10456_v21 = vld [vmem:[#allocation3 + $0x38] sm:$0xf]  ;;  %8206 = vmatpush.bf16.msra.mxu3 %v12121_v45  ;;  %v12057_v61 = vor.u32 %v15680_v50, %v12056_v48  ;;  %8181 = vmatpush.bf16.msra.mxu1 %v11033_v49 }
 0x595   : > { %v15280_v6 = vld [vmem:[#allocation3 + $0x74] sm:$0xf0] }
 0x596   : > { %v10968_v63 = vld [vmem:[#allocation3 + $0x438] sm:$0xf]  ;;  %v10457_v16 = vor.u32 %v15280_v6, %v10456_v21  ;;  %8194 = vmatpush.bf16.msra.mxu2 %v11545_v62 }
 0x597   : > { %v15408_v1 = vld [vmem:[#allocation3 + $0x474] sm:$0xf0] }
 0x598   : > { %v11480_v2 = vld [vmem:[#allocation3 + $0x838] sm:$0xf]  ;;  %v10969_v23 = vor.u32 %v15408_v1, %v10968_v63  ;;  %8207 = vmatpush.bf16.msra.mxu3 %v12057_v61  ;;  %8169 = vmatpush.bf16.msra.mxu0 %v10457_v16 }
 0x599   : > { %v15536_v5 = vld [vmem:[#allocation3 + $0x874] sm:$0xf0] }
 0x59a   : > { %v11992_v7 = vld [vmem:[#allocation3 + $0xc38] sm:$0xf]  ;;  %v11481_v27 = vor.u32 %v15536_v5, %v11480_v2  ;;  %8182 = vmatpush.bf16.msra.mxu1 %v10969_v23  ;;  %v7963_v23 = vpop.f32.mrf.mxu0 }
 0x59b   : > { %v15664_v9 = vld [vmem:[#allocation3 + $0xc74] sm:$0xf0]  ;;  %8170 = vmatmul.bf16.vlgmr.msra.gmra.mxu0 %v17022_v19 }
 0x59c   : > { %v12952_v11 = vld [vmem:[#allocation3 + $0x13b8] sm:$0xf]  ;;  %v11993_v15 = vor.u32 %v15664_v9, %v11992_v7  ;;  %8195 = vmatpush.bf16.msra.mxu2 %v11481_v27  ;;  %v17250_v9 = vld [vmem:[#allocation5 + $0x8] sm:$0xff] }
 0x59d   : > { %v15904_v13 = vld [vmem:[#allocation3 + $0x13f4] sm:$0xf0]  ;;  %8183 = vmatmul.bf16.vlgmr.msra.gmra.mxu1 %v17026_v22  ;;  %v1538_v10 = vperm.slane %v17250_v9, 4 }
 0x59e   : > { %v13464_v14 = vld [vmem:[#allocation3 + $0x17b8] sm:$0xf]  ;;  %v12953_v3 = vor.u32 %v15904_v13, %v12952_v11  ;;  %8208 = vmatpush.bf16.msra.mxu3 %v11993_v15 }
 0x59f   : > { %v16032_v29 = vld [vmem:[#allocation3 + $0x17f4] sm:$0xf0]  ;;  %8196 = vmatmul.bf16.vlgmr.msra.gmra.mxu2 %v17020_v18 }
 0x5a0   : > { %v13976_v8 = vld [vmem:[#allocation3 + $0x1bb8] sm:$0xf]  ;;  %v13465_v56 = vor.u32 %v16032_v29, %v13464_v14  ;;  %8214 = vmatpush.bf16.msrb.mxu0 %v12953_v3 }
 0x5a1   : > { %v16160_v17 = vld [vmem:[#allocation3 + $0x1bf4] sm:$0xf0]  ;;  %8209 = vmatmul.bf16.vlgmr.msra.gmra.mxu3 %v17024_v20 }
 0x5a2   : > { %v14488_v30 = vld [vmem:[#allocation3 + $0x1fb8] sm:$0xf]  ;;  %v13977_v32 = vor.u32 %v16160_v17, %v13976_v8  ;;  %8227 = vmatpush.bf16.msrb.mxu1 %v13465_v56  ;;  %v7964_v56 = vadd.f32 %v7963_v23, %v1538_v10 }
 0x5a3   : > { %v16288_v31 = vld [vmem:[#allocation3 + $0x1ff4] sm:$0xf0] }
 0x5a4   : > { %v12888_v33 = vld [vmem:[#allocation3 + $0x1338] sm:$0xf]  ;;  %v14489_v40 = vor.u32 %v16288_v31, %v14488_v30  ;;  %8240 = vmatpush.bf16.msrb.mxu2 %v13977_v32  ;;  %v7976_v32 = vpop.f32.mrf.mxu1 }
 0x5a5   : > { %v15888_v51 = vld [vmem:[#allocation3 + $0x1374] sm:$0xf0] }
 0x5a6   : > { %v13400_v39 = vld [vmem:[#allocation3 + $0x1738] sm:$0xf]  ;;  %v12889_v45 = vor.u32 %v15888_v51, %v12888_v33  ;;  %8253 = vmatpush.bf16.msrb.mxu3 %v14489_v40 }
 0x5a7   : > { %v16016_v28 = vld [vmem:[#allocation3 + $0x1774] sm:$0xf0] }
 0x5a8   : > { %v13912_v37 = vld [vmem:[#allocation3 + $0x1b38] sm:$0xf]  ;;  %v13401_v46 = vor.u32 %v16016_v28, %v13400_v39  ;;  %8215 = vmatpush.bf16.msrb.mxu0 %v12889_v45 }
 0x5a9   : > { %v16144_v52 = vld [vmem:[#allocation3 + $0x1b74] sm:$0xf0] }
 0x5aa   : > { %v14424_v53 = vld [vmem:[#allocation3 + $0x1f38] sm:$0xf]  ;;  %v13913_v47 = vor.u32 %v16144_v52, %v13912_v37  ;;  %8228 = vmatpush.bf16.msrb.mxu1 %v13401_v46  ;;  %v7977_v52 = vadd.f32 %v7976_v32, %v7964_v56 }
 0x5ab   : > { %v16272_v43 = vld [vmem:[#allocation3 + $0x1f74] sm:$0xf0] }
 0x5ac   : > { %v12824_v60 = vld [vmem:[#allocation3 + $0x12b8] sm:$0xf]  ;;  %v14425_v0 = vor.u32 %v16272_v43, %v14424_v53  ;;  %8241 = vmatpush.bf16.msrb.mxu2 %v13913_v47 }
 0x5ad   : > { %v15872_v48 = vld [vmem:[#allocation3 + $0x12f4] sm:$0xf0] }
 0x5ae   : > { %v13336_v50 = vld [vmem:[#allocation3 + $0x16b8] sm:$0xf]  ;;  %v12825_v1 = vor.u32 %v15872_v48, %v12824_v60  ;;  %8254 = vmatpush.bf16.msrb.mxu3 %v14425_v0  ;;  %v7989_v48 = vpop.f32.mrf.mxu2 }
 0x5af   : > { %v16000_v21 = vld [vmem:[#allocation3 + $0x16f4] sm:$0xf0] }
 0x5b0   : > { %v13848_v6 = vld [vmem:[#allocation3 + $0x1ab8] sm:$0xf]  ;;  %v13337_v4 = vor.u32 %v16000_v21, %v13336_v50  ;;  %8216 = vmatpush.bf16.msrb.mxu0 %v12825_v1 }
 0x5b1   : > { %v16128_v49 = vld [vmem:[#allocation3 + $0x1af4] sm:$0xf0] }
 0x5b2   : > { %v14360_v62 = vld [vmem:[#allocation3 + $0x1eb8] sm:$0xf]  ;;  %v13849_v61 = vor.u32 %v16128_v49, %v13848_v6  ;;  %8229 = vmatpush.bf16.msrb.mxu1 %v13337_v4  ;;  %v7990_v49 = vadd.f32 %v7989_v48, %v7977_v52  ;;  %v15640_v48 = vld [vmem:[#allocation3 + $0xbbc] sm:$0xf] }
 0x5b3   : > { %v16256_v63 = vld [vmem:[#allocation3 + $0x1ef4] sm:$0xf0] }
 0x5b4   : > { %v12760_v2 = vld [vmem:[#allocation3 + $0x1238] sm:$0xf]  ;;  %v14361_v11 = vor.u32 %v16256_v63, %v14360_v62  ;;  %8242 = vmatpush.bf16.msrb.mxu2 %v13849_v61  ;;  %v8002_v62 = vpop.f32.mrf.mxu3  ;;  %v7965_v61 = vpop.f32.mrf.mxu0 }
 0x5b5   : > { %v15856_v5 = vld [vmem:[#allocation3 + $0x1274] sm:$0xf0]  ;;  %v17253_v4 = vadd.f32 %v8002_v62, %v7990_v49  ;;  %v12442_v49 = vld [vmem:[#allocation3 + $0xff8] sm:$0xf0] }
 0x5b6   : > { %v13272_v7 = vld [vmem:[#allocation3 + $0x1638] sm:$0xf]  ;;  %v12761_v17 = vor.u32 %v15856_v5, %v12760_v2  ;;  %8255 = vmatpush.bf16.msrb.mxu3 %v14361_v11  ;;  %v15368_v61 = vld [vmem:[#allocation3 + $0x33c] sm:$0xf] }
 0x5b7   : > { %v15984_v13 = vld [vmem:[#allocation3 + $0x1674] sm:$0xf0] }
 0x5b8   : > { %v13784_v14 = vld [vmem:[#allocation3 + $0x1a38] sm:$0xf]  ;;  %v13273_v27 = vor.u32 %v15984_v13, %v13272_v7  ;;  %8217 = vmatpush.bf16.msrb.mxu0 %v12761_v17 }
 0x5b9   : > { %v16112_v16 = vld [vmem:[#allocation3 + $0x1a74] sm:$0xf0] }
 0x5ba   : > { %v14296_v29 = vld [vmem:[#allocation3 + $0x1e38] sm:$0xf]  ;;  %v13785_v30 = vor.u32 %v16112_v16, %v13784_v14  ;;  %8230 = vmatpush.bf16.msrb.mxu1 %v13273_v27  ;;  %v7978_v14 = vpop.f32.mrf.mxu1 }
 0x5bb   : > { %v16240_v8 = vld [vmem:[#allocation3 + $0x1e74] sm:$0xf0]  ;;  %v11866_v14 = vld [vmem:[#allocation3 + $0xb78] sm:$0xf0] }
 0x5bc   : > { %v12696_v31 = vld [vmem:[#allocation3 + $0x11b8] sm:$0xf]  ;;  %v14297_v33 = vor.u32 %v16240_v8, %v14296_v29  ;;  %8243 = vmatpush.bf16.msrb.mxu2 %v13785_v30 }
 0x5bd   : > { %v15840_v15 = vld [vmem:[#allocation3 + $0x11f4] sm:$0xf0] }
 0x5be   : > { %v13208_v3 = vld [vmem:[#allocation3 + $0x15b8] sm:$0xf]  ;;  %v12697_v53 = vor.u32 %v15840_v15, %v12696_v31  ;;  %8256 = vmatpush.bf16.msrb.mxu3 %v14297_v33 }
 0x5bf   : > { %v15968_v51 = vld [vmem:[#allocation3 + $0x15f4] sm:$0xf0] }
 0x5c0   : > { %v13720_v39 = vld [vmem:[#allocation3 + $0x19b8] sm:$0xf]  ;;  %v13209_v43 = vor.u32 %v15968_v51, %v13208_v3  ;;  %8218 = vmatpush.bf16.msrb.mxu0 %v12697_v53  ;;  %v8004_v53 = vpop.f32.mrf.mxu3 }
 0x5c1   : > { %v16096_v40 = vld [vmem:[#allocation3 + $0x19f4] sm:$0xf0]  ;;  %v15464_v53 = vld [vmem:[#allocation3 + $0x63c] sm:$0xf] }
 0x5c2   : > { %v14232_v28 = vld [vmem:[#allocation3 + $0x1db8] sm:$0xf]  ;;  %v13721_v45 = vor.u32 %v16096_v40, %v13720_v39  ;;  %8231 = vmatpush.bf16.msrb.mxu1 %v13209_v43  ;;  %v7991_v39 = vpop.f32.mrf.mxu2  ;;  %v15384_v43 = vld [vmem:[#allocation3 + $0x3bc] sm:$0xf] }
 0x5c3   : > { %v16224_v37 = vld [vmem:[#allocation3 + $0x1df4] sm:$0xf0] }
 0x5c4   : > { %v12632_v46 = vld [vmem:[#allocation3 + $0x1138] sm:$0xf]  ;;  %v14233_v50 = vor.u32 %v16224_v37, %v14232_v28  ;;  %8244 = vmatpush.bf16.msrb.mxu2 %v13721_v45  ;;  %v10906_v45 = vld [vmem:[#allocation3 + $0x3f8] sm:$0xf0] }
 0x5c5   : > { %v15824_v47 = vld [vmem:[#allocation3 + $0x1174] sm:$0xf0] }
 0x5c6   : > { %v13144_v60 = vld [vmem:[#allocation3 + $0x1538] sm:$0xf]  ;;  %v12633_v2 = vor.u32 %v15824_v47, %v12632_v46  ;;  %8257 = vmatpush.bf16.msrb.mxu3 %v14233_v50  ;;  %v15512_v46 = vld [vmem:[#allocation3 + $0x7bc] sm:$0xf] }
 0x5c7   : > { %v15952_v0 = vld [vmem:[#allocation3 + $0x1574] sm:$0xf0]  ;;  %v11930_v50 = vld [vmem:[#allocation3 + $0xbf8] sm:$0xf0] }
 0x5c8   : > { %v13656_v21 = vld [vmem:[#allocation3 + $0x1938] sm:$0xf]  ;;  %v13145_v5 = vor.u32 %v15952_v0, %v13144_v60  ;;  %8219 = vmatpush.bf16.msrb.mxu0 %v12633_v2  ;;  %v11418_v60 = vld [vmem:[#allocation3 + $0x7f8] sm:$0xf0]  ;;  %v11933_v2 = vor.u32 %v15640_v48, %v11930_v50 }
 0x5c9   : > { %v16080_v6 = vld [vmem:[#allocation3 + $0x1974] sm:$0xf0]  ;;  %v12250_v48 = vld [vmem:[#allocation3 + $0xe78] sm:$0xf0] }
 0x5ca   : > { %v14168_v63 = vld [vmem:[#allocation3 + $0x1d38] sm:$0xf]  ;;  %v13657_v7 = vor.u32 %v16080_v6, %v13656_v21  ;;  %8232 = vmatpush.bf16.msrb.mxu1 %v13145_v5  ;;  %v15768_v6 = vld [vmem:[#allocation3 + $0xfbc] sm:$0xf] }
 0x5cb   : > { %v16208_v1 = vld [vmem:[#allocation3 + $0x1d74] sm:$0xf0]  ;;  %v10842_v5 = vld [vmem:[#allocation3 + $0x378] sm:$0xf0] }
 0x5cc   : > { %v12568_v10 = vld [vmem:[#allocation3 + $0x10b8] sm:$0xf]  ;;  %v14169_v16 = vor.u32 %v16208_v1, %v14168_v63  ;;  %8245 = vmatpush.bf16.msrb.mxu2 %v13657_v7  ;;  %v10909_v63 = vor.u32 %v15384_v43, %v10906_v45  ;;  %v11421_v1 = vor.u32 %v15512_v46, %v11418_v60  ;;  %v15496_v7 = vld [vmem:[#allocation3 + $0x73c] sm:$0xf] }
 0x5cd   : > { %v15808_v11 = vld [vmem:[#allocation3 + $0x10f4] sm:$0xf0]  ;;  %v11226_v45 = vld [vmem:[#allocation3 + $0x678] sm:$0xf0] }
 0x5ce   : > { %v13080_v13 = vld [vmem:[#allocation3 + $0x14b8] sm:$0xf]  ;;  %v12569_v30 = vor.u32 %v15808_v11, %v12568_v10  ;;  %8258 = vmatpush.bf16.msrb.mxu3 %v14169_v16  ;;  %v12445_v10 = vor.u32 %v15768_v6, %v12442_v49  ;;  %v11354_v11 = vld [vmem:[#allocation3 + $0x778] sm:$0xf0] }
 0x5cf   : > { %v15936_v29 = vld [vmem:[#allocation3 + $0x14f4] sm:$0xf0]  ;;  %v15752_v16 = vld [vmem:[#allocation3 + $0xf3c] sm:$0xf] }
 0x5d0   : > { %v13592_v8 = vld [vmem:[#allocation3 + $0x18b8] sm:$0xf]  ;;  %v13081_v3 = vor.u32 %v15936_v29, %v13080_v13  ;;  %8220 = vmatpush.bf16.msrb.mxu0 %v12569_v30  ;;  %v15624_v13 = vld [vmem:[#allocation3 + $0xb3c] sm:$0xf] }
 0x5d1   : > { %v16064_v17 = vld [vmem:[#allocation3 + $0x18f4] sm:$0xf0]  ;;  %v12378_v29 = vld [vmem:[#allocation3 + $0xf78] sm:$0xf0] }
 0x5d2   : > { %v14104_v23 = vld [vmem:[#allocation3 + $0x1cb8] sm:$0xf]  ;;  %v13593_v56 = vor.u32 %v16064_v17, %v13592_v8  ;;  %8233 = vmatpush.bf16.msrb.mxu1 %v13081_v3  ;;  %v10845_v8 = vor.u32 %v15368_v61, %v10842_v5  ;;  %v11357_v17 = vor.u32 %v15496_v7, %v11354_v11  ;;  %v10778_v30 = vld [vmem:[#allocation3 + $0x2f8] sm:$0xf0] }
 0x5d3   : > { %v16192_v27 = vld [vmem:[#allocation3 + $0x1cf4] sm:$0xf0]  ;;  %v11290_v3 = vld [vmem:[#allocation3 + $0x6f8] sm:$0xf0] }
 0x5d4   : > { %v12504_v31 = vld [vmem:[#allocation3 + $0x1038] sm:$0xf]  ;;  %v14105_v40 = vor.u32 %v16192_v27, %v14104_v23  ;;  %8246 = vmatpush.bf16.msrb.mxu2 %v13593_v56  ;;  %v11869_v23 = vor.u32 %v15624_v13, %v11866_v14  ;;  %v15352_v27 = vld [vmem:[#allocation3 + $0x2bc] sm:$0xf] }
 0x5d5   : > { %v15792_v15 = vld [vmem:[#allocation3 + $0x1074] sm:$0xf0]  ;;  %v15608_v56 = vld [vmem:[#allocation3 + $0xabc] sm:$0xf]  ;;  %v10781_v39 = vor.u32 %v15352_v27, %v10778_v30 }
 0x5d6   : > { %v13016_v32 = vld [vmem:[#allocation3 + $0x1438] sm:$0xf]  ;;  %v12505_v47 = vor.u32 %v15792_v15, %v12504_v31  ;;  %8259 = vmatpush.bf16.msrb.mxu3 %v14105_v40  ;;  %v15480_v31 = vld [vmem:[#allocation3 + $0x6bc] sm:$0xf]  ;;  %v12381_v15 = vor.u32 %v15752_v16, %v12378_v29  ;;  %v8378_v16 = vmax.f32 %v17200_v12, 0.0 }
 0x5d7   : > { %v15920_v33 = vld [vmem:[#allocation3 + $0x1474] sm:$0xf0]  ;;  %v11293_v40 = vor.u32 %v15480_v31, %v11290_v3  ;;  %v15592_v46 = vld [vmem:[#allocation3 + $0xa3c] sm:$0xf]  ;;  %v8054_v3 = vpop.f32.mrf.mxu3  ;;  %v14514_v12 = vld [vmem:[#allocation7 + $0x30] sm:$0xf0] }
 0x5d8   : > { %v13528_v51 = vld [vmem:[#allocation3 + $0x1838] sm:$0xf]  ;;  %v13017_v0 = vor.u32 %v15920_v33, %v13016_v32  ;;  %8221 = vmatpush.bf16.msrb.mxu0 %v12505_v47  ;;  %v11802_v32 = vld [vmem:[#allocation3 + $0xaf8] sm:$0xf0] }
 0x5d9   : > { %v16048_v28 = vld [vmem:[#allocation3 + $0x1874] sm:$0xf0]  ;;  %v15736_v33 = vld [vmem:[#allocation3 + $0xebc] sm:$0xf] }
 0x5da   : > { %v14040_v37 = vld [vmem:[#allocation3 + $0x1c38] sm:$0xf]  ;;  %v13529_v21 = vor.u32 %v16048_v28, %v13528_v51  ;;  %8234 = vmatpush.bf16.msrb.mxu1 %v13017_v0  ;;  %v12314_v51 = vld [vmem:[#allocation3 + $0xef8] sm:$0xf0]  ;;  %v11805_v28 = vor.u32 %v15608_v56, %v11802_v32  ;;  %v8015_v0 = vpop.f32.mrf.mxu0 }
 0x5db   : > { %v16176_v52 = vld [vmem:[#allocation3 + $0x1c74] sm:$0xf0]  ;;  %8222 = vmatmul.bf16.vlgmr.msrb.gmra.mxu0 %v17036_v41  ;;  %v12317_v43 = vor.u32 %v15736_v33, %v12314_v51  ;;  %v11738_v47 = vld [vmem:[#allocation3 + $0xa78] sm:$0xf0]  ;;  %v8016_v49 = vadd.f32 %v8015_v0, %v17253_v4 }
 0x5dc   : > { %v14041_v62 = vor.u32 %v16176_v52, %v14040_v37  ;;  %8247 = vmatpush.bf16.msrb.mxu2 %v13529_v21  ;;  %8266 = vmatpush.bf16.msra.mxu0 %v10909_v63  ;;  %v15336_v37 = vld [vmem:[#allocation3 + $0x23c] sm:$0xf]  ;;  %v11229_v21 = vor.u32 %v15464_v53, %v11226_v45  ;;  %v11741_v6 = vor.u32 %v15592_v46, %v11738_v47 }
 0x5dd   : > { %8235 = vmatmul.bf16.vlgmr.msrb.gmra.mxu1 %v17040_v44  ;;  %v10714_v52 = vld [vmem:[#allocation3 + $0x278] sm:$0xf0] }
 0x5de   : > { %8260 = vmatpush.bf16.msrb.mxu3 %v14041_v62  ;;  %8279 = vmatpush.bf16.msra.mxu1 %v11421_v1  ;;  %v15720_v60 = vld [vmem:[#allocation3 + $0xe3c] sm:$0xf]  ;;  %v10717_v50 = vor.u32 %v15336_v37, %v10714_v52  ;;  %v8028_v62 = vpop.f32.mrf.mxu1 }
 0x5df   : > { %8248 = vmatmul.bf16.vlgmr.msrb.gmra.mxu2 %v17034_v38  ;;  %v15320_v63 = vld [vmem:[#allocation3 + $0x1bc] sm:$0xf]  ;;  %v12253_v61 = vor.u32 %v15720_v60, %v12250_v48  ;;  %v8029_v11 = vadd.f32 %v8028_v62, %v8016_v49  ;;  %v8390_v48 = vadd.f32 %v17129_v34, %v8378_v16 }
 0x5e0   : > { %8292 = vmatpush.bf16.msra.mxu2 %v11933_v2  ;;  %8267 = vmatpush.bf16.msra.mxu0 %v10845_v8  ;;  %v10650_v1 = vld [vmem:[#allocation3 + $0x1f8] sm:$0xf0] }
 0x5e1   : > { %8261 = vmatmul.bf16.vlgmr.msrb.gmra.mxu3 %v17038_v42  ;;  %v15448_v2 = vld [vmem:[#allocation3 + $0x5bc] sm:$0xf]  ;;  %v10653_v29 = vor.u32 %v15320_v63, %v10650_v1 }
 0x5e2   : > { %8305 = vmatpush.bf16.msra.mxu3 %v12445_v10  ;;  %8280 = vmatpush.bf16.msra.mxu1 %v11357_v17  ;;  %v11162_v5 = vld [vmem:[#allocation3 + $0x5f8] sm:$0xf0]  ;;  %v8041_v17 = vpop.f32.mrf.mxu2  ;;  %v8017_v52 = vpop.f32.mrf.mxu0 }
 0x5e3   : > { %v15576_v7 = vld [vmem:[#allocation3 + $0x9bc] sm:$0xf]  ;;  %v11165_v8 = vor.u32 %v15448_v2, %v11162_v5 }
 0x5e4   : > { %8293 = vmatpush.bf16.msra.mxu2 %v11869_v23  ;;  %8268 = vmatpush.bf16.msra.mxu0 %v10781_v39  ;;  %v11674_v10 = vld [vmem:[#allocation3 + $0x9f8] sm:$0xf0] }
 0x5e5   : > { %v15704_v13 = vld [vmem:[#allocation3 + $0xdbc] sm:$0xf]  ;;  %v11677_v4 = vor.u32 %v15576_v7, %v11674_v10 }
 0x5e6   : > { %8306 = vmatpush.bf16.msra.mxu3 %v12381_v15  ;;  %8281 = vmatpush.bf16.msra.mxu1 %v11293_v40  ;;  %v12186_v14 = vld [vmem:[#allocation3 + $0xdf8] sm:$0xf0]  ;;  %v8042_v15 = vadd.f32 %v8041_v17, %v8029_v11  ;;  %v8030_v60 = vpop.f32.mrf.mxu1  ;;  %v8056_v17 = vpop.f32.mrf.mxu3 }
 0x5e7   : > { %v15304_v23 = vld [vmem:[#allocation3 + $0x13c] sm:$0xf]  ;;  %v12189_v31 = vor.u32 %v15704_v13, %v12186_v14 }
 0x5e8   : > { %8294 = vmatpush.bf16.msra.mxu2 %v11805_v28  ;;  %8269 = vmatpush.bf16.msra.mxu0 %v10717_v50  ;;  %v10586_v27 = vld [vmem:[#allocation3 + $0x178] sm:$0xf0]  ;;  %v17261_v40 = vadd.f32 %v8054_v3, %v8042_v15 }
 0x5e9   : > { %v15432_v30 = vld [vmem:[#allocation3 + $0x53c] sm:$0xf]  ;;  %v10589_v28 = vor.u32 %v15304_v23, %v10586_v27 }
 0x5ea   : > { %8307 = vmatpush.bf16.msra.mxu3 %v12317_v43  ;;  %8282 = vmatpush.bf16.msra.mxu1 %v11229_v21  ;;  %v11098_v56 = vld [vmem:[#allocation3 + $0x578] sm:$0xf0]  ;;  %v8382_v50 = vmax.f32 %v17261_v40, 0.0  ;;  %v8043_v13 = vpop.f32.mrf.mxu2 }
 0x5eb   : > { %v15560_v32 = vld [vmem:[#allocation3 + $0x93c] sm:$0xf]  ;;  %v11101_v53 = vor.u32 %v15432_v30, %v11098_v56 }
 0x5ec   : > { %8295 = vmatpush.bf16.msra.mxu2 %v11741_v6  ;;  %v11610_v33 = vld [vmem:[#allocation3 + $0x978] sm:$0xf0]  ;;  %8270 = vmatpush.bf16.msra.mxu0 %v10653_v29  ;;  %v17269_v63 = vadd.f32 %v8390_v48, %v8382_v50 }
 0x5ed   : > { %v15688_v51 = vld [vmem:[#allocation3 + $0xd3c] sm:$0xf]  ;;  %v11613_v43 = vor.u32 %v15560_v32, %v11610_v33 }
 0x5ee   : > { %8308 = vmatpush.bf16.msra.mxu3 %v12253_v61  ;;  %v12122_v39 = vld [vmem:[#allocation3 + $0xd78] sm:$0xf0]  ;;  %8283 = vmatpush.bf16.msra.mxu1 %v11165_v8 }
 0x5ef   : > { %v15288_v37 = vld [vmem:[#allocation3 + $0xbc] sm:$0xf]  ;;  %v12125_v0 = vor.u32 %v15688_v51, %v12122_v39 }
 0x5f0   : > { %8296 = vmatpush.bf16.msra.mxu2 %v11677_v4  ;;  %v10522_v45 = vld [vmem:[#allocation3 + $0xf8] sm:$0xf0]  ;;  %8271 = vmatpush.bf16.msra.mxu0 %v10589_v28 }
 0x5f1   : > { %v15416_v46 = vld [vmem:[#allocation3 + $0x4bc] sm:$0xf]  ;;  %v10525_v1 = vor.u32 %v15288_v37, %v10522_v45 }
 0x5f2   : > { %v11034_v47 = vld [vmem:[#allocation3 + $0x4f8] sm:$0xf0]  ;;  %8309 = vmatpush.bf16.msra.mxu3 %v12189_v31  ;;  %8284 = vmatpush.bf16.msra.mxu1 %v11101_v53 }
 0x5f3   : > { %v15544_v21 = vld [vmem:[#allocation3 + $0x8bc] sm:$0xf]  ;;  %v11037_v5 = vor.u32 %v15416_v46, %v11034_v47 }
 0x5f4   : > { %v11546_v6 = vld [vmem:[#allocation3 + $0x8f8] sm:$0xf0]  ;;  %8297 = vmatpush.bf16.msra.mxu2 %v11613_v43  ;;  %8272 = vmatpush.bf16.msra.mxu0 %v10525_v1 }
 0x5f5   : > { %v15672_v49 = vld [vmem:[#allocation3 + $0xcbc] sm:$0xf]  ;;  %v11549_v34 = vor.u32 %v15544_v21, %v11546_v6 }
 0x5f6   : > { %v12058_v62 = vld [vmem:[#allocation3 + $0xcf8] sm:$0xf0]  ;;  %8310 = vmatpush.bf16.msra.mxu3 %v12125_v0  ;;  %8285 = vmatpush.bf16.msra.mxu1 %v11037_v5 }
 0x5f7   : > { %v15272_v2 = vld [vmem:[#allocation3 + $0x3c] sm:$0xf]  ;;  %v12061_v14 = vor.u32 %v15672_v49, %v12058_v62 }
 0x5f8   : > { %v10458_v61 = vld [vmem:[#allocation3 + $0x78] sm:$0xf0]  ;;  %8298 = vmatpush.bf16.msra.mxu2 %v11549_v34 }
 0x5f9   : > { %v15400_v7 = vld [vmem:[#allocation3 + $0x43c] sm:$0xf]  ;;  %v10461_v31 = vor.u32 %v15272_v2, %v10458_v61 }
 0x5fa   : > { %v10970_v10 = vld [vmem:[#allocation3 + $0x478] sm:$0xf0]  ;;  %8311 = vmatpush.bf16.msra.mxu3 %v12061_v14 }
 0x5fb   : > { %v15528_v11 = vld [vmem:[#allocation3 + $0x83c] sm:$0xf]  ;;  %v10973_v32 = vor.u32 %v15400_v7, %v10970_v10  ;;  %8273 = vmatpush.bf16.msra.mxu0 %v10461_v31 }
 0x5fc   : > { %v11482_v29 = vld [vmem:[#allocation3 + $0x878] sm:$0xf0] }
 0x5fd   : > { %v15656_v8 = vld [vmem:[#allocation3 + $0xc3c] sm:$0xf]  ;;  %v11485_v33 = vor.u32 %v15528_v11, %v11482_v29  ;;  %8286 = vmatpush.bf16.msra.mxu1 %v10973_v32 }
 0x5fe   : > { %v11994_v4 = vld [vmem:[#allocation3 + $0xc78] sm:$0xf0]  ;;  %8274 = vmatmul.bf16.vlgmr.msra.gmra.mxu0 %v17022_v19 }
 0x5ff   : > { %v15896_v23 = vld [vmem:[#allocation3 + $0x13bc] sm:$0xf]  ;;  %v11997_v28 = vor.u32 %v15656_v8, %v11994_v4  ;;  %8299 = vmatpush.bf16.msra.mxu2 %v11485_v33 }
 0x600   : > { %v12954_v27 = vld [vmem:[#allocation3 + $0x13f8] sm:$0xf0]  ;;  %8287 = vmatmul.bf16.vlgmr.msra.gmra.mxu1 %v17026_v22 }
 0x601   : > { %v16024_v30 = vld [vmem:[#allocation3 + $0x17bc] sm:$0xf]  ;;  %v12957_v37 = vor.u32 %v15896_v23, %v12954_v27  ;;  %8312 = vmatpush.bf16.msra.mxu3 %v11997_v28  ;;  %v17277_v28 = vpop.f32.mrf.mxu1 }
 0x602   : > { %v13466_v15 = vld [vmem:[#allocation3 + $0x17f8] sm:$0xf0]  ;;  %8300 = vmatmul.bf16.vlgmr.msra.gmra.mxu2 %v17020_v18 }
 0x603   : > { %v16152_v3 = vld [vmem:[#allocation3 + $0x1bbc] sm:$0xf]  ;;  %v13469_v52 = vor.u32 %v16024_v30, %v13466_v15  ;;  %8318 = vmatpush.bf16.msrb.mxu0 %v12957_v37 }
 0x604   : > { %v13978_v56 = vld [vmem:[#allocation3 + $0x1bf8] sm:$0xf0]  ;;  %8313 = vmatmul.bf16.vlgmr.msra.gmra.mxu3 %v17024_v20 }
 0x605   : > { %v16280_v51 = vld [vmem:[#allocation3 + $0x1fbc] sm:$0xf]  ;;  %v13981_v53 = vor.u32 %v16152_v3, %v13978_v56  ;;  %8331 = vmatpush.bf16.msrb.mxu1 %v13469_v52  ;;  %v17275_v56 = vpop.f32.mrf.mxu0 }
 0x606   : > { %v14490_v39 = vld [vmem:[#allocation3 + $0x1ff8] sm:$0xf0] }
 0x607   : > { %v15880_v43 = vld [vmem:[#allocation3 + $0x133c] sm:$0xf]  ;;  %v14493_v47 = vor.u32 %v16280_v51, %v14490_v39  ;;  %8344 = vmatpush.bf16.msrb.mxu2 %v13981_v53 }
 0x608   : > { %v12890_v45 = vld [vmem:[#allocation3 + $0x1378] sm:$0xf0] }
 0x609   : > { %v16008_v46 = vld [vmem:[#allocation3 + $0x173c] sm:$0xf]  ;;  %v12893_v49 = vor.u32 %v15880_v43, %v12890_v45  ;;  %8357 = vmatpush.bf16.msrb.mxu3 %v14493_v47 }
 0x60a   : > { %v13402_v60 = vld [vmem:[#allocation3 + $0x1778] sm:$0xf0] }
 0x60b   : > { %v16136_v48 = vld [vmem:[#allocation3 + $0x1b3c] sm:$0xf]  ;;  %v13405_v62 = vor.u32 %v16008_v46, %v13402_v60  ;;  %8319 = vmatpush.bf16.msrb.mxu0 %v12893_v49  ;;  %v17279_v49 = vpop.f32.mrf.mxu2 }
 0x60c   : > { %v13914_v0 = vld [vmem:[#allocation3 + $0x1b78] sm:$0xf0] }
 0x60d   : > { %v16264_v21 = vld [vmem:[#allocation3 + $0x1f3c] sm:$0xf]  ;;  %v13917_v1 = vor.u32 %v16136_v48, %v13914_v0  ;;  %8332 = vmatpush.bf16.msrb.mxu1 %v13405_v62 }
 0x60e   : > { %v14426_v6 = vld [vmem:[#allocation3 + $0x1f78] sm:$0xf0] }
 0x60f   : > { %v15864_v2 = vld [vmem:[#allocation3 + $0x12bc] sm:$0xf]  ;;  %v14429_v34 = vor.u32 %v16264_v21, %v14426_v6  ;;  %8345 = vmatpush.bf16.msrb.mxu2 %v13917_v1 }
 0x610   : > { %v12826_v61 = vld [vmem:[#allocation3 + $0x12f8] sm:$0xf0] }
 0x611   : > { %v15992_v5 = vld [vmem:[#allocation3 + $0x16bc] sm:$0xf]  ;;  %v12829_v29 = vor.u32 %v15864_v2, %v12826_v61  ;;  %8358 = vmatpush.bf16.msrb.mxu3 %v14429_v34 }
 0x612   : > { %v13338_v7 = vld [vmem:[#allocation3 + $0x16f8] sm:$0xf0] }
 0x613   : > { %v16120_v10 = vld [vmem:[#allocation3 + $0x1abc] sm:$0xf]  ;;  %v13341_v8 = vor.u32 %v15992_v5, %v13338_v7  ;;  %8320 = vmatpush.bf16.msrb.mxu0 %v12829_v29  ;;  %v17281_v5 = vpop.f32.mrf.mxu3 }
 0x614   : > { %v13850_v11 = vld [vmem:[#allocation3 + $0x1af8] sm:$0xf0] }
 0x615   : > { %v16248_v13 = vld [vmem:[#allocation3 + $0x1ebc] sm:$0xf]  ;;  %v13853_v4 = vor.u32 %v16120_v10, %v13850_v11  ;;  %8333 = vmatpush.bf16.msrb.mxu1 %v13341_v8  ;;  %v8069_v11 = vpop.f32.mrf.mxu0 }
 0x616   : > { %v14362_v14 = vld [vmem:[#allocation3 + $0x1ef8] sm:$0xf0] }
 0x617   : > { %v15848_v17 = vld [vmem:[#allocation3 + $0x123c] sm:$0xf]  ;;  %v14365_v27 = vor.u32 %v16248_v13, %v14362_v14  ;;  %8346 = vmatpush.bf16.msrb.mxu2 %v13853_v4 }
 0x618   : > { %v12762_v23 = vld [vmem:[#allocation3 + $0x1278] sm:$0xf0] }
 0x619   : > { %v15976_v18 = vld [vmem:[#allocation3 + $0x163c] sm:$0xf]  ;;  %v12765_v20 = vor.u32 %v15848_v17, %v12762_v23  ;;  %8359 = vmatpush.bf16.msrb.mxu3 %v14365_v27  ;;  %v8082_v17 = vpop.f32.mrf.mxu1 }
 0x61a   : > { %v13274_v30 = vld [vmem:[#allocation3 + $0x1678] sm:$0xf0] }
 0x61b   : > { %v16104_v31 = vld [vmem:[#allocation3 + $0x1a3c] sm:$0xf]  ;;  %v13277_v22 = vor.u32 %v15976_v18, %v13274_v30  ;;  %8321 = vmatpush.bf16.msrb.mxu0 %v12765_v20 }
 0x61c   : > { %v13786_v15 = vld [vmem:[#allocation3 + $0x1a78] sm:$0xf0] }
 0x61d   : > { %v16232_v3 = vld [vmem:[#allocation3 + $0x1e3c] sm:$0xf]  ;;  %v13789_v32 = vor.u32 %v16104_v31, %v13786_v15  ;;  %8334 = vmatpush.bf16.msrb.mxu1 %v13277_v22 }
 0x61e   : > { %v14298_v19 = vld [vmem:[#allocation3 + $0x1e78] sm:$0xf0] }
 0x61f   : > { %v15832_v33 = vld [vmem:[#allocation3 + $0x11bc] sm:$0xf]  ;;  %v14301_v37 = vor.u32 %v16232_v3, %v14298_v19  ;;  %8347 = vmatpush.bf16.msrb.mxu2 %v13789_v32  ;;  %v1539_v3 = vperm.slane %v17250_v9, 5 }
 0x620   : > { %v12698_v51 = vld [vmem:[#allocation3 + $0x11f8] sm:$0xf0] }
 0x621   : > { %v15960_v39 = vld [vmem:[#allocation3 + $0x15bc] sm:$0xf]  ;;  %v12701_v47 = vor.u32 %v15832_v33, %v12698_v51  ;;  %8360 = vmatpush.bf16.msrb.mxu3 %v14301_v37  ;;  %v8068_v9 = vadd.f32 %v17275_v56, %v1539_v3 }
 0x622   : > { %v13210_v52 = vld [vmem:[#allocation3 + $0x15f8] sm:$0xf0] }
 0x623   : > { %v16088_v53 = vld [vmem:[#allocation3 + $0x19bc] sm:$0xf]  ;;  %v13213_v60 = vor.u32 %v15960_v39, %v13210_v52  ;;  %8322 = vmatpush.bf16.msrb.mxu0 %v12701_v47  ;;  %v8095_v52 = vpop.f32.mrf.mxu2  ;;  %v8108_v47 = vpop.f32.mrf.mxu3 }
 0x624   : > { %v13722_v43 = vld [vmem:[#allocation3 + $0x19f8] sm:$0xf0]  ;;  %v14960_v52 = vld [vmem:[#allocation7 + $0x3a0] sm:$0xf]  ;;  %v16307_v47 = vld [vmem:[#allocation7 + $0x8c] sm:$0xf0] }
 0x625   : > { %v16216_v45 = vld [vmem:[#allocation3 + $0x1dbc] sm:$0xf]  ;;  %v13725_v48 = vor.u32 %v16088_v53, %v13722_v43  ;;  %8335 = vmatpush.bf16.msrb.mxu1 %v13213_v60  ;;  %v14608_v60 = vld [vmem:[#allocation7 + $0xe0] sm:$0xf] }
 0x626   : > { %v14234_v46 = vld [vmem:[#allocation3 + $0x1df8] sm:$0xf0] }
 0x627   : > { %v15816_v0 = vld [vmem:[#allocation3 + $0x113c] sm:$0xf]  ;;  %v14237_v62 = vor.u32 %v16216_v45, %v14234_v46  ;;  %8348 = vmatpush.bf16.msrb.mxu2 %v13725_v48  ;;  %v16319_v48 = vld [vmem:[#allocation7 + $0xec] sm:$0xf0] }
 0x628   : > { %v12634_v21 = vld [vmem:[#allocation3 + $0x1178] sm:$0xf0]  ;;  %v14609_v11 = vor.u32 %v16319_v48, %v14608_v60  ;;  %v14816_v48 = vld [vmem:[#allocation7 + $0x280] sm:$0xf] }
 0x629   : > { %v15944_v6 = vld [vmem:[#allocation3 + $0x153c] sm:$0xf]  ;;  %v12637_v10 = vor.u32 %v15816_v0, %v12634_v21  ;;  %8361 = vmatpush.bf16.msrb.mxu3 %v14237_v62  ;;  %v14736_v0 = vld [vmem:[#allocation7 + $0x1e0] sm:$0xf] }
 0x62a   : > { %v13146_v1 = vld [vmem:[#allocation3 + $0x1578] sm:$0xf0]  ;;  %v14864_v62 = vld [vmem:[#allocation7 + $0x2e0] sm:$0xf] }
 0x62b   : > { %v16072_v2 = vld [vmem:[#allocation3 + $0x193c] sm:$0xf]  ;;  %v13149_v13 = vor.u32 %v15944_v6, %v13146_v1  ;;  %8323 = vmatpush.bf16.msrb.mxu0 %v12637_v10  ;;  %v16351_v6 = vld [vmem:[#allocation7 + $0x1ec] sm:$0xf0] }
 0x62c   : > { %v13658_v61 = vld [vmem:[#allocation3 + $0x1978] sm:$0xf0]  ;;  %v16383_v1 = vld [vmem:[#allocation7 + $0x2ec] sm:$0xf0]  ;;  %v14737_v56 = vor.u32 %v16351_v6, %v14736_v0  ;;  %v14944_v0 = vld [vmem:[#allocation7 + $0x380] sm:$0xf]  ;;  %v8119_v6 = vpop.f32.mrf.mxu0 }
 0x62d   : > { %v16200_v34 = vld [vmem:[#allocation3 + $0x1d3c] sm:$0xf]  ;;  %v13661_v14 = vor.u32 %v16072_v2, %v13658_v61  ;;  %8336 = vmatpush.bf16.msrb.mxu1 %v13149_v13  ;;  %v8081_v13 = vadd.f32 %v17277_v28, %v8068_v9  ;;  %v14688_v9 = vld [vmem:[#allocation7 + $0x180] sm:$0xf] }
 0x62e   : > { %v14170_v7 = vld [vmem:[#allocation3 + $0x1d78] sm:$0xf0] }
 0x62f   : > { %v15800_v29 = vld [vmem:[#allocation3 + $0x10bc] sm:$0xf]  ;;  %v14173_v23 = vor.u32 %v16200_v34, %v14170_v7  ;;  %8349 = vmatpush.bf16.msrb.mxu2 %v13661_v14  ;;  %v14992_v34 = vld [vmem:[#allocation7 + $0x3e0] sm:$0xf]  ;;  %v16415_v7 = vld [vmem:[#allocation7 + $0x3ec] sm:$0xf0]  ;;  %v14865_v14 = vor.u32 %v16383_v1, %v14864_v62  ;;  %v8094_v28 = vadd.f32 %v17279_v49, %v8081_v13 }
 0x630   : > { %v12570_v8 = vld [vmem:[#allocation3 + $0x10f8] sm:$0xf0]  ;;  %v14993_v17 = vor.u32 %v16415_v7, %v14992_v34  ;;  %v16303_v34 = vld [vmem:[#allocation7 + $0x6c] sm:$0xf0]  ;;  %v14672_v7 = vld [vmem:[#allocation7 + $0x160] sm:$0xf] }
 0x631   : > { %v15928_v4 = vld [vmem:[#allocation3 + $0x14bc] sm:$0xf]  ;;  %v12573_v19 = vor.u32 %v15800_v29, %v12570_v8  ;;  %8362 = vmatpush.bf16.msrb.mxu3 %v14173_v23  ;;  %v14592_v29 = vld [vmem:[#allocation7 + $0xc0] sm:$0xf]  ;;  %v16315_v8 = vld [vmem:[#allocation7 + $0xcc] sm:$0xf0] }
 0x632   : > { %v13082_v18 = vld [vmem:[#allocation3 + $0x14f8] sm:$0xf0]  ;;  %v16347_v23 = vld [vmem:[#allocation7 + $0x1cc] sm:$0xf0]  ;;  %v14800_v13 = vld [vmem:[#allocation7 + $0x260] sm:$0xf] }
 0x633   : > { %v16056_v27 = vld [vmem:[#allocation3 + $0x18bc] sm:$0xf]  ;;  %v13085_v32 = vor.u32 %v15928_v4, %v13082_v18  ;;  %8324 = vmatpush.bf16.msrb.mxu0 %v12573_v19  ;;  %v14720_v4 = vld [vmem:[#allocation7 + $0x1c0] sm:$0xf] }
 0x634   : > { %v13594_v30 = vld [vmem:[#allocation3 + $0x18f8] sm:$0xf0]  ;;  %v14848_v18 = vld [vmem:[#allocation7 + $0x2c0] sm:$0xf]  ;;  %v14721_v3 = vor.u32 %v16347_v23, %v14720_v4  ;;  %v8379_v4 = vmax.f32 %v17214_v54, 0.0 }
 0x635   : > { %v16184_v31 = vld [vmem:[#allocation3 + $0x1cbc] sm:$0xf]  ;;  %v13597_v33 = vor.u32 %v16056_v27, %v13594_v30  ;;  %8337 = vmatpush.bf16.msrb.mxu1 %v13085_v32  ;;  %v16379_v27 = vld [vmem:[#allocation7 + $0x2cc] sm:$0xf0]  ;;  %v14976_v30 = vld [vmem:[#allocation7 + $0x3c0] sm:$0xf] }
 0x636   : > { %v14106_v15 = vld [vmem:[#allocation3 + $0x1cf8] sm:$0xf0]  ;;  %v14849_v19 = vor.u32 %v16379_v27, %v14848_v18  ;;  %v14704_v32 = vld [vmem:[#allocation7 + $0x1a0] sm:$0xf]  ;;  %v8145_v27 = vpop.f32.mrf.mxu2  ;;  %v16369_v54 = vld [vmem:[#allocation7 + $0x284] sm:$0xf] }
 0x637   : > { %v15784_v20 = vld [vmem:[#allocation3 + $0x103c] sm:$0xf]  ;;  %v14109_v53 = vor.u32 %v16184_v31, %v14106_v15  ;;  %8350 = vmatpush.bf16.msrb.mxu2 %v13597_v33  ;;  %v16411_v31 = vld [vmem:[#allocation7 + $0x3cc] sm:$0xf0]  ;;  %v14593_v15 = vor.u32 %v16315_v8, %v14592_v29  ;;  %v14928_v29 = vld [vmem:[#allocation7 + $0x360] sm:$0xf] }
 0x638   : > { %v12506_v22 = vld [vmem:[#allocation3 + $0x1078] sm:$0xf0]  ;;  %v14977_v33 = vor.u32 %v16411_v31, %v14976_v30  ;;  %v16399_v8 = vld [vmem:[#allocation7 + $0x36c] sm:$0xf0]  ;;  %v14528_v30 = vld [vmem:[#allocation7 + $0x40] sm:$0xf] }
 0x639   : > { %v15912_v51 = vld [vmem:[#allocation3 + $0x143c] sm:$0xf]  ;;  %v12509_v21 = vor.u32 %v15784_v20, %v12506_v22  ;;  %8363 = vmatpush.bf16.msrb.mxu3 %v14109_v53  ;;  %v14576_v20 = vld [vmem:[#allocation7 + $0xa0] sm:$0xf]  ;;  %v16311_v22 = vld [vmem:[#allocation7 + $0xac] sm:$0xf0] }
 0x63a   : > { %v13018_v39 = vld [vmem:[#allocation3 + $0x1478] sm:$0xf0]  ;;  %v16407_v53 = vld [vmem:[#allocation7 + $0x3ac] sm:$0xf0]  ;;  %v14577_v49 = vor.u32 %v16311_v22, %v14576_v20  ;;  %v14784_v22 = vld [vmem:[#allocation7 + $0x240] sm:$0xf] }
 0x63b   : > { %v16040_v37 = vld [vmem:[#allocation3 + $0x183c] sm:$0xf]  ;;  %v13021_v2 = vor.u32 %v15912_v51, %v13018_v39  ;;  %8325 = vmatpush.bf16.msrb.mxu0 %v12509_v21  ;;  %v16343_v51 = vld [vmem:[#allocation7 + $0x1ac] sm:$0xf0]  ;;  %v14832_v39 = vld [vmem:[#allocation7 + $0x2a0] sm:$0xf]  ;;  %v14961_v60 = vor.u32 %v16407_v53, %v14960_v52  ;;  %v8121_v53 = vpop.f32.mrf.mxu0 }
 0x63c   : > { %v13530_v43 = vld [vmem:[#allocation3 + $0x1878] sm:$0xf0]  ;;  %v16403_v21 = vld [vmem:[#allocation7 + $0x38c] sm:$0xf0]  ;;  %v14512_v52 = vld [vmem:[#allocation7 + $0x20] sm:$0xf] }
 0x63d   : > { %v16168_v45 = vld [vmem:[#allocation3 + $0x1c3c] sm:$0xf]  ;;  %v13533_v61 = vor.u32 %v16040_v37, %v13530_v43  ;;  %8338 = vmatpush.bf16.msrb.mxu1 %v13021_v2  ;;  %v16375_v37 = vld [vmem:[#allocation7 + $0x2ac] sm:$0xf0]  ;;  %v8107_v43 = vadd.f32 %v17281_v5, %v8094_v28  ;;  %v8132_v2 = vpop.f32.mrf.mxu1  ;;  %v14929_v28 = vor.u32 %v16399_v8, %v14928_v29  ;;  %v16317_v29 = vld [vmem:[#allocation7 + $0xe4] sm:$0xf] }
 0x63e   : > { %v14042_v46 = vld [vmem:[#allocation3 + $0x1c78] sm:$0xf0]  ;;  %8326 = vmatmul.bf16.vlgmr.msrb.gmra.mxu0 %v17036_v41  ;;  %v14833_v41 = vor.u32 %v16375_v37, %v14832_v39  ;;  %v16299_v31 = vld [vmem:[#allocation7 + $0x4c] sm:$0xf0]  ;;  %v14610_v8 = vld [vmem:[#allocation7 + $0xf0] sm:$0xf0] }
 0x63f   : > { %v14045_v10 = vor.u32 %v16168_v45, %v14042_v46  ;;  %8351 = vmatpush.bf16.msrb.mxu2 %v13533_v61  ;;  %9216 = vmatpush.bf16.msra.mxu0 %v14609_v11  ;;  %v14705_v45 = vor.u32 %v16343_v51, %v14704_v32  ;;  %v14560_v46 = vld [vmem:[#allocation7 + $0x80] sm:$0xf]  ;;  %v8120_v1 = vadd.f32 %v8119_v6, %v8107_v43  ;;  %v16335_v11 = vld [vmem:[#allocation7 + $0x16c] sm:$0xf0]  ;;  %v14706_v53 = vld [vmem:[#allocation7 + $0x1b0] sm:$0xf0] }
 0x640   : > { %8339 = vmatmul.bf16.vlgmr.msrb.gmra.mxu1 %v17040_v44  ;;  %v16339_v44 = vld [vmem:[#allocation7 + $0x18c] sm:$0xf0]  ;;  %v14544_v61 = vld [vmem:[#allocation7 + $0x60] sm:$0xf]  ;;  %v14673_v23 = vor.u32 %v16335_v11, %v14672_v7  ;;  %v14529_v37 = vor.u32 %v16299_v31, %v14528_v30 }
 0x641   : > { %8364 = vmatpush.bf16.msrb.mxu3 %v14045_v10  ;;  %9235 = vmatpush.bf16.msra.mxu1 %v14737_v56  ;;  %v14689_v5 = vor.u32 %v16339_v44, %v14688_v9  ;;  %v14945_v10 = vor.u32 %v16403_v21, %v14944_v0  ;;  %v16367_v56 = vld [vmem:[#allocation7 + $0x26c] sm:$0xf0]  ;;  %v8391_v9 = vadd.f32 %v17146_v57, %v8379_v4  ;;  %v14896_v0 = vld [vmem:[#allocation7 + $0x320] sm:$0xf] }
 0x642   : > { %8352 = vmatmul.bf16.vlgmr.msrb.gmra.mxu2 %v17034_v38  ;;  %v16371_v38 = vld [vmem:[#allocation7 + $0x28c] sm:$0xf0]  ;;  %v14801_v18 = vor.u32 %v16367_v56, %v14800_v13  ;;  %v14880_v13 = vld [vmem:[#allocation7 + $0x300] sm:$0xf] }
 0x643   : > { %9254 = vmatpush.bf16.msra.mxu2 %v14865_v14  ;;  %9217 = vmatpush.bf16.msra.mxu0 %v14593_v15  ;;  %v14817_v62 = vor.u32 %v16371_v38, %v14816_v48  ;;  %v8133_v14 = vadd.f32 %v8132_v2, %v8120_v1  ;;  %v14656_v15 = vld [vmem:[#allocation7 + $0x140] sm:$0xf]  ;;  %v16331_v20 = vld [vmem:[#allocation7 + $0x14c] sm:$0xf0] }
 0x644   : > { %8365 = vmatmul.bf16.vlgmr.msrb.gmra.mxu3 %v17038_v42  ;;  %v14561_v42 = vor.u32 %v16307_v47, %v14560_v46  ;;  %v16363_v32 = vld [vmem:[#allocation7 + $0x24c] sm:$0xf0]  ;;  %v14768_v48 = vld [vmem:[#allocation7 + $0x220] sm:$0xf] }
 0x645   : > { %9273 = vmatpush.bf16.msra.mxu3 %v14993_v17  ;;  %9236 = vmatpush.bf16.msra.mxu1 %v14721_v3  ;;  %v14545_v17 = vor.u32 %v16303_v34, %v14544_v61  ;;  %v8146_v3 = vadd.f32 %v8145_v27, %v8133_v14  ;;  %v16395_v51 = vld [vmem:[#allocation7 + $0x34c] sm:$0xf0]  ;;  %v14785_v43 = vor.u32 %v16363_v32, %v14784_v22  ;;  %v8134_v47 = vpop.f32.mrf.mxu1  ;;  %v14624_v2 = vld [vmem:[#allocation7 + $0x100] sm:$0xf]  ;;  %v8147_v34 = vpop.f32.mrf.mxu2  ;;  %v14722_v22 = vld [vmem:[#allocation7 + $0x1d0] sm:$0xf0] }
 0x646   : > { %v16327_v46 = vld [vmem:[#allocation7 + $0x12c] sm:$0xf0]  ;;  %v14562_v47 = vld [vmem:[#allocation7 + $0x90] sm:$0xf0] }
 0x647   : > { %9255 = vmatpush.bf16.msra.mxu2 %v14849_v19  ;;  %9218 = vmatpush.bf16.msra.mxu0 %v14577_v49  ;;  %v8158_v19 = vpop.f32.mrf.mxu3  ;;  %v14657_v49 = vor.u32 %v16331_v20, %v14656_v15  ;;  %v16359_v38 = vld [vmem:[#allocation7 + $0x22c] sm:$0xf0]  ;;  %v14613_v15 = vor.u32 %v16317_v29, %v14610_v8  ;;  %v16345_v20 = vld [vmem:[#allocation7 + $0x1c4] sm:$0xf]  ;;  %v14658_v29 = vld [vmem:[#allocation7 + $0x150] sm:$0xf0] }
 0x648   : > { %v17293_v39 = vadd.f32 %v8158_v19, %v8146_v3  ;;  %v16391_v21 = vld [vmem:[#allocation7 + $0x32c] sm:$0xf0]  ;;  %v14769_v1 = vor.u32 %v16359_v38, %v14768_v48  ;;  %v16313_v3 = vld [vmem:[#allocation7 + $0xc4] sm:$0xf]  ;;  %v14594_v19 = vld [vmem:[#allocation7 + $0xd0] sm:$0xf0] }
 0x649   : > { %9274 = vmatpush.bf16.msra.mxu3 %v14977_v33  ;;  %9237 = vmatpush.bf16.msra.mxu1 %v14705_v45  ;;  %v14912_v33 = vld [vmem:[#allocation7 + $0x340] sm:$0xf]  ;;  %v16295_v45 = vld [vmem:[#allocation7 + $0x2c] sm:$0xf0]  ;;  %v14897_v7 = vor.u32 %v16391_v21, %v14896_v0  ;;  %v14597_v32 = vor.u32 %v16313_v3, %v14594_v19  ;;  %v14690_v48 = vld [vmem:[#allocation7 + $0x190] sm:$0xf0]  ;;  %v8171_v21 = vpop.f32.mrf.mxu0 }
 0x64a   : > { %v14913_v44 = vor.u32 %v16395_v51, %v14912_v33  ;;  %v14513_v6 = vor.u32 %v16295_v45, %v14512_v52  ;;  %v16291_v57 = vld [vmem:[#allocation7 + $0xc] sm:$0xf0]  ;;  %v14725_v33 = vor.u32 %v16345_v20, %v14722_v22  ;;  %v16309_v51 = vld [vmem:[#allocation7 + $0xa4] sm:$0xf]  ;;  %v14866_v45 = vld [vmem:[#allocation7 + $0x2f0] sm:$0xf0] }
 0x64b   : > { %9256 = vmatpush.bf16.msra.mxu2 %v14833_v41  ;;  %9219 = vmatpush.bf16.msra.mxu0 %v14561_v42  ;;  %v14640_v41 = vld [vmem:[#allocation7 + $0x120] sm:$0xf]  ;;  %v16323_v61 = vld [vmem:[#allocation7 + $0x10c] sm:$0xf0]  ;;  %v16341_v52 = vld [vmem:[#allocation7 + $0x1a4] sm:$0xf] }
 0x64c   : > { %v16355_v11 = vld [vmem:[#allocation7 + $0x20c] sm:$0xf0]  ;;  %v14625_v27 = vor.u32 %v16323_v61, %v14624_v2  ;;  %v16301_v0 = vld [vmem:[#allocation7 + $0x64] sm:$0xf]  ;;  %v14674_v61 = vld [vmem:[#allocation7 + $0x170] sm:$0xf0] }
 0x64d   : > { %9275 = vmatpush.bf16.msra.mxu3 %v14961_v60  ;;  %9238 = vmatpush.bf16.msra.mxu1 %v14689_v5  ;;  %v8383_v60 = vmax.f32 %v17293_v39, 0.0  ;;  %v14496_v5 = vld [vmem:[#allocation7] sm:$0xf]  ;;  %v16387_v14 = vld [vmem:[#allocation7 + $0x30c] sm:$0xf0]  ;;  %v17327_v39 = vld [vmem:[#allocation5 + $0x8] sm:$0xff] }
 0x64e   : > { %v14881_v31 = vor.u32 %v16387_v14, %v14880_v13  ;;  %v16333_v2 = vld [vmem:[#allocation7 + $0x164] sm:$0xf]  ;;  %v14530_v13 = vld [vmem:[#allocation7 + $0x50] sm:$0xf0]  ;;  %v17309_v14 = vpop.f32.mrf.mxu2 }
 0x64f   : > { %9257 = vmatpush.bf16.msra.mxu2 %v14817_v62  ;;  %9220 = vmatpush.bf16.msra.mxu0 %v14545_v17  ;;  %v17301_v42 = vadd.f32 %v8391_v9, %v8383_v60  ;;  %v14641_v62 = vor.u32 %v16327_v46, %v14640_v41  ;;  %v8160_v56 = vpop.f32.mrf.mxu3  ;;  %v14497_v17 = vor.u32 %v16291_v57, %v14496_v5  ;;  %v16305_v46 = vld [vmem:[#allocation7 + $0x84] sm:$0xf]  ;;  %v14546_v5 = vld [vmem:[#allocation7 + $0x70] sm:$0xf0] }
 0x650   : > { %v14709_v41 = vor.u32 %v16341_v52, %v14706_v53  ;;  %v14565_v38 = vor.u32 %v16305_v46, %v14562_v47  ;;  %v14850_v57 = vld [vmem:[#allocation7 + $0x2d0] sm:$0xf0]  ;;  %v16329_v56 = vld [vmem:[#allocation7 + $0x144] sm:$0xf] }
 0x651   : > { %9276 = vmatpush.bf16.msra.mxu3 %v14945_v10  ;;  %9239 = vmatpush.bf16.msra.mxu1 %v14673_v23  ;;  %v14752_v10 = vld [vmem:[#allocation7 + $0x200] sm:$0xf]  ;;  %v16349_v23 = vld [vmem:[#allocation7 + $0x1e4] sm:$0xf] }
 0x652   : > { %v14753_v30 = vor.u32 %v16355_v11, %v14752_v10  ;;  %v14677_v10 = vor.u32 %v16333_v2, %v14674_v61  ;;  %v16297_v11 = vld [vmem:[#allocation7 + $0x44] sm:$0xf]  ;;  %v14600_v61 = vld [vmem:[#allocation7 + $0xc8] sm:$0xf] }
 0x653   : > { %9258 = vmatpush.bf16.msra.mxu2 %v14801_v18  ;;  %9221 = vmatpush.bf16.msra.mxu0 %v14529_v37  ;;  %v14738_v18 = vld [vmem:[#allocation7 + $0x1f0] sm:$0xf0]  ;;  %v16293_v3 = vld [vmem:[#allocation7 + $0x24] sm:$0xf] }
 0x654   : > { %v14578_v37 = vld [vmem:[#allocation7 + $0xb0] sm:$0xf0]  ;;  %v16325_v19 = vld [vmem:[#allocation7 + $0x124] sm:$0xf]  ;;  %v14517_v20 = vor.u32 %v16293_v3, %v14514_v12 }
 0x655   : > { %9277 = vmatpush.bf16.msra.mxu3 %v14929_v28  ;;  %9240 = vmatpush.bf16.msra.mxu1 %v14657_v49  ;;  %v14741_v28 = vor.u32 %v16349_v23, %v14738_v18  ;;  %v16381_v49 = vld [vmem:[#allocation7 + $0x2e4] sm:$0xf]  ;;  %v14834_v23 = vld [vmem:[#allocation7 + $0x2b0] sm:$0xf0]  ;;  %v17317_v18 = vpack.c.bf16 %v8382_v50, %v8378_v16 }
 0x656   : > { %v14869_v9 = vor.u32 %v16381_v49, %v14866_v45  ;;  %v14642_v16 = vld [vmem:[#allocation7 + $0x130] sm:$0xf0]  ;;  %v16289_v22 = vld [vmem:[#allocation7 + $0x4] sm:$0xf]  ;;  %v8199_v52 = vpop.f32.mrf.mxu2  ;;  %v16320_v45 = vld [vmem:[#allocation7 + $0xf4] sm:$0xf0] }
 0x657   : > { %9259 = vmatpush.bf16.msra.mxu2 %v14785_v43  ;;  %9222 = vmatpush.bf16.msra.mxu0 %v14513_v6  ;;  %v14581_v43 = vor.u32 %v16309_v51, %v14578_v37  ;;  %v17311_v8 = vpop.f32.mrf.mxu3  ;;  %v14818_v50 = vld [vmem:[#allocation7 + $0x290] sm:$0xf0]  ;;  %v14645_v51 = vor.u32 %v16325_v19, %v14642_v16  ;;  %v16365_v53 = vld [vmem:[#allocation7 + $0x264] sm:$0xf]  ;;  %v14552_v52 = vld [vmem:[#allocation7 + $0x68] sm:$0xf] }
 0x658   : > { %v14626_v37 = vld [vmem:[#allocation7 + $0x110] sm:$0xf0] }
 0x659   : > { %9278 = vmatpush.bf16.msra.mxu3 %v14913_v44  ;;  %9241 = vmatpush.bf16.msra.mxu1 %v14641_v62  ;;  %v16337_v44 = vld [vmem:[#allocation7 + $0x184] sm:$0xf]  ;;  %v17307_v62 = vpop.f32.mrf.mxu1  ;;  %v14802_v49 = vld [vmem:[#allocation7 + $0x270] sm:$0xf0] }
 0x65a   : > { %v14693_v6 = vor.u32 %v16337_v44, %v14690_v48  ;;  %v14805_v47 = vor.u32 %v16365_v53, %v14802_v49  ;;  %v16352_v44 = vld [vmem:[#allocation7 + $0x1f4] sm:$0xf0]  ;;  %v16361_v48 = vld [vmem:[#allocation7 + $0x244] sm:$0xf]  ;;  %v14754_v3 = vld [vmem:[#allocation7 + $0x210] sm:$0xf0] }
 0x65b   : > { %9260 = vmatpush.bf16.msra.mxu2 %v14769_v1  ;;  %9223 = vmatpush.bf16.msra.mxu0 %v14497_v17  ;;  %v16377_v1 = vld [vmem:[#allocation7 + $0x2c4] sm:$0xf]  ;;  %v14856_v53 = vld [vmem:[#allocation7 + $0x2c8] sm:$0xf] }
 0x65c   : > { %v14853_v34 = vor.u32 %v16377_v1, %v14850_v57  ;;  %v16373_v17 = vld [vmem:[#allocation7 + $0x2a4] sm:$0xf]  ;;  %v14680_v49 = vld [vmem:[#allocation7 + $0x168] sm:$0xf] }
 0x65d   : > { %9279 = vmatpush.bf16.msra.mxu3 %v14897_v7  ;;  %9242 = vmatpush.bf16.msra.mxu1 %v14625_v27  ;;  %v14549_v7 = vor.u32 %v16301_v0, %v14546_v5  ;;  %v14837_v27 = vor.u32 %v16373_v17, %v14834_v23  ;;  %v14584_v17 = vld [vmem:[#allocation7 + $0xa8] sm:$0xf]  ;;  %v16312_v23 = vld [vmem:[#allocation7 + $0xb4] sm:$0xf0] }
 0x65e   : > { %9224 = vmatmul.bf16.vlgmr.msra.gmra.mxu0 %v17131_v35 }
 0x65f   : > { %9261 = vmatpush.bf16.msra.mxu2 %v14753_v30  ;;  %9292 = vmatpush.bf16.msrb.mxu0 %v14613_v15  ;;  %v17323_v30 = vpack.c.bf16 %v8383_v60, %v8379_v4  ;;  %v8173_v15 = vpop.f32.mrf.mxu0  ;;  %v1540_v4 = vperm.slane %v17327_v39, 6  ;;  %v14821_v60 = vor.u32 %v16369_v54, %v14818_v50  ;;  %v8212_v46 = vpop.f32.mrf.mxu3  ;;  %v14696_v54 = vld [vmem:[#allocation7 + $0x188] sm:$0xf]  ;;  %v16340_v50 = vld [vmem:[#allocation7 + $0x194] sm:$0xf0] }
 0x660   : > { %9243 = vmatmul.bf16.vlgmr.msra.gmra.mxu1 %v17148_v58  ;;  %v14585_v15 = vor.u32 %v16312_v23, %v14584_v17 }
 0x661   : > { %9280 = vmatpush.bf16.msra.mxu3 %v14881_v31  ;;  %9311 = vmatpush.bf16.msrb.mxu1 %v14741_v28  ;;  %v14533_v31 = vor.u32 %v16297_v11, %v14530_v13  ;;  %v14661_v28 = vor.u32 %v16329_v56, %v14658_v29  ;;  %v8186_v40 = vpop.f32.mrf.mxu1  ;;  %v16357_v11 = vld [vmem:[#allocation7 + $0x224] sm:$0xf] }
 0x662   : > { %9262 = vmatmul.bf16.vlgmr.msra.gmra.mxu2 %v17167_v25  ;;  %v14568_v40 = vld [vmem:[#allocation7 + $0x88] sm:$0xf] }
 0x663   : > { %9293 = vmatpush.bf16.msrb.mxu0 %v14597_v32  ;;  %9330 = vmatpush.bf16.msrb.mxu2 %v14869_v9  ;;  %v14498_v32 = vld [vmem:[#allocation7 + $0x10] sm:$0xf0]  ;;  %v8172_v9 = vadd.f32 %v8171_v21, %v1540_v4  ;;  %v14872_v4 = vld [vmem:[#allocation7 + $0x2e8] sm:$0xf] }
 0x664   : > { %9281 = vmatmul.bf16.vlgmr.msra.gmra.mxu3 %v17184_v59  ;;  %v14501_v0 = vor.u32 %v16289_v22, %v14498_v32  ;;  %v14770_v21 = vld [vmem:[#allocation7 + $0x230] sm:$0xf0] }
 0x665   : > { %9312 = vmatpush.bf16.msrb.mxu1 %v14725_v33  ;;  %v16321_v33 = vld [vmem:[#allocation7 + $0x104] sm:$0xf]  ;;  %v8185_v2 = vadd.f32 %v17307_v62, %v8172_v9  ;;  %v16344_v62 = vld [vmem:[#allocation7 + $0x1b4] sm:$0xf0]  ;;  %v14840_v9 = vld [vmem:[#allocation7 + $0x2a8] sm:$0xf] }
 0x667   : > { %9294 = vmatpush.bf16.msrb.mxu0 %v14581_v43  ;;  %9331 = vmatpush.bf16.msrb.mxu2 %v14853_v34  ;;  %v14616_v43 = vld [vmem:[#allocation7 + $0xe8] sm:$0xf]  ;;  %v16316_v34 = vld [vmem:[#allocation7 + $0xd4] sm:$0xf0]  ;;  %v8198_v56 = vadd.f32 %v17309_v14, %v8185_v2 }
 0x668   : > { %v14617_v5 = vor.u32 %v16320_v45, %v14616_v43  ;;  %v14601_v13 = vor.u32 %v16316_v34, %v14600_v61  ;;  %v16308_v14 = vld [vmem:[#allocation7 + $0x94] sm:$0xf0]  ;;  %v14664_v2 = vld [vmem:[#allocation7 + $0x148] sm:$0xf] }
 0x669   : > { %9313 = vmatpush.bf16.msrb.mxu1 %v14709_v41  ;;  %v14744_v41 = vld [vmem:[#allocation7 + $0x1e8] sm:$0xf]  ;;  %v8211_v12 = vadd.f32 %v17311_v8, %v8198_v56  ;;  %v14569_v22 = vor.u32 %v16308_v14, %v14568_v40  ;;  %v16304_v8 = vld [vmem:[#allocation7 + $0x74] sm:$0xf0] }
 0x66a   : > { %v14745_v1 = vor.u32 %v16352_v44, %v14744_v41  ;;  %v16336_v43 = vld [vmem:[#allocation7 + $0x174] sm:$0xf0]  ;;  %v14632_v40 = vld [vmem:[#allocation7 + $0x108] sm:$0xf] }
 0x66b   : > { %9295 = vmatpush.bf16.msrb.mxu0 %v14565_v38  ;;  %9332 = vmatpush.bf16.msrb.mxu2 %v14837_v27  ;;  %v14786_v38 = vld [vmem:[#allocation7 + $0x250] sm:$0xf0]  ;;  %v14773_v27 = vor.u32 %v16357_v11, %v14770_v21  ;;  %v16380_v45 = vld [vmem:[#allocation7 + $0x2d4] sm:$0xf0] }
 0x66c   : > { %v14789_v57 = vor.u32 %v16361_v48, %v14786_v38  ;;  %v14857_v46 = vor.u32 %v16380_v45, %v14856_v53  ;;  %v16376_v44 = vld [vmem:[#allocation7 + $0x2b4] sm:$0xf0]  ;;  %v8249_v48 = vpop.f32.mrf.mxu2  ;;  %v14681_v38 = vor.u32 %v16336_v43, %v14680_v49  ;;  %v14792_v53 = vld [vmem:[#allocation7 + $0x248] sm:$0xf]  ;;  %v16314_v45 = vld [vmem:[#allocation7 + $0xcc] sm:$0xf] }
 0x66d   : > { %9314 = vmatpush.bf16.msrb.mxu1 %v14693_v6  ;;  %v14629_v6 = vor.u32 %v16321_v33, %v14626_v37  ;;  %v14697_v37 = vor.u32 %v16340_v50, %v14696_v54  ;;  %v16332_v61 = vld [vmem:[#allocation7 + $0x154] sm:$0xf0]  ;;  %v14841_v34 = vor.u32 %v16376_v44, %v14840_v9  ;;  %v16318_v50 = vld [vmem:[#allocation7 + $0xec] sm:$0xf]  ;;  %v14776_v44 = vld [vmem:[#allocation7 + $0x228] sm:$0xf] }
 0x66e   : > { %9229 = vmatmul.bf16.gmra.mxu0 %v17317_v18  ;;  %v14665_v21 = vor.u32 %v16332_v61, %v14664_v2  ;;  %v16296_v56 = vld [vmem:[#allocation7 + $0x34] sm:$0xf0]  ;;  %v14586_v2 = vld [vmem:[#allocation7 + $0xb8] sm:$0xf0]  ;;  %v16342_v61 = vld [vmem:[#allocation7 + $0x1ac] sm:$0xf] }
 0x66f   : > { %9296 = vmatpush.bf16.msrb.mxu0 %v14549_v7  ;;  %9333 = vmatpush.bf16.msrb.mxu2 %v14821_v60  ;;  %v14728_v7 = vld [vmem:[#allocation7 + $0x1c8] sm:$0xf]  ;;  %v16384_v60 = vld [vmem:[#allocation7 + $0x2f4] sm:$0xf0] }
 0x670   : > { %9248 = vmatmul.bf16.gmra.mxu1 %v17323_v30  ;;  %v14873_v32 = vor.u32 %v16384_v60, %v14872_v4  ;;  %v16324_v14 = vld [vmem:[#allocation7 + $0x114] sm:$0xf0]  ;;  %v14618_v4 = vld [vmem:[#allocation7 + $0xf8] sm:$0xf0]  ;;  %v16350_v60 = vld [vmem:[#allocation7 + $0x1ec] sm:$0xf] }
 0x671   : > { %9315 = vmatpush.bf16.msrb.mxu1 %v14677_v10  ;;  %v16348_v10 = vld [vmem:[#allocation7 + $0x1d4] sm:$0xf0] }
 0x672   : > { %v14729_v29 = vor.u32 %v16348_v10, %v14728_v7  ;;  %v16364_v49 = vld [vmem:[#allocation7 + $0x254] sm:$0xf0] }
 0x673   : > { %9297 = vmatpush.bf16.msrb.mxu0 %v14533_v31  ;;  %9334 = vmatpush.bf16.msrb.mxu2 %v14805_v47  ;;  %v14712_v31 = vld [vmem:[#allocation7 + $0x1a8] sm:$0xf]  ;;  %v14553_v47 = vor.u32 %v16304_v8, %v14552_v52  ;;  %v14633_v52 = vor.u32 %v16324_v14, %v14632_v40  ;;  %v14621_v8 = vor.u32 %v16318_v50, %v14618_v4  ;;  %v16334_v14 = vld [vmem:[#allocation7 + $0x16c] sm:$0xf]  ;;  %v14874_v4 = vld [vmem:[#allocation7 + $0x2f8] sm:$0xf0] }
 0x674   : > { %v14713_v19 = vor.u32 %v16344_v62, %v14712_v31  ;;  %v14793_v9 = vor.u32 %v16364_v49, %v14792_v53  ;;  %v16382_v50 = vld [vmem:[#allocation7 + $0x2ec] sm:$0xf]  ;;  %v14666_v53 = vld [vmem:[#allocation7 + $0x158] sm:$0xf0] }
 0x675   : > { %9316 = vmatpush.bf16.msrb.mxu1 %v14661_v28  ;;  %v16353_v28 = vld [vmem:[#allocation7 + $0x204] sm:$0xf] }
 0x676   : > { %v14757_v16 = vor.u32 %v16353_v28, %v14754_v3  ;;  %v14504_v28 = vld [vmem:[#allocation7 + $0x8] sm:$0xf] }
 0x677   : > { %9298 = vmatpush.bf16.msrb.mxu0 %v14517_v20  ;;  %9335 = vmatpush.bf16.msrb.mxu2 %v14789_v57  ;;  %v8223_v20 = vpop.f32.mrf.mxu0  ;;  %v8262_v57 = vpop.f32.mrf.mxu3  ;;  %v14824_v3 = vld [vmem:[#allocation7 + $0x288] sm:$0xf] }
 0x678   : > { %v8224_v33 = vadd.f32 %v8223_v20, %v8211_v12  ;;  %v16372_v12 = vld [vmem:[#allocation7 + $0x294] sm:$0xf0] }
 0x679   : > { %9317 = vmatpush.bf16.msrb.mxu1 %v14645_v51  ;;  %v8236_v51 = vpop.f32.mrf.mxu1  ;;  %v14825_v54 = vor.u32 %v16372_v12, %v14824_v3  ;;  %v14554_v12 = vld [vmem:[#allocation7 + $0x78] sm:$0xf0] }
 0x67a   : > { %v8237_v41 = vadd.f32 %v8236_v51, %v8224_v33  ;;  %v16368_v33 = vld [vmem:[#allocation7 + $0x274] sm:$0xf0] }
 0x67b   : > { %9299 = vmatpush.bf16.msrb.mxu0 %v14501_v0  ;;  %9336 = vmatpush.bf16.msrb.mxu2 %v14773_v27  ;;  %v14536_v0 = vld [vmem:[#allocation7 + $0x48] sm:$0xf] }
 0x67c   : > { %v14648_v27 = vld [vmem:[#allocation7 + $0x128] sm:$0xf] }
 0x67d   : > { %9318 = vmatpush.bf16.msrb.mxu1 %v14629_v6  ;;  %v16300_v6 = vld [vmem:[#allocation7 + $0x54] sm:$0xf0] }
 0x67e   : > { %9300 = vmatmul.bf16.vlgmr.msrb.gmra.mxu0 %v17131_v35  ;;  %v14537_v10 = vor.u32 %v16300_v6, %v14536_v0  ;;  %v14994_v0 = vld [vmem:[#allocation7 + $0x3f0] sm:$0xf0] }
 0x67f   : > { %9368 = vmatpush.bf16.msra.mxu0 %v14617_v5  ;;  %9337 = vmatpush.bf16.msrb.mxu2 %v14757_v16  ;;  %v8380_v5 = vmax.f32 %v17230_v24, 0.0  ;;  %v8225_v11 = vpop.f32.mrf.mxu0  ;;  %v16328_v24 = vld [vmem:[#allocation7 + $0x134] sm:$0xf0]  ;;  %v8251_v16 = vpop.f32.mrf.mxu2 }
 0x680   : > { %9319 = vmatmul.bf16.vlgmr.msrb.gmra.mxu1 %v17148_v58  ;;  %v8264_v20 = vpop.f32.mrf.mxu3  ;;  %v14682_v16 = vld [vmem:[#allocation7 + $0x178] sm:$0xf0] }
 0x681   : > { %9387 = vmatpush.bf16.msra.mxu1 %v14745_v1  ;;  %v8250_v1 = vadd.f32 %v8249_v48, %v8237_v41  ;;  %v8392_v17 = vadd.f32 %v17165_v26, %v8380_v5  ;;  %v16292_v26 = vld [vmem:[#allocation7 + $0x14] sm:$0xf0]  ;;  %v14602_v41 = vld [vmem:[#allocation7 + $0xd8] sm:$0xf0]  ;;  %v16298_v20 = vld [vmem:[#allocation7 + $0x4c] sm:$0xf] }
 0x682   : > { %v14505_v51 = vor.u32 %v16292_v26, %v14504_v28  ;;  %v16360_v48 = vld [vmem:[#allocation7 + $0x234] sm:$0xf0]  ;;  %v14605_v6 = vor.u32 %v16314_v45, %v14602_v41  ;;  %v14978_v26 = vld [vmem:[#allocation7 + $0x3d0] sm:$0xf0]  ;;  %v16378_v45 = vld [vmem:[#allocation7 + $0x2cc] sm:$0xf] }
 0x683   : > { %9369 = vmatpush.bf16.msra.mxu0 %v14601_v13  ;;  %9406 = vmatpush.bf16.msra.mxu2 %v14873_v32  ;;  %v8263_v7 = vadd.f32 %v8262_v57, %v8250_v1  ;;  %v14520_v13 = vld [vmem:[#allocation7 + $0x28] sm:$0xf]  ;;  %v16310_v57 = vld [vmem:[#allocation7 + $0xac] sm:$0xf]  ;;  %v14858_v41 = vld [vmem:[#allocation7 + $0x2d8] sm:$0xf0] }
 0x684   : > { %v14808_v32 = vld [vmem:[#allocation7 + $0x268] sm:$0xf] }
 0x685   : > { %9388 = vmatpush.bf16.msra.mxu1 %v14729_v29  ;;  %v8238_v29 = vpop.f32.mrf.mxu1  ;;  %v8384_v23 = vmax.f32 %v8263_v7, 0.0  ;;  %v14777_v7 = vor.u32 %v16360_v48, %v14776_v44 }
 0x686   : > { %v14698_v29 = vld [vmem:[#allocation7 + $0x198] sm:$0xf0] }
 0x687   : > { %9370 = vmatpush.bf16.msra.mxu0 %v14585_v15  ;;  %9407 = vmatpush.bf16.msra.mxu2 %v14857_v46  ;;  %v17338_v31 = vadd.f32 %v8392_v17, %v8384_v23  ;;  %v17340_v62 = vpack.c.bf16 %v8384_v23, %v8380_v5  ;;  %v14521_v15 = vor.u32 %v16296_v56, %v14520_v13  ;;  %v16346_v46 = vld [vmem:[#allocation7 + $0x1cc] sm:$0xf]  ;;  %v14570_v13 = vld [vmem:[#allocation7 + $0x98] sm:$0xf0]  ;;  %v14760_v17 = vld [vmem:[#allocation7 + $0x208] sm:$0xf]  ;;  %v17347_v28 = vpop.f32.mrf.mxu0 }
 0x688   : > { %v16338_v56 = vld [vmem:[#allocation7 + $0x18c] sm:$0xf]  ;;  %v16356_v23 = vld [vmem:[#allocation7 + $0x214] sm:$0xf0] }
 0x689   : > { %9389 = vmatpush.bf16.msra.mxu1 %v14713_v19  ;;  %v14649_v19 = vor.u32 %v16328_v24, %v14648_v27  ;;  %9267 = vmatmul.bf16.gmra.mxu2 %v17340_v62  ;;  %v16302_v24 = vld [vmem:[#allocation7 + $0x6c] sm:$0xf]  ;;  %v14701_v3 = vor.u32 %v16338_v56, %v14698_v29  ;;  %v16397_v56 = vld [vmem:[#allocation7 + $0x364] sm:$0xf]  ;;  %v14930_v29 = vld [vmem:[#allocation7 + $0x370] sm:$0xf0] }
 0x68b   : > { %9371 = vmatpush.bf16.msra.mxu0 %v14569_v22  ;;  %9408 = vmatpush.bf16.msra.mxu2 %v14841_v34  ;;  %v14746_v22 = vld [vmem:[#allocation7 + $0x1f8] sm:$0xf0] }
 0x68c   : > { %v14749_v43 = vor.u32 %v16350_v60, %v14746_v22  ;;  %v14714_v34 = vld [vmem:[#allocation7 + $0x1b8] sm:$0xf0]  ;;  %v14557_v60 = vor.u32 %v16302_v24, %v14554_v12  ;;  %v14877_v22 = vor.u32 %v16382_v50, %v14874_v4  ;;  %v16370_v12 = vld [vmem:[#allocation7 + $0x28c] sm:$0xf] }
 0x68d   : > { %9390 = vmatpush.bf16.msra.mxu1 %v14697_v37  ;;  %v14809_v37 = vor.u32 %v16368_v33, %v14808_v32  ;;  %v14717_v11 = vor.u32 %v16342_v61, %v14714_v34  ;;  %v17349_v40 = vpop.f32.mrf.mxu1  ;;  %v14685_v32 = vor.u32 %v16334_v14, %v14682_v16  ;;  %v14538_v33 = vld [vmem:[#allocation7 + $0x58] sm:$0xf0]  ;;  %v16374_v61 = vld [vmem:[#allocation7 + $0x2ac] sm:$0xf] }
 0x68e   : > { %9305 = vmatmul.bf16.gmra.mxu0 %v17317_v18  ;;  %v14842_v34 = vld [vmem:[#allocation7 + $0x2b8] sm:$0xf0]  ;;  %v16366_v4 = vld [vmem:[#allocation7 + $0x26c] sm:$0xf] }
 0x68f   : > { %9372 = vmatpush.bf16.msra.mxu0 %v14553_v47  ;;  %9409 = vmatpush.bf16.msra.mxu2 %v14825_v54  ;;  %v14730_v47 = vld [vmem:[#allocation7 + $0x1d8] sm:$0xf0]  ;;  %v8277_v44 = vpop.f32.mrf.mxu0 }
 0x690   : > { %9324 = vmatmul.bf16.gmra.mxu1 %v17323_v30  ;;  %v14733_v1 = vor.u32 %v16346_v46, %v14730_v47  ;;  %v14541_v46 = vor.u32 %v16298_v20, %v14538_v33  ;;  %v16294_v47 = vld [vmem:[#allocation7 + $0x2c] sm:$0xf]  ;;  %v14634_v24 = vld [vmem:[#allocation7 + $0x118] sm:$0xf0]  ;;  %v16389_v20 = vld [vmem:[#allocation7 + $0x324] sm:$0xf] }
 0x691   : > { %9391 = vmatpush.bf16.msra.mxu1 %v14681_v38  ;;  %v16413_v38 = vld [vmem:[#allocation7 + $0x3e4] sm:$0xf]  ;;  %v14898_v33 = vld [vmem:[#allocation7 + $0x330] sm:$0xf0] }
 0x692   : > { %v14997_v5 = vor.u32 %v16413_v38, %v14994_v0  ;;  %v14522_v38 = vld [vmem:[#allocation7 + $0x38] sm:$0xf0]  ;;  %v16401_v0 = vld [vmem:[#allocation7 + $0x384] sm:$0xf] }
 0x693   : > { %9373 = vmatpush.bf16.msra.mxu0 %v14537_v10  ;;  %9410 = vmatpush.bf16.msra.mxu2 %v14809_v37  ;;  %v14589_v10 = vor.u32 %v16310_v57, %v14586_v2  ;;  %v14962_v37 = vld [vmem:[#allocation7 + $0x3b0] sm:$0xf0]  ;;  %v14650_v57 = vld [vmem:[#allocation7 + $0x138] sm:$0xf0] }
 0x694   : > { %9349 = vmatpush.bf16.msrb.mxu3 %v14997_v5 }
 0x695   : > { %9392 = vmatpush.bf16.msra.mxu1 %v14665_v21  ;;  %v16306_v21 = vld [vmem:[#allocation7 + $0x8c] sm:$0xf]  ;;  %v8290_v5 = vpop.f32.mrf.mxu1 }
 0x696   : > { %v14573_v27 = vor.u32 %v16306_v21, %v14570_v13  ;;  %v14506_v13 = vld [vmem:[#allocation7 + $0x18] sm:$0xf0]  ;;  %v16354_v5 = vld [vmem:[#allocation7 + $0x20c] sm:$0xf] }
 0x697   : > { %9374 = vmatpush.bf16.msra.mxu0 %v14521_v15  ;;  %9411 = vmatpush.bf16.msra.mxu2 %v14793_v9  ;;  %v14761_v15 = vor.u32 %v16356_v23, %v14760_v17  ;;  %v14861_v9 = vor.u32 %v16378_v45, %v14858_v41  ;;  %v1541_v17 = vperm.slane %v17327_v39, 7 }
 0x699   : > { %9393 = vmatpush.bf16.msra.mxu1 %v14649_v19  ;;  %9338 = vmatmul.bf16.vlgmr.msrb.gmra.mxu2 %v17167_v25  ;;  %v16409_v19 = vld [vmem:[#allocation7 + $0x3c4] sm:$0xf] }
 0x69a   : > { %v14981_v54 = vor.u32 %v16409_v19, %v14978_v26  ;;  %v14826_v19 = vld [vmem:[#allocation7 + $0x298] sm:$0xf0]  ;;  %v16393_v26 = vld [vmem:[#allocation7 + $0x344] sm:$0xf] }
 0x69b   : > { %9375 = vmatpush.bf16.msra.mxu0 %v14505_v51  ;;  %9412 = vmatpush.bf16.msra.mxu2 %v14777_v7  ;;  %v16405_v51 = vld [vmem:[#allocation7 + $0x3a4] sm:$0xf]  ;;  %v14525_v7 = vor.u32 %v16294_v47, %v14522_v38  ;;  %v14829_v16 = vor.u32 %v16370_v12, %v14826_v19  ;;  %v16416_v38 = vld [vmem:[#allocation7 + $0x3f4] sm:$0xf0] }
 0x69c   : > { %9350 = vmatpush.bf16.msrb.mxu3 %v14981_v54  ;;  %v14965_v49 = vor.u32 %v16405_v51, %v14962_v37  ;;  %v14914_v54 = vld [vmem:[#allocation7 + $0x350] sm:$0xf0]  ;;  %v16362_v51 = vld [vmem:[#allocation7 + $0x24c] sm:$0xf]  ;;  %v14794_v37 = vld [vmem:[#allocation7 + $0x258] sm:$0xf0] }
 0x69d   : > { %9394 = vmatpush.bf16.msra.mxu1 %v14633_v52  ;;  %v17351_v52 = vpop.f32.mrf.mxu2  ;;  %v14917_v50 = vor.u32 %v16393_v26, %v14914_v54  ;;  %v14797_v41 = vor.u32 %v16362_v51, %v14794_v37  ;;  %v16414_v37 = vld [vmem:[#allocation7 + $0x3ec] sm:$0xf] }
 0x69e   : > { %9376 = vmatmul.bf16.vlgmr.msra.gmra.mxu0 %v17131_v35 }
 0x69f   : > { %9444 = vmatpush.bf16.msrb.mxu0 %v14621_v8  ;;  %9413 = vmatpush.bf16.msra.mxu2 %v14761_v15  ;;  %v16330_v8 = vld [vmem:[#allocation7 + $0x14c] sm:$0xf]  ;;  %v14933_v15 = vor.u32 %v16397_v56, %v14930_v29 }
 0x6a0   : > { %9395 = vmatmul.bf16.vlgmr.msra.gmra.mxu1 %v17148_v58  ;;  %9351 = vmatpush.bf16.msrb.mxu3 %v14965_v49  ;;  %v14669_v48 = vor.u32 %v16330_v8, %v14666_v53  ;;  %v14901_v8 = vor.u32 %v16389_v20, %v14898_v33  ;;  %v16385_v53 = vld [vmem:[#allocation7 + $0x304] sm:$0xf]  ;;  %v14882_v49 = vld [vmem:[#allocation7 + $0x310] sm:$0xf0]  ;;  %v16392_v20 = vld [vmem:[#allocation7 + $0x334] sm:$0xf0] }
 0x6a1   : > { %9463 = vmatpush.bf16.msrb.mxu1 %v14749_v43  ;;  %v17353_v43 = vpop.f32.mrf.mxu3  ;;  %v16388_v33 = vld [vmem:[#allocation7 + $0x314] sm:$0xf0] }
 0x6a3   : > { %9445 = vmatpush.bf16.msrb.mxu0 %v14605_v6  ;;  %9482 = vmatpush.bf16.msrb.mxu2 %v14877_v22  ;;  %v14946_v6 = vld [vmem:[#allocation7 + $0x390] sm:$0xf0]  ;;  %v8276_v22 = vadd.f32 %v17347_v28, %v1541_v17  ;;  %v16358_v28 = vld [vmem:[#allocation7 + $0x22c] sm:$0xf] }
 0x6a4   : > { %v14949_v2 = vor.u32 %v16401_v0, %v14946_v6 }
 0x6a5   : > { %9464 = vmatpush.bf16.msrb.mxu1 %v14733_v1  ;;  %v16326_v1 = vld [vmem:[#allocation7 + $0x12c] sm:$0xf]  ;;  %v8303_v23 = vpop.f32.mrf.mxu2  ;;  %v8289_v45 = vadd.f32 %v17349_v40, %v8276_v22 }
 0x6a6   : > { %9352 = vmatpush.bf16.msrb.mxu3 %v14949_v2  ;;  %v14653_v21 = vor.u32 %v16326_v1, %v14650_v57  ;;  %v14762_v1 = vld [vmem:[#allocation7 + $0x218] sm:$0xf0] }
 0x6a7   : > { %9446 = vmatpush.bf16.msrb.mxu0 %v14589_v10  ;;  %9483 = vmatpush.bf16.msrb.mxu2 %v14861_v9  ;;  %v16290_v10 = vld [vmem:[#allocation7 + $0xc] sm:$0xf]  ;;  %v8302_v47 = vadd.f32 %v17351_v52, %v8289_v45  ;;  %v14778_v9 = vld [vmem:[#allocation7 + $0x238] sm:$0xf0]  ;;  %v14765_v52 = vor.u32 %v16354_v5, %v14762_v1 }
 0x6a8   : > { %v14509_v14 = vor.u32 %v16290_v10, %v14506_v13  ;;  %v14781_v44 = vor.u32 %v16358_v28, %v14778_v9  ;;  %v16406_v45 = vld [vmem:[#allocation7 + $0x3ac] sm:$0xf]  ;;  %v14954_v28 = vld [vmem:[#allocation7 + $0x398] sm:$0xf0] }
 0x6a9   : > { %9465 = vmatpush.bf16.msrb.mxu1 %v14717_v11  ;;  %v14845_v11 = vor.u32 %v16374_v61, %v14842_v34  ;;  %9343 = vmatmul.bf16.gmra.mxu2 %v17340_v62  ;;  %v8315_v0 = vadd.f32 %v17353_v43, %v8302_v47  ;;  %v14984_v61 = vld [vmem:[#allocation7 + $0x3c8] sm:$0xf]  ;;  %v16412_v34 = vld [vmem:[#allocation7 + $0x3d4] sm:$0xf0]  ;;  %v16402_v47 = vld [vmem:[#allocation7 + $0x38c] sm:$0xf] }
 0x6aa   : > { %9353 = vmatpush.bf16.msrb.mxu3 %v14933_v15  ;;  %v14957_v9 = vor.u32 %v16402_v47, %v14954_v28  ;;  %v14906_v5 = vld [vmem:[#allocation7 + $0x338] sm:$0xf0]  ;;  %v16426_v47 = vld [vmem:[#allocation10 + $0x48] sm:$0xff] }
 0x6ab   : > { %9447 = vmatpush.bf16.msrb.mxu0 %v14573_v27  ;;  %v16322_v27 = vld [vmem:[#allocation7 + $0x10c] sm:$0xf]  ;;  %9484 = vmatpush.bf16.msrb.mxu2 %v14845_v11  ;;  %v16408_v11 = vld [vmem:[#allocation7 + $0x3b4] sm:$0xf0] }
 0x6ac   : > { %v14637_v39 = vor.u32 %v16322_v27, %v14634_v24  ;;  %v14952_v27 = vld [vmem:[#allocation7 + $0x388] sm:$0xf]  ;;  %v16404_v24 = vld [vmem:[#allocation7 + $0x394] sm:$0xf0] }
 0x6ad   : > { %9466 = vmatpush.bf16.msrb.mxu1 %v14701_v3  ;;  %v8316_v3 = vpop.f32.mrf.mxu3  ;;  %v14953_v12 = vor.u32 %v16404_v24, %v14952_v27 }
 0x6ae   : > { %9381 = vmatmul.bf16.gmra.mxu0 %v17317_v18  ;;  %9354 = vmatpush.bf16.msrb.mxu3 %v14917_v50  ;;  %v16396_v50 = vld [vmem:[#allocation7 + $0x354] sm:$0xf0] }
 0x6af   : > { %9448 = vmatpush.bf16.msrb.mxu0 %v14557_v60  ;;  %v14810_v60 = vld [vmem:[#allocation7 + $0x278] sm:$0xf0]  ;;  %9485 = vmatpush.bf16.msrb.mxu2 %v14829_v16  ;;  %v16400_v16 = vld [vmem:[#allocation7 + $0x374] sm:$0xf0] }
 0x6b0   : > { %9400 = vmatmul.bf16.gmra.mxu1 %v17323_v30 }
 0x6b1   : > { %9467 = vmatpush.bf16.msrb.mxu1 %v14685_v32  ;;  %v14813_v32 = vor.u32 %v16366_v4, %v14810_v60  ;;  %v14904_v60 = vld [vmem:[#allocation7 + $0x328] sm:$0xf] }
 0x6b2   : > { %9355 = vmatpush.bf16.msrb.mxu3 %v14901_v8  ;;  %v14905_v22 = vor.u32 %v16392_v20, %v14904_v60  ;;  %v16410_v8 = vld [vmem:[#allocation7 + $0x3cc] sm:$0xf]  ;;  %v16452_v60 = vld [vmem:[#allocation13 + $0x18] sm:$0xff] }
 0x6b3   : > { %9449 = vmatpush.bf16.msrb.mxu0 %v14541_v46  ;;  %9486 = vmatpush.bf16.msrb.mxu2 %v14813_v32  ;;  %v14885_v46 = vor.u32 %v16385_v53, %v14882_v49  ;;  %v14888_v32 = vld [vmem:[#allocation7 + $0x308] sm:$0xf]  ;;  %v14986_v53 = vld [vmem:[#allocation7 + $0x3d8] sm:$0xf0]  ;;  %v17390_v20 = vld [vmem:[#allocation8] sm:$0xf] }
 0x6b4   : > { %v14889_v51 = vor.u32 %v16388_v33, %v14888_v32  ;;  %v14989_v49 = vor.u32 %v16410_v8, %v14986_v53  ;;  %v16451_v32 = vld [vmem:[#allocation13 + $0x10] sm:$0xff]  ;;  %v8568_v33 = vperm.slane %v17390_v20, 0 }
 0x6b5   : > { %9468 = vmatpush.bf16.msrb.mxu1 %v14669_v48  ;;  %v15000_v48 = vld [vmem:[#allocation7 + $0x3e8] sm:$0xf]  ;;  %v16427_v8 = vld [vmem:[#allocation10 + $0x50] sm:$0xff] }
 0x6b6   : > { %9356 = vmatpush.bf16.msrb.mxu3 %v14885_v46  ;;  %v15001_v40 = vor.u32 %v16416_v38, %v15000_v48  ;;  %v14938_v48 = vld [vmem:[#allocation7 + $0x378] sm:$0xf0] }
 0x6b7   : > { %9450 = vmatpush.bf16.msrb.mxu0 %v14525_v7  ;;  %9487 = vmatpush.bf16.msrb.mxu2 %v14797_v41  ;;  %v14985_v7 = vor.u32 %v16412_v34, %v14984_v61  ;;  %v14970_v41 = vld [vmem:[#allocation7 + $0x3b8] sm:$0xf0]  ;;  %v16423_v34 = vld [vmem:[#allocation10 + $0x30] sm:$0xff] }
 0x6b8   : > { %v14973_v46 = vor.u32 %v16406_v45, %v14970_v41  ;;  %v16424_v61 = vld [vmem:[#allocation10 + $0x38] sm:$0xff] }
 0x6b9   : > { %9469 = vmatpush.bf16.msrb.mxu1 %v14653_v21  ;;  %9414 = vmatmul.bf16.vlgmr.msra.gmra.mxu2 %v17167_v25  ;;  %v8381_v21 = vmax.f32 %v17244_v36, 0.0  ;;  %v14936_v36 = vld [vmem:[#allocation7 + $0x368] sm:$0xf] }
 0x6ba   : > { %9425 = vmatpush.bf16.msra.mxu3 %v15001_v40 }
 0x6bb   : > { %9451 = vmatpush.bf16.msrb.mxu0 %v14509_v14  ;;  %v8327_v6 = vpop.f32.mrf.mxu0  ;;  %9488 = vmatpush.bf16.msrb.mxu2 %v14781_v44  ;;  %v8393_v15 = vadd.f32 %v17182_v55, %v8381_v21  ;;  %v14920_v55 = vld [vmem:[#allocation7 + $0x348] sm:$0xf]  ;;  %v16398_v44 = vld [vmem:[#allocation7 + $0x36c] sm:$0xf] }
 0x6bc   : > { %v8328_v2 = vadd.f32 %v8327_v6, %v8315_v0  ;;  %v14921_v4 = vor.u32 %v16396_v50, %v14920_v55  ;;  %v14941_v38 = vor.u32 %v16398_v44, %v14938_v48  ;;  %v16394_v0 = vld [vmem:[#allocation7 + $0x34c] sm:$0xf]  ;;  %v14922_v6 = vld [vmem:[#allocation7 + $0x358] sm:$0xf0] }
 0x6bd   : > { %9470 = vmatpush.bf16.msrb.mxu1 %v14637_v39  ;;  %v8340_v57 = vpop.f32.mrf.mxu1  ;;  %v14937_v39 = vor.u32 %v16400_v16, %v14936_v36  ;;  %v14925_v40 = vor.u32 %v16394_v0, %v14922_v6  ;;  %v16454_v36 = vld [vmem:[#allocation13 + $0x28] sm:$0xff]  ;;  %v16449_v44 = vld [vmem:[#allocation13] sm:$0xff] }
 0x6be   : > { %9452 = vmatmul.bf16.vlgmr.msrb.gmra.mxu0 %v17131_v35  ;;  %v8341_v43 = vadd.f32 %v8340_v57, %v8328_v2  ;;  %9426 = vmatpush.bf16.msra.mxu3 %v14985_v7  ;;  %v14968_v35 = vld [vmem:[#allocation7 + $0x3a8] sm:$0xf]  ;;  %v16386_v57 = vld [vmem:[#allocation7 + $0x30c] sm:$0xf] }
 0x6bf   : > { %9489 = vmatpush.bf16.msrb.mxu2 %v14765_v52  ;;  %v14890_v52 = vld [vmem:[#allocation7 + $0x318] sm:$0xf0]  ;;  %9813 = vmatpush.bf16.msra.mxu0 %v16424_v61 }
 0x6c0   : > { %9471 = vmatmul.bf16.vlgmr.msrb.gmra.mxu1 %v17148_v58  ;;  %v14969_v58 = vor.u32 %v16408_v11, %v14968_v35  ;;  %v14893_v2 = vor.u32 %v16386_v57, %v14890_v52  ;;  %v16464_v52 = vld [vmem:[#allocation13 + $0x78] sm:$0xff] }
 0x6c2   : > { %9427 = vmatpush.bf16.msra.mxu3 %v14969_v58 }
 0x6c3   : > { %v8329_v29 = vpop.f32.mrf.mxu0  ;;  %9814 = vmatpush.bf16.msra.mxu0 %v16423_v34 }
 0x6c5   : > { %v8353_v10 = vpop.f32.mrf.mxu2  ;;  %v8342_v17 = vpop.f32.mrf.mxu1 }
 0x6c6   : > { %v8354_v13 = vadd.f32 %v8353_v10, %v8341_v43  ;;  %9428 = vmatpush.bf16.msra.mxu3 %v14953_v12  ;;  %v16422_v43 = vld [vmem:[#allocation10 + $0x28] sm:$0xff]  ;;  %v16421_v10 = vld [vmem:[#allocation10 + $0x20] sm:$0xff] }
 0x6c7   : > { %v8366_v56 = vpop.f32.mrf.mxu3  ;;  %9815 = vmatpush.bf16.msra.mxu0 %v16422_v43  ;;  %v16418_v17 = vld [vmem:[#allocation10 + $0x8] sm:$0xff] }
 0x6c8   : > { %v8367_v23 = vadd.f32 %v8366_v56, %v8354_v13  ;;  %v16419_v13 = vld [vmem:[#allocation10 + $0x10] sm:$0xff] }
 0x6c9   : > { %9419 = vmatmul.bf16.gmra.mxu2 %v17340_v62 }
 0x6ca   : > { %v8385_v3 = vmax.f32 %v8367_v23, 0.0  ;;  %9429 = vmatpush.bf16.msra.mxu3 %v14937_v39  ;;  %v16417_v23 = vld [vmem:[#allocation10] sm:$0xff]  ;;  %v16430_v39 = vld [vmem:[#allocation10 + $0x68] sm:$0xff] }
 0x6cb   : > { %9816 = vmatpush.bf16.msra.mxu0 %v16421_v10  ;;  %v16463_v10 = vld [vmem:[#allocation13 + $0x70] sm:$0xff] }
 0x6cc   : > { %v17368_v19 = vadd.f32 %v8393_v15, %v8385_v3  ;;  %v17370_v26 = vpack.c.bf16 %v8385_v3, %v8381_v21  ;;  %v16420_v21 = vld [vmem:[#allocation10 + $0x18] sm:$0xff] }
 0x6cd   : > { %v8355_v14 = vpop.f32.mrf.mxu2  ;;  %v16432_v15 = vld [vmem:[#allocation10 + $0x78] sm:$0xff] }
 0x6ce   : > { %9286 = vmatmul.bf16.gmra.mxu3 %v17370_v26  ;;  %9457 = vmatmul.bf16.gmra.mxu0 %v17317_v18  ;;  %v15002_v18 = vld [vmem:[#allocation7 + $0x3f8] sm:$0xf0]  ;;  %v16431_v14 = vld [vmem:[#allocation10 + $0x70] sm:$0xff] }
 0x6cf   : > { %v8368_v54 = vpop.f32.mrf.mxu3  ;;  %9430 = vmatpush.bf16.msra.mxu3 %v14921_v4  ;;  %9817 = vmatpush.bf16.msra.mxu0 %v16420_v21  ;;  %v16455_v3 = vld [vmem:[#allocation13 + $0x30] sm:$0xff]  ;;  %v16429_v4 = vld [vmem:[#allocation10 + $0x60] sm:$0xff] }
 0x6d0   : > { %9476 = vmatmul.bf16.gmra.mxu1 %v17323_v30  ;;  %v15005_v30 = vor.u32 %v16414_v37, %v15002_v18 }
 0x6d1   : > { %9826 = vmatpush.bf16.msra.mxu1 %v16432_v15  ;;  %v16438_v15 = vld [vmem:[#allocation10 + $0xa8] sm:$0xff] }
 0x6d3   : > { %9431 = vmatpush.bf16.msra.mxu3 %v14905_v22  ;;  %9818 = vmatpush.bf16.msra.mxu0 %v16419_v13  ;;  %v16428_v22 = vld [vmem:[#allocation10 + $0x58] sm:$0xff] }
 0x6d5   : > { %9827 = vmatpush.bf16.msra.mxu1 %v16431_v14 }
 0x6d7   : > { %9432 = vmatpush.bf16.msra.mxu3 %v14889_v51  ;;  %9819 = vmatpush.bf16.msra.mxu0 %v16418_v17 }
 0x6d9   : > { %9490 = vmatmul.bf16.vlgmr.msrb.gmra.mxu2 %v17167_v25  ;;  %v16390_v25 = vld [vmem:[#allocation7 + $0x32c] sm:$0xf]  ;;  %9828 = vmatpush.bf16.msra.mxu1 %v16430_v39  ;;  %v16460_v39 = vld [vmem:[#allocation13 + $0x58] sm:$0xff] }
 0x6da   : > { %v14909_v1 = vor.u32 %v16390_v25, %v14906_v5  ;;  %v16425_v25 = vld [vmem:[#allocation10 + $0x40] sm:$0xff] }
 0x6db   : > { %v9225_v7 = vpop.f32.mrf.mxu0  ;;  %9820 = vmatpush.bf16.msra.mxu0 %v16417_v23  ;;  %v16462_v23 = vld [vmem:[#allocation13 + $0x68] sm:$0xff] }
 0x6dc   : > { %v9226_v53 = vadd.f32 %v9225_v7, %v8568_v33  ;;  %v16440_v7 = vld [vmem:[#allocation10 + $0xb8] sm:$0xff] }
 0x6dd   : > { %9829 = vmatpush.bf16.msra.mxu1 %v16429_v4  ;;  %9839 = vmatpush.bf16.msra.mxu2 %v16440_v7  ;;  %v16459_v4 = vld [vmem:[#allocation13 + $0x50] sm:$0xff] }
 0x6de   : > { %9357 = vmatmul.bf16.vlgmr.msrb.gmra.mxu3 %v17184_v59  ;;  %v16471_v7 = vld [vmem:[#allocation13 + $0xb0] sm:$0xff] }
 0x6df   : > { %9501 = vmatpush.bf16.msrb.mxu3 %v15005_v30 }
 0x6e1   : > { %9830 = vmatpush.bf16.msra.mxu1 %v16428_v22  ;;  %v8569_v22 = vperm.slane %v17390_v20, 1 }
 0x6e3   : > { %9502 = vmatpush.bf16.msrb.mxu3 %v14989_v49  ;;  %v9227_v11 = vpop.f32.mrf.mxu0  ;;  %v16450_v49 = vld [vmem:[#allocation13 + $0x8] sm:$0xff] }
 0x6e4   : > { %v9228_v18 = vadd.f32 %v9227_v11, %v8568_v33 }
 0x6e5   : > { %v17385_v35 = vpop.f32.mrf.mxu2  ;;  %9831 = vmatpush.bf16.msra.mxu1 %v16427_v8  ;;  %v16458_v8 = vld [vmem:[#allocation13 + $0x48] sm:$0xff] }
 0x6e7   : > { %9503 = vmatpush.bf16.msrb.mxu3 %v14973_v46  ;;  %v9282_v55 = vpop.f32.mrf.mxu3 }
 0x6e9   : > { %9495 = vmatmul.bf16.gmra.mxu2 %v17340_v62  ;;  %v17382_v62 = vpop.f32.mrf.mxu1  ;;  %9832 = vmatpush.bf16.msra.mxu1 %v16426_v47 }
 0x6ea   : > { %v9245_v28 = vadd.f32 %v17382_v62, %v9226_v53 }
 0x6eb   : > { %9504 = vmatpush.bf16.msrb.mxu3 %v14957_v9  ;;  %v9230_v58 = vpop.f32.mrf.mxu0 }
 0x6ec   : > { %v9231_v46 = vadd.f32 %v9230_v58, %v8568_v33  ;;  %v9264_v48 = vadd.f32 %v17385_v35, %v9245_v28  ;;  %v16457_v28 = vld [vmem:[#allocation13 + $0x40] sm:$0xff] }
 0x6ed   : > { %v9265_v29 = vpop.f32.mrf.mxu2  ;;  %9833 = vmatpush.bf16.msra.mxu1 %v16425_v25 }
 0x6ee   : > { %9362 = vmatmul.bf16.gmra.mxu3 %v17370_v26 }
 0x6ef   : > { %9505 = vmatpush.bf16.msrb.mxu3 %v14941_v38  ;;  %v9284_v30 = vpop.f32.mrf.mxu3 }
 0x6f1   : > { %v9246_v56 = vpop.f32.mrf.mxu1  ;;  %10144 = vmatpush.bf16.msrb.mxu1 %v16464_v52 }
 0x6f2   : > { %v9247_v41 = vadd.f32 %v9246_v56, %v9228_v18  ;;  %v16439_v56 = vld [vmem:[#allocation10 + $0xb0] sm:$0xff] }
 0x6f3   : > { %9506 = vmatpush.bf16.msrb.mxu3 %v14925_v40  ;;  %v9232_v12 = vpop.f32.mrf.mxu0  ;;  %9840 = vmatpush.bf16.msra.mxu2 %v16439_v56  ;;  %v16435_v18 = vld [vmem:[#allocation10 + $0x90] sm:$0xff] }
 0x6f4   : > { %v9266_v9 = vadd.f32 %v9265_v29, %v9247_v41  ;;  %v16434_v41 = vld [vmem:[#allocation10 + $0x88] sm:$0xff] }
 0x6f5   : > { %10145 = vmatpush.bf16.msrb.mxu1 %v16463_v10  ;;  %v16470_v56 = vld [vmem:[#allocation13 + $0xa8] sm:$0xff] }
 0x6f6   : > { %v9285_v5 = vadd.f32 %v9284_v30, %v9266_v9 }
 0x6f7   : > { %9507 = vmatpush.bf16.msrb.mxu3 %v14909_v1  ;;  %v9233_v1 = vadd.f32 %v9232_v12, %v8568_v33  ;;  %v16461_v12 = vld [vmem:[#allocation13 + $0x60] sm:$0xff]  ;;  %9841 = vmatpush.bf16.msra.mxu2 %v16438_v15 }
 0x6f8   : > { %v9524_v43 = vmax.f32 %v9285_v5, 0.0 }
 0x6f9   : > { %v9249_v27 = vpop.f32.mrf.mxu1  ;;  %10146 = vmatpush.bf16.msrb.mxu1 %v16462_v23  ;;  %v16446_v23 = vld [vmem:[#allocation10 + $0xe8] sm:$0xff] }
 0x6fa   : > { %v9250_v38 = vadd.f32 %v9249_v27, %v9231_v46 }
 0x6fb   : > { %9508 = vmatpush.bf16.msrb.mxu3 %v14893_v2  ;;  %v17388_v50 = vpop.f32.mrf.mxu0  ;;  %v9283_v2 = vadd.f32 %v9282_v55, %v9264_v48  ;;  %v16436_v55 = vld [vmem:[#allocation10 + $0x98] sm:$0xff] }
 0x6fc   : > { %v9302_v53 = vadd.f32 %v17388_v50, %v8569_v22 }
 0x6fd   : > { %v9520_v35 = vmax.f32 %v9283_v2, 0.0  ;;  %10147 = vmatpush.bf16.msrb.mxu1 %v16461_v12 }
 0x6fe   : > { %9433 = vmatmul.bf16.vlgmr.msra.gmra.mxu3 %v17184_v59 }
 0x6ff   : > { %v9536_v29 = vadd.f32 %v9524_v43, %v9520_v35 }
 0x701   : > { %v9251_v16 = vpop.f32.mrf.mxu1  ;;  %10148 = vmatpush.bf16.msrb.mxu1 %v16460_v39 }
 0x702   : > { %v9252_v62 = vadd.f32 %v9251_v16, %v9233_v1 }
 0x703   : > { %v17397_v45 = vpop.f32.mrf.mxu0 }
 0x704   : > { %v9304_v30 = vadd.f32 %v17397_v45, %v8569_v22 }
 0x705   : > { %10149 = vmatpush.bf16.msrb.mxu1 %v16459_v4  ;;  %v16443_v4 = vld [vmem:[#allocation10 + $0xd0] sm:$0xff] }
 0x709   : > { %v17393_v51 = vpop.f32.mrf.mxu1  ;;  %10150 = vmatpush.bf16.msrb.mxu1 %v16458_v8 }
 0x70a   : > { %v9321_v45 = vadd.f32 %v17393_v51, %v9302_v53  ;;  %v16442_v53 = vld [vmem:[#allocation10 + $0xc8] sm:$0xff] }
 0x70b   : > { %v9306_v34 = vpop.f32.mrf.mxu0 }
 0x70c   : > { %v9268_v24 = vpop.f32.mrf.mxu2 }
 0x70d   : > { %v9269_v57 = vadd.f32 %v9268_v24, %v9250_v38  ;;  %10151 = vmatpush.bf16.msrb.mxu1 %v16457_v28 }
 0x70e   : > { %9438 = vmatmul.bf16.gmra.mxu3 %v17370_v26 }
 0x711   : > { %v17401_v0 = vpop.f32.mrf.mxu1 }
 0x712   : > { %v9323_v46 = vadd.f32 %v17401_v0, %v9304_v30 }
 0x713   : > { %v9308_v14 = vpop.f32.mrf.mxu0 }
 0x714   : > { %v9270_v54 = vpop.f32.mrf.mxu2  ;;  %v9309_v25 = vadd.f32 %v9308_v14, %v8569_v22  ;;  %v16468_v14 = vld [vmem:[#allocation13 + $0x98] sm:$0xff] }
 0x715   : > { %v9271_v11 = vadd.f32 %v9270_v54, %v9252_v62  ;;  %v16437_v54 = vld [vmem:[#allocation10 + $0xa0] sm:$0xff] }
 0x716   : > { %9842 = vmatpush.bf16.msra.mxu2 %v16437_v54  ;;  %v16467_v54 = vld [vmem:[#allocation13 + $0x90] sm:$0xff] }
 0x719   : > { %v9325_v58 = vpop.f32.mrf.mxu1 }
 0x71a   : > { %9843 = vmatpush.bf16.msra.mxu2 %v16436_v55 }
 0x71c   : > { %v17395_v37 = vpop.f32.mrf.mxu2 }
 0x71d   : > { %v9340_v0 = vadd.f32 %v17395_v37, %v9321_v45 }
 0x71e   : > { %9509 = vmatmul.bf16.vlgmr.msrb.gmra.mxu3 %v17184_v59  ;;  %v16456_v59 = vld [vmem:[#allocation13 + $0x38] sm:$0xff]  ;;  %9844 = vmatpush.bf16.msra.mxu2 %v16435_v18 }
 0x71f   : > { %10131 = vmatpush.bf16.msrb.mxu0 %v16456_v59 }
 0x722   : > { %9845 = vmatpush.bf16.msra.mxu2 %v16434_v41  ;;  %v16465_v41 = vld [vmem:[#allocation13 + $0x80] sm:$0xff] }
 0x723   : > { %10132 = vmatpush.bf16.msrb.mxu0 %v16455_v3 }
 0x724   : > { %v17403_v6 = vpop.f32.mrf.mxu2 }
 0x725   : > { %v9342_v38 = vadd.f32 %v17403_v6, %v9323_v46  ;;  %v9867_v46 = vpack.c.bf16 %v17301_v42, %v17301_v42 }
 0x727   : > { %10133 = vmatpush.bf16.msrb.mxu0 %v16454_v36 }
 0x72c   : > { %v9344_v27 = vpop.f32.mrf.mxu2 }
 0x72e   : > { %9514 = vmatmul.bf16.gmra.mxu3 %v17370_v26  ;;  %v16453_v26 = vld [vmem:[#allocation13 + $0x20] sm:$0xff] }
 0x72f   : > { %10134 = vmatpush.bf16.msrb.mxu0 %v16453_v26  ;;  %v9327_v26 = vpop.f32.mrf.mxu1 }
 0x730   : > { %v9328_v51 = vadd.f32 %v9327_v26, %v9309_v25  ;;  %v8570_v26 = vperm.slane %v17390_v20, 2 }
 0x733   : > { %10135 = vmatpush.bf16.msrb.mxu0 %v16452_v60 }
 0x734   : > { %v9346_v60 = vpop.f32.mrf.mxu2 }
 0x735   : > { %v9347_v43 = vadd.f32 %v9346_v60, %v9328_v51 }
 0x737   : > { %10136 = vmatpush.bf16.msrb.mxu0 %v16451_v32  ;;  %v17406_v32 = vpop.f32.mrf.mxu0  ;;  %v17411_v47 = vpop.f32.mrf.mxu1 }
 0x73b   : > { %10137 = vmatpush.bf16.msrb.mxu0 %v16450_v49  ;;  %v9307_v49 = vadd.f32 %v9306_v34, %v8569_v22  ;;  %v16466_v22 = vld [vmem:[#allocation13 + $0x88] sm:$0xff] }
 0x73c   : > { %v17413_v9 = vpop.f32.mrf.mxu2 }
 0x73d   : > { %v9326_v48 = vadd.f32 %v9325_v58, %v9307_v49 }
 0x73f   : > { %10138 = vmatpush.bf16.msrb.mxu0 %v16449_v44  ;;  %v9866_v44 = vpack.c.bf16 %v17269_v63, %v17269_v63  ;;  %v9345_v5 = vadd.f32 %v9344_v27, %v9326_v48  ;;  %v9379_v52 = vpop.f32.mrf.mxu0  ;;  %v16448_v63 = vld [vmem:[#allocation10 + $0xf8] sm:$0xff]  ;;  %v9398_v6 = vpop.f32.mrf.mxu1 }
 0x740   : > { %9852 = vmatpush.bf16.msra.mxu3 %v16448_v63  ;;  %v9380_v60 = vadd.f32 %v9379_v52, %v8570_v26 }
 0x742   : > { %v9399_v49 = vadd.f32 %v9398_v6, %v9380_v60 }
 0x744   : > { %v9417_v37 = vpop.f32.mrf.mxu2 }
 0x745   : > { %v9418_v45 = vadd.f32 %v9417_v37, %v9399_v49 }
 0x747   : > { %v9401_v12 = vpop.f32.mrf.mxu1 }
 0x74f   : > { %v9403_v30 = vpop.f32.mrf.mxu1 }
 0x751   : > { %v9287_v40 = vpop.f32.mrf.mxu3 }
 0x752   : > { %v9288_v61 = vadd.f32 %v9287_v40, %v9269_v57  ;;  %v16433_v40 = vld [vmem:[#allocation10 + $0x80] sm:$0xff] }
 0x753   : > { %v16472_v57 = vld [vmem:[#allocation13 + $0xb8] sm:$0xff]  ;;  %9846 = vmatpush.bf16.msra.mxu2 %v16433_v40 }
 0x754   : > { %v9528_v21 = vmax.f32 %v9288_v61, 0.0 }
 0x756   : > { %v9540_v59 = vadd.f32 %v9536_v29, %v9528_v21 }
 0x757   : > { %10157 = vmatpush.bf16.msrb.mxu2 %v16472_v57  ;;  %v9472_v52 = vpop.f32.mrf.mxu1 }
 0x759   : > { %v9289_v13 = vpop.f32.mrf.mxu3 }
 0x75a   : > { %v9290_v17 = vadd.f32 %v9289_v13, %v9271_v11  ;;  %v16447_v11 = vld [vmem:[#allocation10 + $0xf0] sm:$0xff] }
 0x75b   : > { %10158 = vmatpush.bf16.msrb.mxu2 %v16471_v7  ;;  %9853 = vmatpush.bf16.msra.mxu3 %v16447_v11  ;;  %v16477_v11 = vld [vmem:[#allocation13 + $0xe0] sm:$0xff] }
 0x75c   : > { %v9532_v24 = vmax.f32 %v9290_v17, 0.0  ;;  %v9382_v17 = vpop.f32.mrf.mxu0 }
 0x75d   : > { %v9383_v18 = vadd.f32 %v9382_v17, %v8570_v26  ;;  %v16475_v17 = vld [vmem:[#allocation13 + $0xd0] sm:$0xff] }
 0x75e   : > { %v9544_v3 = vadd.f32 %v9540_v59, %v9532_v24  ;;  %v16469_v59 = vld [vmem:[#allocation13 + $0xa0] sm:$0xff] }
 0x75f   : > { %10159 = vmatpush.bf16.msrb.mxu2 %v16470_v56  ;;  %9854 = vmatpush.bf16.msra.mxu3 %v16446_v23 }
 0x760   : > { %v9548_v36 = vpack.c.bf16 %v9544_v3, %v9544_v3  ;;  %v16445_v3 = vld [vmem:[#allocation10 + $0xe0] sm:$0xff] }
 0x761   : > { %v9358_v16 = vpop.f32.mrf.mxu3 }
 0x762   : > { %9821 = vmatmul.bf16.vlgmr.msra.gmra.mxu0 %v9548_v36  ;;  %v9359_v2 = vadd.f32 %v9358_v16, %v9340_v0  ;;  %v9420_v36 = vpop.f32.mrf.mxu2  ;;  %v16444_v16 = vld [vmem:[#allocation10 + $0xd8] sm:$0xff] }
 0x763   : > { %10160 = vmatpush.bf16.msrb.mxu2 %v16469_v59  ;;  %9855 = vmatpush.bf16.msra.mxu3 %v16445_v3  ;;  %v16474_v59 = vld [vmem:[#allocation13 + $0xc8] sm:$0xff] }
 0x764   : > { %v9521_v62 = vmax.f32 %v9359_v2, 0.0  ;;  %v9384_v39 = vpop.f32.mrf.mxu0  ;;  %v16479_v2 = vld [vmem:[#allocation13 + $0xf0] sm:$0xff] }
 0x767   : > { %10161 = vmatpush.bf16.msrb.mxu2 %v16468_v14  ;;  %9856 = vmatpush.bf16.msra.mxu3 %v16444_v16  ;;  %v16473_v16 = vld [vmem:[#allocation13 + $0xc0] sm:$0xff] }
 0x769   : > { %v9360_v33 = vpop.f32.mrf.mxu3 }
 0x76a   : > { %v9361_v1 = vadd.f32 %v9360_v33, %v9342_v38  ;;  %v9378_v33 = vadd.f32 %v17406_v32, %v8570_v26  ;;  %v9422_v8 = vpop.f32.mrf.mxu2  ;;  %v9385_v32 = vadd.f32 %v9384_v39, %v8570_v26  ;;  %v9868_v26 = vpack.c.bf16 %v17338_v31, %v17338_v31 }
 0x76b   : > { %10162 = vmatpush.bf16.msrb.mxu2 %v16467_v54  ;;  %9857 = vmatpush.bf16.msra.mxu3 %v16443_v4 }
 0x76c   : > { %v9525_v34 = vmax.f32 %v9361_v1, 0.0  ;;  %v9397_v28 = vadd.f32 %v17411_v47, %v9378_v33  ;;  %v9453_v48 = vpop.f32.mrf.mxu0  ;;  %v9404_v42 = vadd.f32 %v9403_v30, %v9385_v32 }
 0x76e   : > { %v9537_v21 = vadd.f32 %v9525_v34, %v9521_v62  ;;  %v9416_v40 = vadd.f32 %v17413_v9, %v9397_v28  ;;  %v9423_v63 = vadd.f32 %v9422_v8, %v9404_v42 }
 0x76f   : > { %10163 = vmatpush.bf16.msrb.mxu2 %v16466_v22  ;;  %9858 = vmatpush.bf16.msra.mxu3 %v16442_v53 }
 0x771   : > { %v9363_v50 = vpop.f32.mrf.mxu3 }
 0x772   : > { %10139 = vmatmul.bf16.vlgmr.msrb.gmra.mxu0 %v9866_v44  ;;  %v9364_v61 = vadd.f32 %v9363_v50, %v9345_v5  ;;  %v9402_v44 = vadd.f32 %v9401_v12, %v9383_v18  ;;  %v16441_v50 = vld [vmem:[#allocation10 + $0xc0] sm:$0xff] }
 0x773   : > { %10164 = vmatpush.bf16.msrb.mxu2 %v16465_v41  ;;  %v16480_v5 = vld [vmem:[#allocation13 + $0xf8] sm:$0xff]  ;;  %9859 = vmatpush.bf16.msra.mxu3 %v16441_v50 }
 0x774   : > { %v9529_v10 = vmax.f32 %v9364_v61, 0.0  ;;  %v9421_v25 = vadd.f32 %v9420_v36, %v9402_v44  ;;  %v9491_v61 = vpop.f32.mrf.mxu2  ;;  %v9455_v62 = vpop.f32.mrf.mxu0 }
 0x776   : > { %v9541_v29 = vadd.f32 %v9537_v21, %v9529_v10  ;;  %v9474_v21 = vpop.f32.mrf.mxu1 }
 0x777   : > { %10170 = vmatpush.bf16.msrb.mxu3 %v16480_v5  ;;  %v9869_v5 = vpack.c.bf16 %v17368_v19, %v17368_v19 }
 0x779   : > { %v9365_v35 = vpop.f32.mrf.mxu3 }
 0x77a   : > { %v9366_v13 = vadd.f32 %v9365_v35, %v9347_v43  ;;  %v16478_v43 = vld [vmem:[#allocation13 + $0xe8] sm:$0xff] }
 0x77b   : > { %10171 = vmatpush.bf16.msrb.mxu3 %v16479_v2 }
 0x77c   : > { %v9533_v58 = vmax.f32 %v9366_v13, 0.0  ;;  %v9493_v56 = vpop.f32.mrf.mxu2  ;;  %v9458_v23 = vpop.f32.mrf.mxu0 }
 0x77e   : > { %v9545_v27 = vadd.f32 %v9541_v29, %v9533_v58  ;;  %v16476_v58 = vld [vmem:[#allocation13 + $0xd8] sm:$0xff]  ;;  %v9477_v3 = vpop.f32.mrf.mxu1 }
 0x77f   : > { %10172 = vmatpush.bf16.msrb.mxu3 %v16478_v43 }
 0x780   : > { %v9549_v24 = vpack.c.bf16 %v9545_v27, %v9545_v27  ;;  %v8571_v27 = vperm.slane %v17390_v20, 3 }
 0x781   : > { %v9434_v15 = vpop.f32.mrf.mxu3 }
 0x782   : > { %9834 = vmatmul.bf16.vlgmr.msra.gmra.mxu1 %v9549_v24  ;;  %v9435_v1 = vadd.f32 %v9434_v15, %v9416_v40  ;;  %v9456_v15 = vadd.f32 %v9455_v62, %v8571_v27  ;;  %v9454_v14 = vadd.f32 %v9453_v48, %v8571_v27  ;;  %v9459_v36 = vadd.f32 %v9458_v23, %v8571_v27 }
 0x783   : > { %10173 = vmatpush.bf16.msrb.mxu3 %v16477_v11  ;;  %v10183_v23 = vlaneseq }
 0x784   : > { %v9522_v51 = vmax.f32 %v9435_v1, 0.0  ;;  %v9496_v12 = vpop.f32.mrf.mxu2  ;;  %v9475_v54 = vadd.f32 %v9474_v21, %v9456_v15  ;;  %v9460_v39 = vpop.f32.mrf.mxu0  ;;  %v9478_v4 = vadd.f32 %v9477_v3, %v9459_v36 }
 0x785   : > { %v9461_v22 = vadd.f32 %v9460_v39, %v8571_v27  ;;  %v10184_v27 = vand.u32 127, %v10183_v23 }
 0x786   : > { %v9494_v60 = vadd.f32 %v9493_v56, %v9475_v54  ;;  %v9497_v18 = vadd.f32 %v9496_v12, %v9478_v4  ;;  %v9479_v49 = vpop.f32.mrf.mxu1 }
 0x787   : > { %10174 = vmatpush.bf16.msrb.mxu3 %v16476_v58  ;;  %vm10185_vm0 = vcmp.lt.s32.totalorder %v10184_v27, 16 }
 0x789   : > { %v9436_v55 = vpop.f32.mrf.mxu3 }
 0x78a   : > { %v9437_v0 = vadd.f32 %v9436_v55, %v9418_v45  ;;  %v9473_v55 = vadd.f32 %v9472_v52, %v9454_v14  ;;  %v9616_v52 = vld [vmem:[#allocation11] sm:$0x1] }
 0x78b   : > { %10175 = vmatpush.bf16.msrb.mxu3 %v16475_v17 }
 0x78c   : > { %v9526_v47 = vmax.f32 %v9437_v0, 0.0  ;;  %v9492_v33 = vadd.f32 %v9491_v61, %v9473_v55  ;;  %v9498_v41 = vpop.f32.mrf.mxu2 }
 0x78e   : > { %v9538_v6 = vadd.f32 %v9526_v47, %v9522_v51  ;;  %v9617_v47 = vmul.f32 4.0, %v9616_v52 }
 0x78f   : > { %10176 = vmatpush.bf16.msrb.mxu3 %v16474_v59 }
 0x790   : > { %v9619_v61 = vperm.slane %v9617_v47, 0 }
 0x791   : > { %v9439_v38 = vpop.f32.mrf.mxu3 }
 0x792   : > { %10152 = vmatmul.bf16.vlgmr.msrb.gmra.mxu1 %v9867_v46  ;;  %v9440_v57 = vadd.f32 %v9439_v38, %v9421_v25  ;;  %v9480_v46 = vadd.f32 %v9479_v49, %v9461_v22 }
 0x793   : > { %10177 = vmatpush.bf16.msrb.mxu3 %v16473_v16 }
 0x794   : > { %v9530_v34 = vmax.f32 %v9440_v57, 0.0  ;;  %v9499_v44 = vadd.f32 %v9498_v41, %v9480_v46 }
 0x796   : > { %v9542_v10 = vadd.f32 %v9538_v6, %v9530_v34 }
 0x799   : > { %v9441_v7 = vpop.f32.mrf.mxu3 }
 0x79a   : > { %v9442_v9 = vadd.f32 %v9441_v7, %v9423_v63  ;;  %v9934_v7 = vld [vmem:[#allocation14] sm:$0x1] }
 0x79b   : > { %v9935_v6 = vmul.f32 4.0, %v9934_v7 }
 0x79c   : > { %v9534_v37 = vmax.f32 %v9442_v9, 0.0 }
 0x79d   : > { %v9937_v43 = vperm.slane %v9935_v6, 0 }
 0x79e   : > { %v9546_v35 = vadd.f32 %v9542_v10, %v9534_v37 }
 0x7a0   : > { %v9550_v13 = vpack.c.bf16 %v9546_v35, %v9546_v35 }
 0x7a1   : > { %v9510_v29 = vpop.f32.mrf.mxu3 }
 0x7a2   : > { %9847 = vmatmul.bf16.vlgmr.msra.gmra.mxu2 %v9550_v13  ;;  %v9511_v8 = vadd.f32 %v9510_v29, %v9492_v33 }
 0x7a4   : > { %v9523_v45 = vmax.f32 %v9511_v8, 0.0 }
 0x7a9   : > { %v9512_v24 = vpop.f32.mrf.mxu3 }
 0x7aa   : > { %v9513_v30 = vadd.f32 %v9512_v24, %v9494_v60 }
 0x7ac   : > { %v9527_v28 = vmax.f32 %v9513_v30, 0.0 }
 0x7ae   : > { %v9539_v38 = vadd.f32 %v9527_v28, %v9523_v45 }
 0x7b1   : > { %v9515_v20 = vpop.f32.mrf.mxu3 }
 0x7b2   : > { %10165 = vmatmul.bf16.vlgmr.msrb.gmra.mxu2 %v9868_v26  ;;  %v9516_v53 = vadd.f32 %v9515_v20, %v9497_v18 }
 0x7b4   : > { %v9531_v48 = vmax.f32 %v9516_v53, 0.0 }
 0x7b6   : > { %v9543_v32 = vadd.f32 %v9539_v38, %v9531_v48 }
 0x7b9   : > { %v9517_v31 = vpop.f32.mrf.mxu3 }
 0x7ba   : > { %v9518_v50 = vadd.f32 %v9517_v31, %v9499_v44 }
 0x7bc   : > { %v9535_v40 = vmax.f32 %v9518_v50, 0.0 }
 0x7be   : > { %v9547_v25 = vadd.f32 %v9543_v32, %v9535_v40 }
 0x7c0   : > { %v9551_v0 = vpack.c.bf16 %v9547_v25, %v9547_v25 }
 0x7c2   : > { %9860 = vmatmul.bf16.vlgmr.msra.gmra.mxu3 %v9551_v0 }
 0x7d2   : > { %10178 = vmatmul.bf16.vlgmr.msrb.gmra.mxu3 %v9869_v5 }
 0x7df   : > { %v9822_v1 = vpop.f32.mrf.mxu0 }
 0x7e0   : > { %v9823_v63 = vadd.f32 %v9822_v1, %v9619_v61 }
 0x7e7   : > { %v9824_v57 = vpop.f32.mrf.mxu0 }
 0x7ef   : > { %v10140_v42 = vpop.f32.mrf.mxu0 }
 0x7f0   : > { %v10141_v62 = vadd.f32 %v10140_v42, %v9937_v43 }
 0x7f7   : > { %v10142_v2 = vpop.f32.mrf.mxu0 }
 0x7ff   : > { %v9835_v51 = vpop.f32.mrf.mxu1 }
 0x800   : > { %v9836_v34 = vadd.f32 %v9835_v51, %v9823_v63 }
 0x807   : > { %v9837_v9 = vpop.f32.mrf.mxu1 }
 0x80f   : > { %v10153_v10 = vpop.f32.mrf.mxu1 }
 0x810   : > { %v10154_v19 = vadd.f32 %v10153_v10, %v10141_v62 }
 0x817   : > { %v10155_v37 = vpop.f32.mrf.mxu1 }
 0x825   : > { %v9848_v35 = vpop.f32.mrf.mxu2 }
 0x826   : > { %v9849_v56 = vadd.f32 %v9848_v35, %v9836_v34 }
 0x82d   : > { %v9850_v11 = vpop.f32.mrf.mxu2 }
 0x835   : > { %v10166_v21 = vpop.f32.mrf.mxu2 }
 0x836   : > { %v10167_v59 = vadd.f32 %v10166_v21, %v10154_v19 }
 0x83d   : > { %v10168_v13 = vpop.f32.mrf.mxu2 }
 0x845   : > { %v9861_v29 = vpop.f32.mrf.mxu3 }
 0x846   : > { %v9862_v58 = vadd.f32 %v9861_v29, %v9849_v56 }
 0x848   : > { %9865 = vst [vmem:[%s489_s22] sm:$0xff] %v9862_v58 }
 0x84d   : > { %v9863_v17 = vpop.f32.mrf.mxu3 }
 0x855   : > { %v10179_v24 = vpop.f32.mrf.mxu3 }
 0x856   : > { %v10180_v15 = vadd.f32 %v10179_v24, %v10167_v59 }
 0x858   : > { %v10186_v3 = vsel %vm10185_vm0, %v10180_v15, -1e+30 }
 0x859   : > { %10187 = vmax.xlane.f32.xlu0 %v10186_v3 }
 0x85d   : > { %v10181_v12 = vpop.f32.mrf.mxu3 }
 0x8cc   : > { %v10188_v14 = vpop.xlane.xlu0 %10187 }
 0x8cd   : > { %v10189_v36 = vsub.f32 %v10186_v3, %v10188_v14 }
 0x8cf   : > { %v10190_v16 = vmul.f32 1.442695, %v10189_v36 }
 0x8d1   : > { %16575 = vpow2.f32 %v10190_v16 }
 0x8d7   : > { %v16576_v54 = vpop.eup %16575 }
 0x8d8   : > { %10192 = vadd.xlane.f32.xlu0 %v16576_v54 }
 0x94b   : > { %v10193_v39 = vpop.xlane.xlu0 %10192 }
 0x94c   : > { %16577 = vrcp.f32 %v10193_v39  ;;  %v10205_v60 = vand.u32 2147483648, %v10193_v39  ;;  %v10203_v22 = vand.u32 2147483647, %v10193_v39  ;;  %vm10199_vm2 = vweird.f32 %v10193_v39 }
 0x94e   : > { %v10206_v18 = vor.u32 1.1754944e-38, %v10205_v60  ;;  %vm10204_vm4 = vcmp.eq.f32.partialorder %v10203_v22, 8.507059e+37 }
 0x952   : > { %v16578_v26 = vpop.eup %16577 }
 0x953   : > { %v10195_v55 = vmul.f32 %v16578_v26, %v10193_v39  ;;  %vm10200_vm1 = vweird.f32 %v16578_v26 }
 0x954   : > { %vm10201_vm3 = vmor %vm10199_vm2, %vm10200_vm1 }
 0x955   : > { %v10196_v4 = vsub.f32 1.0, %v10195_v55 }
 0x957   : > { %v10197_v20 = vmul.f32 %v16578_v26, %v10196_v4 }
 0x959   : > { %v10198_v33 = vadd.f32 %v16578_v26, %v10197_v20 }
 0x95b   : > { %v10202_v30 = vsel %vm10201_vm3, %v16578_v26, %v10198_v33 }
 0x95c   : > { %v10207_v8 = vsel %vm10204_vm4, %v10206_v18, %v10202_v30 }
 0x95d   : > { %v10208_v53 = vmul.f32 %v16576_v54, %v10207_v8 }
 0x95f   : > { %10209 = vst [vmem:[%s493_s24] sm:$0xff] %v10208_v53 }
 0x960 PF: > { %s26_s13 = sadd.s32 1, %s16851_s13  }
 0x961   : > { %p23_p7 = scmp.ge.s32.totalorder %s26_s13, 4  }
 0x963   :  { %25 = sbr.rel (!%p23_p7) target bundleno = 5 (0x5), region = 131 }
 0x968   :  { %10243 = vsyncpa [#allocation4], 1 }
 0x969   :  { %10245 = vsyncpa [#allocation4 + $0x1], 1 }
 0x96a   :  { %10246 = vsyncpa [#allocation6], 1 }
 0x96b   :  { %10247 = vsyncpa [#allocation9], 1 }
 0x96c   :  { %10248 = vsyncpa [#allocation12], 1 }
 0x96d   :  { %10249 = vsyncpa [#allocation15], 1 }

</bundles_post_ra>
